<compile_context>
chip_gen: v5e
topology: v5e:2x2
jax: 0.10.0
libtpu: 0.0.40
codegen_flags: <defaults>
</compile_context>

<pallas_src>
import jax
import jax.numpy as jnp
import numpy as np
from jax.experimental import pallas as pl
from jax.experimental.pallas import tpu as pltpu

# Geometry implied by the module (x.view(-1,128) needs 1x1 spatial at the end):
# 28 -conv5-> 24 -pool-> 12 -conv5-> 8 -pool-> 4 -conv3-> 2 -pool-> 1.
_IN_HW = 28
_K1_PAD = 128          # layer-1 (W*Cin)=28 zero-padded to one full 128-lane block


# ------------------------------ Pallas kernel -------------------------------

def _mnist_fused_kernel(x_ref, t1_ref, p1_ref, b1_ref, t2_ref, p2_ref, b2_ref,
                        t3_ref, b3_ref, o_ref, a1_ref, a2_ref):
    """Whole-network forward for ONE image.

    x_ref : (1, 28, 128) bf16       input image, cols = W*Cin zero-padded to 128
    tN_ref: (2, kh*Kb, PW*Cout) bf16 block-Toeplitz conv weights per col tap dj
    pN_ref: (2, PH, OH) bf16        0/1 row-pool selection matrices per row tap
    bN_ref: (1, PW*Cout) f32        bias tiled across pooled output columns
    o_ref : (1, 1, 128) f32         final features for this image
    a1_ref: (12, 384) bf16 scratch  pooled layer-1 activation, col = w*32 + c
    a2_ref: (4, 256)  bf16 scratch  pooled layer-2 activation, col = w*64 + c
    """

    def conv_relu_pool(read_rows, t_ref, p_ref, b_ref, kh, oh):
        # Shifted contiguous row windows, concatenated along lanes -> (OH, kh*Kb).
        rows = jnp.concatenate([read_rows(ki, oh) for ki in range(kh)], axis=1)
        pooled = None
        for dj in range(2):                      # pool column tap (baked into T)
            conv = jnp.dot(rows, t_ref[dj], preferred_element_type=jnp.float32)
            h = jnp.maximum(conv + b_ref[...], 0.0).astype(jnp.bfloat16)
            for di in range(2):                  # pool row tap: exact 0/1 select
                sel = jnp.dot(p_ref[di], h, preferred_element_type=jnp.float32)
                pooled = sel if pooled is None else jnp.maximum(pooled, sel)
        return pooled                            # (PH, PW*Cout) f32

    # Layer 1: 28x28x1 -conv5-> 24x24x32 -pool-> 12x12x32
    a1 = conv_relu_pool(lambda ki, oh: x_ref[0, pl.ds(ki, oh), :],
                        t1_ref, p1_ref, b1_ref, kh=5, oh=24)
    a1_ref[...] = a1.astype(jnp.bfloat16)
    # F.dropout(p=0.25, training=False) == identity at inference.

    # Layer 2: 12x12x32 -conv5-> 8x8x64 -pool-> 4x4x64
    a2 = conv_relu_pool(lambda ki, oh: a1_ref[pl.ds(ki, oh), :],
                        t2_ref, p2_ref, b2_ref, kh=5, oh=8)
    a2_ref[...] = a2.astype(jnp.bfloat16)

    # Layer 3: 4x4x64 -conv3-> 2x2x128 -pool-> 1x1x128 (pool == full reduce).
    rows3 = jnp.concatenate([a2_ref[pl.ds(ki, 2), :] for ki in range(3)], axis=1)
    out = None
    for dj in range(2):
        conv = jnp.dot(rows3, t3_ref[dj], preferred_element_type=jnp.float32)
        h = jnp.maximum(conv + b3_ref[...], 0.0)          # (2, 128) f32
        m = jnp.max(h, axis=0, keepdims=True)             # (1, 128)
        out = m if out is None else jnp.maximum(out, m)
    o_ref[0] = out.astype(o_ref.dtype)
    # TODO(synk): self.fc (Linear 128->10) exists in MNISTNet.__init__ but is
    # never called in forward(), so it is intentionally not applied here.


# --------------------- Host-side constant construction ----------------------

def _layer_constants(w_oihw, bias, h, w, kb=None):
    """Block-Toeplitz conv weights, pool-row selection matrices, tiled bias.

    With activations laid out 2-D as (H, W*Cin) and column pool tap dj:
      conv_dj = concat_ki(act[ki:ki+OH, :]) @ T[dj]                # (OH, PW*Cout)
      T[dj][(ki, w, cin), (q, cout)] = W[cout, cin, ki, w-2q-dj]   (0<=kj<kw else 0)
    Row pooling: P[di] @ x picks rows 2p+di (exact 0/1 selection).
    """
    wt = np.asarray(w_oihw, np.float32)
    b = np.asarray(bias, np.float32)
    cout, cin, kh, kw = wt.shape
    oh, ow = h - kh + 1, w - kw + 1
    ph, pw = oh // 2, ow // 2
    kb = w * cin if kb is None else kb
    assert kb >= w * cin
    t = np.zeros((2, kh, kb, pw * cout), np.float32)
    for dj in range(2):
        for ki in range(kh):
            for q in range(pw):
                for kj in range(kw):
                    wcol = 2 * q + dj + kj
                    t[dj, ki, wcol * cin:(wcol + 1) * cin,
                      q * cout:(q + 1) * cout] = wt[:, :, ki, kj].T
    t = t.reshape(2, kh * kb, pw * cout)
    p = np.zeros((2, ph, oh), np.float32)
    for di in range(2):
        p[di, np.arange(ph), 2 * np.arange(ph) + di] = 1.0
    bias_row = np.tile(b, pw).reshape(1, pw * cout)
    return (jnp.asarray(t, jnp.bfloat16), jnp.asarray(p, jnp.bfloat16),
            jnp.asarray(bias_row, jnp.float32))


def prepare_params(params):
    """One-time repacking of the PyTorch-layout weights (outside the jit)."""
    t1, p1, b1 = _layer_constants(params['w1'], params['b1'], 28, 28, kb=_K1_PAD)
    t2, p2, b2 = _layer_constants(params['w2'], params['b2'], 12, 12)
    t3, _p3, b3 = _layer_constants(params['w3'], params['b3'], 4, 4)
    # Layer-3 row pooling degenerates to a full reduce in the kernel: drop P3.
    return dict(t1=t1, p1=p1, b1=b1, t2=t2, p2=p2, b2=b2, t3=t3, b3=b3)


# ----------------------------- Forward wrapper -------------------------------

@jax.jit
def mnist_forward(consts, x_nchw):
    n = x_nchw.shape[0]
    assert x_nchw.shape[1:] == (1, _IN_HW, _IN_HW), x_nchw.shape
    x = x_nchw.reshape(n, _IN_HW, _IN_HW)                       # Cin == 1
    x = jnp.pad(x, ((0, 0), (0, 0), (0, _K1_PAD - _IN_HW))).astype(jnp.bfloat16)

    t1, p1, b1 = consts['t1'], consts['p1'], consts['b1']
    t2, p2, b2 = consts['t2'], consts['p2'], consts['b2']
    t3, b3 = consts['t3'], consts['b3']

    # Advisory cost hint (helps XLA schedule the tiny custom call).
    macs = (2 * (24 * t1.shape[1] * t1.shape[2]
                 + 8 * t2.shape[1] * t2.shape[2]
                 + 2 * t3.shape[1] * t3.shape[2])
            + 4 * (12 * 24 * t1.shape[2] + 4 * 8 * t2.shape[2]))
    bytes_accessed = (x.size * 2 + (t1.size + t2.size + t3.size) * 2
                      + (p1.size + p2.size) * 2
                      + (b1.size + b2.size + b3.size) * 4 + n * 128 * 4)

    out = pl.pallas_call(
        _mnist_fused_kernel,
        out_shape=jax.ShapeDtypeStruct((n, 1, 128), jnp.float32),
        grid_spec=pltpu.PrefetchScalarGridSpec(
            num_scalar_prefetch=0,
            grid=(n,),
            in_specs=[
                pl.BlockSpec((1, _IN_HW, _K1_PAD), lambda i: (i, 0, 0)),  # x
                pl.BlockSpec(t1.shape, lambda i: (0, 0, 0)),
                pl.BlockSpec(p1.shape, lambda i: (0, 0, 0)),
                pl.BlockSpec(b1.shape, lambda i: (0, 0)),
                pl.BlockSpec(t2.shape, lambda i: (0, 0, 0)),
                pl.BlockSpec(p2.shape, lambda i: (0, 0, 0)),
                pl.BlockSpec(b2.shape, lambda i: (0, 0)),
                pl.BlockSpec(t3.shape, lambda i: (0, 0, 0)),
                pl.BlockSpec(b3.shape, lambda i: (0, 0)),
            ],
            out_specs=pl.BlockSpec((1, 1, 128), lambda i: (i, 0, 0)),
            scratch_shapes=[pltpu.VMEM((12, 384), jnp.bfloat16),
                            pltpu.VMEM((4, 256), jnp.bfloat16)],
        ),
        compiler_params=pltpu.CompilerParams(
            dimension_semantics=("parallel",),
            vmem_limit_bytes=32 * 1024 * 1024),
        cost_estimate=pl.CostEstimate(flops=int(2 * n * macs), transcendentals=0,
                                      bytes_accessed=int(bytes_accessed)),
    )(x, t1, p1, b1, t2, p2, b2, t3, b3)
    return out.reshape(n, 128)                                  # x.view(-1, 128)


# ----------------------------- Model definition ------------------------------

def init_params(key):
    """Deterministic PyTorch-style (uniform +/- 1/sqrt(fan_in)) init."""
    def conv_init(kk, cout, cin, kh, kw):
        k1, k2 = jax.random.split(kk)
        bound = 1.0 / np.sqrt(cin * kh * kw)
        w = jax.random.uniform(k1, (cout, cin, kh, kw), jnp.float32, -bound, bound)
        b = jax.random.uniform(k2, (cout,), jnp.float32, -bound, bound)
        return w, b

    keys = jax.random.split(key, 3)
    p = {}
    p['w1'], p['b1'] = conv_init(keys[0], 32, 1, 5, 5)
    p['w2'], p['b2'] = conv_init(keys[1], 64, 32, 5, 5)
    p['w3'], p['b3'] = conv_init(keys[2], 128, 64, 3, 3)
    return p


# --------------------------- Pure-JAX reference ------------------------------

def reference_forward(params, x_nchw):
    x = jnp.transpose(x_nchw, (0, 2, 3, 1))

    def conv(x, w, b):
        w_hwio = jnp.transpose(w, (2, 3, 1, 0))
        y = jax.lax.conv_general_dilated(
            x, w_hwio, (1, 1), 'VALID',
            dimension_numbers=('NHWC', 'HWIO', 'NHWC'))
        return y + b.reshape(1, 1, 1, -1)

    def relu_pool(x):
        y = jnp.maximum(x, 0.0)
        return jax.lax.reduce_window(y, -jnp.inf, jax.lax.max,
                                     (1, 2, 2, 1), (1, 2, 2, 1), 'VALID')

    x = relu_pool(conv(x, params['w1'], params['b1']))
    x = relu_pool(conv(x, params['w2'], params['b2']))
    x = relu_pool(conv(x, params['w3'], params['b3']))
    return x.reshape(-1, 128)


if __name__ == "__main__":
    key = jax.random.PRNGKey(0)
    pkey, xkey = jax.random.split(key)
    params = init_params(pkey)
    consts = prepare_params(params)

    # MNIST-style NCHW input, batch=2 (28x28 makes view(-1,128) exact).
    x = jax.random.normal(xkey, (2, 1, 28, 28), jnp.float32)

    out = jax.block_until_ready(mnist_forward(consts, x))
    assert out.shape == (2, 128), out.shape

    ref = jax.block_until_ready(reference_forward(params, x))
    # bf16 weights/activations (f32 accumulation) vs f32 reference: 2e-2 is an
    # explicit precision choice for MNIST inference.
    np.testing.assert_allclose(np.asarray(out), np.asarray(ref),
                               rtol=2e-2, atol=2e-2)
    print("KERNEL_OK")
</pallas_src>

<mosaic_0001>
module attributes {stable_mosaic.version = 11 : i64} {
  func.func @_mnist_fused_kernel(%arg0: i32, %arg1: memref<1x28x128xbf16, #tpu.memory_space<vmem>>, %arg2: memref<2x640x384xbf16, #tpu.memory_space<vmem>>, %arg3: memref<2x12x24xbf16, #tpu.memory_space<vmem>>, %arg4: memref<1x384xf32, #tpu.memory_space<vmem>>, %arg5: memref<2x1920x256xbf16, #tpu.memory_space<vmem>>, %arg6: memref<2x4x8xbf16, #tpu.memory_space<vmem>>, %arg7: memref<1x256xf32, #tpu.memory_space<vmem>>, %arg8: memref<2x768x128xbf16, #tpu.memory_space<vmem>>, %arg9: memref<1x128xf32, #tpu.memory_space<vmem>>, %arg10: memref<1x1x128xf32, #tpu.memory_space<vmem>>, %arg11: memref<12x384xbf16, #tpu.memory_space<vmem>>, %arg12: memref<4x256xbf16, #tpu.memory_space<vmem>>) attributes {dimension_semantics = [#tpu.dimension_semantics<parallel>], iteration_bounds = array<i64: 2>, scalar_prefetch = 0 : i64, scratch_operands = 2 : i64, tpu.core_type = #tpu.core_type<tc>, window_params = [{transform_indices = @transform_0, window_bounds = array<i64: 1, 28, 128>}, {pipeline_mode = #tpu.pipeline_mode<synchronous>, transform_indices = @transform_1, window_bounds = array<i64: 2, 640, 384>}, {pipeline_mode = #tpu.pipeline_mode<synchronous>, transform_indices = @transform_2, window_bounds = array<i64: 2, 12, 24>}, {pipeline_mode = #tpu.pipeline_mode<synchronous>, transform_indices = @transform_3, window_bounds = array<i64: 1, 384>}, {pipeline_mode = #tpu.pipeline_mode<synchronous>, transform_indices = @transform_4, window_bounds = array<i64: 2, 1920, 256>}, {pipeline_mode = #tpu.pipeline_mode<synchronous>, transform_indices = @transform_5, window_bounds = array<i64: 2, 4, 8>}, {pipeline_mode = #tpu.pipeline_mode<synchronous>, transform_indices = @transform_6, window_bounds = array<i64: 1, 256>}, {pipeline_mode = #tpu.pipeline_mode<synchronous>, transform_indices = @transform_7, window_bounds = array<i64: 2, 768, 128>}, {pipeline_mode = #tpu.pipeline_mode<synchronous>, transform_indices = @transform_8, window_bounds = array<i64: 1, 128>}, {transform_indices = @transform_9, window_bounds = array<i64: 1, 1, 128>}]} {
    %c0 = arith.constant 0 : index
    %c0_0 = arith.constant 0 : index
    %c0_1 = arith.constant 0 : index
    %0 = vector.load %arg1[%c0, %c0_0, %c0_1] : memref<1x28x128xbf16, #tpu.memory_space<vmem>>, vector<1x24x128xbf16>
    %1 = vector.shape_cast %0 : vector<1x24x128xbf16> to vector<24x128xbf16>
    %c0_2 = arith.constant 0 : index
    %c1 = arith.constant 1 : index
    %c0_3 = arith.constant 0 : index
    %2 = vector.load %arg1[%c0_2, %c1, %c0_3] : memref<1x28x128xbf16, #tpu.memory_space<vmem>>, vector<1x24x128xbf16>
    %3 = vector.shape_cast %2 : vector<1x24x128xbf16> to vector<24x128xbf16>
    %c0_4 = arith.constant 0 : index
    %c2 = arith.constant 2 : index
    %c0_5 = arith.constant 0 : index
    %4 = vector.load %arg1[%c0_4, %c2, %c0_5] : memref<1x28x128xbf16, #tpu.memory_space<vmem>>, vector<1x24x128xbf16>
    %5 = vector.shape_cast %4 : vector<1x24x128xbf16> to vector<24x128xbf16>
    %c0_6 = arith.constant 0 : index
    %c3 = arith.constant 3 : index
    %c0_7 = arith.constant 0 : index
    %6 = vector.load %arg1[%c0_6, %c3, %c0_7] : memref<1x28x128xbf16, #tpu.memory_space<vmem>>, vector<1x24x128xbf16>
    %7 = vector.shape_cast %6 : vector<1x24x128xbf16> to vector<24x128xbf16>
    %c0_8 = arith.constant 0 : index
    %c4 = arith.constant 4 : index
    %c0_9 = arith.constant 0 : index
    %8 = vector.load %arg1[%c0_8, %c4, %c0_9] : memref<1x28x128xbf16, #tpu.memory_space<vmem>>, vector<1x24x128xbf16>
    %9 = vector.shape_cast %8 : vector<1x24x128xbf16> to vector<24x128xbf16>
    %10 = tpu.concatenate %1, %3, %5, %7, %9 in 1 : vector<24x128xbf16>, vector<24x128xbf16>, vector<24x128xbf16>, vector<24x128xbf16>, vector<24x128xbf16> -> vector<24x640xbf16>
    %c0_10 = arith.constant 0 : index
    %c0_11 = arith.constant 0 : index
    %c0_12 = arith.constant 0 : index
    %11 = vector.load %arg2[%c0_10, %c0_11, %c0_12] : memref<2x640x384xbf16, #tpu.memory_space<vmem>>, vector<1x640x384xbf16>
    %12 = vector.shape_cast %11 : vector<1x640x384xbf16> to vector<640x384xbf16>
    %cst = arith.constant dense<0.000000e+00> : vector<24x384xf32>
    %13 = tpu.matmul %10, %12, %cst {dimension_numbers = #tpu.dot_dimension_numbers<[1], [0], [0], [1], [0, 0, 1, 1], [], []>} : vector<24x640xbf16>, vector<640x384xbf16>, vector<24x384xf32> -> vector<24x384xf32>
    %c0_13 = arith.constant 0 : index
    %c0_14 = arith.constant 0 : index
    %14 = vector.load %arg4[%c0_13, %c0_14] : memref<1x384xf32, #tpu.memory_space<vmem>>, vector<1x384xf32>
    %15 = vector.broadcast %14 : vector<1x384xf32> to vector<24x384xf32>
    %16 = arith.addf %13, %15 : vector<24x384xf32>
    %cst_15 = arith.constant 0.000000e+00 : f32
    %17 = vector.broadcast %cst_15 : f32 to vector<24x384xf32>
    %18 = arith.maximumf %16, %17 : vector<24x384xf32>
    %19 = arith.truncf %18 : vector<24x384xf32> to vector<24x384xbf16>
    %c0_16 = arith.constant 0 : index
    %c0_17 = arith.constant 0 : index
    %c0_18 = arith.constant 0 : index
    %20 = vector.load %arg3[%c0_16, %c0_17, %c0_18] : memref<2x12x24xbf16, #tpu.memory_space<vmem>>, vector<1x12x24xbf16>
    %21 = vector.shape_cast %20 : vector<1x12x24xbf16> to vector<12x24xbf16>
    %cst_19 = arith.constant dense<0.000000e+00> : vector<12x384xf32>
    %22 = tpu.matmul %21, %19, %cst_19 {dimension_numbers = #tpu.dot_dimension_numbers<[1], [0], [0], [1], [0, 0, 1, 1], [], []>} : vector<12x24xbf16>, vector<24x384xbf16>, vector<12x384xf32> -> vector<12x384xf32>
    %c1_20 = arith.constant 1 : index
    %c0_21 = arith.constant 0 : index
    %c0_22 = arith.constant 0 : index
    %23 = vector.load %arg3[%c1_20, %c0_21, %c0_22] : memref<2x12x24xbf16, #tpu.memory_space<vmem>>, vector<1x12x24xbf16>
    %24 = vector.shape_cast %23 : vector<1x12x24xbf16> to vector<12x24xbf16>
    %cst_23 = arith.constant dense<0.000000e+00> : vector<12x384xf32>
    %25 = tpu.matmul %24, %19, %cst_23 {dimension_numbers = #tpu.dot_dimension_numbers<[1], [0], [0], [1], [0, 0, 1, 1], [], []>} : vector<12x24xbf16>, vector<24x384xbf16>, vector<12x384xf32> -> vector<12x384xf32>
    %26 = arith.maximumf %22, %25 : vector<12x384xf32>
    %c1_24 = arith.constant 1 : index
    %c0_25 = arith.constant 0 : index
    %c0_26 = arith.constant 0 : index
    %27 = vector.load %arg2[%c1_24, %c0_25, %c0_26] : memref<2x640x384xbf16, #tpu.memory_space<vmem>>, vector<1x640x384xbf16>
    %28 = vector.shape_cast %27 : vector<1x640x384xbf16> to vector<640x384xbf16>
    %cst_27 = arith.constant dense<0.000000e+00> : vector<24x384xf32>
    %29 = tpu.matmul %10, %28, %cst_27 {dimension_numbers = #tpu.dot_dimension_numbers<[1], [0], [0], [1], [0, 0, 1, 1], [], []>} : vector<24x640xbf16>, vector<640x384xbf16>, vector<24x384xf32> -> vector<24x384xf32>
    %c0_28 = arith.constant 0 : index
    %c0_29 = arith.constant 0 : index
    %30 = vector.load %arg4[%c0_28, %c0_29] : memref<1x384xf32, #tpu.memory_space<vmem>>, vector<1x384xf32>
    %31 = vector.broadcast %30 : vector<1x384xf32> to vector<24x384xf32>
    %32 = arith.addf %29, %31 : vector<24x384xf32>
    %cst_30 = arith.constant 0.000000e+00 : f32
    %33 = vector.broadcast %cst_30 : f32 to vector<24x384xf32>
    %34 = arith.maximumf %32, %33 : vector<24x384xf32>
    %35 = arith.truncf %34 : vector<24x384xf32> to vector<24x384xbf16>
    %c0_31 = arith.constant 0 : index
    %c0_32 = arith.constant 0 : index
    %c0_33 = arith.constant 0 : index
    %36 = vector.load %arg3[%c0_31, %c0_32, %c0_33] : memref<2x12x24xbf16, #tpu.memory_space<vmem>>, vector<1x12x24xbf16>
    %37 = vector.shape_cast %36 : vector<1x12x24xbf16> to vector<12x24xbf16>
    %cst_34 = arith.constant dense<0.000000e+00> : vector<12x384xf32>
    %38 = tpu.matmul %37, %35, %cst_34 {dimension_numbers = #tpu.dot_dimension_numbers<[1], [0], [0], [1], [0, 0, 1, 1], [], []>} : vector<12x24xbf16>, vector<24x384xbf16>, vector<12x384xf32> -> vector<12x384xf32>
    %39 = arith.maximumf %26, %38 : vector<12x384xf32>
    %c1_35 = arith.constant 1 : index
    %c0_36 = arith.constant 0 : index
    %c0_37 = arith.constant 0 : index
    %40 = vector.load %arg3[%c1_35, %c0_36, %c0_37] : memref<2x12x24xbf16, #tpu.memory_space<vmem>>, vector<1x12x24xbf16>
    %41 = vector.shape_cast %40 : vector<1x12x24xbf16> to vector<12x24xbf16>
    %cst_38 = arith.constant dense<0.000000e+00> : vector<12x384xf32>
    %42 = tpu.matmul %41, %35, %cst_38 {dimension_numbers = #tpu.dot_dimension_numbers<[1], [0], [0], [1], [0, 0, 1, 1], [], []>} : vector<12x24xbf16>, vector<24x384xbf16>, vector<12x384xf32> -> vector<12x384xf32>
    %43 = arith.maximumf %39, %42 : vector<12x384xf32>
    %44 = arith.truncf %43 : vector<12x384xf32> to vector<12x384xbf16>
    %c0_39 = arith.constant 0 : index
    %c0_40 = arith.constant 0 : index
    %45 = vector.load %arg11[%c0_39, %c0_40] : memref<12x384xbf16, #tpu.memory_space<vmem>>, vector<12x384xbf16>
    tpu.vector_store %arg11[%c0_39, %c0_40], %44 {strides = array<i32>} : memref<12x384xbf16, #tpu.memory_space<vmem>>, vector<12x384xbf16>,
    %c0_41 = arith.constant 0 : index
    %c0_42 = arith.constant 0 : index
    %46 = vector.load %arg11[%c0_41, %c0_42] : memref<12x384xbf16, #tpu.memory_space<vmem>>, vector<8x384xbf16>
    %c1_43 = arith.constant 1 : index
    %c0_44 = arith.constant 0 : index
    %47 = vector.load %arg11[%c1_43, %c0_44] : memref<12x384xbf16, #tpu.memory_space<vmem>>, vector<8x384xbf16>
    %c2_45 = arith.constant 2 : index
    %c0_46 = arith.constant 0 : index
    %48 = vector.load %arg11[%c2_45, %c0_46] : memref<12x384xbf16, #tpu.memory_space<vmem>>, vector<8x384xbf16>
    %c3_47 = arith.constant 3 : index
    %c0_48 = arith.constant 0 : index
    %49 = vector.load %arg11[%c3_47, %c0_48] : memref<12x384xbf16, #tpu.memory_space<vmem>>, vector<8x384xbf16>
    %c4_49 = arith.constant 4 : index
    %c0_50 = arith.constant 0 : index
    %50 = vector.load %arg11[%c4_49, %c0_50] : memref<12x384xbf16, #tpu.memory_space<vmem>>, vector<8x384xbf16>
    %51 = tpu.concatenate %46, %47, %48, %49, %50 in 1 : vector<8x384xbf16>, vector<8x384xbf16>, vector<8x384xbf16>, vector<8x384xbf16>, vector<8x384xbf16> -> vector<8x1920xbf16>
    %c0_51 = arith.constant 0 : index
    %c0_52 = arith.constant 0 : index
    %c0_53 = arith.constant 0 : index
    %52 = vector.load %arg5[%c0_51, %c0_52, %c0_53] : memref<2x1920x256xbf16, #tpu.memory_space<vmem>>, vector<1x1920x256xbf16>
    %53 = vector.shape_cast %52 : vector<1x1920x256xbf16> to vector<1920x256xbf16>
    %cst_54 = arith.constant dense<0.000000e+00> : vector<8x256xf32>
    %54 = tpu.matmul %51, %53, %cst_54 {dimension_numbers = #tpu.dot_dimension_numbers<[1], [0], [0], [1], [0, 0, 1, 1], [], []>} : vector<8x1920xbf16>, vector<1920x256xbf16>, vector<8x256xf32> -> vector<8x256xf32>
    %c0_55 = arith.constant 0 : index
    %c0_56 = arith.constant 0 : index
    %55 = vector.load %arg7[%c0_55, %c0_56] : memref<1x256xf32, #tpu.memory_space<vmem>>, vector<1x256xf32>
    %56 = vector.broadcast %55 : vector<1x256xf32> to vector<8x256xf32>
    %57 = arith.addf %54, %56 : vector<8x256xf32>
    %cst_57 = arith.constant 0.000000e+00 : f32
    %58 = vector.broadcast %cst_57 : f32 to vector<8x256xf32>
    %59 = arith.maximumf %57, %58 : vector<8x256xf32>
    %60 = arith.truncf %59 : vector<8x256xf32> to vector<8x256xbf16>
    %c0_58 = arith.constant 0 : index
    %c0_59 = arith.constant 0 : index
    %c0_60 = arith.constant 0 : index
    %61 = vector.load %arg6[%c0_58, %c0_59, %c0_60] : memref<2x4x8xbf16, #tpu.memory_space<vmem>>, vector<1x4x8xbf16>
    %62 = vector.shape_cast %61 : vector<1x4x8xbf16> to vector<4x8xbf16>
    %cst_61 = arith.constant dense<0.000000e+00> : vector<4x256xf32>
    %63 = tpu.matmul %62, %60, %cst_61 {dimension_numbers = #tpu.dot_dimension_numbers<[1], [0], [0], [1], [0, 0, 1, 1], [], []>} : vector<4x8xbf16>, vector<8x256xbf16>, vector<4x256xf32> -> vector<4x256xf32>
    %c1_62 = arith.constant 1 : index
    %c0_63 = arith.constant 0 : index
    %c0_64 = arith.constant 0 : index
    %64 = vector.load %arg6[%c1_62, %c0_63, %c0_64] : memref<2x4x8xbf16, #tpu.memory_space<vmem>>, vector<1x4x8xbf16>
    %65 = vector.shape_cast %64 : vector<1x4x8xbf16> to vector<4x8xbf16>
    %cst_65 = arith.constant dense<0.000000e+00> : vector<4x256xf32>
    %66 = tpu.matmul %65, %60, %cst_65 {dimension_numbers = #tpu.dot_dimension_numbers<[1], [0], [0], [1], [0, 0, 1, 1], [], []>} : vector<4x8xbf16>, vector<8x256xbf16>, vector<4x256xf32> -> vector<4x256xf32>
    %67 = arith.maximumf %63, %66 : vector<4x256xf32>
    %c1_66 = arith.constant 1 : index
    %c0_67 = arith.constant 0 : index
    %c0_68 = arith.constant 0 : index
    %68 = vector.load %arg5[%c1_66, %c0_67, %c0_68] : memref<2x1920x256xbf16, #tpu.memory_space<vmem>>, vector<1x1920x256xbf16>
    %69 = vector.shape_cast %68 : vector<1x1920x256xbf16> to vector<1920x256xbf16>
    %cst_69 = arith.constant dense<0.000000e+00> : vector<8x256xf32>
    %70 = tpu.matmul %51, %69, %cst_69 {dimension_numbers = #tpu.dot_dimension_numbers<[1], [0], [0], [1], [0, 0, 1, 1], [], []>} : vector<8x1920xbf16>, vector<1920x256xbf16>, vector<8x256xf32> -> vector<8x256xf32>
    %c0_70 = arith.constant 0 : index
    %c0_71 = arith.constant 0 : index
    %71 = vector.load %arg7[%c0_70, %c0_71] : memref<1x256xf32, #tpu.memory_space<vmem>>, vector<1x256xf32>
    %72 = vector.broadcast %71 : vector<1x256xf32> to vector<8x256xf32>
    %73 = arith.addf %70, %72 : vector<8x256xf32>
    %cst_72 = arith.constant 0.000000e+00 : f32
    %74 = vector.broadcast %cst_72 : f32 to vector<8x256xf32>
    %75 = arith.maximumf %73, %74 : vector<8x256xf32>
    %76 = arith.truncf %75 : vector<8x256xf32> to vector<8x256xbf16>
    %c0_73 = arith.constant 0 : index
    %c0_74 = arith.constant 0 : index
    %c0_75 = arith.constant 0 : index
    %77 = vector.load %arg6[%c0_73, %c0_74, %c0_75] : memref<2x4x8xbf16, #tpu.memory_space<vmem>>, vector<1x4x8xbf16>
    %78 = vector.shape_cast %77 : vector<1x4x8xbf16> to vector<4x8xbf16>
    %cst_76 = arith.constant dense<0.000000e+00> : vector<4x256xf32>
    %79 = tpu.matmul %78, %76, %cst_76 {dimension_numbers = #tpu.dot_dimension_numbers<[1], [0], [0], [1], [0, 0, 1, 1], [], []>} : vector<4x8xbf16>, vector<8x256xbf16>, vector<4x256xf32> -> vector<4x256xf32>
    %80 = arith.maximumf %67, %79 : vector<4x256xf32>
    %c1_77 = arith.constant 1 : index
    %c0_78 = arith.constant 0 : index
    %c0_79 = arith.constant 0 : index
    %81 = vector.load %arg6[%c1_77, %c0_78, %c0_79] : memref<2x4x8xbf16, #tpu.memory_space<vmem>>, vector<1x4x8xbf16>
    %82 = vector.shape_cast %81 : vector<1x4x8xbf16> to vector<4x8xbf16>
    %cst_80 = arith.constant dense<0.000000e+00> : vector<4x256xf32>
    %83 = tpu.matmul %82, %76, %cst_80 {dimension_numbers = #tpu.dot_dimension_numbers<[1], [0], [0], [1], [0, 0, 1, 1], [], []>} : vector<4x8xbf16>, vector<8x256xbf16>, vector<4x256xf32> -> vector<4x256xf32>
    %84 = arith.maximumf %80, %83 : vector<4x256xf32>
    %85 = arith.truncf %84 : vector<4x256xf32> to vector<4x256xbf16>
    %c0_81 = arith.constant 0 : index
    %c0_82 = arith.constant 0 : index
    %86 = vector.load %arg12[%c0_81, %c0_82] : memref<4x256xbf16, #tpu.memory_space<vmem>>, vector<4x256xbf16>
    tpu.vector_store %arg12[%c0_81, %c0_82], %85 {strides = array<i32>} : memref<4x256xbf16, #tpu.memory_space<vmem>>, vector<4x256xbf16>,
    %c0_83 = arith.constant 0 : index
    %c0_84 = arith.constant 0 : index
    %87 = vector.load %arg12[%c0_83, %c0_84] : memref<4x256xbf16, #tpu.memory_space<vmem>>, vector<2x256xbf16>
    %c1_85 = arith.constant 1 : index
    %c0_86 = arith.constant 0 : index
    %88 = vector.load %arg12[%c1_85, %c0_86] : memref<4x256xbf16, #tpu.memory_space<vmem>>, vector<2x256xbf16>
    %c2_87 = arith.constant 2 : index
    %c0_88 = arith.constant 0 : index
    %89 = vector.load %arg12[%c2_87, %c0_88] : memref<4x256xbf16, #tpu.memory_space<vmem>>, vector<2x256xbf16>
    %90 = tpu.concatenate %87, %88, %89 in 1 : vector<2x256xbf16>, vector<2x256xbf16>, vector<2x256xbf16> -> vector<2x768xbf16>
    %c0_89 = arith.constant 0 : index
    %c0_90 = arith.constant 0 : index
    %c0_91 = arith.constant 0 : index
    %91 = vector.load %arg8[%c0_89, %c0_90, %c0_91] : memref<2x768x128xbf16, #tpu.memory_space<vmem>>, vector<1x768x128xbf16>
    %92 = vector.shape_cast %91 : vector<1x768x128xbf16> to vector<768x128xbf16>
    %cst_92 = arith.constant dense<0.000000e+00> : vector<2x128xf32>
    %93 = tpu.matmul %90, %92, %cst_92 {dimension_numbers = #tpu.dot_dimension_numbers<[1], [0], [0], [1], [0, 0, 1, 1], [], []>} : vector<2x768xbf16>, vector<768x128xbf16>, vector<2x128xf32> -> vector<2x128xf32>
    %c0_93 = arith.constant 0 : index
    %c0_94 = arith.constant 0 : index
    %94 = vector.load %arg9[%c0_93, %c0_94] : memref<1x128xf32, #tpu.memory_space<vmem>>, vector<1x128xf32>
    %95 = vector.broadcast %94 : vector<1x128xf32> to vector<2x128xf32>
    %96 = arith.addf %93, %95 : vector<2x128xf32>
    %cst_95 = arith.constant 0.000000e+00 : f32
    %97 = vector.broadcast %cst_95 : f32 to vector<2x128xf32>
    %98 = arith.maximumf %96, %97 : vector<2x128xf32>
    %cst_96 = arith.constant dense<0xFF800000> : vector<128xf32>
    %99 = vector.multi_reduction <maximumf>, %98, %cst_96 [0] : vector<2x128xf32> to vector<128xf32>
    %100 = vector.shape_cast %99 : vector<128xf32> to vector<1x128xf32>
    %c1_97 = arith.constant 1 : index
    %c0_98 = arith.constant 0 : index
    %c0_99 = arith.constant 0 : index
    %101 = vector.load %arg8[%c1_97, %c0_98, %c0_99] : memref<2x768x128xbf16, #tpu.memory_space<vmem>>, vector<1x768x128xbf16>
    %102 = vector.shape_cast %101 : vector<1x768x128xbf16> to vector<768x128xbf16>
    %cst_100 = arith.constant dense<0.000000e+00> : vector<2x128xf32>
    %103 = tpu.matmul %90, %102, %cst_100 {dimension_numbers = #tpu.dot_dimension_numbers<[1], [0], [0], [1], [0, 0, 1, 1], [], []>} : vector<2x768xbf16>, vector<768x128xbf16>, vector<2x128xf32> -> vector<2x128xf32>
    %c0_101 = arith.constant 0 : index
    %c0_102 = arith.constant 0 : index
    %104 = vector.load %arg9[%c0_101, %c0_102] : memref<1x128xf32, #tpu.memory_space<vmem>>, vector<1x128xf32>
    %105 = vector.broadcast %104 : vector<1x128xf32> to vector<2x128xf32>
    %106 = arith.addf %103, %105 : vector<2x128xf32>
    %cst_103 = arith.constant 0.000000e+00 : f32
    %107 = vector.broadcast %cst_103 : f32 to vector<2x128xf32>
    %108 = arith.maximumf %106, %107 : vector<2x128xf32>
    %cst_104 = arith.constant dense<0xFF800000> : vector<128xf32>
    %109 = vector.multi_reduction <maximumf>, %108, %cst_104 [0] : vector<2x128xf32> to vector<128xf32>
    %110 = vector.shape_cast %109 : vector<128xf32> to vector<1x128xf32>
    %111 = arith.maximumf %100, %110 : vector<1x128xf32>
    %c0_105 = arith.constant 0 : index
    %c0_106 = arith.constant 0 : index
    %c0_107 = arith.constant 0 : index
    %112 = vector.load %arg10[%c0_105, %c0_106, %c0_107] : memref<1x1x128xf32, #tpu.memory_space<vmem>>, vector<1x1x128xf32>
    %113 = vector.shape_cast %112 : vector<1x1x128xf32> to vector<1x128xf32>
    %114 = vector.shape_cast %111 : vector<1x128xf32> to vector<1x1x128xf32>
    tpu.vector_store %arg10[%c0_105, %c0_106, %c0_107], %114 {strides = array<i32>} : memref<1x1x128xf32, #tpu.memory_space<vmem>>, vector<1x1x128xf32>,
    return
  }
  func.func @transform_0(%arg0: i32) -> (i32, i32, i32) {
    %c0_i32 = arith.constant 0 : i32
    %c0_i32_0 = arith.constant 0 : i32
    %c0_i32_1 = arith.constant 0 : i32
    return %arg0, %c0_i32, %c0_i32_0 : i32, i32, i32
  }
  func.func @transform_1(%arg0: i32) -> (i32, i32, i32) {
    %c0_i32 = arith.constant 0 : i32
    %c0_i32_0 = arith.constant 0 : i32
    %c0_i32_1 = arith.constant 0 : i32
    %c0_i32_2 = arith.constant 0 : i32
    return %c0_i32, %c0_i32_0, %c0_i32_1 : i32, i32, i32
  }
  func.func @transform_2(%arg0: i32) -> (i32, i32, i32) {
    %c0_i32 = arith.constant 0 : i32
    %c0_i32_0 = arith.constant 0 : i32
    %c0_i32_1 = arith.constant 0 : i32
    %c0_i32_2 = arith.constant 0 : i32
    return %c0_i32, %c0_i32_0, %c0_i32_1 : i32, i32, i32
  }
  func.func @transform_3(%arg0: i32) -> (i32, i32) {
    %c0_i32 = arith.constant 0 : i32
    %c0_i32_0 = arith.constant 0 : i32
    %c0_i32_1 = arith.constant 0 : i32
    return %c0_i32, %c0_i32_0 : i32, i32
  }
  func.func @transform_4(%arg0: i32) -> (i32, i32, i32) {
    %c0_i32 = arith.constant 0 : i32
    %c0_i32_0 = arith.constant 0 : i32
    %c0_i32_1 = arith.constant 0 : i32
    %c0_i32_2 = arith.constant 0 : i32
    return %c0_i32, %c0_i32_0, %c0_i32_1 : i32, i32, i32
  }
  func.func @transform_5(%arg0: i32) -> (i32, i32, i32) {
    %c0_i32 = arith.constant 0 : i32
    %c0_i32_0 = arith.constant 0 : i32
    %c0_i32_1 = arith.constant 0 : i32
    %c0_i32_2 = arith.constant 0 : i32
    return %c0_i32, %c0_i32_0, %c0_i32_1 : i32, i32, i32
  }
  func.func @transform_6(%arg0: i32) -> (i32, i32) {
    %c0_i32 = arith.constant 0 : i32
    %c0_i32_0 = arith.constant 0 : i32
    %c0_i32_1 = arith.constant 0 : i32
    return %c0_i32, %c0_i32_0 : i32, i32
  }
  func.func @transform_7(%arg0: i32) -> (i32, i32, i32) {
    %c0_i32 = arith.constant 0 : i32
    %c0_i32_0 = arith.constant 0 : i32
    %c0_i32_1 = arith.constant 0 : i32
    %c0_i32_2 = arith.constant 0 : i32
    return %c0_i32, %c0_i32_0, %c0_i32_1 : i32, i32, i32
  }
  func.func @transform_8(%arg0: i32) -> (i32, i32) {
    %c0_i32 = arith.constant 0 : i32
    %c0_i32_0 = arith.constant 0 : i32
    %c0_i32_1 = arith.constant 0 : i32
    return %c0_i32, %c0_i32_0 : i32, i32
  }
  func.func @transform_9(%arg0: i32) -> (i32, i32, i32) {
    %c0_i32 = arith.constant 0 : i32
    %c0_i32_0 = arith.constant 0 : i32
    %c0_i32_1 = arith.constant 0 : i32
    return %arg0, %c0_i32, %c0_i32_0 : i32, i32, i32
  }
}

</mosaic_0001>

<bundles_post_ra>
// kernel: mnist_forward.1
= control target key start
LH: loop header
LB: loop body
LE: loop exit
PB: predicated region body
PF: predicated region fallthrough
CT: control target
= control target key end

     0   :  { %s13386_s0 = inlined_call_operand.vmem [shape: bf16[2,28,128], index: 0, kind: input, shape index: {}]   ;;  %s13387_s1 = inlined_call_operand.hbm [shape: bf16[2,640,384], index: 1, kind: input, shape index: {}]   ;;  %s13388_s2 = inlined_call_operand.vmem [shape: bf16[2,12,24], index: 2, kind: input, shape index: {}]   ;;  %s13389_s3 = inlined_call_operand.hbm [shape: f32[1,384], index: 3, kind: input, shape index: {}]   ;;  %s13390_s4 = inlined_call_operand.hbm [shape: bf16[2,1920,256], index: 4, kind: input, shape index: {}]   ;;  %s13391_s5 = inlined_call_operand.hbm [shape: bf16[2,4,8], index: 5, kind: input, shape index: {}]   ;;  %s13392_s6 = inlined_call_operand.hbm [shape: f32[1,256], index: 6, kind: input, shape index: {}]   ;;  %s13393_s7 = inlined_call_operand.hbm [shape: bf16[2,768,128], index: 7, kind: input, shape index: {}]   ;;  %s13394_s8 = inlined_call_operand.hbm [shape: f32[1,128], index: 8, kind: input, shape index: {}]   ;;  %s13395_s9 = inlined_call_operand.hbm [shape: f32[2,1,128], index: 9, kind: output, shape index: {}]  }
   0x1   :  { %13399 = sst [smem:[#allocation25_spill]] %s13389_s3 }
   0x2   :  { %13400 = sst [smem:[#allocation26_spill]] %s13391_s5 }
   0x3   :  { %14 = vsyncpa [#allocation5], 0 }
   0x4   :  { %15 = vsyncpa [#allocation8], 0 }
   0x5   :  { %16 = vsyncpa [#allocation11], 0 }
   0x6   :  { %17 = vsyncpa [#allocation14], 0 }
   0x7   :  { %18 = vsyncpa [#allocation6], 0 }
   0x8   :  { %20 = vsyncpa [#allocation6 + $0x1], 0  ;;  %s12603_s30 = smov 0   ;;  %s12605_s10 = smov 0  }
   0x9   :  { %s12607_s11 = smov 0   ;;  %s12609_s12 = smov 0  }
   0xa LB: > { %13401 = sst [smem:[#allocation22_spill]] %s12532_s11  ;;  %s12624_s13 = sadd.s32 4294967295, %s12536_s12   ;;  %s12536_s12 = sphi %s12609_s12, %s13410_s12   ;;  %s12532_s11 = sphi %s12607_s11, %s13412_s11   ;;  %s12528_s10 = sphi %s12605_s10, %s13414_s10   ;;  %s12524_s30 = sphi %s12603_s30, %s13413_s30  }
   0xb   : > { %s7987_s14 = sadd.s32 4294967294, %s12536_s12   ;;  %s12628_s15 = sadd.s32 1, %s12536_s12  }
   0xc   : > { %13402 = sst [smem:[#allocation23_spill]] %s12628_s15  ;;  %s227_s16 = sadd.s32 1, %s12532_s11 }
   0xd   : > { %s224_s17 = ssub.s32 %s12536_s12, %s12628_s15  ;;  %p237_p0 = scmp.ne.s32.totalorder %s12532_s11, %s12528_s10 }
   0xe   : > { %p225_p1 = scmp.eq.s32.totalorder %s224_s17, 0  ;;  %p238_p2 = scmp.eq.s32.totalorder %s12624_s13, 1 }
   0xf   : > { %p243_p3 = scmp.ne.s32.totalorder %s12528_s10, %s12524_s30  ;;  %p244_p4 = scmp.eq.s32.totalorder %s7987_s14, 1 }
  0x10   : > { %s12639_s18 = scalar_select %p225_p1, %s12532_s11, %s227_s16  }
  0x11   : > { %p12641_p5 = por %p238_p2, %p237_p0  ;;  %p12645_p6 = por %p244_p4, %p243_p3 }
  0x12   : > { %13403 = sst [smem:[#allocation24_spill]] %s12639_s18  ;;  %p7988_p7 = scmp.ge.s32.totalorder %s12536_s12, 1 }
  0x13   : > { %p251_p8 = scmp.lt.s32.totalorder %s12536_s12, 3  ;;  %p12182_p9 = scmp.eq.s32.totalorder %s12624_s13, 0 }
  0x14   : > { %s13407_s3 = sld [smem:[#allocation25_spill]]  ;;  %s12538_s25 = smov [#allocation7]  }
  0x15   : > { %p12652_p10 = pnand %p7988_p7, %p251_p8  ;;  %s282_s26 = sshll.u32 %s12538_s25, 4  ;;  %s283_s26 = int_to_ptr.vmem [resolvable:$true] %s282_s26 }
  0x16   : > { %s13408_s5 = sld [smem:[#allocation26_spill]]  ;;  %s12539_s16 = smov [#allocation10]  }
  0x17   : > { %p12156_p11 = pneg %p12652_p10  ;;  %s307_s17 = sshll.u32 %s12539_s16, 4  ;;  %s308_s17 = int_to_ptr.vmem [resolvable:$true] %s307_s17 }
  0x18   : > { %s12540_s22 = smov 32   ;;  %s12541_s23 = smov 2  }
  0x19   : > { %p12666_p12 = pnand %p12182_p9, %p12156_p11  ;;  %s331_s28 = sshll.u32 %s13393_s7, 4  ;;  %s332_s28 = int_to_ptr.hbm [resolvable:$true] %s331_s28 }
  0x1a   : > { %s280_s24 = sshll.u32 %s13407_s3, 4  ;;  %s12542_s3 = smov [#allocation13]   ;;  %s281_s24 = int_to_ptr.hbm [resolvable:$true] %s280_s24 }
  0x1b   : > { %12162 = dma.hbm_to_vmem [thread:$0]  (!%p12666_p12), %s281_s24, 48, %s283_s26, [#allocation8]  }
  0x1c   : > { %s305_s29 = sshll.u32 %s13408_s5, 4  ;;  %s333_s5 = sshll.u32 %s12542_s3, 4  ;;  %s306_s29 = int_to_ptr.hbm [resolvable:$true] %s305_s29  ;;  %s334_s5 = int_to_ptr.vmem [resolvable:$true] %s333_s5 }
  0x1d   : > { %12168 = dma.hbm_to_vmem [thread:$0]  (!%p12666_p12), %s306_s29, 64, %s308_s17, [#allocation11], %s12540_s22, %s12540_s22, %s12541_s23  }
  0x1e   : > { %s262_s16 = sshll.u32 %s13387_s1, 4  ;;  %s12543_s15 = smov 64   ;;  %s263_s16 = int_to_ptr.hbm [resolvable:$true] %s262_s16 }
  0x1f   : > { %s12544_s24 = smov 4   ;;  %s12545_s26 = smov [#allocation4]  }
  0x20   : > { %12174 = dma.hbm_to_vmem [thread:$0]  (!%p12666_p12), %s332_s28, 12288, %s334_s5, [#allocation14], %s12543_s15, %s12543_s15, %s12544_s24  }
  0x21   : > { %s264_s29 = sshll.u32 %s12545_s26, 4  ;;  %s12546_s17 = smov 192   ;;  %s265_s29 = int_to_ptr.vmem [resolvable:$true] %s264_s29 }
  0x22   : > { %s12547_s22 = smov 12   ;;  %s291_s25 = sshll.u32 %s13390_s4, 4  ;;  %s292_s25 = int_to_ptr.hbm [resolvable:$true] %s291_s25 }
  0x23   : > { %12159 = dma.hbm_to_vmem [thread:$0]  (!%p12666_p12), %s263_s16, 30720, %s265_s29, [#allocation5], %s12546_s17, %s12546_s17, %s12547_s22  }
  0x24   : > { %s12548_s11 = smov [#allocation9]   ;;  %s320_s27 = sshll.u32 %s13392_s6, 4  ;;  %s321_s27 = int_to_ptr.hbm [resolvable:$true] %s320_s27 }
  0x25   : > { %s293_s18 = sshll.u32 %s12548_s11, 4  ;;  %s12549_s28 = smov 128   ;;  %s294_s18 = int_to_ptr.vmem [resolvable:$true] %s293_s18 }
  0x26   : > { %s12550_s24 = smov 8   ;;  %s12551_s26 = smov [#allocation12]  }
  0x27   : > { %12165 = dma.hbm_to_vmem [thread:$0]  (!%p12666_p12), %s292_s25, 61440, %s294_s18, [#allocation8], %s12549_s28, %s12549_s28, %s12550_s24  }
  0x28   : > { %s322_s16 = sshll.u32 %s12551_s26, 4  ;;  %s346_s22 = sshll.u32 %s13394_s8, 4  ;;  %s323_s16 = int_to_ptr.vmem [resolvable:$true] %s322_s16  ;;  %s347_s22 = int_to_ptr.hbm [resolvable:$true] %s346_s22 }
  0x29   : > { %12171 = dma.hbm_to_vmem [thread:$0]  (!%p12666_p12), %s321_s27, 32, %s323_s16, [#allocation11]  }
  0x2a   : > { %s12552_s3 = smov [#allocation15]   ;;  %369 = sbr.rel (%p12652_p10) target bundleno = 1845 (0x735), region = 56 }
  0x2b   : > { %s348_s23 = sshll.u32 %s12552_s3, 4  ;;  %s349_s23 = int_to_ptr.vmem [resolvable:$true] %s348_s23 }
  0x2c   : > { %12177 = dma.hbm_to_vmem [thread:$0]  (!%p12666_p12), %s347_s22, 16, %s349_s23, [#allocation14]  }
  0x2f   : > { %12503 = dma.done.wait (%p12182_p9), [#allocation5], 30720  }
  0x30   : > { %12505 = vsyncadd (%p12182_p9), [#allocation5], 4294936576 }
  0x31   : > { %12507 = dma.done.wait (%p12182_p9), [#allocation8], 61488  }
  0x32   : > { %12509 = vsyncadd (%p12182_p9), [#allocation8], 4294905808 }
  0x33   : > { %12511 = dma.done.wait (%p12182_p9), [#allocation11], 96  }
  0x34   : > { %12513 = vsyncadd (%p12182_p9), [#allocation11], 4294967200 }
  0x35   : > { %12515 = dma.done.wait (%p12182_p9), [#allocation14], 12304  }
  0x36   : > { %12517 = vsyncadd (%p12182_p9), [#allocation14], 4294954992  ;;  %p435_p13 = scmp.lt.s32.totalorder %s12624_s13, 1  ;;  %v8093_v0 = vld [vmem:[#allocation4 + $0xa8] sm:$0xf]  ;;  %vm482_vm1 = vcmask 1046528   ;;  %s7859_s23 = scalar_lea.hbm %s13395_s9, %s12624_s13 }
  0x37   : > { %v11326_v1 = vld [vmem:[#allocation4 + $0xb0] sm:$0xf0]  ;;  %v8189_v2 = vld [vmem:[#allocation4 + $0x168] sm:$0xf]  ;;  %v8081_v11 = vld [vmem:[#allocation4 + $0x90] sm:$0xf] }
  0x38   : > { %v8094_v3 = vor.u32 %v11326_v1, %v8093_v0  ;;  %v11350_v4 = vld [vmem:[#allocation4 + $0x170] sm:$0xf0]  ;;  %v8285_v5 = vld [vmem:[#allocation4 + $0x228] sm:$0xf]  ;;  %v11323_v13 = vld [vmem:[#allocation4 + $0x98] sm:$0xf0] }
  0x39   : > { %v11374_v6 = vld [vmem:[#allocation4 + $0x230] sm:$0xf0]  ;;  %v8190_v7 = vor.u32 %v11350_v4, %v8189_v2  ;;  %v8381_v9 = vld [vmem:[#allocation4 + $0x2e8] sm:$0xf]  ;;  %v8177_v14 = vld [vmem:[#allocation4 + $0x150] sm:$0xf]  ;;  %v8082_v16 = vor.u32 %v11323_v13, %v8081_v11 }
  0x3a   : > { %v8286_v8 = vor.u32 %v11374_v6, %v8285_v5  ;;  %v11398_v10 = vld [vmem:[#allocation4 + $0x2f0] sm:$0xf0]  ;;  %1328 = vmatpush.bf16.msra.mxu0 %v8094_v3  ;;  %v11347_v15 = vld [vmem:[#allocation4 + $0x158] sm:$0xf0]  ;;  %v8273_v18 = vld [vmem:[#allocation4 + $0x210] sm:$0xf] }
  0x3b   : > { %v8382_v12 = vor.u32 %v11398_v10, %v8381_v9  ;;  %1346 = vmatpush.bf16.msra.mxu1 %v8190_v7  ;;  %v8178_v17 = vor.u32 %v11347_v15, %v8177_v14  ;;  %v11371_v19 = vld [vmem:[#allocation4 + $0x218] sm:$0xf0]  ;;  %v8369_v20 = vld [vmem:[#allocation4 + $0x2d0] sm:$0xf]  ;;  %v8069_v23 = vld [vmem:[#allocation4 + $0x78] sm:$0xf] }
  0x3c   : > { %1364 = vmatpush.bf16.msra.mxu2 %v8286_v8  ;;  %v8274_v21 = vor.u32 %v11371_v19, %v8273_v18  ;;  %v11395_v22 = vld [vmem:[#allocation4 + $0x2d8] sm:$0xf0]  ;;  %v11320_v24 = vld [vmem:[#allocation4 + $0x80] sm:$0xf0]  ;;  %v8165_v26 = vld [vmem:[#allocation4 + $0x138] sm:$0xf] }
  0x3d   : > { %1382 = vmatpush.bf16.msra.mxu3 %v8382_v12  ;;  %v8370_v25 = vor.u32 %v11395_v22, %v8369_v20  ;;  %v11344_v27 = vld [vmem:[#allocation4 + $0x140] sm:$0xf0]  ;;  %v8261_v28 = vld [vmem:[#allocation4 + $0x1f8] sm:$0xf]  ;;  %v8070_v29 = vor.u32 %v11320_v24, %v8069_v23  ;;  %v8057_v35 = vld [vmem:[#allocation4 + $0x60] sm:$0xf] }
  0x3e   : > { %1329 = vmatpush.bf16.msra.mxu0 %v8082_v16  ;;  %v11368_v30 = vld [vmem:[#allocation4 + $0x200] sm:$0xf0]  ;;  %v8357_v31 = vld [vmem:[#allocation4 + $0x2b8] sm:$0xf]  ;;  %v8166_v33 = vor.u32 %v11344_v27, %v8165_v26  ;;  %v11317_v36 = vld [vmem:[#allocation4 + $0x68] sm:$0xf0] }
  0x3f   : > { %v11392_v32 = vld [vmem:[#allocation4 + $0x2c0] sm:$0xf0]  ;;  %1347 = vmatpush.bf16.msra.mxu1 %v8178_v17  ;;  %v8262_v34 = vor.u32 %v11368_v30, %v8261_v28  ;;  %v8153_v37 = vld [vmem:[#allocation4 + $0x120] sm:$0xf]  ;;  %v11341_v39 = vld [vmem:[#allocation4 + $0x128] sm:$0xf0]  ;;  %v8058_v44 = vor.u32 %v11317_v36, %v8057_v35 }
  0x40   : > { %1365 = vmatpush.bf16.msra.mxu2 %v8274_v21  ;;  %v8358_v38 = vor.u32 %v11392_v32, %v8357_v31  ;;  %v8249_v40 = vld [vmem:[#allocation4 + $0x1e0] sm:$0xf]  ;;  %v11365_v41 = vld [vmem:[#allocation4 + $0x1e8] sm:$0xf0]  ;;  %s12721_s21 = scalar_select %p435_p13, %s12624_s13, 1  ;;  %v8154_v45 = vor.u32 %v11341_v39, %v8153_v37  ;;  %vm514_vm3 = vcmask 1045504  }
  0x41   : > { %1383 = vmatpush.bf16.msra.mxu3 %v8370_v25  ;;  %v8345_v42 = vld [vmem:[#allocation4 + $0x2a0] sm:$0xf]  ;;  %v11389_v43 = vld [vmem:[#allocation4 + $0x2a8] sm:$0xf0]  ;;  %v8250_v46 = vor.u32 %v11365_v41, %v8249_v40  ;;  %v8045_v47 = vld [vmem:[#allocation4 + $0x48] sm:$0xf] }
  0x42   : > { %1330 = vmatpush.bf16.msra.mxu0 %v8070_v29  ;;  %v11314_v48 = vld [vmem:[#allocation4 + $0x50] sm:$0xf0]  ;;  %v8141_v49 = vld [vmem:[#allocation4 + $0x108] sm:$0xf]  ;;  %v8346_v50 = vor.u32 %v11389_v43, %v8345_v42  ;;  %v8033_v57 = vld [vmem:[#allocation4 + $0x30] sm:$0xf] }
  0x43   : > { %1348 = vmatpush.bf16.msra.mxu1 %v8166_v33  ;;  %v11338_v51 = vld [vmem:[#allocation4 + $0x110] sm:$0xf0]  ;;  %v8237_v52 = vld [vmem:[#allocation4 + $0x1c8] sm:$0xf]  ;;  %v8046_v56 = vor.u32 %v11314_v48, %v8045_v47  ;;  %s11303_s14 = sshll.u32 %s12721_s21, 4  ;;  %vm1624_vm4 = vcmask 1043456  }
  0x44   : > { %1366 = vmatpush.bf16.msra.mxu2 %v8262_v34  ;;  %v11362_v53 = vld [vmem:[#allocation4 + $0x1d0] sm:$0xf0]  ;;  %v8333_v54 = vld [vmem:[#allocation4 + $0x288] sm:$0xf]  ;;  %v8142_v58 = vor.u32 %v11338_v51, %v8141_v49  ;;  %v11311_v60 = vld [vmem:[#allocation4 + $0x38] sm:$0xf0]  ;;  %s12727_s18 = scalar_lea.vmem %s13386_s0, %s11303_s14 }
  0x45   : > { %1384 = vmatpush.bf16.msra.mxu3 %v8358_v38  ;;  %v11386_v55 = vld [vmem:[#allocation4 + $0x290] sm:$0xf0]  ;;  %v8238_v59 = vor.u32 %v11362_v53, %v8237_v52  ;;  %v8129_v61 = vld [vmem:[#allocation4 + $0xf0] sm:$0xf]  ;;  %v11335_v62 = vld [vmem:[#allocation4 + $0xf8] sm:$0xf0]  ;;  %v8034_v6 = vor.u32 %v11311_v60, %v8033_v57 }
  0x46   : > { %1331 = vmatpush.bf16.msra.mxu0 %v8058_v44  ;;  %v8334_v63 = vor.u32 %v11386_v55, %v8333_v54  ;;  %v8225_v0 = vld [vmem:[#allocation4 + $0x1b0] sm:$0xf]  ;;  %v11359_v1 = vld [vmem:[#allocation4 + $0x1b8] sm:$0xf0]  ;;  %v8021_v4 = vld [vmem:[#allocation4 + $0x18] sm:$0xf]  ;;  %v8130_v10 = vor.u32 %v11335_v62, %v8129_v61 }
  0x47   : > { %1349 = vmatpush.bf16.msra.mxu1 %v8154_v45  ;;  %v8321_v2 = vld [vmem:[#allocation4 + $0x270] sm:$0xf]  ;;  %v11383_v3 = vld [vmem:[#allocation4 + $0x278] sm:$0xf0]  ;;  %v11308_v5 = vld [vmem:[#allocation4 + $0x20] sm:$0xf0]  ;;  %v8226_v11 = vor.u32 %v11359_v1, %v8225_v0 }
  0x48   : > { %1367 = vmatpush.bf16.msra.mxu2 %v8250_v46  ;;  %v8117_v7 = vld [vmem:[#allocation4 + $0xd8] sm:$0xf]  ;;  %v11332_v8 = vld [vmem:[#allocation4 + $0xe0] sm:$0xf0]  ;;  %v8322_v15 = vor.u32 %v11383_v3, %v8321_v2  ;;  %v12729_v16 = vld [vmem:[#allocation4] sm:$0xf]  ;;  %v8022_v22 = vor.u32 %v11308_v5, %v8021_v4 }
  0x49   : > { %1385 = vmatpush.bf16.msra.mxu3 %v8346_v50  ;;  %v8213_v9 = vld [vmem:[#allocation4 + $0x198] sm:$0xf]  ;;  %v11356_v12 = vld [vmem:[#allocation4 + $0x1a0] sm:$0xf0]  ;;  %v12731_v17 = vld [vmem:[#allocation4 + $0x8] sm:$0xf0]  ;;  %v8118_v34 = vor.u32 %v11332_v8, %v8117_v7 }
  0x4a   : > { %1332 = vmatpush.bf16.msra.mxu0 %v8046_v56  ;;  %v8309_v13 = vld [vmem:[#allocation4 + $0x258] sm:$0xf]  ;;  %v11380_v14 = vld [vmem:[#allocation4 + $0x260] sm:$0xf0]  ;;  %v12733_v18 = vld [vmem:[#allocation4 + $0xc0] sm:$0xf]  ;;  %v8214_v35 = vor.u32 %v11356_v12, %v8213_v9  ;;  %v8010_v44 = vor.u32 %v12731_v17, %v12729_v16 }
  0x4b   : > { %1350 = vmatpush.bf16.msra.mxu1 %v8142_v58  ;;  %v12735_v19 = vld [vmem:[#allocation4 + $0xc8] sm:$0xf0]  ;;  %v12738_v20 = vld [vmem:[%s12727_s18] sm:$0xff]   ;;  %v443_v21 = vld [vmem:[%s12727_s18 + $0x8] sm:$0xf]  ;;  %v8310_v36 = vor.u32 %v11380_v14, %v8309_v13  ;;  %vm1620_vm5 = vcmask 195584  }
  0x4c   : > { %1368 = vmatpush.bf16.msra.mxu2 %v8238_v59  ;;  %v12741_v23 = vld [vmem:[#allocation4 + $0x180] sm:$0xf]  ;;  %v444_v24 = vld [vmem:[%s12727_s18 + $0xc] sm:$0x1]  ;;  %v12745_v26 = vunpack.c.l.b16 %v443_v21  ;;  %v12125_v27 = vunpack.c.h.b16 %v12738_v20  ;;  %v11353_v28 = vld [vmem:[#allocation4 + $0x188] sm:$0xf0]  ;;  %v8106_v45 = vor.u32 %v12735_v19, %v12733_v18 }
  0x4d   : > { %1386 = vmatpush.bf16.msra.mxu3 %v8334_v63  ;;  %v446_v25 = vld [vmem:[%s12727_s18 + $0xc] sm:$0x3]  ;;  %v459_v29 = vunpack.c.l.b16 %v444_v24  ;;  %v463_v30 = vshrl.u32 %v12738_v20, 16  ;;  %v465_v31 = vshll.u32 %v12738_v20, 16  ;;  %v445_v33 = vld [vmem:[%s12727_s18] sm:$0xe]  ;;  %v8202_v46 = vor.u32 %v11353_v28, %v12741_v23 }
  0x4e   : > { %1333 = vmatpush.bf16.msra.mxu0 %v8034_v6  ;;  %v489_v32 = vunpack.c.l.b16 %v446_v25  ;;  %v8297_v37 = vld [vmem:[#allocation4 + $0x240] sm:$0xf]  ;;  %v11377_v38 = vld [vmem:[#allocation4 + $0x248] sm:$0xf0]  ;;  %v480_v39 = vunpack.c.l.b16 %v445_v33  ;;  %vm461_vm0 = vsmask.f32 7424 }
  0x4f   : > { %1351 = vmatpush.bf16.msra.mxu1 %v8130_v10  ;;  %v12752_v40 = vpack.c.b16 %v459_v29, %v12745_v26  ;;  %v467_v41 = vrot.slane %v465_v31, 1  ;;  %v8477_v43 = vld [vmem:[#allocation4 + $0x3a8] sm:$0xf]  ;;  %v11422_v48 = vld [vmem:[#allocation4 + $0x3b0] sm:$0xf0]  ;;  %v8298_v51 = vor.u32 %v11377_v38, %v8297_v37  ;;  %vm4891_vm6 = vcmask 64512  }
  0x50   : > { %1369 = vmatpush.bf16.msra.mxu2 %v8226_v11  ;;  %v12755_v42 = vpack.c.b16 %v489_v32, %v12745_v26  ;;  %v481_v47 = vpack.c.b16 %v12125_v27, %v480_v39  ;;  %v11325_v49 = vld [vmem:[#allocation4 + $0xac] sm:$0xf]  ;;  %v8095_v50 = vld [vmem:[#allocation4 + $0xb4] sm:$0xf0]  ;;  %v8478_v62 = vor.u32 %v11422_v48, %v8477_v43  ;;  %v8465_v5 = vld [vmem:[#allocation4 + $0x390] sm:$0xf] }
  0x51   : > { %1387 = vmatpush.bf16.msra.mxu3 %v8322_v15  ;;  %v468_v52 = vor.u32 %v467_v41, %v463_v30  ;;  %v470_v53 = vshll.u32 %v12752_v40, 16  ;;  %v11349_v54 = vld [vmem:[#allocation4 + $0x16c] sm:$0xf]  ;;  %v8191_v55 = vld [vmem:[#allocation4 + $0x174] sm:$0xf0]  ;;  %v12766_v56 = vrot.slane %v12752_v40, 1  ;;  %v8098_v4 = vor.u32 %v11325_v49, %v8095_v50 }
  0x52   : > { %1334 = vmatpush.bf16.msra.mxu0 %v8022_v22  ;;  %v501_v57 = vshrl.u32 %v12755_v42, 16  ;;  %v504_v58 = vshll.u32 %v12755_v42, 16  ;;  %v483_v59 = vrot.slane %v481_v47, 1  ;;  %v11373_v60 = vld [vmem:[#allocation4 + $0x22c] sm:$0xf]  ;;  %v493_v63 = vshrl.u32 %v481_v47, 16 }
  0x53   : > { %1352 = vmatpush.bf16.msra.mxu1 %v8118_v34  ;;  %v12770_v61 = vrot.slane %v470_v53, 1  ;;  %v496_v0 = vshll.u32 %v481_v47, 16  ;;  %v8287_v1 = vld [vmem:[#allocation4 + $0x234] sm:$0xf0]  ;;  %v11419_v6 = vld [vmem:[#allocation4 + $0x398] sm:$0xf0]  ;;  %v8194_v7 = vor.u32 %v11349_v54, %v8191_v55 }
  0x54   : > { %1370 = vmatpush.bf16.msra.mxu2 %v8214_v35  ;;  %v503_v2 = vrot.slane %v501_v57, 1  ;;  %v506_v3 = vrot.slane %v504_v58, 2  ;;  %v495_v8 = vrot.slane %v493_v63, 1  ;;  %v11322_v10 = vld [vmem:[#allocation4 + $0x94] sm:$0xf]  ;;  %v12778_v13 = vsel %vm482_vm1, %v483_v59, %v12766_v56  ;;  %s433_s17 = sand.u32 1, %s12528_s10  }
  0x55   : > { %1388 = vmatpush.bf16.msra.mxu3 %v8310_v36  ;;  %v498_v9 = vrot.slane %v496_v0, 2  ;;  %v8083_v11 = vld [vmem:[#allocation4 + $0x9c] sm:$0xf0]  ;;  %v12774_v12 = vsel %vm461_vm0, %v468_v52, %v12770_v61  ;;  %vm491_vm2 = vsmask.f32 6400  ;;  %v8290_v16 = vor.u32 %v11373_v60, %v8287_v1  ;;  %s434_s21 = scalar_lea.vmem [#allocation16], %s433_s17 }
  0x56   : > { %1335 = vmatpush.bf16.msra.mxu0 %v8010_v44  ;;  %v12780_v14 = vor.u32 %v506_v3, %v503_v2  ;;  %v8466_v17 = vor.u32 %v11419_v6, %v8465_v5  ;;  %v11346_v18 = vld [vmem:[#allocation4 + $0x154] sm:$0xf]  ;;  %v8179_v19 = vld [vmem:[#allocation4 + $0x15c] sm:$0xf0]  ;;  %v8086_v22 = vor.u32 %v11322_v10, %v8083_v11  ;;  %v8453_v24 = vld [vmem:[#allocation4 + $0x378] sm:$0xf]  ;;  %v12793_v2 = vpack.c.b16 %v12745_v26, %v12745_v26 }
  0x57   : > { %1353 = vmatpush.bf16.msra.mxu1 %v8106_v45  ;;  %v499_v15 = vor.u32 %v498_v9, %v495_v8  ;;  %v11370_v21 = vld [vmem:[#allocation4 + $0x214] sm:$0xf]  ;;  %v8275_v23 = vld [vmem:[#allocation4 + $0x21c] sm:$0xf0]  ;;  %v11416_v25 = vld [vmem:[#allocation4 + $0x380] sm:$0xf0]  ;;  %v8182_v31 = vor.u32 %v11346_v18, %v8179_v19 }
  0x58   : > { %1371 = vmatpush.bf16.msra.mxu2 %v8202_v46  ;;  %v11319_v29 = vld [vmem:[#allocation4 + $0x7c] sm:$0xf]  ;;  %v8071_v30 = vld [vmem:[#allocation4 + $0x84] sm:$0xf0]  ;;  %v8278_v32 = vor.u32 %v11370_v21, %v8275_v23  ;;  %v8454_v33 = vor.u32 %v11416_v25, %v8453_v24  ;;  %v8441_v39 = vld [vmem:[#allocation4 + $0x360] sm:$0xf] }
  0x59   : > { %1389 = vmatpush.bf16.msra.mxu3 %v8298_v51  ;;  %1336 = vmatmul.bf16.vlgmr.msra.gmra.mxu0 %v12738_v20  ;;  %v12787_v28 = vsel %vm491_vm2, %v499_v15, %v12780_v14  ;;  %v11343_v34 = vld [vmem:[#allocation4 + $0x13c] sm:$0xf]  ;;  %v8167_v35 = vld [vmem:[#allocation4 + $0x144] sm:$0xf0]  ;;  %v8074_v37 = vor.u32 %v11319_v29, %v8071_v30  ;;  %v11413_v41 = vld [vmem:[#allocation4 + $0x368] sm:$0xf0] }
  0x5a   : > { %1400 = vmatpush.bf16.msrb.mxu0 %v8478_v62  ;;  %1354 = vmatmul.bf16.vlgmr.msra.gmra.mxu1 %v12774_v12  ;;  %v11367_v36 = vld [vmem:[#allocation4 + $0x1fc] sm:$0xf]  ;;  %v8263_v38 = vld [vmem:[#allocation4 + $0x204] sm:$0xf0]  ;;  %v11316_v43 = vld [vmem:[#allocation4 + $0x64] sm:$0xf]  ;;  %v8170_v45 = vor.u32 %v11343_v34, %v8167_v35  ;;  %v8442_v47 = vor.u32 %v11413_v41, %v8441_v39 }
  0x5b   : > { %1418 = vmatpush.bf16.msrb.mxu1 %v8098_v4  ;;  %1372 = vmatmul.bf16.vlgmr.msra.gmra.mxu2 %v12778_v13  ;;  %v8059_v44 = vld [vmem:[#allocation4 + $0x6c] sm:$0xf0]  ;;  %v8266_v46 = vor.u32 %v11367_v36, %v8263_v38  ;;  %v11340_v48 = vld [vmem:[#allocation4 + $0x124] sm:$0xf]  ;;  %v8429_v53 = vld [vmem:[#allocation4 + $0x348] sm:$0xf] }
  0x5c   : > { %1436 = vmatpush.bf16.msrb.mxu2 %v8194_v7  ;;  %1390 = vmatmul.bf16.vlgmr.msra.gmra.mxu3 %v12787_v28  ;;  %v8155_v49 = vld [vmem:[#allocation4 + $0x12c] sm:$0xf0]  ;;  %v11364_v50 = vld [vmem:[#allocation4 + $0x1e4] sm:$0xf]  ;;  %v8062_v51 = vor.u32 %v11316_v43, %v8059_v44  ;;  %v11410_v54 = vld [vmem:[#allocation4 + $0x350] sm:$0xf0] }
  0x5d   : > { %1454 = vmatpush.bf16.msrb.mxu3 %v8290_v16  ;;  %v8251_v52 = vld [vmem:[#allocation4 + $0x1ec] sm:$0xf0]  ;;  %v474_v55 = vshrl.u32 %v12752_v40, 16  ;;  %v11313_v57 = vld [vmem:[#allocation4 + $0x4c] sm:$0xf]  ;;  %v8158_v59 = vor.u32 %v11340_v48, %v8155_v49  ;;  %v8430_v62 = vor.u32 %v11410_v54, %v8429_v53  ;;  %vm6860_vm7 = vcmask 1041408  }
  0x5e   : > { %1401 = vmatpush.bf16.msrb.mxu0 %v8466_v17  ;;  %v8047_v58 = vld [vmem:[#allocation4 + $0x54] sm:$0xf0]  ;;  %v8254_v60 = vor.u32 %v11364_v50, %v8251_v52  ;;  %v11337_v63 = vld [vmem:[#allocation4 + $0x10c] sm:$0xf]  ;;  %v8417_v40 = vld [vmem:[#allocation4 + $0x330] sm:$0xf] }
  0x5f   : > { %1419 = vmatpush.bf16.msrb.mxu1 %v8086_v22  ;;  %v8143_v0 = vld [vmem:[#allocation4 + $0x114] sm:$0xf0]  ;;  %v11361_v1 = vld [vmem:[#allocation4 + $0x1cc] sm:$0xf]  ;;  %v8050_v3 = vor.u32 %v11313_v57, %v8047_v58  ;;  %v11407_v5 = vld [vmem:[#allocation4 + $0x338] sm:$0xf0]  ;;  %v12796_v6 = vor.u32 %v474_v55, %v12770_v61 }
  0x60   : > { %1437 = vmatpush.bf16.msrb.mxu2 %v8182_v31  ;;  %v8239_v4 = vld [vmem:[#allocation4 + $0x1d4] sm:$0xf0]  ;;  %v11310_v7 = vld [vmem:[#allocation4 + $0x34] sm:$0xf]  ;;  %v8035_v8 = vld [vmem:[#allocation4 + $0x3c] sm:$0xf0]  ;;  %v8146_v9 = vor.u32 %v11337_v63, %v8143_v0  ;;  %v8418_v15 = vor.u32 %v11407_v5, %v8417_v40 }
  0x61   : > { %1455 = vmatpush.bf16.msrb.mxu3 %v8278_v32  ;;  %v447_v10 = vld [vmem:[%s12727_s18] sm:$0xc]  ;;  %v8242_v11 = vor.u32 %v11361_v1, %v8239_v4  ;;  %v11334_v16 = vld [vmem:[#allocation4 + $0xf4] sm:$0xf]  ;;  %v8131_v17 = vld [vmem:[#allocation4 + $0xfc] sm:$0xf0]  ;;  %v8038_v18 = vor.u32 %v11310_v7, %v8035_v8 }
  0x62   : > { %1402 = vmatpush.bf16.msrb.mxu0 %v8454_v33  ;;  %v11358_v26 = vld [vmem:[#allocation4 + $0x1b4] sm:$0xf]  ;;  %v8227_v19 = vld [vmem:[#allocation4 + $0x1bc] sm:$0xf0]  ;;  %v8405_v21 = vld [vmem:[#allocation4 + $0x318] sm:$0xf]  ;;  %v512_v24 = vunpack.c.l.b16 %v447_v10  ;;  %v8134_v25 = vor.u32 %v11334_v16, %v8131_v17 }
  0x63   : > { %1420 = vmatpush.bf16.msrb.mxu1 %v8074_v37  ;;  %v11404_v61 = vld [vmem:[#allocation4 + $0x320] sm:$0xf0]  ;;  %v11307_v22 = vld [vmem:[#allocation4 + $0x1c] sm:$0xf]  ;;  %v8023_v23 = vld [vmem:[#allocation4 + $0x24] sm:$0xf0]  ;;  %v8230_v30 = vor.u32 %v11358_v26, %v8227_v19 }
  0x64   : > { %1438 = vmatpush.bf16.msrb.mxu2 %v8170_v45  ;;  %v11331_v29 = vld [vmem:[#allocation4 + $0xdc] sm:$0xf]  ;;  %v8406_v31 = vor.u32 %v11404_v61, %v8405_v21  ;;  %v8119_v32 = vld [vmem:[#allocation4 + $0xe4] sm:$0xf0]  ;;  %v8026_v35 = vor.u32 %v11307_v22, %v8023_v23  ;;  %v8393_v36 = vld [vmem:[#allocation4 + $0x300] sm:$0xf]  ;;  %v513_v41 = vpack.c.b16 %v12125_v27, %v512_v24 }
  0x65   : > { %1456 = vmatpush.bf16.msrb.mxu3 %v8266_v46  ;;  %v11355_v33 = vld [vmem:[#allocation4 + $0x19c] sm:$0xf]  ;;  %v8215_v34 = vld [vmem:[#allocation4 + $0x1a4] sm:$0xf0]  ;;  %v11401_v37 = vld [vmem:[#allocation4 + $0x308] sm:$0xf0]  ;;  %v8122_v45 = vor.u32 %v11331_v29, %v8119_v32 }
  0x66   : > { %1403 = vmatpush.bf16.msrb.mxu0 %v8442_v47  ;;  %v11304_v38 = vld [vmem:[#allocation4 + $0x4] sm:$0xf]  ;;  %v8011_v39 = vld [vmem:[#allocation4 + $0xc] sm:$0xf0]  ;;  %v11397_v43 = vld [vmem:[#allocation4 + $0x2ec] sm:$0xf]  ;;  %v8218_v48 = vor.u32 %v11355_v33, %v8215_v34  ;;  %v8394_v49 = vor.u32 %v11401_v37, %v8393_v36 }
  0x67   : > { %1421 = vmatpush.bf16.msrb.mxu1 %v8062_v51  ;;  %v8383_v44 = vld [vmem:[#allocation4 + $0x2f4] sm:$0xf0]  ;;  %v11421_v46 = vld [vmem:[#allocation4 + $0x3ac] sm:$0xf]  ;;  %v11328_v50 = vld [vmem:[#allocation4 + $0xc4] sm:$0xf]  ;;  %v8014_v53 = vor.u32 %v11304_v38, %v8011_v39 }
  0x68   : > { %1439 = vmatpush.bf16.msrb.mxu2 %v8158_v59  ;;  %v8479_v47 = vld [vmem:[#allocation4 + $0x3b4] sm:$0xf0]  ;;  %v8107_v51 = vld [vmem:[#allocation4 + $0xcc] sm:$0xf0]  ;;  %v11352_v52 = vld [vmem:[#allocation4 + $0x184] sm:$0xf]  ;;  %v8386_v55 = vor.u32 %v11397_v43, %v8383_v44 }
  0x69   : > { %1457 = vmatpush.bf16.msrb.mxu3 %v8254_v60  ;;  %1341 = vmatmul.bf16.gmra.mxu0 %v12793_v2  ;;  %v8203_v54 = vld [vmem:[#allocation4 + $0x18c] sm:$0xf0]  ;;  %v11327_v58 = vld [vmem:[#allocation4 + $0xb8] sm:$0xf0]  ;;  %v12806_v27 = vrot.slane %v12755_v42, 2  ;;  %v515_v59 = vrot.slane %v513_v41, 2  ;;  %v8482_v60 = vor.u32 %v11421_v46, %v8479_v47  ;;  %v8110_v0 = vor.u32 %v11328_v50, %v8107_v51 }
  0x6a   : > { %1404 = vmatpush.bf16.msrb.mxu0 %v8430_v62  ;;  %1359 = vmatmul.bf16.gmra.mxu1 %v12796_v6  ;;  %v8101_v57 = vld [vmem:[#allocation4 + $0xb0] sm:$0xf]  ;;  %v11351_v63 = vld [vmem:[#allocation4 + $0x178] sm:$0xf0]  ;;  %v8206_v1 = vor.u32 %v11352_v52, %v8203_v54  ;;  %v11394_v4 = vld [vmem:[#allocation4 + $0x2d4] sm:$0xf] }
  0x6b   : > { %1422 = vmatpush.bf16.msrb.mxu1 %v8050_v3  ;;  %1377 = vmatmul.bf16.gmra.mxu2 %v12766_v56  ;;  %v8197_v62 = vld [vmem:[#allocation4 + $0x170] sm:$0xf]  ;;  %v8102_v3 = vor.u32 %v11327_v58, %v8101_v57  ;;  %v8371_v40 = vld [vmem:[#allocation4 + $0x2dc] sm:$0xf0]  ;;  %v11418_v5 = vld [vmem:[#allocation4 + $0x394] sm:$0xf]  ;;  %v12809_v10 = vsel %vm514_vm3, %v515_v59, %v12806_v27 }
  0x6c   : > { %1440 = vmatpush.bf16.msrb.mxu2 %v8146_v9  ;;  %1395 = vmatmul.bf16.gmra.mxu3 %v12780_v14  ;;  %v8198_v7 = vor.u32 %v11351_v63, %v8197_v62  ;;  %v8467_v8 = vld [vmem:[#allocation4 + $0x39c] sm:$0xf0]  ;;  %v8089_v42 = vld [vmem:[#allocation4 + $0x98] sm:$0xf]  ;;  %v11324_v9 = vld [vmem:[#allocation4 + $0xa0] sm:$0xf0]  ;;  %v8374_v16 = vor.u32 %v11394_v4, %v8371_v40 }
  0x6d   : > { %1458 = vmatpush.bf16.msrb.mxu3 %v8242_v11  ;;  %v8185_v11 = vld [vmem:[#allocation4 + $0x158] sm:$0xf]  ;;  %v8470_v17 = vor.u32 %v11418_v5, %v8467_v8  ;;  %v8090_v26 = vor.u32 %v11324_v9, %v8089_v42  ;;  %v8359_v19 = vld [vmem:[#allocation4 + $0x2c4] sm:$0xf0]  ;;  %v11415_v21 = vld [vmem:[#allocation4 + $0x37c] sm:$0xf] }
  0x6e   : > { %1405 = vmatpush.bf16.msrb.mxu0 %v8418_v15  ;;  %v11348_v15 = vld [vmem:[#allocation4 + $0x160] sm:$0xf0]  ;;  %v8455_v22 = vld [vmem:[#allocation4 + $0x384] sm:$0xf0]  ;;  %v8077_v23 = vld [vmem:[#allocation4 + $0x80] sm:$0xf] }
  0x6f   : > { %1423 = vmatpush.bf16.msrb.mxu1 %v8038_v18  ;;  %v11391_v18 = vld [vmem:[#allocation4 + $0x2bc] sm:$0xf]  ;;  %v8186_v61 = vor.u32 %v11348_v15, %v8185_v11  ;;  %v11321_v24 = vld [vmem:[#allocation4 + $0x88] sm:$0xf0]  ;;  %v11388_v33 = vld [vmem:[#allocation4 + $0x2a4] sm:$0xf] }
  0x70   : > { %1441 = vmatpush.bf16.msrb.mxu2 %v8134_v25  ;;  %v8173_v25 = vld [vmem:[#allocation4 + $0x140] sm:$0xf]  ;;  %v11345_v29 = vld [vmem:[#allocation4 + $0x148] sm:$0xf0]  ;;  %v8078_v32 = vor.u32 %v11321_v24, %v8077_v23  ;;  %v8347_v34 = vld [vmem:[#allocation4 + $0x2ac] sm:$0xf0] }
  0x71   : > { %1459 = vmatpush.bf16.msrb.mxu3 %v8230_v30  ;;  %v8362_v30 = vor.u32 %v11391_v18, %v8359_v19  ;;  %v8174_v36 = vor.u32 %v11345_v29, %v8173_v25  ;;  %v8443_v37 = vld [vmem:[#allocation4 + $0x36c] sm:$0xf0]  ;;  %v8065_v38 = vld [vmem:[#allocation4 + $0x68] sm:$0xf]  ;;  %v11318_v39 = vld [vmem:[#allocation4 + $0x70] sm:$0xf0]  ;;  %v8350_v44 = vor.u32 %v11388_v33, %v8347_v34 }
  0x72   : > { %1406 = vmatpush.bf16.msrb.mxu0 %v8406_v31  ;;  %v8458_v31 = vor.u32 %v11415_v21, %v8455_v22  ;;  %v8161_v41 = vld [vmem:[#allocation4 + $0x128] sm:$0xf]  ;;  %v11342_v43 = vld [vmem:[#allocation4 + $0x130] sm:$0xf0]  ;;  %v8066_v46 = vor.u32 %v11318_v39, %v8065_v38  ;;  %v11385_v47 = vld [vmem:[#allocation4 + $0x28c] sm:$0xf] }
  0x73   : > { %1424 = vmatpush.bf16.msrb.mxu1 %v8026_v35  ;;  %v11412_v35 = vld [vmem:[#allocation4 + $0x364] sm:$0xf]  ;;  %v8162_v50 = vor.u32 %v11342_v43, %v8161_v41  ;;  %v8431_v51 = vld [vmem:[#allocation4 + $0x354] sm:$0xf0]  ;;  %v8053_v52 = vld [vmem:[#allocation4 + $0x50] sm:$0xf] }
  0x74   : > { %1442 = vmatpush.bf16.msrb.mxu2 %v8122_v45  ;;  %v8446_v45 = vor.u32 %v11412_v35, %v8443_v37  ;;  %v8149_v54 = vld [vmem:[#allocation4 + $0x110] sm:$0xf]  ;;  %v11382_v58 = vld [vmem:[#allocation4 + $0x274] sm:$0xf]  ;;  %v8323_v62 = vld [vmem:[#allocation4 + $0x27c] sm:$0xf0] }
  0x75   : > { %1460 = vmatpush.bf16.msrb.mxu3 %v8218_v48  ;;  %v8335_v48 = vld [vmem:[#allocation4 + $0x294] sm:$0xf0]  ;;  %v11406_v63 = vld [vmem:[#allocation4 + $0x334] sm:$0xf]  ;;  %v11312_v4 = vld [vmem:[#allocation4 + $0x40] sm:$0xf0] }
  0x76   : > { %1407 = vmatpush.bf16.msrb.mxu0 %v8394_v49  ;;  %v11409_v49 = vld [vmem:[#allocation4 + $0x34c] sm:$0xf]  ;;  %v8338_v57 = vor.u32 %v11385_v47, %v8335_v48  ;;  %v8137_v40 = vld [vmem:[#allocation4 + $0xf8] sm:$0xf]  ;;  %v11336_v5 = vld [vmem:[#allocation4 + $0x100] sm:$0xf0] }
  0x77   : > { %1425 = vmatpush.bf16.msrb.mxu1 %v8014_v53  ;;  %v11315_v53 = vld [vmem:[#allocation4 + $0x58] sm:$0xf0]  ;;  %v8434_v59 = vor.u32 %v11409_v49, %v8431_v51  ;;  %v8311_v11 = vld [vmem:[#allocation4 + $0x264] sm:$0xf0]  ;;  %v11309_v18 = vld [vmem:[#allocation4 + $0x28] sm:$0xf0] }
  0x78   : > { %1443 = vmatpush.bf16.msrb.mxu2 %v8110_v0  ;;  %v8419_v0 = vld [vmem:[#allocation4 + $0x33c] sm:$0xf0]  ;;  %v11379_v9 = vld [vmem:[#allocation4 + $0x25c] sm:$0xf]  ;;  %v11333_v21 = vld [vmem:[#allocation4 + $0xe8] sm:$0xf0] }
  0x79   : > { %1461 = vmatpush.bf16.msrb.mxu3 %v8206_v1  ;;  %1408 = vmatmul.bf16.vlgmr.msrb.gmra.mxu0 %v12809_v10  ;;  %v8422_v8 = vor.u32 %v11406_v63, %v8419_v0  ;;  %v11403_v15 = vld [vmem:[#allocation4 + $0x31c] sm:$0xf]  ;;  %v8125_v19 = vld [vmem:[#allocation4 + $0xe0] sm:$0xf]  ;;  %v11376_v22 = vld [vmem:[#allocation4 + $0x244] sm:$0xf] }
  0x7a   : > { %1472 = vmatpush.bf16.msra.mxu0 %v8386_v55  ;;  %1426 = vmatmul.bf16.vlgmr.msrb.gmra.mxu1 %v12738_v20  ;;  %v11339_v55 = vld [vmem:[#allocation4 + $0x118] sm:$0xf0]  ;;  %v8299_v23 = vld [vmem:[#allocation4 + $0x24c] sm:$0xf0]  ;;  %v11400_v29 = vld [vmem:[#allocation4 + $0x304] sm:$0xf] }
  0x7b   : > { %1490 = vmatpush.bf16.msra.mxu1 %v8482_v60  ;;  %1444 = vmatmul.bf16.vlgmr.msrb.gmra.mxu2 %v12774_v12  ;;  %v8054_v60 = vor.u32 %v11315_v53, %v8053_v52  ;;  %v8150_v1 = vor.u32 %v11339_v55, %v8149_v54  ;;  %v11306_v33 = vld [vmem:[#allocation4 + $0x10] sm:$0xf0]  ;;  %v8113_v34 = vld [vmem:[#allocation4 + $0xc8] sm:$0xf]  ;;  %v11375_v37 = vld [vmem:[#allocation4 + $0x238] sm:$0xf0]  ;;  %v8302_v39 = vor.u32 %v11376_v22, %v8299_v23 }
  0x7c   : > { %1508 = vmatpush.bf16.msra.mxu2 %v8102_v3  ;;  %1462 = vmatmul.bf16.vlgmr.msrb.gmra.mxu3 %v12778_v13  ;;  %v8041_v3 = vld [vmem:[#allocation4 + $0x38] sm:$0xf]  ;;  %v11330_v35 = vld [vmem:[#allocation4 + $0xd0] sm:$0xf0]  ;;  %v8389_v38 = vld [vmem:[#allocation4 + $0x2f0] sm:$0xf] }
  0x7d   : > { %1526 = vmatpush.bf16.msra.mxu3 %v8198_v7  ;;  %v8326_v7 = vor.u32 %v11382_v58, %v8323_v62  ;;  %v8042_v42 = vor.u32 %v11312_v4, %v8041_v3  ;;  %v11399_v41 = vld [vmem:[#allocation4 + $0x2f8] sm:$0xf0]  ;;  %v8485_v43 = vld [vmem:[#allocation4 + $0x3b0] sm:$0xf]  ;;  %v8114_v47 = vor.u32 %v11330_v35, %v8113_v34  ;;  %v8281_v51 = vld [vmem:[#allocation4 + $0x218] sm:$0xf] }
  0x7e   : > { %1473 = vmatpush.bf16.msra.mxu0 %v8374_v16  ;;  %v8138_v16 = vor.u32 %v11336_v5, %v8137_v40  ;;  %v8390_v49 = vor.u32 %v11399_v41, %v8389_v38  ;;  %v11372_v52 = vld [vmem:[#allocation4 + $0x220] sm:$0xf0]  ;;  %v8377_v53 = vld [vmem:[#allocation4 + $0x2d8] sm:$0xf]  ;;  %v8269_v62 = vld [vmem:[#allocation4 + $0x200] sm:$0xf] }
  0x7f   : > { %1491 = vmatpush.bf16.msra.mxu1 %v8470_v17  ;;  %v8407_v17 = vld [vmem:[#allocation4 + $0x324] sm:$0xf0]  ;;  %v11396_v54 = vld [vmem:[#allocation4 + $0x2e0] sm:$0xf0]  ;;  %v8473_v55 = vld [vmem:[#allocation4 + $0x398] sm:$0xf]  ;;  %v8282_v58 = vor.u32 %v11372_v52, %v8281_v51 }
  0x80   : > { %1509 = vmatpush.bf16.msra.mxu2 %v8090_v26  ;;  %v8029_v26 = vld [vmem:[#allocation4 + $0x20] sm:$0xf]  ;;  %v8410_v24 = vor.u32 %v11403_v15, %v8407_v17  ;;  %v11369_v63 = vld [vmem:[#allocation4 + $0x208] sm:$0xf0]  ;;  %v8449_v15 = vld [vmem:[#allocation4 + $0x368] sm:$0xf] }
  0x81   : > { %1527 = vmatpush.bf16.msra.mxu3 %v8186_v61  ;;  %v8314_v61 = vor.u32 %v11379_v9, %v8311_v11  ;;  %v8030_v25 = vor.u32 %v11309_v18, %v8029_v26  ;;  %v8365_v0 = vld [vmem:[#allocation4 + $0x2c0] sm:$0xf]  ;;  %v11417_v4 = vld [vmem:[#allocation4 + $0x388] sm:$0xf0]  ;;  %v8270_v40 = vor.u32 %v11369_v63, %v8269_v62  ;;  %v8353_v9 = vld [vmem:[#allocation4 + $0x2a8] sm:$0xf] }
  0x82   : > { %1474 = vmatpush.bf16.msra.mxu0 %v8362_v30  ;;  %v8395_v30 = vld [vmem:[#allocation4 + $0x30c] sm:$0xf0]  ;;  %v8461_v3 = vld [vmem:[#allocation4 + $0x380] sm:$0xf]  ;;  %v11390_v11 = vld [vmem:[#allocation4 + $0x2b0] sm:$0xf0] }
  0x83   : > { %1492 = vmatpush.bf16.msra.mxu1 %v8458_v31  ;;  %v8017_v31 = vld [vmem:[#allocation4 + $0x8] sm:$0xf]  ;;  %v8354_v26 = vor.u32 %v11390_v11, %v8353_v9  ;;  %v8245_v18 = vld [vmem:[#allocation4 + $0x1d0] sm:$0xf]  ;;  %v11411_v23 = vld [vmem:[#allocation4 + $0x358] sm:$0xf0] }
  0x84   : > { %1510 = vmatpush.bf16.msra.mxu2 %v8078_v32  ;;  %v8126_v32 = vor.u32 %v11333_v21, %v8125_v19  ;;  %v11363_v19 = vld [vmem:[#allocation4 + $0x1d8] sm:$0xf0]  ;;  %v8341_v21 = vld [vmem:[#allocation4 + $0x290] sm:$0xf]  ;;  %v8425_v34 = vld [vmem:[#allocation4 + $0x338] sm:$0xf] }
  0x85   : > { %1528 = vmatpush.bf16.msra.mxu3 %v8174_v36  ;;  %v8293_v36 = vld [vmem:[#allocation4 + $0x230] sm:$0xf]  ;;  %v11408_v35 = vld [vmem:[#allocation4 + $0x340] sm:$0xf0]  ;;  %v11357_v41 = vld [vmem:[#allocation4 + $0x1a8] sm:$0xf0] }
  0x86   : > { %1475 = vmatpush.bf16.msra.mxu0 %v8350_v44  ;;  %v11423_v44 = vld [vmem:[#allocation4 + $0x3b8] sm:$0xf0]  ;;  %v8294_v48 = vor.u32 %v11375_v37, %v8293_v36  ;;  %v8437_v22 = vld [vmem:[#allocation4 + $0x350] sm:$0xf]  ;;  %v8426_v38 = vor.u32 %v11408_v35, %v8425_v34  ;;  %v11354_v51 = vld [vmem:[#allocation4 + $0x190] sm:$0xf0] }
  0x87   : > { %1493 = vmatpush.bf16.msra.mxu1 %v8446_v45  ;;  %v8398_v45 = vor.u32 %v11400_v29, %v8395_v30  ;;  %v8438_v29 = vor.u32 %v11411_v23, %v8437_v22  ;;  %v8233_v30 = vld [vmem:[#allocation4 + $0x1b8] sm:$0xf]  ;;  %v8305_v52 = vld [vmem:[#allocation4 + $0x248] sm:$0xf]  ;;  %s7861_s14 = sshll.u32 %s434_s21, 4  ;;  %s7863_s25 = sshll.u32 %s7859_s23, 4  ;;  %s7862_s14 = int_to_ptr.vmem [resolvable:$true] %s7861_s14  ;;  %s7864_s25 = int_to_ptr.hbm [resolvable:$true] %s7863_s25 }
  0x88   : > { %1511 = vmatpush.bf16.msra.mxu2 %v8066_v46  ;;  %v8018_v46 = vor.u32 %v11306_v33, %v8017_v31  ;;  %v11360_v31 = vld [vmem:[#allocation4 + $0x1c0] sm:$0xf0]  ;;  %s7851_s11 = scalar_lea.sflag [#allocation6], %s433_s17  ;;  %s12478_s27 = scalar_lea.hbm %s13395_s9, 2 }
  0x89   : > { %1529 = vmatpush.bf16.msra.mxu3 %v8162_v50  ;;  %1413 = vmatmul.bf16.gmra.mxu0 %v12806_v27  ;;  %v8486_v50 = vor.u32 %v11423_v44, %v8485_v43  ;;  %v11384_v33 = vld [vmem:[#allocation4 + $0x280] sm:$0xf0]  ;;  %v8234_v36 = vor.u32 %v11360_v31, %v8233_v30  ;;  %v8317_v43 = vld [vmem:[#allocation4 + $0x260] sm:$0xf]  ;;  %v11381_v44 = vld [vmem:[#allocation4 + $0x268] sm:$0xf0] }
  0x8a   : > { %1476 = vmatpush.bf16.msra.mxu0 %v8338_v57  ;;  %1431 = vmatmul.bf16.gmra.mxu1 %v12793_v2  ;;  %v11420_v57 = vld [vmem:[#allocation4 + $0x3a0] sm:$0xf0] }
  0x8b   : > { %1494 = vmatpush.bf16.msra.mxu1 %v8434_v59  ;;  %1449 = vmatmul.bf16.gmra.mxu2 %v12796_v6  ;;  %v8378_v59 = vor.u32 %v11396_v54, %v8377_v53  ;;  %v11378_v53 = vld [vmem:[#allocation4 + $0x250] sm:$0xf0]  ;;  %v8401_v54 = vld [vmem:[#allocation4 + $0x308] sm:$0xf] }
  0x8c   : > { %1512 = vmatpush.bf16.msra.mxu2 %v8054_v60  ;;  %1467 = vmatmul.bf16.gmra.mxu3 %v12766_v56  ;;  %v8474_v60 = vor.u32 %v11420_v57, %v8473_v55  ;;  %v11402_v55 = vld [vmem:[#allocation4 + $0x310] sm:$0xf0] }
  0x8d   : > { %1530 = vmatpush.bf16.msra.mxu3 %v8150_v1  ;;  %v11393_v1 = vld [vmem:[#allocation4 + $0x2c8] sm:$0xf0] }
  0x8e   : > { %1477 = vmatpush.bf16.msra.mxu0 %v8326_v7  ;;  %v8366_v5 = vor.u32 %v11393_v1, %v8365_v0  ;;  %v8462_v7 = vor.u32 %v11417_v4, %v8461_v3 }
  0x8f   : > { %1495 = vmatpush.bf16.msra.mxu1 %v8422_v8  ;;  %v8257_v8 = vld [vmem:[#allocation4 + $0x1e8] sm:$0xf] }
  0x90   : > { %1513 = vmatpush.bf16.msra.mxu2 %v8042_v42  ;;  %v11366_v42 = vld [vmem:[#allocation4 + $0x1f0] sm:$0xf0] }
  0x91   : > { %1531 = vmatpush.bf16.msra.mxu3 %v8138_v16  ;;  %v11414_v16 = vld [vmem:[#allocation4 + $0x370] sm:$0xf0]  ;;  %v8258_v17 = vor.u32 %v11366_v42, %v8257_v8 }
  0x92   : > { %1478 = vmatpush.bf16.msra.mxu0 %v8314_v61  ;;  %v11387_v61 = vld [vmem:[#allocation4 + $0x298] sm:$0xf0] }
  0x93   : > { %1496 = vmatpush.bf16.msra.mxu1 %v8410_v24  ;;  %v8246_v24 = vor.u32 %v11363_v19, %v8245_v18 }
  0x94   : > { %1514 = vmatpush.bf16.msra.mxu2 %v8030_v25  ;;  %v8342_v25 = vor.u32 %v11387_v61, %v8341_v21 }
  0x95   : > { %1532 = vmatpush.bf16.msra.mxu3 %v8126_v32  ;;  %v8329_v32 = vld [vmem:[#allocation4 + $0x278] sm:$0xf] }
  0x96   : > { %1479 = vmatpush.bf16.msra.mxu0 %v8302_v39  ;;  %v8330_v37 = vor.u32 %v11384_v33, %v8329_v32  ;;  %v8221_v39 = vld [vmem:[#allocation4 + $0x1a0] sm:$0xf] }
  0x97   : > { %1497 = vmatpush.bf16.msra.mxu1 %v8398_v45  ;;  %v8413_v45 = vld [vmem:[#allocation4 + $0x320] sm:$0xf] }
  0x98   : > { %1515 = vmatpush.bf16.msra.mxu2 %v8018_v46  ;;  %v11405_v46 = vld [vmem:[#allocation4 + $0x328] sm:$0xf0] }
  0x99   : > { %1533 = vmatpush.bf16.msra.mxu3 %v8114_v47  ;;  %1480 = vmatmul.bf16.vlgmr.msra.gmra.mxu0 %v12787_v28  ;;  %v8222_v47 = vor.u32 %v11357_v41, %v8221_v39 }
  0x9a   : > { %1544 = vmatpush.bf16.msrb.mxu0 %v8294_v48  ;;  %1498 = vmatmul.bf16.vlgmr.msra.gmra.mxu1 %v12809_v10  ;;  %v8318_v48 = vor.u32 %v11381_v44, %v8317_v43 }
  0x9b   : > { %1562 = vmatpush.bf16.msrb.mxu1 %v8390_v49  ;;  %1516 = vmatmul.bf16.vlgmr.msra.gmra.mxu2 %v12738_v20  ;;  %v8450_v20 = vor.u32 %v11414_v16, %v8449_v15  ;;  %v8414_v49 = vor.u32 %v11405_v46, %v8413_v45  ;;  %v12833_v15 = vld [vmem:[#allocation7] sm:$0x7] }
  0x9c   : > { %1580 = vmatpush.bf16.msrb.mxu2 %v8486_v50  ;;  %1534 = vmatmul.bf16.vlgmr.msra.gmra.mxu3 %v12774_v12  ;;  %v8209_v50 = vld [vmem:[#allocation4 + $0x188] sm:$0xf] }
  0x9d   : > { %v8210_v57 = vor.u32 %v11354_v51, %v8209_v50 }
  0x9e   : > { %1545 = vmatpush.bf16.msrb.mxu0 %v8282_v58  ;;  %v8306_v58 = vor.u32 %v11378_v53, %v8305_v52 }
  0x9f   : > { %1563 = vmatpush.bf16.msrb.mxu1 %v8378_v59  ;;  %v8402_v59 = vor.u32 %v11402_v55, %v8401_v54 }
  0xa0   : > { %1581 = vmatpush.bf16.msrb.mxu2 %v8474_v60 }
  0xa2   : > { %1546 = vmatpush.bf16.msrb.mxu0 %v8270_v40 }
  0xa3   : > { %1564 = vmatpush.bf16.msrb.mxu1 %v8366_v5 }
  0xa4   : > { %1582 = vmatpush.bf16.msrb.mxu2 %v8462_v7 }
  0xa6   : > { %1547 = vmatpush.bf16.msrb.mxu0 %v8258_v17 }
  0xa7   : > { %1565 = vmatpush.bf16.msrb.mxu1 %v8354_v26 }
  0xa8   : > { %1583 = vmatpush.bf16.msrb.mxu2 %v8450_v20  ;;  %v12836_v20 = vperm.slane %v12833_v15, 0 }
  0xa9   : > { %1485 = vmatmul.bf16.gmra.mxu0 %v12780_v14 }
  0xaa   : > { %1548 = vmatpush.bf16.msrb.mxu0 %v8246_v24  ;;  %1503 = vmatmul.bf16.gmra.mxu1 %v12806_v27 }
  0xab   : > { %1566 = vmatpush.bf16.msrb.mxu1 %v8342_v25  ;;  %1521 = vmatmul.bf16.gmra.mxu2 %v12793_v2 }
  0xac   : > { %1584 = vmatpush.bf16.msrb.mxu2 %v8438_v29  ;;  %1539 = vmatmul.bf16.gmra.mxu3 %v12796_v6 }
  0xae   : > { %1549 = vmatpush.bf16.msrb.mxu0 %v8234_v36 }
  0xaf   : > { %1567 = vmatpush.bf16.msrb.mxu1 %v8330_v37 }
  0xb0   : > { %1585 = vmatpush.bf16.msrb.mxu2 %v8426_v38 }
  0xb2   : > { %1550 = vmatpush.bf16.msrb.mxu0 %v8222_v47 }
  0xb3   : > { %1568 = vmatpush.bf16.msrb.mxu1 %v8318_v48 }
  0xb4   : > { %1586 = vmatpush.bf16.msrb.mxu2 %v8414_v49 }
  0xb6   : > { %1551 = vmatpush.bf16.msrb.mxu0 %v8210_v57 }
  0xb7   : > { %1569 = vmatpush.bf16.msrb.mxu1 %v8306_v58 }
  0xb8   : > { %1587 = vmatpush.bf16.msrb.mxu2 %v8402_v59 }
  0xb9   : > { %1552 = vmatmul.bf16.vlgmr.msrb.gmra.mxu0 %v12778_v13 }
  0xba   : > { %1570 = vmatmul.bf16.vlgmr.msrb.gmra.mxu1 %v12787_v28 }
  0xbb   : > { %1588 = vmatmul.bf16.vlgmr.msrb.gmra.mxu2 %v12809_v10 }
  0xc9   : > { %1557 = vmatmul.bf16.gmra.mxu0 %v12766_v56 }
  0xca   : > { %1575 = vmatmul.bf16.gmra.mxu1 %v12780_v14 }
  0xcb   : > { %1593 = vmatmul.bf16.gmra.mxu2 %v12806_v27 }
  0xd6   : > { %v1337_v60 = vpop.f32.mrf.mxu0 }
  0xd7   : > { %v1355_v62 = vpop.f32.mrf.mxu1  ;;  %v1338_v21 = vadd.f32 %v1337_v60, %v12836_v20 }
  0xd9   : > { %v1356_v30 = vadd.f32 %v1355_v62, %v1338_v21 }
  0xde   : > { %v1373_v63 = vpop.f32.mrf.mxu2  ;;  %v1339_v0 = vpop.f32.mrf.mxu0 }
  0xdf   : > { %v1391_v1 = vpop.f32.mrf.mxu3  ;;  %v1357_v3 = vpop.f32.mrf.mxu1  ;;  %v1340_v61 = vadd.f32 %v1339_v0, %v12836_v20  ;;  %v1374_v34 = vadd.f32 %v1373_v63, %v1356_v30  ;;  %v8489_v63 = vld [vmem:[%s13388_s2] sm:$0xf]  ;;  %v11424_v0 = vld [vmem:[%s13388_s2] sm:$0x30] }
  0xe1   : > { %v1358_v31 = vadd.f32 %v1357_v3, %v1340_v61  ;;  %v1392_v44 = vadd.f32 %v1391_v1, %v1374_v34  ;;  %v12849_v1 = vperm.slane %v12833_v15, 1  ;;  %v12851_v3 = vor.u32 %v11424_v0, %v8489_v63  ;;  %v11490_v63 = vld [vmem:[#allocation4 + $0x5c0] sm:$0xf0] }
  0xe6   : > { %v1375_v4 = vpop.f32.mrf.mxu2  ;;  %v1342_v40 = vpop.f32.mrf.mxu0 }
  0xe7   : > { %v1393_v5 = vpop.f32.mrf.mxu3  ;;  %v1360_v7 = vpop.f32.mrf.mxu1  ;;  %v1343_v19 = vadd.f32 %v1342_v40, %v12836_v20  ;;  %v1376_v33 = vadd.f32 %v1375_v4, %v1358_v31 }
  0xe9   : > { %v1361_v22 = vadd.f32 %v1360_v7, %v1343_v19  ;;  %v1394_v37 = vadd.f32 %v1393_v5, %v1376_v33 }
  0xee   : > { %v1378_v8 = vpop.f32.mrf.mxu2  ;;  %v1344_v42 = vpop.f32.mrf.mxu0 }
  0xef   : > { %v1396_v9 = vpop.f32.mrf.mxu3  ;;  %v1362_v11 = vpop.f32.mrf.mxu1  ;;  %v1379_v32 = vadd.f32 %v1378_v8, %v1361_v22 }
  0xf1   : > { %v1397_v35 = vadd.f32 %v1396_v9, %v1379_v32 }
  0xf6   : > { %v1380_v16 = vpop.f32.mrf.mxu2  ;;  %v1409_v26 = vpop.f32.mrf.mxu0 }
  0xf7   : > { %v1398_v17 = vpop.f32.mrf.mxu3  ;;  %v1427_v18 = vpop.f32.mrf.mxu1  ;;  %v1410_v47 = vadd.f32 %v1409_v26, %v1392_v44 }
  0xf8   : > { %v1428_v5 = vadd.f32 %v1427_v18, %v12849_v1 }
  0xf9   : > { %v1598_v52 = vmax.f32 %v1410_v47, 0.0  ;;  %v8685_v47 = vld [vmem:[#allocation4 + $0x528] sm:$0xf] }
  0xfe   : > { %v1445_v23 = vpop.f32.mrf.mxu2  ;;  %v1411_v24 = vpop.f32.mrf.mxu0 }
  0xff   : > { %v1463_v25 = vpop.f32.mrf.mxu3  ;;  %v1429_v29 = vpop.f32.mrf.mxu1  ;;  %v1412_v45 = vadd.f32 %v1411_v24, %v1394_v37  ;;  %v1446_v17 = vadd.f32 %v1445_v23, %v1428_v5  ;;  %v8498_v5 = vld [vmem:[%s13388_s2 + $0x8] sm:$0xf] }
 0x100   : > { %v1430_v7 = vadd.f32 %v1429_v29, %v12849_v1 }
 0x101   : > { %v1601_v49 = vmax.f32 %v1412_v45, 0.0  ;;  %v1464_v61 = vadd.f32 %v1463_v25, %v1446_v17  ;;  %v11496_v25 = vld [vmem:[#allocation4 + $0x5f0] sm:$0xf0]  ;;  %v11487_v17 = vld [vmem:[#allocation4 + $0x5a8] sm:$0xf0] }
 0x103   : > { %v1607_v57 = vpack.c.bf16 %v1601_v49, %v1598_v52  ;;  %v11493_v52 = vld [vmem:[#allocation4 + $0x5d8] sm:$0xf0] }
 0x106   : > { %v1447_v36 = vpop.f32.mrf.mxu2  ;;  %v1414_v38 = vpop.f32.mrf.mxu0 }
 0x107   : > { %v1465_v39 = vpop.f32.mrf.mxu3  ;;  %v1415_v41 = vadd.f32 %v1414_v38, %v1397_v35  ;;  %v1432_v43 = vpop.f32.mrf.mxu1  ;;  %v1448_v11 = vadd.f32 %v1447_v36, %v1430_v7  ;;  %v11425_v7 = vld [vmem:[%s13388_s2 + $0x8] sm:$0x30] }
 0x108   : > { %v1433_v4 = vadd.f32 %v1432_v43, %v12849_v1 }
 0x109   : > { %v1604_v46 = vmax.f32 %v1415_v41, 0.0  ;;  %v1466_v26 = vadd.f32 %v1465_v39, %v1448_v11  ;;  %v8781_v41 = vld [vmem:[#allocation4 + $0x5e8] sm:$0xf]  ;;  %v11466_v11 = vld [vmem:[#allocation4 + $0x500] sm:$0xf0] }
 0x10b   : > { %v1610_v48 = vpack.c.bf16 %v1604_v46, %v1604_v46  ;;  %v8782_v46 = vor.u32 %v11496_v25, %v8781_v41  ;;  %v8721_v25 = vld [vmem:[#allocation4 + $0x570] sm:$0xf] }
 0x10d   : > { %v1626_v51 = vsel %vm1624_vm4, %v1610_v48, 0  ;;  %v11472_v48 = vld [vmem:[#allocation4 + $0x530] sm:$0xf0] }
 0x10e   : > { %v1450_v50 = vpop.f32.mrf.mxu2  ;;  %v1416_v53 = vpop.f32.mrf.mxu0  ;;  %1640 = vmatpush.bf16.msrb.mxu3 %v1626_v51  ;;  %1693 = vmatpush.bf16.msra.mxu1 %v1626_v51  ;;  %v8769_v51 = vld [vmem:[#allocation4 + $0x5d0] sm:$0xf] }
 0x10f   : > { %v1468_v54 = vpop.f32.mrf.mxu3  ;;  %v1434_v55 = vpop.f32.mrf.mxu1  ;;  %v1451_v16 = vadd.f32 %v1450_v50, %v1433_v4  ;;  %v8686_v50 = vor.u32 %v11472_v48, %v8685_v47  ;;  %v8625_v47 = vld [vmem:[#allocation4 + $0x4b0] sm:$0xf]  ;;  %v11457_v48 = vld [vmem:[#allocation4 + $0x4b8] sm:$0xf0] }
 0x110   : > { %v8673_v55 = vld [vmem:[#allocation4 + $0x510] sm:$0xf] }
 0x111   : > { %v1469_v19 = vadd.f32 %v1468_v54, %v1451_v16  ;;  %v8770_v54 = vor.u32 %v11493_v52, %v8769_v51  ;;  %v8745_v16 = vld [vmem:[#allocation4 + $0x5a0] sm:$0xf]  ;;  %v8626_v51 = vor.u32 %v11457_v48, %v8625_v47  ;;  %v11478_v52 = vld [vmem:[#allocation4 + $0x560] sm:$0xf0]  ;;  %v11444_v48 = vld [vmem:[#allocation4 + $0x454] sm:$0xf] }
 0x112   : > { %1641 = vmatpush.bf16.msrb.mxu3 %v1607_v57  ;;  %1694 = vmatpush.bf16.msra.mxu1 %v1607_v57  ;;  %v11469_v57 = vld [vmem:[#allocation4 + $0x518] sm:$0xf0] }
 0x115   : > { %8491 = vmatmul.msk.bf16.vlgmr.msrb.gmra.mxu3 %vm1620_vm5, %v12851_v3 }
 0x116   : > { %v1452_v58 = vpop.f32.mrf.mxu2  ;;  %v1481_v60 = vpop.f32.mrf.mxu0  ;;  %2554 = vmatpush.bf16.msrb.mxu1 %v8686_v50 }
 0x117   : > { %v1470_v59 = vpop.f32.mrf.mxu3  ;;  %v1499_v62 = vpop.f32.mrf.mxu1  ;;  %v1482_v32 = vadd.f32 %v1481_v60, %v1464_v61  ;;  %v8674_v60 = vor.u32 %v11469_v57, %v8673_v55  ;;  %v8746_v61 = vor.u32 %v11487_v17, %v8745_v16  ;;  %v11471_v16 = vld [vmem:[#allocation4 + $0x52c] sm:$0xf] }
 0x119   : > { %v1500_v35 = vadd.f32 %v1499_v62, %v1482_v32  ;;  %v8757_v62 = vld [vmem:[#allocation4 + $0x5b8] sm:$0xf]  ;;  %v8733_v32 = vld [vmem:[#allocation4 + $0x588] sm:$0xf] }
 0x11a   : > { %2555 = vmatpush.bf16.msrb.mxu1 %v8674_v60  ;;  %v8758_v4 = vor.u32 %v11490_v63, %v8757_v62  ;;  %v11454_v60 = vld [vmem:[#allocation4 + $0x4a0] sm:$0xf0] }
 0x11b   : > { %v1599_v45 = vmax.f32 %v1500_v35, 0.0 }
 0x11e   : > { %v12856_v40 = vpop.f32.mrf.mxu2  ;;  %v1483_v8 = vpop.f32.mrf.mxu0 }
 0x11f   : > { %v12860_v42 = vpop.f32.mrf.mxu3  ;;  %v1501_v9 = vpop.f32.mrf.mxu1  ;;  %v1484_v22 = vadd.f32 %v1483_v8, %v1466_v26  ;;  %v8661_v8 = vld [vmem:[#allocation4 + $0x4f8] sm:$0xf] }
 0x120   : > { %v8662_v26 = vor.u32 %v11466_v11, %v8661_v8  ;;  %v8601_v11 = vld [vmem:[#allocation4 + $0x480] sm:$0xf] }
 0x121   : > { %v1502_v33 = vadd.f32 %v1501_v9, %v1484_v22  ;;  %v12883_v9 = vor.u32 %v11425_v7, %v8498_v5  ;;  %v8649_v22 = vld [vmem:[#allocation4 + $0x4e0] sm:$0xf] }
 0x122   : > { %2556 = vmatpush.bf16.msrb.mxu1 %v8662_v26 }
 0x123   : > { %v1602_v23 = vmax.f32 %v1502_v33, 0.0  ;;  %8500 = vmatmul.msk.bf16.vlgmr.msra.gmra.mxu1 %vm1620_vm5, %v12883_v9 }
 0x125   : > { %v1608_v49 = vpack.c.bf16 %v1602_v23, %v1599_v45  ;;  %v11460_v23 = vld [vmem:[#allocation4 + $0x4d0] sm:$0xf0] }
 0x126   : > { %v12862_v21 = vpop.f32.mrf.mxu2  ;;  %v1486_v24 = vpop.f32.mrf.mxu0 }
 0x127   : > { %v12864_v30 = vpop.f32.mrf.mxu3  ;;  %v1487_v31 = vadd.f32 %v1486_v24, %v1469_v19  ;;  %v1504_v18 = vpop.f32.mrf.mxu1  ;;  %v11463_v24 = vld [vmem:[#allocation4 + $0x4e8] sm:$0xf0] }
 0x129   : > { %v1505_v29 = vadd.f32 %v1504_v18, %v1487_v31  ;;  %v8650_v18 = vor.u32 %v11463_v24, %v8649_v22  ;;  %v8687_v24 = vld [vmem:[#allocation4 + $0x534] sm:$0xf0] }
 0x12b   : > { %v1605_v34 = vmax.f32 %v1505_v29, 0.0  ;;  %v11484_v29 = vld [vmem:[#allocation4 + $0x590] sm:$0xf0]  ;;  %2557 = vmatpush.bf16.msrb.mxu1 %v8650_v18  ;;  %v8690_v18 = vor.u32 %v11471_v16, %v8687_v24 }
 0x12c   : > { %v8734_v35 = vor.u32 %v11484_v29, %v8733_v32 }
 0x12d   : > { %v1611_v37 = vpack.c.bf16 %v1605_v34, %v1605_v34  ;;  %v12892_v34 = vperm.slane %v12833_v15, 2 }
 0x12e   : > { %v12866_v36 = vpop.f32.mrf.mxu2  ;;  %v1488_v38 = vpop.f32.mrf.mxu0 }
 0x12f   : > { %v12868_v39 = vpop.f32.mrf.mxu3  ;;  %v1506_v43 = vpop.f32.mrf.mxu1  ;;  %v1629_v44 = vsel %vm1624_vm4, %v1611_v37, 0  ;;  %v8637_v37 = vld [vmem:[#allocation4 + $0x4c8] sm:$0xf]  ;;  %v1523_v38 = vadd.f32 %v12866_v36, %v12892_v34  ;;  %v1518_v45 = vadd.f32 %v12856_v40, %v12892_v34  ;;  %v8709_v36 = vld [vmem:[#allocation4 + $0x558] sm:$0xf] }
 0x130   : > { %1654 = vmatpush.bf16.msra.mxu3 %v1629_v44  ;;  %1707 = vmatpush.bf16.msra.mxu2 %v1629_v44  ;;  %v8638_v41 = vor.u32 %v11460_v23, %v8637_v37  ;;  %v11481_v43 = vld [vmem:[#allocation4 + $0x578] sm:$0xf0]  ;;  %v1520_v44 = vadd.f32 %v12862_v21, %v12892_v34  ;;  %v8710_v40 = vor.u32 %v11478_v52, %v8709_v36  ;;  %v11468_v37 = vld [vmem:[#allocation4 + $0x514] sm:$0xf]  ;;  %v8577_v52 = vld [vmem:[#allocation4 + $0x450] sm:$0xf] }
 0x131   : > { %v8722_v15 = vor.u32 %v11481_v43, %v8721_v25  ;;  %v1536_v21 = vadd.f32 %v12860_v42, %v1518_v45  ;;  %v11451_v42 = vld [vmem:[#allocation4 + $0x488] sm:$0xf0]  ;;  %v8675_v25 = vld [vmem:[#allocation4 + $0x51c] sm:$0xf0]  ;;  %v11520_v45 = vld [vmem:[#allocation4 + $0x6b0] sm:$0xf0] }
 0x132   : > { %2558 = vmatpush.bf16.msrb.mxu1 %v8638_v41  ;;  %v8602_v22 = vor.u32 %v11451_v42, %v8601_v11  ;;  %v11448_v41 = vld [vmem:[#allocation4 + $0x470] sm:$0xf0]  ;;  %v11514_v11 = vld [vmem:[#allocation4 + $0x680] sm:$0xf0] }
 0x134   : > { %1655 = vmatpush.bf16.msra.mxu3 %v1608_v49  ;;  %1708 = vmatpush.bf16.msra.mxu2 %v1608_v49  ;;  %v1541_v49 = vadd.f32 %v12868_v39, %v1523_v38  ;;  %v8697_v39 = vld [vmem:[#allocation4 + $0x540] sm:$0xf]  ;;  %v8589_v38 = vld [vmem:[#allocation4 + $0x468] sm:$0xf] }
 0x136   : > { %v1524_v53 = vpop.f32.mrf.mxu2  ;;  %v12871_v58 = vpop.f32.mrf.mxu0  ;;  %2559 = vmatpush.bf16.msrb.mxu1 %v8626_v51  ;;  %v8590_v51 = vor.u32 %v11448_v41, %v8589_v38  ;;  %v11456_v38 = vld [vmem:[#allocation4 + $0x4b4] sm:$0xf]  ;;  %v8627_v41 = vld [vmem:[#allocation4 + $0x4bc] sm:$0xf0] }
 0x137   : > { %v1542_v59 = vpop.f32.mrf.mxu3  ;;  %v12873_v0 = vpop.f32.mrf.mxu1  ;;  %8492 = vmatmul.msk.bf16.vlgmr.msra.gmra.mxu3 %vm1620_vm5, %v12851_v3  ;;  %8501 = vmatmul.msk.bf16.vlgmr.msra.gmra.mxu2 %vm1620_vm5, %v12883_v9  ;;  %v1538_v53 = vadd.f32 %v12864_v30, %v1520_v44  ;;  %v1554_v62 = vadd.f32 %v12871_v58, %v1536_v21  ;;  %v8877_v44 = vld [vmem:[#allocation4 + $0x6a8] sm:$0xf]  ;;  %v11445_v21 = vld [vmem:[#allocation4 + $0x458] sm:$0xf0] }
 0x138   : > { %2572 = vmatpush.bf16.msrb.mxu2 %v8782_v46  ;;  %v8613_v59 = vld [vmem:[#allocation4 + $0x498] sm:$0xf]  ;;  %v8878_v36 = vor.u32 %v11520_v45, %v8877_v44  ;;  %v11436_v44 = vld [vmem:[#allocation4 + $0x410] sm:$0xf0]  ;;  %v8829_v45 = vld [vmem:[#allocation4 + $0x648] sm:$0xf] }
 0x139   : > { %v8614_v63 = vor.u32 %v11454_v60, %v8613_v59  ;;  %v1572_v17 = vadd.f32 %v12873_v0, %v1554_v62  ;;  %v11441_v60 = vld [vmem:[#allocation4 + $0x43c] sm:$0xf]  ;;  %v8567_v62 = vld [vmem:[#allocation4 + $0x444] sm:$0xf0] }
 0x13a   : > { %v8570_v42 = vor.u32 %v11441_v60, %v8567_v62  ;;  %v11450_v60 = vld [vmem:[#allocation4 + $0x484] sm:$0xf] }
 0x13b   : > { %2560 = vmatpush.bf16.msrb.mxu1 %v8614_v63  ;;  %v11462_v63 = vld [vmem:[#allocation4 + $0x4e4] sm:$0xf] }
 0x13c   : > { %2573 = vmatpush.bf16.msrb.mxu2 %v8770_v54 }
 0x13e   : > { %v12889_v19 = vpop.f32.mrf.mxu2  ;;  %v1555_v31 = vpop.f32.mrf.mxu0 }
 0x13f   : > { %v1573_v33 = vpop.f32.mrf.mxu1  ;;  %v1556_v57 = vadd.f32 %v1555_v31, %v1538_v53  ;;  %v1590_v32 = vadd.f32 %v12889_v19, %v1572_v17  ;;  %2561 = vmatpush.bf16.msrb.mxu1 %v8602_v22  ;;  %v8663_v53 = vld [vmem:[#allocation4 + $0x504] sm:$0xf0]  ;;  %v11438_v17 = vld [vmem:[#allocation4 + $0x424] sm:$0xf]  ;;  %v8639_v22 = vld [vmem:[#allocation4 + $0x4d4] sm:$0xf0] }
 0x140   : > { %2574 = vmatpush.bf16.msrb.mxu2 %v8758_v4  ;;  %v11475_v4 = vld [vmem:[#allocation4 + $0x548] sm:$0xf0] }
 0x141   : > { %v1574_v7 = vadd.f32 %v1573_v33, %v1556_v57  ;;  %v8698_v30 = vor.u32 %v11475_v4, %v8697_v39  ;;  %v11447_v33 = vld [vmem:[#allocation4 + $0x46c] sm:$0xf]  ;;  %v11517_v57 = vld [vmem:[#allocation4 + $0x698] sm:$0xf0]  ;;  %v8578_v39 = vor.u32 %v11445_v21, %v8577_v52  ;;  %v8529_v52 = vld [vmem:[#allocation4 + $0x3f0] sm:$0xf] }
 0x142   : > { %2562 = vmatmul.bf16.vlgmr.msrb.gmra.mxu1 %v12774_v12  ;;  %v11505_v21 = vld [vmem:[#allocation4 + $0x638] sm:$0xf0] }
 0x144   : > { %2575 = vmatpush.bf16.msrb.mxu2 %v8746_v61 }
 0x146   : > { %v1591_v46 = vpop.f32.mrf.mxu2  ;;  %v1558_v50 = vpop.f32.mrf.mxu0 }
 0x147   : > { %v1576_v54 = vpop.f32.mrf.mxu1  ;;  %v1559_v55 = vadd.f32 %v1558_v50, %v1541_v49  ;;  %v1592_v31 = vadd.f32 %v1591_v46, %v1574_v7  ;;  %v8678_v46 = vor.u32 %v11468_v37, %v8675_v25  ;;  %v8579_v49 = vld [vmem:[#allocation4 + $0x45c] sm:$0xf0]  ;;  %v11465_v50 = vld [vmem:[#allocation4 + $0x4fc] sm:$0xf]  ;;  %v11442_v7 = vld [vmem:[#allocation4 + $0x440] sm:$0xf0] }
 0x148   : > { %2576 = vmatpush.bf16.msrb.mxu2 %v8734_v35  ;;  %v8591_v35 = vld [vmem:[#allocation4 + $0x474] sm:$0xf0]  ;;  %v8666_v59 = vor.u32 %v11465_v50, %v8663_v53  ;;  %v11435_v37 = vld [vmem:[#allocation4 + $0x40c] sm:$0xf]  ;;  %v8615_v50 = vld [vmem:[#allocation4 + $0x4a4] sm:$0xf0] }
 0x149   : > { %v1577_v5 = vadd.f32 %v1576_v54, %v1559_v55  ;;  %v8594_v0 = vor.u32 %v11447_v33, %v8591_v35  ;;  %v1603_v43 = vmax.f32 %v1592_v31, 0.0  ;;  %v8865_v55 = vld [vmem:[#allocation4 + $0x690] sm:$0xf]  ;;  %v11433_v53 = vld [vmem:[#allocation4 + $0x3f8] sm:$0xf0] }
 0x14a   : > { %v8866_v4 = vor.u32 %v11517_v57, %v8865_v55  ;;  %v8530_v62 = vor.u32 %v11433_v53, %v8529_v52  ;;  %v8573_v52 = vld [vmem:[#allocation4 + $0x440] sm:$0xf]  ;;  %v11443_v53 = vld [vmem:[#allocation4 + $0x448] sm:$0xf0] }
 0x14b   : > { %2626 = vmatpush.bf16.msra.mxu1 %v8594_v0 }
 0x14c   : > { %2577 = vmatpush.bf16.msrb.mxu2 %v8722_v15  ;;  %v1600_v15 = vmax.f32 %v1590_v32, 0.0  ;;  %v8841_v32 = vld [vmem:[#allocation4 + $0x660] sm:$0xf] }
 0x14e   : > { %v1594_v8 = vpop.f32.mrf.mxu2  ;;  %v1560_v61 = vpop.f32.mrf.mxu0  ;;  %v1609_v54 = vpack.c.bf16 %v1603_v43, %v1600_v15  ;;  %v8541_v43 = vld [vmem:[#allocation4 + $0x408] sm:$0xf] }
 0x14f   : > { %v1595_v26 = vadd.f32 %v1594_v8, %v1577_v5  ;;  %v1578_v58 = vpop.f32.mrf.mxu1  ;;  %v8565_v5 = vld [vmem:[#allocation4 + $0x438] sm:$0xf]  ;;  %v8651_v8 = vld [vmem:[#allocation4 + $0x4ec] sm:$0xf0]  ;;  %v11459_v61 = vld [vmem:[#allocation4 + $0x4cc] sm:$0xf] }
 0x150   : > { %2578 = vmatpush.bf16.msrb.mxu2 %v8710_v40  ;;  %v8582_v40 = vor.u32 %v11444_v48, %v8579_v49  ;;  %v8654_v16 = vor.u32 %v11462_v63, %v8651_v8  ;;  %v8566_v24 = vor.u32 %v11442_v7, %v8565_v5  ;;  %v8553_v58 = vld [vmem:[#allocation4 + $0x420] sm:$0xf]  ;;  %v8642_v35 = vor.u32 %v11459_v61, %v8639_v22  ;;  %v11453_v49 = vld [vmem:[#allocation4 + $0x49c] sm:$0xf]  ;;  %v8603_v5 = vld [vmem:[#allocation4 + $0x48c] sm:$0xf0] }
 0x151   : > { %v1606_v29 = vmax.f32 %v1595_v26, 0.0  ;;  %v8555_v26 = vld [vmem:[#allocation4 + $0x42c] sm:$0xf0]  ;;  %v8531_v48 = vld [vmem:[#allocation4 + $0x3fc] sm:$0xf0]  ;;  %v8618_v57 = vor.u32 %v11453_v49, %v8615_v50 }
 0x152   : > { %2627 = vmatpush.bf16.msra.mxu1 %v8582_v40  ;;  %v8558_v33 = vor.u32 %v11438_v17, %v8555_v26  ;;  %v11429_v40 = vld [vmem:[#allocation4 + $0x3dc] sm:$0xf]  ;;  %v8805_v7 = vld [vmem:[#allocation4 + $0x618] sm:$0xf]  ;;  %v11502_v8 = vld [vmem:[#allocation4 + $0x620] sm:$0xf0] }
 0x153   : > { %v1612_v23 = vpack.c.bf16 %v1606_v29, %v1606_v29  ;;  %v11511_v29 = vld [vmem:[#allocation4 + $0x668] sm:$0xf0]  ;;  %2567 = vmatmul.bf16.gmra.mxu1 %v12796_v6  ;;  %v8597_v17 = vld [vmem:[#allocation4 + $0x470] sm:$0xf]  ;;  %v11449_v26 = vld [vmem:[#allocation4 + $0x478] sm:$0xf0] }
 0x154   : > { %2579 = vmatpush.bf16.msrb.mxu2 %v8698_v30  ;;  %v8853_v30 = vld [vmem:[#allocation4 + $0x678] sm:$0xf]  ;;  %v8842_v25 = vor.u32 %v11511_v29, %v8841_v32  ;;  %v8505_v61 = vld [vmem:[#allocation4 + $0x3c0] sm:$0xf]  ;;  %v11427_v22 = vld [vmem:[#allocation4 + $0x3c8] sm:$0xf0] }
 0x155   : > { %v1632_v47 = vsel %vm1624_vm4, %v1612_v23, 0  ;;  %v8854_v31 = vor.u32 %v11514_v11, %v8853_v30  ;;  %v8543_v23 = vld [vmem:[#allocation4 + $0x414] sm:$0xf0]  ;;  %v8606_v11 = vor.u32 %v11450_v60, %v8603_v5  ;;  %v11499_v32 = vld [vmem:[#allocation4 + $0x608] sm:$0xf0] }
 0x156   : > { %v1596_v19 = vpop.f32.mrf.mxu2  ;;  %1668 = vmatpush.bf16.msra.mxu0 %v1632_v47  ;;  %1721 = vmatpush.bf16.msrb.mxu3 %v1632_v47  ;;  %v8546_v15 = vor.u32 %v11435_v37, %v8543_v23  ;;  %v8630_v47 = vor.u32 %v11456_v38, %v8627_v41  ;;  %v8973_v29 = vld [vmem:[#allocation4 + $0x768] sm:$0xf]  ;;  %v8783_v37 = vld [vmem:[#allocation4 + $0x5f4] sm:$0xf0]  ;;  %v11543_v38 = vld [vmem:[#allocation4 + $0x76c] sm:$0xf] }
 0x157   : > { %2580 = vmatmul.bf16.vlgmr.msrb.gmra.mxu2 %v12778_v13  ;;  %2628 = vmatpush.bf16.msra.mxu1 %v8570_v42  ;;  %v11432_v19 = vld [vmem:[#allocation4 + $0x3f4] sm:$0xf]  ;;  %v11426_v42 = vld [vmem:[#allocation4 + $0x3c4] sm:$0xf]  ;;  %v8975_v41 = vld [vmem:[#allocation4 + $0x774] sm:$0xf0] }
 0x158   : > { %2644 = vmatpush.bf16.msra.mxu2 %v8690_v18  ;;  %v11439_v18 = vld [vmem:[#allocation4 + $0x428] sm:$0xf0]  ;;  %v8534_v55 = vor.u32 %v11432_v19, %v8531_v48  ;;  %v11492_v49 = vld [vmem:[#allocation4 + $0x5d4] sm:$0xf]  ;;  %v8771_v50 = vld [vmem:[#allocation4 + $0x5dc] sm:$0xf0] }
 0x159   : > { %v8554_v0 = vor.u32 %v11439_v18, %v8553_v58  ;;  %v8806_v18 = vor.u32 %v11502_v8, %v8805_v7  ;;  %v11489_v60 = vld [vmem:[#allocation4 + $0x5bc] sm:$0xf]  ;;  %v8561_v5 = vld [vmem:[#allocation4 + $0x428] sm:$0xf]  ;;  %v8937_v7 = vld [vmem:[#allocation4 + $0x720] sm:$0xf] }
 0x15a   : > { %1669 = vmatpush.bf16.msra.mxu0 %v1609_v54  ;;  %1722 = vmatpush.bf16.msrb.mxu3 %v1609_v54  ;;  %v8817_v54 = vld [vmem:[#allocation4 + $0x630] sm:$0xf]  ;;  %v11535_v8 = vld [vmem:[#allocation4 + $0x728] sm:$0xf0] }
 0x15b   : > { %2629 = vmatpush.bf16.msra.mxu1 %v8558_v33  ;;  %v8818_v63 = vor.u32 %v11505_v21, %v8817_v54  ;;  %v11544_v33 = vld [vmem:[#allocation4 + $0x770] sm:$0xf0]  ;;  %v8574_v21 = vor.u32 %v11443_v53, %v8573_v52  ;;  %v8723_v52 = vld [vmem:[#allocation4 + $0x57c] sm:$0xf0] }
 0x15c   : > { %2645 = vmatpush.bf16.msra.mxu2 %v8678_v46  ;;  %v11508_v46 = vld [vmem:[#allocation4 + $0x650] sm:$0xf0]  ;;  %v8974_v19 = vor.u32 %v11544_v33, %v8973_v29  ;;  %v11531_v33 = vld [vmem:[#allocation4 + $0x70c] sm:$0xf] }
 0x15d   : > { %8502 = vmatmul.msk.bf16.vlgmr.msrb.gmra.mxu3 %vm1620_vm5, %v12883_v9  ;;  %8493 = vmatmul.msk.bf16.vlgmr.msra.gmra.mxu0 %vm1620_vm5, %v12851_v3 }
 0x15e   : > { %2536 = vmatpush.bf16.msrb.mxu0 %v8590_v51  ;;  %2590 = vmatpush.bf16.msra.mxu3 %v8878_v36  ;;  %v8542_v51 = vor.u32 %v11436_v44, %v8541_v43  ;;  %v8830_v36 = vor.u32 %v11508_v46, %v8829_v45  ;;  %v8978_v43 = vor.u32 %v11543_v38, %v8975_v41  ;;  %v8537_v38 = vld [vmem:[#allocation4 + $0x3f8] sm:$0xf]  ;;  %v11434_v41 = vld [vmem:[#allocation4 + $0x400] sm:$0xf0] }
 0x15f   : > { %2630 = vmatpush.bf16.msra.mxu1 %v8546_v15  ;;  %v8506_v45 = vor.u32 %v11427_v22, %v8505_v61  ;;  %v8961_v15 = vld [vmem:[#allocation4 + $0x750] sm:$0xf]  ;;  %v11534_v22 = vld [vmem:[#allocation4 + $0x724] sm:$0xf] }
 0x160   : > { %2646 = vmatpush.bf16.msra.mxu2 %v8666_v59  ;;  %v8519_v59 = vld [vmem:[#allocation4 + $0x3e4] sm:$0xf0] }
 0x161   : > { %v8522_v30 = vor.u32 %v11429_v40, %v8519_v59  ;;  %v8949_v40 = vld [vmem:[#allocation4 + $0x738] sm:$0xf]  ;;  %v11538_v59 = vld [vmem:[#allocation4 + $0x740] sm:$0xf0] }
 0x162   : > { %2537 = vmatpush.bf16.msrb.mxu0 %v8578_v39  ;;  %2591 = vmatpush.bf16.msra.mxu3 %v8866_v4  ;;  %v8517_v39 = vld [vmem:[#allocation4 + $0x3d8] sm:$0xf]  ;;  %v11430_v4 = vld [vmem:[#allocation4 + $0x3e0] sm:$0xf0] }
 0x163   : > { %2631 = vmatpush.bf16.msra.mxu1 %v8534_v55  ;;  %v8518_v58 = vor.u32 %v11430_v4, %v8517_v39  ;;  %v11537_v39 = vld [vmem:[#allocation4 + $0x73c] sm:$0xf]  ;;  %v8951_v4 = vld [vmem:[#allocation4 + $0x744] sm:$0xf0] }
 0x164   : > { %2647 = vmatpush.bf16.msra.mxu2 %v8654_v16  ;;  %v8507_v16 = vld [vmem:[#allocation4 + $0x3cc] sm:$0xf0] }
 0x165   : > { %v8510_v23 = vor.u32 %v11426_v42, %v8507_v16  ;;  %v8950_v42 = vor.u32 %v11538_v59, %v8949_v40  ;;  %v11526_v40 = vld [vmem:[#allocation4 + $0x6e0] sm:$0xf0]  ;;  %v11477_v59 = vld [vmem:[#allocation4 + $0x55c] sm:$0xf] }
 0x166   : > { %2538 = vmatpush.bf16.msrb.mxu0 %v8566_v24  ;;  %2592 = vmatpush.bf16.msra.mxu3 %v8854_v31  ;;  %v8793_v24 = vld [vmem:[#allocation4 + $0x600] sm:$0xf]  ;;  %v8598_v31 = vor.u32 %v11449_v26, %v8597_v17  ;;  %v11486_v17 = vld [vmem:[#allocation4 + $0x5a4] sm:$0xf]  ;;  %v8747_v26 = vld [vmem:[#allocation4 + $0x5ac] sm:$0xf0] }
 0x167   : > { %2585 = vmatmul.bf16.gmra.mxu2 %v12766_v56  ;;  %2632 = vmatpush.bf16.msra.mxu1 %v8522_v30  ;;  %v8794_v46 = vor.u32 %v11499_v32, %v8793_v24  ;;  %v8954_v30 = vor.u32 %v11537_v39, %v8951_v4  ;;  %v8939_v24 = vld [vmem:[#allocation4 + $0x72c] sm:$0xf0]  ;;  %v8903_v39 = vld [vmem:[#allocation4 + $0x6e4] sm:$0xf0] }
 0x168   : > { %2648 = vmatpush.bf16.msra.mxu2 %v8642_v35  ;;  %v11495_v35 = vld [vmem:[#allocation4 + $0x5ec] sm:$0xf]  ;;  %v8942_v32 = vor.u32 %v11534_v22, %v8939_v24  ;;  %v8513_v4 = vld [vmem:[#allocation4 + $0x3c8] sm:$0xf]  ;;  %v11522_v22 = vld [vmem:[#allocation4 + $0x6c4] sm:$0xf] }
 0x169   : > { %v8786_v48 = vor.u32 %v11495_v35, %v8783_v37  ;;  %v8938_v35 = vor.u32 %v11535_v8, %v8937_v7  ;;  %v8750_v37 = vor.u32 %v11486_v17, %v8747_v26  ;;  %v11523_v7 = vld [vmem:[#allocation4 + $0x6c8] sm:$0xf0]  ;;  %v11474_v8 = vld [vmem:[#allocation4 + $0x544] sm:$0xf]  ;;  %v8699_v17 = vld [vmem:[#allocation4 + $0x54c] sm:$0xf0] }
 0x16a   : > { %2539 = vmatpush.bf16.msrb.mxu0 %v8554_v0  ;;  %2593 = vmatpush.bf16.msra.mxu3 %v8842_v25  ;;  %v8585_v0 = vld [vmem:[#allocation4 + $0x458] sm:$0xf]  ;;  %v11446_v25 = vld [vmem:[#allocation4 + $0x460] sm:$0xf0]  ;;  %v11519_v26 = vld [vmem:[#allocation4 + $0x6ac] sm:$0xf] }
 0x16b   : > { %v8586_v44 = vor.u32 %v11446_v25, %v8585_v0  ;;  %2633 = vmatpush.bf16.msra.mxu1 %v8510_v23  ;;  %v8927_v23 = vld [vmem:[#allocation4 + $0x714] sm:$0xf0]  ;;  %v11532_v0 = vld [vmem:[#allocation4 + $0x710] sm:$0xf0]  ;;  %v11483_v25 = vld [vmem:[#allocation4 + $0x58c] sm:$0xf] }
 0x16c   : > { %2649 = vmatpush.bf16.msra.mxu2 %v8630_v47  ;;  %v11541_v47 = vld [vmem:[#allocation4 + $0x758] sm:$0xf0]  ;;  %v8891_v24 = vld [vmem:[#allocation4 + $0x6cc] sm:$0xf0] }
 0x16d   : > { %v8962_v55 = vor.u32 %v11541_v47, %v8961_v15  ;;  %v11528_v15 = vld [vmem:[#allocation4 + $0x6f4] sm:$0xf] }
 0x16e   : > { %2540 = vmatpush.bf16.msrb.mxu0 %v8542_v51  ;;  %2594 = vmatpush.bf16.msra.mxu3 %v8830_v36  ;;  %v11540_v51 = vld [vmem:[#allocation4 + $0x754] sm:$0xf]  ;;  %v8963_v36 = vld [vmem:[#allocation4 + $0x75c] sm:$0xf0] }
 0x16f   : > { %2698 = vmatpush.bf16.msrb.mxu1 %v8978_v43  ;;  %v8966_v54 = vor.u32 %v11540_v51, %v8963_v36  ;;  %v8735_v43 = vld [vmem:[#allocation4 + $0x594] sm:$0xf0]  ;;  %v11529_v51 = vld [vmem:[#allocation4 + $0x6f8] sm:$0xf0]  ;;  %v11480_v36 = vld [vmem:[#allocation4 + $0x574] sm:$0xf] }
 0x170   : > { %2650 = vmatpush.bf16.msra.mxu2 %v8618_v57  ;;  %v8774_v57 = vor.u32 %v11492_v49, %v8771_v50  ;;  %v8525_v49 = vld [vmem:[#allocation4 + $0x3e0] sm:$0xf]  ;;  %v11431_v50 = vld [vmem:[#allocation4 + $0x3e8] sm:$0xf0] }
 0x172   : > { %2541 = vmatpush.bf16.msrb.mxu0 %v8530_v62  ;;  %2595 = vmatpush.bf16.msra.mxu3 %v8818_v63  ;;  %v8759_v62 = vld [vmem:[#allocation4 + $0x5c4] sm:$0xf0]  ;;  %v12917_v63 = vld [vmem:[%s12727_s18] sm:$0xff]   ;;  %s12472_s18 = sshra.s32 %s7864_s25, 4  ;;  %s12473_s18 = int_to_ptr.hbm [resolvable:$true] %s12472_s18 }
 0x173   : > { %2634 = vmatmul.bf16.vlgmr.msra.gmra.mxu1 %v12917_v63  ;;  %v8762_v16 = vor.u32 %v11489_v60, %v8759_v62  ;;  %v8711_v60 = vld [vmem:[#allocation4 + $0x564] sm:$0xf0]  ;;  %v11525_v62 = vld [vmem:[#allocation4 + $0x6dc] sm:$0xf]  ;;  %s12474_s5 = scalar_lea.hbm %s12473_s18, 1  ;;  %p12479_p3 = scmp.lt.s32.totalorder %s12473_s18, %s13395_s9 }
 0x174   : > { %2651 = vmatpush.bf16.msra.mxu2 %v8606_v11  ;;  %2699 = vmatpush.bf16.msrb.mxu1 %v8966_v54  ;;  %v11440_v11 = vld [vmem:[#allocation4 + $0x430] sm:$0xf0]  ;;  %v8526_v54 = vor.u32 %v11431_v50, %v8525_v49  ;;  %v8957_v49 = vld [vmem:[#allocation4 + $0x740] sm:$0xf]  ;;  %v11539_v50 = vld [vmem:[#allocation4 + $0x748] sm:$0xf0]  ;;  %p12475_p0 = scmp.ne.s32.totalorder %s12473_s18, %s12474_s5  ;;  %p12480_p4 = scmp.lt.s32.totalorder %s12478_s27, %s12474_s5 }
 0x175   : > { %v8562_v61 = vor.u32 %v11440_v11, %v8561_v5  ;;  %v8889_v5 = vld [vmem:[#allocation4 + $0x6c0] sm:$0xf]  ;;  %v11428_v11 = vld [vmem:[#allocation4 + $0x3d0] sm:$0xf0] }
 0x176   : > { %2542 = vmatpush.bf16.msrb.mxu0 %v8518_v58  ;;  %2596 = vmatpush.bf16.msra.mxu3 %v8806_v18  ;;  %v11437_v58 = vld [vmem:[#allocation4 + $0x418] sm:$0xf0]  ;;  %v8925_v18 = vld [vmem:[#allocation4 + $0x708] sm:$0xf]  ;;  %p12476_p1 = pnand %p12475_p0, %p12641_p5  ;;  %p12481_p7 = por %p12480_p4, %p12479_p3 }
 0x177   : > { %2652 = vmatmul.bf16.vlgmr.msra.gmra.mxu2 %v12774_v12  ;;  %v8926_v47 = vor.u32 %v11532_v0, %v8925_v18  ;;  %v8879_v18 = vld [vmem:[#allocation4 + $0x6b4] sm:$0xf0] }
 0x178   : > { %2716 = vmatpush.bf16.msrb.mxu2 %v8598_v31  ;;  %v8549_v31 = vld [vmem:[#allocation4 + $0x410] sm:$0xf]  ;;  %2700 = vmatpush.bf16.msrb.mxu1 %v8954_v30  ;;  %v8906_v30 = vor.u32 %v11525_v62, %v8903_v39  ;;  %v8969_v0 = vld [vmem:[#allocation4 + $0x758] sm:$0xf]  ;;  %p12477_p2 = pneg %p12476_p1 }
 0x179   : > { %v8550_v29 = vor.u32 %v11437_v58, %v8549_v31  ;;  %v8981_v31 = vld [vmem:[#allocation4 + $0x770] sm:$0xf]  ;;  %v11545_v58 = vld [vmem:[#allocation4 + $0x778] sm:$0xf0] }
 0x17a   : > { %2543 = vmatpush.bf16.msrb.mxu0 %v8506_v45  ;;  %2597 = vmatpush.bf16.msra.mxu3 %v8794_v46  ;;  %v8930_v45 = vor.u32 %v11531_v33, %v8927_v23  ;;  %v8538_v46 = vor.u32 %v11434_v41, %v8537_v38  ;;  %v8982_v33 = vor.u32 %v11545_v58, %v8981_v31  ;;  %v11521_v23 = vld [vmem:[#allocation4 + $0x6b8] sm:$0xf0]  ;;  %v11512_v31 = vld [vmem:[#allocation4 + $0x670] sm:$0xf0]  ;;  %p12482_p8 = pnand %p12481_p7, %p12477_p2 }
 0x17b   : > { %v8890_v38 = vor.u32 %v11523_v7, %v8889_v5  ;;  %v8702_v41 = vor.u32 %v11474_v8, %v8699_v17  ;;  %v8657_v5 = vld [vmem:[#allocation4 + $0x4e8] sm:$0xf]  ;;  %v11464_v7 = vld [vmem:[#allocation4 + $0x4f0] sm:$0xf0]  ;;  %v8861_v8 = vld [vmem:[#allocation4 + $0x680] sm:$0xf] }
 0x17c   : > { %2717 = vmatpush.bf16.msrb.mxu2 %v8586_v44  ;;  %v8913_v44 = vld [vmem:[#allocation4 + $0x6f0] sm:$0xf]  ;;  %2701 = vmatpush.bf16.msrb.mxu1 %v8942_v32  ;;  %v11533_v58 = vld [vmem:[#allocation4 + $0x718] sm:$0xf0] }
 0x17d   : > { %2544 = vmatmul.bf16.vlgmr.msrb.gmra.mxu0 %v12917_v63  ;;  %2598 = vmatmul.bf16.vlgmr.msra.gmra.mxu3 %v12787_v28  ;;  %v8693_v32 = vld [vmem:[#allocation4 + $0x530] sm:$0xf] }
 0x17e   : > { %2608 = vmatpush.bf16.msra.mxu0 %v8974_v19  ;;  %2662 = vmatpush.bf16.msrb.mxu3 %v8786_v48  ;;  %v8738_v19 = vor.u32 %v11483_v25, %v8735_v43  ;;  %v8915_v48 = vld [vmem:[#allocation4 + $0x6fc] sm:$0xf0]  ;;  %v11542_v25 = vld [vmem:[#allocation4 + $0x760] sm:$0xf0]  ;;  %v8882_v43 = vor.u32 %v11519_v26, %v8879_v18  ;;  %v8933_v26 = vld [vmem:[#allocation4 + $0x710] sm:$0xf] }
 0x17f   : > { %v8918_v53 = vor.u32 %v11528_v15, %v8915_v48  ;;  %v8681_v15 = vld [vmem:[#allocation4 + $0x518] sm:$0xf]  ;;  %v8970_v48 = vor.u32 %v11542_v25, %v8969_v0  ;;  %v11504_v0 = vld [vmem:[#allocation4 + $0x634] sm:$0xf]  ;;  %v8837_v25 = vld [vmem:[#allocation4 + $0x650] sm:$0xf] }
 0x180   : > { %2718 = vmatpush.bf16.msrb.mxu2 %v8574_v21  ;;  %2702 = vmatpush.bf16.msrb.mxu1 %v8930_v45  ;;  %v8914_v21 = vor.u32 %v11529_v51, %v8913_v44  ;;  %v11516_v45 = vld [vmem:[#allocation4 + $0x694] sm:$0xf]  ;;  %v8831_v18 = vld [vmem:[#allocation4 + $0x654] sm:$0xf0] }
 0x182   : > { %2609 = vmatpush.bf16.msra.mxu0 %v8962_v55  ;;  %2663 = vmatpush.bf16.msrb.mxu3 %v8774_v57  ;;  %v8726_v55 = vor.u32 %v11480_v36, %v8723_v52  ;;  %v8901_v57 = vld [vmem:[#allocation4 + $0x6d8] sm:$0xf]  ;;  %v11513_v52 = vld [vmem:[#allocation4 + $0x67c] sm:$0xf] }
 0x183   : > { %2639 = vmatmul.bf16.gmra.mxu1 %v12793_v2 }
 0x184   : > { %2719 = vmatpush.bf16.msrb.mxu2 %v8562_v61  ;;  %2703 = vmatpush.bf16.msrb.mxu1 %v8918_v53  ;;  %v8514_v61 = vor.u32 %v11428_v11, %v8513_v4  ;;  %v8873_v53 = vld [vmem:[#allocation4 + $0x698] sm:$0xf]  ;;  %v8843_v4 = vld [vmem:[#allocation4 + $0x66c] sm:$0xf0]  ;;  %v8945_v11 = vld [vmem:[#allocation4 + $0x728] sm:$0xf] }
 0x186   : > { %2610 = vmatpush.bf16.msra.mxu0 %v8950_v42  ;;  %2664 = vmatpush.bf16.msrb.mxu3 %v8762_v16  ;;  %v8902_v42 = vor.u32 %v11526_v40, %v8901_v57  ;;  %v8714_v16 = vor.u32 %v11477_v59, %v8711_v60  ;;  %v11467_v57 = vld [vmem:[#allocation4 + $0x508] sm:$0xf0]  ;;  %v8958_v40 = vor.u32 %v11539_v50, %v8957_v49  ;;  %v11510_v59 = vld [vmem:[#allocation4 + $0x664] sm:$0xf] }
 0x187   : > { %2657 = vmatmul.bf16.gmra.mxu2 %v12796_v6 }
 0x188   : > { %2720 = vmatpush.bf16.msrb.mxu2 %v8550_v29  ;;  %v11473_v29 = vld [vmem:[#allocation4 + $0x538] sm:$0xf0]  ;;  %2704 = vmatpush.bf16.msrb.mxu1 %v8906_v30  ;;  %v11515_v30 = vld [vmem:[#allocation4 + $0x688] sm:$0xf0] }
 0x189   : > { %v8694_v44 = vor.u32 %v11473_v29, %v8693_v32  ;;  %v8645_v32 = vld [vmem:[#allocation4 + $0x4d0] sm:$0xf]  ;;  %v11461_v29 = vld [vmem:[#allocation4 + $0x4d8] sm:$0xf0] }
 0x18a   : > { %2611 = vmatpush.bf16.msra.mxu0 %v8938_v35  ;;  %2665 = vmatpush.bf16.msrb.mxu3 %v8750_v37  ;;  %v8894_v35 = vor.u32 %v11522_v22, %v8891_v24  ;;  %v8885_v37 = vld [vmem:[#allocation4 + $0x6b0] sm:$0xf]  ;;  %v8658_v22 = vor.u32 %v11464_v7, %v8657_v5  ;;  %v8849_v24 = vld [vmem:[#allocation4 + $0x668] sm:$0xf]  ;;  %v8813_v5 = vld [vmem:[#allocation4 + $0x620] sm:$0xf] }
 0x18b   : > { %v11503_v7 = vld [vmem:[#allocation4 + $0x628] sm:$0xf0] }
 0x18c   : > { %2721 = vmatpush.bf16.msrb.mxu2 %v8538_v46  ;;  %v8867_v46 = vld [vmem:[#allocation4 + $0x69c] sm:$0xf0]  ;;  %2705 = vmatpush.bf16.msrb.mxu1 %v8894_v35  ;;  %v8850_v35 = vor.u32 %v11512_v31, %v8849_v24  ;;  %v8777_v31 = vld [vmem:[#allocation4 + $0x5d8] sm:$0xf] }
 0x18d   : > { %2549 = vmatmul.bf16.gmra.mxu0 %v12793_v2  ;;  %2603 = vmatmul.bf16.gmra.mxu3 %v12780_v14  ;;  %v8870_v51 = vor.u32 %v11516_v45, %v8867_v46  ;;  %v8633_v45 = vld [vmem:[#allocation4 + $0x4b8] sm:$0xf]  ;;  %v11458_v46 = vld [vmem:[#allocation4 + $0x4c0] sm:$0xf0] }
 0x18e   : > { %2612 = vmatpush.bf16.msra.mxu0 %v8926_v47  ;;  %2666 = vmatpush.bf16.msrb.mxu3 %v8738_v19  ;;  %v11470_v47 = vld [vmem:[#allocation4 + $0x520] sm:$0xf0]  ;;  %v8886_v19 = vor.u32 %v11521_v23, %v8885_v37  ;;  %v8921_v37 = vld [vmem:[#allocation4 + $0x6f8] sm:$0xf]  ;;  %v8634_v50 = vor.u32 %v11458_v46, %v8633_v45 }
 0x18f   : > { %v8682_v36 = vor.u32 %v11470_v47, %v8681_v15  ;;  %v11530_v23 = vld [vmem:[#allocation4 + $0x700] sm:$0xf0]  ;;  %v8729_v45 = vld [vmem:[#allocation4 + $0x578] sm:$0xf] }
 0x190   : > { %2722 = vmatpush.bf16.msrb.mxu2 %v8526_v54  ;;  %v11518_v54 = vld [vmem:[#allocation4 + $0x6a0] sm:$0xf0]  ;;  %2770 = vmatpush.bf16.msra.mxu1 %v8886_v19  ;;  %v8922_v15 = vor.u32 %v11530_v23, %v8921_v37  ;;  %v8909_v19 = vld [vmem:[#allocation4 + $0x6e0] sm:$0xf]  ;;  %v8753_v23 = vld [vmem:[#allocation4 + $0x5a8] sm:$0xf] }
 0x191   : > { %v8874_v60 = vor.u32 %v11518_v54, %v8873_v53  ;;  %v8807_v53 = vld [vmem:[#allocation4 + $0x624] sm:$0xf0]  ;;  %v8621_v54 = vld [vmem:[#allocation4 + $0x4a0] sm:$0xf]  ;;  %v11482_v46 = vld [vmem:[#allocation4 + $0x580] sm:$0xf0] }
 0x192   : > { %2613 = vmatpush.bf16.msra.mxu0 %v8914_v21  ;;  %2667 = vmatpush.bf16.msrb.mxu3 %v8726_v55  ;;  %v8855_v21 = vld [vmem:[#allocation4 + $0x684] sm:$0xf0]  ;;  %v8669_v55 = vld [vmem:[#allocation4 + $0x500] sm:$0xf] }
 0x193   : > { %v8858_v62 = vor.u32 %v11513_v52, %v8855_v21  ;;  %v8670_v39 = vor.u32 %v11467_v57, %v8669_v55  ;;  %2706 = vmatmul.bf16.vlgmr.msrb.gmra.mxu1 %v12809_v10  ;;  %v11506_v52 = vld [vmem:[#allocation4 + $0x640] sm:$0xf0]  ;;  %v11455_v21 = vld [vmem:[#allocation4 + $0x4a8] sm:$0xf0] }
 0x194   : > { %2723 = vmatpush.bf16.msrb.mxu2 %v8514_v61  ;;  %2771 = vmatpush.bf16.msra.mxu1 %v8874_v60  ;;  %v8846_v61 = vor.u32 %v11510_v59, %v8843_v4  ;;  %v11498_v57 = vld [vmem:[#allocation4 + $0x604] sm:$0xf]  ;;  %v8622_v60 = vor.u32 %v11455_v21, %v8621_v54  ;;  %v11452_v4 = vld [vmem:[#allocation4 + $0x490] sm:$0xf0] }
 0x196   : > { %2614 = vmatpush.bf16.msra.mxu0 %v8902_v42  ;;  %2668 = vmatpush.bf16.msrb.mxu3 %v8714_v16  ;;  %v11507_v42 = vld [vmem:[#allocation4 + $0x64c] sm:$0xf]  ;;  %v8862_v16 = vor.u32 %v11515_v30, %v8861_v8  ;;  %v8897_v8 = vld [vmem:[#allocation4 + $0x6c8] sm:$0xf]  ;;  %v11497_v30 = vld [vmem:[#allocation4 + $0x5f8] sm:$0xf0] }
 0x197   : > { %2724 = vmatmul.bf16.vlgmr.msrb.gmra.mxu2 %v12917_v63  ;;  %v11536_v63 = vld [vmem:[#allocation4 + $0x730] sm:$0xf0] }
 0x198   : > { %2788 = vmatpush.bf16.msra.mxu2 %v8982_v33  ;;  %v8946_v17 = vor.u32 %v11536_v63, %v8945_v11  ;;  %v8934_v33 = vor.u32 %v11533_v58, %v8933_v26  ;;  %2772 = vmatpush.bf16.msra.mxu1 %v8862_v16  ;;  %v11524_v11 = vld [vmem:[#allocation4 + $0x6d0] sm:$0xf0]  ;;  %v8814_v63 = vor.u32 %v11503_v7, %v8813_v5  ;;  %v12934_v26 = vpop.f32.mrf.mxu3  ;;  %v11494_v58 = vld [vmem:[#allocation4 + $0x5e0] sm:$0xf0] }
 0x19a   : > { %2615 = vmatpush.bf16.msra.mxu0 %v8890_v38  ;;  %2669 = vmatpush.bf16.msrb.mxu3 %v8702_v41  ;;  %v8834_v38 = vor.u32 %v11507_v42, %v8831_v18  ;;  %v8646_v41 = vor.u32 %v11461_v29, %v8645_v32  ;;  %v8898_v42 = vor.u32 %v11524_v11, %v8897_v8  ;;  %v8765_v29 = vld [vmem:[#allocation4 + $0x5c0] sm:$0xf] }
 0x19b   : > { %v8778_v32 = vor.u32 %v11494_v58, %v8777_v31 }
 0x19c   : > { %2789 = vmatpush.bf16.msra.mxu2 %v8970_v48  ;;  %2773 = vmatpush.bf16.msra.mxu1 %v8850_v35  ;;  %v11527_v48 = vld [vmem:[#allocation4 + $0x6e8] sm:$0xf0] }
 0x19d   : > { %2616 = vmatmul.bf16.vlgmr.msra.gmra.mxu0 %v12809_v10  ;;  %2670 = vmatmul.bf16.vlgmr.msrb.gmra.mxu3 %v12778_v13  ;;  %v8910_v55 = vor.u32 %v11527_v48, %v8909_v19  ;;  %v8730_v19 = vor.u32 %v11482_v46, %v8729_v45  ;;  %v8717_v48 = vld [vmem:[#allocation4 + $0x560] sm:$0xf] }
 0x19e   : > { %2680 = vmatpush.bf16.msrb.mxu0 %v8882_v43  ;;  %2734 = vmatpush.bf16.msra.mxu3 %v8694_v44  ;;  %v11509_v43 = vld [vmem:[#allocation4 + $0x658] sm:$0xf0]  ;;  %v8819_v44 = vld [vmem:[#allocation4 + $0x63c] sm:$0xf0] }
 0x19f   : > { %v8838_v47 = vor.u32 %v11509_v43, %v8837_v25  ;;  %v8822_v49 = vor.u32 %v11504_v0, %v8819_v44  ;;  %v8741_v43 = vld [vmem:[#allocation4 + $0x590] sm:$0xf] }
 0x1a0   : > { %2790 = vmatpush.bf16.msra.mxu2 %v8958_v40  ;;  %v12937_v37 = vpop.f32.mrf.mxu3 }
 0x1a1   : > { %2774 = vmatpush.bf16.msra.mxu1 %v8838_v47 }
 0x1a2   : > { %2681 = vmatpush.bf16.msrb.mxu0 %v8870_v51  ;;  %2735 = vmatpush.bf16.msra.mxu3 %v8682_v36  ;;  %v11501_v51 = vld [vmem:[#allocation4 + $0x61c] sm:$0xf]  ;;  %v8825_v36 = vld [vmem:[#allocation4 + $0x638] sm:$0xf] }
 0x1a3   : > { %v8826_v40 = vor.u32 %v11506_v52, %v8825_v36  ;;  %v8810_v59 = vor.u32 %v11501_v51, %v8807_v53  ;;  %2711 = vmatmul.bf16.gmra.mxu1 %v12806_v27  ;;  %v11476_v51 = vld [vmem:[#allocation4 + $0x550] sm:$0xf0] }
 0x1a4   : > { %2791 = vmatpush.bf16.msra.mxu2 %v8946_v17 }
 0x1a5   : > { %2775 = vmatpush.bf16.msra.mxu1 %v8826_v40 }
 0x1a6   : > { %2682 = vmatpush.bf16.msrb.mxu0 %v8858_v62  ;;  %2736 = vmatpush.bf16.msra.mxu3 %v8670_v39  ;;  %v8795_v62 = vld [vmem:[#allocation4 + $0x60c] sm:$0xf0]  ;;  %v8609_v39 = vld [vmem:[#allocation4 + $0x488] sm:$0xf] }
 0x1a7   : > { %2729 = vmatmul.bf16.gmra.mxu2 %v12793_v2  ;;  %v8789_v2 = vld [vmem:[#allocation4 + $0x5f0] sm:$0xf]  ;;  %v8798_v16 = vor.u32 %v11498_v57, %v8795_v62  ;;  %v8610_v17 = vor.u32 %v11452_v4, %v8609_v39 }
 0x1a8   : > { %2792 = vmatpush.bf16.msra.mxu2 %v8934_v33  ;;  %v8790_v24 = vor.u32 %v11497_v30, %v8789_v2  ;;  %v11491_v33 = vld [vmem:[#allocation4 + $0x5c8] sm:$0xf0] }
 0x1a9   : > { %2776 = vmatpush.bf16.msra.mxu1 %v8814_v63  ;;  %v8766_v35 = vor.u32 %v11491_v33, %v8765_v29 }
 0x1aa   : > { %2683 = vmatpush.bf16.msrb.mxu0 %v8846_v61  ;;  %2737 = vmatpush.bf16.msra.mxu3 %v8658_v22  ;;  %v8801_v61 = vld [vmem:[#allocation4 + $0x608] sm:$0xf]  ;;  %v11500_v22 = vld [vmem:[#allocation4 + $0x610] sm:$0xf0] }
 0x1ab   : > { %v8802_v18 = vor.u32 %v11500_v22, %v8801_v61 }
 0x1ac   : > { %2793 = vmatpush.bf16.msra.mxu2 %v8922_v15 }
 0x1ad   : > { %2621 = vmatmul.bf16.gmra.mxu0 %v12806_v27  ;;  %2675 = vmatmul.bf16.gmra.mxu3 %v12766_v56 }
 0x1ae   : > { %2684 = vmatpush.bf16.msrb.mxu0 %v8834_v38  ;;  %2738 = vmatpush.bf16.msra.mxu3 %v8646_v41  ;;  %v11488_v38 = vld [vmem:[#allocation4 + $0x5b0] sm:$0xf0]  ;;  %v12941_v41 = vpop.f32.mrf.mxu1 }
 0x1af   : > { %2777 = vmatpush.bf16.msra.mxu1 %v8802_v18  ;;  %v8754_v0 = vor.u32 %v11488_v38, %v8753_v23  ;;  %v1729_v25 = vmax.f32 %v12934_v26, %v12941_v41  ;;  %v9559_v26 = vld [vmem:[#allocation9 + $0x470] sm:$0xf] }
 0x1b0   : > { %2794 = vmatpush.bf16.msra.mxu2 %v8910_v55  ;;  %v9399_v41 = vld [vmem:[#allocation9 + $0x330] sm:$0xf] }
 0x1b2   : > { %2685 = vmatpush.bf16.msrb.mxu0 %v8822_v49  ;;  %2739 = vmatpush.bf16.msra.mxu3 %v8634_v50  ;;  %v8705_v50 = vld [vmem:[#allocation4 + $0x548] sm:$0xf] }
 0x1b3   : > { %2778 = vmatmul.bf16.vlgmr.msra.gmra.mxu1 %v12787_v28  ;;  %v8706_v52 = vor.u32 %v11476_v51, %v8705_v50 }
 0x1b4   : > { %2795 = vmatpush.bf16.msra.mxu2 %v8898_v42 }
 0x1b6   : > { %2686 = vmatpush.bf16.msrb.mxu0 %v8810_v59  ;;  %2740 = vmatpush.bf16.msra.mxu3 %v8622_v60  ;;  %v12955_v36 = vpop.f32.mrf.mxu1 }
 0x1b7   : > { %2796 = vmatmul.bf16.vlgmr.msra.gmra.mxu2 %v12809_v10  ;;  %v11485_v10 = vld [vmem:[#allocation4 + $0x598] sm:$0xf0] }
 0x1b8   : > { %v8742_v44 = vor.u32 %v11485_v10, %v8741_v43 }
 0x1ba   : > { %2687 = vmatpush.bf16.msrb.mxu0 %v8798_v16  ;;  %2741 = vmatpush.bf16.msra.mxu3 %v8610_v17  ;;  %v12946_v15 = vpop.f32.mrf.mxu3  ;;  %v12948_v47 = vpop.f32.mrf.mxu2 }
 0x1bd   : > { %2688 = vmatmul.bf16.vlgmr.msrb.gmra.mxu0 %v12787_v28  ;;  %2742 = vmatmul.bf16.vlgmr.msra.gmra.mxu3 %v12774_v12  ;;  %v1730_v12 = vmax.f32 %v12946_v15, %v12948_v47  ;;  %v11479_v28 = vld [vmem:[#allocation4 + $0x568] sm:$0xf0]  ;;  %v11705_v15 = vld [vmem:[#allocation9 + $0x4f4] sm:$0xf0] }
 0x1be   : > { %2752 = vmatpush.bf16.msra.mxu0 %v8790_v24  ;;  %v8718_v49 = vor.u32 %v11479_v28, %v8717_v48 }
 0x1bf   : > { %v2563_v54 = vpop.f32.mrf.mxu1 }
 0x1c2   : > { %2753 = vmatpush.bf16.msra.mxu0 %v8778_v32  ;;  %v12958_v53 = vpop.f32.mrf.mxu2  ;;  %v12960_v21 = vpop.f32.mrf.mxu3 }
 0x1c3   : > { %2783 = vmatmul.bf16.gmra.mxu1 %v12780_v14 }
 0x1c6   : > { %2754 = vmatpush.bf16.msra.mxu0 %v8766_v35 }
 0x1c7   : > { %2801 = vmatmul.bf16.gmra.mxu2 %v12806_v27  ;;  %v2565_v55 = vpop.f32.mrf.mxu1 }
 0x1ca   : > { %2755 = vmatpush.bf16.msra.mxu0 %v8754_v0 }
 0x1cd   : > { %2693 = vmatmul.bf16.gmra.mxu0 %v12780_v14  ;;  %2747 = vmatmul.bf16.gmra.mxu3 %v12796_v6 }
 0x1ce   : > { %2756 = vmatpush.bf16.msra.mxu0 %v8742_v44 }
 0x1d0   : > { %v2568_v60 = vpop.f32.mrf.mxu1 }
 0x1d2   : > { %2757 = vmatpush.bf16.msra.mxu0 %v8730_v19 }
 0x1d6   : > { %2758 = vmatpush.bf16.msra.mxu0 %v8718_v49 }
 0x1d8   : > { %v2570_v62 = vpop.f32.mrf.mxu1 }
 0x1da   : > { %2759 = vmatpush.bf16.msra.mxu0 %v8706_v52  ;;  %v2581_v27 = vpop.f32.mrf.mxu2  ;;  %v12963_v57 = vpop.f32.mrf.mxu0 }
 0x1dd   : > { %2760 = vmatmul.bf16.vlgmr.msra.gmra.mxu0 %v12778_v13 }
 0x1e0   : > { %v12965_v40 = vpop.f32.mrf.mxu3 }
 0x1e1   : > { %v1731_v59 = vmax.f32 %v12963_v57, %v12965_v40 }
 0x1e2   : > { %v2583_v6 = vpop.f32.mrf.mxu2  ;;  %v12970_v39 = vpop.f32.mrf.mxu0 }
 0x1e8   : > { %v12972_v5 = vpop.f32.mrf.mxu3 }
 0x1ea   : > { %v2586_v14 = vpop.f32.mrf.mxu2 }
 0x1ed   : > { %2765 = vmatmul.bf16.gmra.mxu0 %v12766_v56 }
 0x1f0   : > { %v2635_v13 = vpop.f32.mrf.mxu1 }
 0x1f1   : > { %v2636_v8 = vadd.f32 %v2635_v13, %v12849_v1 }
 0x1f2   : > { %v2588_v4 = vpop.f32.mrf.mxu2 }
 0x1f8   : > { %v2637_v17 = vpop.f32.mrf.mxu1 }
 0x1fa   : > { %v2545_v7 = vpop.f32.mrf.mxu0  ;;  %v2653_v30 = vpop.f32.mrf.mxu2 }
 0x1fb   : > { %v2546_v2 = vadd.f32 %v2545_v7, %v12836_v20  ;;  %v12976_v11 = vadd.f32 %v2653_v30, %v2636_v8 }
 0x1fd   : > { %v2564_v63 = vadd.f32 %v2563_v54, %v2546_v2 }
 0x1ff   : > { %v2582_v42 = vadd.f32 %v2581_v27, %v2564_v63 }
 0x200   : > { %v2599_v16 = vpop.f32.mrf.mxu3  ;;  %v2640_v24 = vpop.f32.mrf.mxu1 }
 0x201   : > { %v2600_v13 = vadd.f32 %v2599_v16, %v2582_v42 }
 0x202   : > { %v2547_v56 = vpop.f32.mrf.mxu0  ;;  %v2655_v61 = vpop.f32.mrf.mxu2 }
 0x203   : > { %v2548_v10 = vadd.f32 %v2547_v56, %v12836_v20 }
 0x205   : > { %v2566_v46 = vadd.f32 %v2565_v55, %v2548_v10 }
 0x207   : > { %v2584_v50 = vadd.f32 %v2583_v6, %v2566_v46 }
 0x208   : > { %v2601_v22 = vpop.f32.mrf.mxu3  ;;  %v2642_v32 = vpop.f32.mrf.mxu1 }
 0x209   : > { %v2602_v54 = vadd.f32 %v2601_v22, %v2584_v50 }
 0x20a   : > { %v2550_v31 = vpop.f32.mrf.mxu0  ;;  %v2658_v58 = vpop.f32.mrf.mxu2 }
 0x20b   : > { %v2551_v43 = vadd.f32 %v2550_v31, %v12836_v20 }
 0x20d   : > { %v2569_v45 = vadd.f32 %v2568_v60, %v2551_v43 }
 0x20f   : > { %v2587_v49 = vadd.f32 %v2586_v14, %v2569_v45 }
 0x210   : > { %v2604_v18 = vpop.f32.mrf.mxu3  ;;  %v12978_v38 = vpop.f32.mrf.mxu1 }
 0x211   : > { %v2605_v52 = vadd.f32 %v2604_v18, %v2587_v49 }
 0x212   : > { %v2552_v29 = vpop.f32.mrf.mxu0  ;;  %v2660_v33 = vpop.f32.mrf.mxu2 }
 0x213   : > { %v2641_v33 = vadd.f32 %v2640_v24, %v12849_v1 }
 0x215   : > { %v2659_v45 = vadd.f32 %v2658_v58, %v2641_v33 }
 0x218   : > { %v2606_v35 = vpop.f32.mrf.mxu3  ;;  %v2709_v48 = vpop.f32.mrf.mxu1 }
 0x219   : > { %v2638_v35 = vadd.f32 %v2637_v17, %v12849_v1 }
 0x21a   : > { %v2617_v23 = vpop.f32.mrf.mxu0  ;;  %v12980_v0 = vpop.f32.mrf.mxu2 }
 0x21b   : > { %v2618_v2 = vadd.f32 %v2617_v23, %v2600_v13  ;;  %v2656_v46 = vadd.f32 %v2655_v61, %v2638_v35 }
 0x21d   : > { %v2806_v56 = vmax.f32 %v2618_v2, 0.0 }
 0x220   : > { %v2671_v44 = vpop.f32.mrf.mxu3  ;;  %v2712_v4 = vpop.f32.mrf.mxu1 }
 0x222   : > { %v2619_v19 = vpop.f32.mrf.mxu0  ;;  %v12984_v28 = vpop.f32.mrf.mxu2 }
 0x223   : > { %v2620_v7 = vadd.f32 %v2619_v19, %v2602_v54 }
 0x225   : > { %v2809_v55 = vmax.f32 %v2620_v7, 0.0 }
 0x227   : > { %v2815_v22 = vpack.c.bf16 %v2809_v55, %v2806_v56 }
 0x228   : > { %v2673_v51 = vpop.f32.mrf.mxu3  ;;  %v2714_v6 = vpop.f32.mrf.mxu1 }
 0x229   : > { %v2674_v19 = vadd.f32 %v2673_v51, %v2656_v46 }
 0x22a   : > { %v2622_v27 = vpop.f32.mrf.mxu0  ;;  %v12986_v8 = vpop.f32.mrf.mxu2 }
 0x22b   : > { %v2623_v62 = vadd.f32 %v2622_v27, %v2605_v52  ;;  %v2672_v52 = vadd.f32 %v2671_v44, %v12976_v11  ;;  %v2731_v6 = vadd.f32 %v12986_v8, %v12892_v34 }
 0x22d   : > { %v2812_v20 = vmax.f32 %v2623_v62, 0.0 }
 0x22f   : > { %v2818_v60 = vpack.c.bf16 %v2812_v20, %v2812_v20 }
 0x230   : > { %v2676_v30 = vpop.f32.mrf.mxu3  ;;  %v2779_v18 = vpop.f32.mrf.mxu1 }
 0x231   : > { %v2822_v63 = vsel %vm1624_vm4, %v2818_v60, 0  ;;  %v2677_v50 = vadd.f32 %v2676_v30, %v2659_v45 }
 0x232   : > { %v2624_v14 = vpop.f32.mrf.mxu0  ;;  %2836 = vmatpush.bf16.msrb.mxu3 %v2822_v63  ;;  %2884 = vmatpush.bf16.msrb.mxu1 %v2822_v63  ;;  %v2732_v31 = vpop.f32.mrf.mxu2 }
 0x233   : > { %v2728_v14 = vadd.f32 %v12984_v28, %v12892_v34 }
 0x236   : > { %2837 = vmatpush.bf16.msrb.mxu3 %v2815_v22  ;;  %2885 = vmatpush.bf16.msrb.mxu1 %v2815_v22 }
 0x238   : > { %v2678_v42 = vpop.f32.mrf.mxu3  ;;  %v2781_v43 = vpop.f32.mrf.mxu1 }
 0x239   : > { %8983 = vmatmul.msk.bf16.vlgmr.msrb.gmra.mxu3 %vm1620_vm5, %v12851_v3  ;;  %8986 = vmatmul.msk.bf16.vlgmr.msrb.gmra.mxu1 %vm1620_vm5, %v12883_v9 }
 0x23a   : > { %v2689_v16 = vpop.f32.mrf.mxu0  ;;  %v2797_v32 = vpop.f32.mrf.mxu2 }
 0x23b   : > { %v2690_v7 = vadd.f32 %v2689_v16, %v2672_v52 }
 0x23d   : > { %v2708_v1 = vadd.f32 %v12978_v38, %v2690_v7  ;;  %v9047_v7 = vld [vmem:[#allocation9 + $0x70] sm:$0xf] }
 0x23f   : > { %v2807_v63 = vmax.f32 %v2708_v1, 0.0 }
 0x240   : > { %v2743_v29 = vpop.f32.mrf.mxu3  ;;  %v2784_v13 = vpop.f32.mrf.mxu1 }
 0x242   : > { %v2691_v23 = vpop.f32.mrf.mxu0  ;;  %v2799_v10 = vpop.f32.mrf.mxu2 }
 0x243   : > { %v2692_v54 = vadd.f32 %v2691_v23, %v2674_v19 }
 0x245   : > { %v2710_v24 = vadd.f32 %v2709_v48, %v2692_v54  ;;  %v2726_v48 = vadd.f32 %v12980_v0, %v12892_v34 }
 0x247   : > { %v2810_v58 = vmax.f32 %v2710_v24, 0.0  ;;  %v2744_v31 = vadd.f32 %v2743_v29, %v2726_v48  ;;  %v9039_v24 = vld [vmem:[#allocation9 + $0x60] sm:$0xf] }
 0x248   : > { %v2745_v49 = vpop.f32.mrf.mxu3  ;;  %v2786_v30 = vpop.f32.mrf.mxu1 }
 0x249   : > { %v2816_v44 = vpack.c.bf16 %v2810_v58, %v2807_v63  ;;  %v2746_v22 = vadd.f32 %v2745_v49, %v2728_v14  ;;  %v11609_v63 = vld [vmem:[#allocation9 + $0x1f4] sm:$0xf0]  ;;  %v9231_v14 = vld [vmem:[#allocation9 + $0x1e0] sm:$0xf] }
 0x24a   : > { %v2694_v27 = vpop.f32.mrf.mxu0  ;;  %v2802_v20 = vpop.f32.mrf.mxu2 }
 0x24b   : > { %v2695_v62 = vadd.f32 %v2694_v27, %v2677_v50 }
 0x24d   : > { %v2713_v2 = vadd.f32 %v2712_v4, %v2695_v62 }
 0x24f   : > { %v2813_v60 = vmax.f32 %v2713_v2, 0.0  ;;  %v11561_v2 = vld [vmem:[#allocation9 + $0x74] sm:$0xf0] }
 0x250   : > { %v2748_v17 = vpop.f32.mrf.mxu3  ;;  %v9048_v29 = vor.u32 %v11561_v2, %v9047_v7  ;;  %v9175_v2 = vld [vmem:[#allocation9 + $0x170] sm:$0xf] }
 0x251   : > { %v2819_v55 = vpack.c.bf16 %v2813_v60, %v2813_v60  ;;  %v2749_v16 = vadd.f32 %v2748_v17, %v2731_v6  ;;  %v11555_v60 = vld [vmem:[#allocation9 + $0x44] sm:$0xf0]  ;;  %v9015_v17 = vld [vmem:[#allocation9 + $0x30] sm:$0xf] }
 0x252   : > { %v2696_v61 = vpop.f32.mrf.mxu0  ;;  %v2804_v11 = vpop.f32.mrf.mxu2  ;;  %v11607_v6 = vld [vmem:[#allocation9 + $0x1e4] sm:$0xf0] }
 0x253   : > { %v2825_v51 = vsel %vm1624_vm4, %v2819_v55, 0  ;;  %v11553_v55 = vld [vmem:[#allocation9 + $0x34] sm:$0xf0]  ;;  %v9007_v61 = vld [vmem:[#allocation9 + $0x20] sm:$0xf] }
 0x254   : > { %2850 = vmatpush.bf16.msra.mxu3 %v2825_v51  ;;  %2898 = vmatpush.bf16.msrb.mxu2 %v2825_v51  ;;  %v9016_v58 = vor.u32 %v11553_v55, %v9015_v17  ;;  %v11551_v51 = vld [vmem:[#allocation9 + $0x24] sm:$0xf0]  ;;  %v9287_v55 = vld [vmem:[#allocation9 + $0x250] sm:$0xf] }
 0x255   : > { %v9008_v30 = vor.u32 %v11551_v51, %v9007_v61  ;;  %v9079_v51 = vld [vmem:[#allocation9 + $0xb0] sm:$0xf] }
 0x258   : > { %2851 = vmatpush.bf16.msra.mxu3 %v2816_v44  ;;  %2899 = vmatpush.bf16.msrb.mxu2 %v2816_v44  ;;  %v2750_v56 = vpop.f32.mrf.mxu3  ;;  %v11549_v44 = vld [vmem:[#allocation9 + $0x14] sm:$0xf0] }
 0x259   : > { %v9111_v56 = vld [vmem:[#allocation9 + $0xf0] sm:$0xf] }
 0x25a   : > { %v2761_v4 = vpop.f32.mrf.mxu0 }
 0x25b   : > { %8984 = vmatmul.msk.bf16.vlgmr.msra.gmra.mxu3 %vm1620_vm5, %v12851_v3  ;;  %8987 = vmatmul.msk.bf16.vlgmr.msrb.gmra.mxu2 %vm1620_vm5, %v12883_v9  ;;  %v2762_v33 = vadd.f32 %v2761_v4, %v2744_v31  ;;  %v11577_v4 = vld [vmem:[#allocation9 + $0xf4] sm:$0xf0]  ;;  %v9103_v31 = vld [vmem:[#allocation9 + $0xe0] sm:$0xf] }
 0x25c   : > { %v9112_v48 = vor.u32 %v11577_v4, %v9111_v56  ;;  %v11567_v4 = vld [vmem:[#allocation9 + $0xa4] sm:$0xf0] }
 0x25d   : > { %v2780_v19 = vadd.f32 %v2779_v18, %v2762_v33 }
 0x25e   : > { %4509 = vmatpush.bf16.msra.mxu1 %v9112_v48  ;;  %v11619_v48 = vld [vmem:[#allocation9 + $0x244] sm:$0xf0] }
 0x25f   : > { %v2798_v0 = vadd.f32 %v2797_v32, %v2780_v19  ;;  %v9031_v32 = vld [vmem:[#allocation9 + $0x50] sm:$0xf]  ;;  %v8991_v19 = vld [vmem:[#allocation9] sm:$0xf] }
 0x261   : > { %v2808_v8 = vmax.f32 %v2798_v0, 0.0 }
 0x262   : > { %v2763_v38 = vpop.f32.mrf.mxu0 }
 0x263   : > { %v2764_v42 = vadd.f32 %v2763_v38, %v2746_v22  ;;  %v9232_v22 = vor.u32 %v11607_v6, %v9231_v14  ;;  %v9191_v14 = vld [vmem:[#allocation9 + $0x190] sm:$0xf]  ;;  %v11597_v6 = vld [vmem:[#allocation9 + $0x194] sm:$0xf0] }
 0x265   : > { %v2782_v45 = vadd.f32 %v2781_v43, %v2764_v42  ;;  %v11559_v43 = vld [vmem:[#allocation9 + $0x64] sm:$0xf0] }
 0x266   : > { %v9040_v18 = vor.u32 %v11559_v43, %v9039_v24  ;;  %v11575_v42 = vld [vmem:[#allocation9 + $0xe4] sm:$0xf0]  ;;  %v9295_v43 = vld [vmem:[#allocation9 + $0x260] sm:$0xf] }
 0x267   : > { %v2800_v52 = vadd.f32 %v2799_v10, %v2782_v45  ;;  %v11557_v10 = vld [vmem:[#allocation9 + $0x54] sm:$0xf0]  ;;  %v9104_v33 = vor.u32 %v11575_v42, %v9103_v31  ;;  %v9095_v45 = vld [vmem:[#allocation9 + $0xd0] sm:$0xf]  ;;  %v9192_v42 = vor.u32 %v11597_v6, %v9191_v14  ;;  %v9135_v6 = vld [vmem:[#allocation9 + $0x120] sm:$0xf] }
 0x269   : > { %v2811_v28 = vmax.f32 %v2800_v52, 0.0  ;;  %v11603_v52 = vld [vmem:[#allocation9 + $0x1c4] sm:$0xf0]  ;;  %4510 = vmatpush.bf16.msra.mxu1 %v9104_v33  ;;  %v11617_v33 = vld [vmem:[#allocation9 + $0x234] sm:$0xf0] }
 0x26a   : > { %v2766_v35 = vpop.f32.mrf.mxu0 }
 0x26b   : > { %v2767_v23 = vadd.f32 %v2766_v35, %v2749_v16  ;;  %v2817_v49 = vpack.c.bf16 %v2811_v28, %v2808_v8  ;;  %v9223_v16 = vld [vmem:[#allocation9 + $0x1d0] sm:$0xf]  ;;  %v11605_v35 = vld [vmem:[#allocation9 + $0x1d4] sm:$0xf0] }
 0x26d   : > { %v2785_v46 = vadd.f32 %v2784_v13, %v2767_v23  ;;  %v9032_v13 = vor.u32 %v11557_v10, %v9031_v32  ;;  %v9224_v23 = vor.u32 %v11605_v35, %v9223_v16  ;;  %v11601_v32 = vld [vmem:[#allocation9 + $0x1b4] sm:$0xf0]  ;;  %v11623_v10 = vld [vmem:[#allocation9 + $0x264] sm:$0xf0]  ;;  %v9271_v16 = vld [vmem:[#allocation9 + $0x230] sm:$0xf] }
 0x26e   : > { %v9272_v35 = vor.u32 %v11617_v33, %v9271_v16  ;;  %v11637_v16 = vld [vmem:[#allocation9 + $0x2d4] sm:$0xf0] }
 0x26f   : > { %v2803_v50 = vadd.f32 %v2802_v20, %v2785_v46  ;;  %v9023_v20 = vld [vmem:[#allocation9 + $0x40] sm:$0xf]  ;;  %v11573_v46 = vld [vmem:[#allocation9 + $0xd4] sm:$0xf0] }
 0x270   : > { %v9024_v1 = vor.u32 %v11555_v60, %v9023_v20  ;;  %v9096_v28 = vor.u32 %v11573_v46, %v9095_v45  ;;  %v9167_v20 = vld [vmem:[#allocation9 + $0x160] sm:$0xf]  ;;  %v11591_v60 = vld [vmem:[#allocation9 + $0x164] sm:$0xf0]  ;;  %v11589_v45 = vld [vmem:[#allocation9 + $0x154] sm:$0xf0] }
 0x271   : > { %v2814_v54 = vmax.f32 %v2803_v50, 0.0  ;;  %v9215_v50 = vld [vmem:[#allocation9 + $0x1c0] sm:$0xf]  ;;  %v9168_v17 = vor.u32 %v11591_v60, %v9167_v20  ;;  %v11641_v20 = vld [vmem:[#allocation9 + $0x2f4] sm:$0xf0] }
 0x272   : > { %v2768_v27 = vpop.f32.mrf.mxu0  ;;  %v9216_v8 = vor.u32 %v11603_v52, %v9215_v50  ;;  %4511 = vmatpush.bf16.msra.mxu1 %v9096_v28  ;;  %v11565_v50 = vld [vmem:[#allocation9 + $0x94] sm:$0xf0]  ;;  %v9263_v52 = vld [vmem:[#allocation9 + $0x220] sm:$0xf] }
 0x273   : > { %v2820_v62 = vpack.c.bf16 %v2814_v54, %v2814_v54  ;;  %v11547_v54 = vld [vmem:[#allocation9 + $0x4] sm:$0xf0]  ;;  %v9303_v27 = vld [vmem:[#allocation9 + $0x270] sm:$0xf]  ;;  %v11613_v60 = vld [vmem:[#allocation9 + $0x214] sm:$0xf0] }
 0x274   : > { %v8992_v0 = vor.u32 %v11547_v54, %v8991_v19  ;;  %v9063_v19 = vld [vmem:[#allocation9 + $0x90] sm:$0xf] }
 0x275   : > { %v2828_v34 = vsel %vm1624_vm4, %v2820_v62, 0  ;;  %v11625_v62 = vld [vmem:[#allocation9 + $0x274] sm:$0xf0]  ;;  %v9064_v54 = vor.u32 %v11565_v50, %v9063_v19  ;;  %v9127_v19 = vld [vmem:[#allocation9 + $0x110] sm:$0xf] }
 0x276   : > { %2864 = vmatpush.bf16.msrb.mxu0 %v2828_v34  ;;  %2912 = vmatpush.bf16.msrb.mxu3 %v2828_v34  ;;  %v9304_v7 = vor.u32 %v11625_v62, %v9303_v27  ;;  %v11593_v34 = vld [vmem:[#allocation9 + $0x174] sm:$0xf0]  ;;  %v11595_v27 = vld [vmem:[#allocation9 + $0x184] sm:$0xf0] }
 0x277   : > { %v9176_v24 = vor.u32 %v11593_v34, %v9175_v2  ;;  %v11615_v62 = vld [vmem:[#allocation9 + $0x224] sm:$0xf0]  ;;  %v11673_v2 = vld [vmem:[#allocation9 + $0x3f4] sm:$0xf0] }
 0x278   : > { %v9264_v34 = vor.u32 %v11615_v62, %v9263_v52  ;;  %v11581_v50 = vld [vmem:[#allocation9 + $0x114] sm:$0xf0] }
 0x279   : > { %4522 = vmatpush.bf16.msra.mxu2 %v9176_v24  ;;  %v9128_v52 = vor.u32 %v11581_v50, %v9127_v19  ;;  %v9311_v19 = vld [vmem:[#allocation9 + $0x280] sm:$0xf]  ;;  %v11627_v50 = vld [vmem:[#allocation9 + $0x284] sm:$0xf0] }
 0x27a   : > { %2865 = vmatpush.bf16.msrb.mxu0 %v2817_v49  ;;  %2913 = vmatpush.bf16.msrb.mxu3 %v2817_v49  ;;  %v11571_v49 = vld [vmem:[#allocation9 + $0xc4] sm:$0xf0] }
 0x27d   : > { %8985 = vmatmul.msk.bf16.vlgmr.msrb.gmra.mxu0 %vm1620_vm5, %v12851_v3  ;;  %8988 = vmatmul.msk.bf16.vlgmr.msrb.gmra.mxu3 %vm1620_vm5, %v12883_v9  ;;  %v9239_v3 = vld [vmem:[#allocation9 + $0x1f0] sm:$0xf] }
 0x27e   : > { %4496 = vmatpush.bf16.msra.mxu0 %v9048_v29  ;;  %v9240_v11 = vor.u32 %v11609_v63, %v9239_v3  ;;  %v8999_v9 = vld [vmem:[#allocation9 + $0x10] sm:$0xf]  ;;  %v9087_v29 = vld [vmem:[#allocation9 + $0xc0] sm:$0xf]  ;;  %v11599_v63 = vld [vmem:[#allocation9 + $0x1a4] sm:$0xf0]  ;;  %4523 = vmatpush.bf16.msra.mxu2 %v9168_v17 }
 0x27f   : > { %v9000_v38 = vor.u32 %v11549_v44, %v8999_v9  ;;  %v9199_v3 = vld [vmem:[#allocation9 + $0x1a0] sm:$0xf] }
 0x280   : > { %4535 = vmatpush.bf16.msra.mxu3 %v9240_v11  ;;  %v9071_v44 = vld [vmem:[#allocation9 + $0xa0] sm:$0xf]  ;;  %v9200_v56 = vor.u32 %v11599_v63, %v9199_v3 }
 0x281   : > { %v9072_v31 = vor.u32 %v11567_v4, %v9071_v44  ;;  %v9487_v17 = vld [vmem:[#allocation9 + $0x3e0] sm:$0xf]  ;;  %v11639_v44 = vld [vmem:[#allocation9 + $0x2e4] sm:$0xf0] }
 0x282   : > { %4497 = vmatpush.bf16.msra.mxu0 %v9040_v18  ;;  %v9207_v18 = vld [vmem:[#allocation9 + $0x1b0] sm:$0xf]  ;;  %v9247_v63 = vld [vmem:[#allocation9 + $0x200] sm:$0xf] }
 0x283   : > { %v9208_v61 = vor.u32 %v11601_v32, %v9207_v18  ;;  %v11563_v18 = vld [vmem:[#allocation9 + $0x84] sm:$0xf0]  ;;  %v9255_v32 = vld [vmem:[#allocation9 + $0x210] sm:$0xf] }
 0x284   : > { %4536 = vmatpush.bf16.msra.mxu3 %v9232_v22 }
 0x286   : > { %4498 = vmatpush.bf16.msra.mxu0 %v9032_v13  ;;  %v9296_v13 = vor.u32 %v11623_v10, %v9295_v43  ;;  %v9055_v43 = vld [vmem:[#allocation9 + $0x80] sm:$0xf] }
 0x287   : > { %v9056_v10 = vor.u32 %v11563_v18, %v9055_v43  ;;  %v11633_v18 = vld [vmem:[#allocation9 + $0x2b4] sm:$0xf0] }
 0x288   : > { %4537 = vmatpush.bf16.msra.mxu3 %v9224_v23  ;;  %v9159_v23 = vld [vmem:[#allocation9 + $0x150] sm:$0xf] }
 0x289   : > { %v9160_v46 = vor.u32 %v11589_v45, %v9159_v23  ;;  %v11667_v23 = vld [vmem:[#allocation9 + $0x3c4] sm:$0xf0] }
 0x28a   : > { %4499 = vmatpush.bf16.msra.mxu0 %v9024_v1  ;;  %v9088_v1 = vor.u32 %v11571_v49, %v9087_v29  ;;  %v9151_v29 = vld [vmem:[#allocation9 + $0x140] sm:$0xf]  ;;  %v11587_v49 = vld [vmem:[#allocation9 + $0x144] sm:$0xf0] }
 0x28b   : > { %4524 = vmatpush.bf16.msra.mxu2 %v9160_v46  ;;  %v9152_v24 = vor.u32 %v11587_v49, %v9151_v29  ;;  %v9431_v29 = vld [vmem:[#allocation9 + $0x370] sm:$0xf]  ;;  %v11657_v49 = vld [vmem:[#allocation9 + $0x374] sm:$0xf0] }
 0x28c   : > { %4538 = vmatpush.bf16.msra.mxu3 %v9216_v8  ;;  %4512 = vmatpush.bf16.msra.mxu1 %v9088_v1  ;;  %v9432_v43 = vor.u32 %v11657_v49, %v9431_v29 }
 0x28e   : > { %4500 = vmatpush.bf16.msra.mxu0 %v9016_v58  ;;  %v11621_v58 = vld [vmem:[#allocation9 + $0x254] sm:$0xf0] }
 0x28f   : > { %v9288_v11 = vor.u32 %v11621_v58, %v9287_v55  ;;  %4525 = vmatpush.bf16.msra.mxu2 %v9152_v24  ;;  %v11671_v55 = vld [vmem:[#allocation9 + $0x3e4] sm:$0xf0]  ;;  %v9256_v58 = vor.u32 %v11613_v60, %v9255_v32  ;;  %v9335_v24 = vld [vmem:[#allocation9 + $0x2b0] sm:$0xf]  ;;  %v9455_v32 = vld [vmem:[#allocation9 + $0x3a0] sm:$0xf] }
 0x290   : > { %4539 = vmatpush.bf16.msra.mxu3 %v9208_v61  ;;  %v9488_v61 = vor.u32 %v11671_v55, %v9487_v17  ;;  %v11655_v60 = vld [vmem:[#allocation9 + $0x364] sm:$0xf0]  ;;  %v9327_v17 = vld [vmem:[#allocation9 + $0x2a0] sm:$0xf] }
 0x291   : > { %v11631_v55 = vld [vmem:[#allocation9 + $0x2a4] sm:$0xf0] }
 0x292   : > { %4501 = vmatpush.bf16.msra.mxu0 %v9008_v30  ;;  %v11569_v30 = vld [vmem:[#allocation9 + $0xb4] sm:$0xf0] }
 0x293   : > { %v9080_v9 = vor.u32 %v11569_v30, %v9079_v51  ;;  %v9143_v51 = vld [vmem:[#allocation9 + $0x130] sm:$0xf]  ;;  %v11585_v30 = vld [vmem:[#allocation9 + $0x134] sm:$0xf0] }
 0x294   : > { %4540 = vmatpush.bf16.msra.mxu3 %v9200_v56  ;;  %v9144_v3 = vor.u32 %v11585_v30, %v9143_v51  ;;  %v9447_v30 = vld [vmem:[#allocation9 + $0x390] sm:$0xf] }
 0x295   : > { %4513 = vmatpush.bf16.msra.mxu1 %v9080_v9  ;;  %v9359_v9 = vld [vmem:[#allocation9 + $0x2e0] sm:$0xf] }
 0x296   : > { %4502 = vmatpush.bf16.msra.mxu0 %v9000_v38  ;;  %v9279_v38 = vld [vmem:[#allocation9 + $0x240] sm:$0xf]  ;;  %4526 = vmatpush.bf16.msra.mxu2 %v9144_v3  ;;  %v9360_v4 = vor.u32 %v11639_v44, %v9359_v9  ;;  %v11661_v3 = vld [vmem:[#allocation9 + $0x394] sm:$0xf0] }
 0x297   : > { %v9280_v22 = vor.u32 %v11619_v48, %v9279_v38  ;;  %v9479_v38 = vld [vmem:[#allocation9 + $0x3d0] sm:$0xf]  ;;  %v11669_v48 = vld [vmem:[#allocation9 + $0x3d4] sm:$0xf0] }
 0x298   : > { %4541 = vmatpush.bf16.msra.mxu3 %v9192_v42  ;;  %v9480_v14 = vor.u32 %v11669_v48, %v9479_v38  ;;  %v9351_v42 = vld [vmem:[#allocation9 + $0x2d0] sm:$0xf]  ;;  %v11653_v9 = vld [vmem:[#allocation9 + $0x354] sm:$0xf0]  ;;  %v9439_v48 = vld [vmem:[#allocation9 + $0x380] sm:$0xf] }
 0x299   : > { %4514 = vmatpush.bf16.msra.mxu1 %v9072_v31  ;;  %v9352_v33 = vor.u32 %v11637_v16, %v9351_v42  ;;  %v11629_v38 = vld [vmem:[#allocation9 + $0x294] sm:$0xf0] }
 0x29a   : > { %4503 = vmatpush.bf16.msra.mxu0 %v8992_v0  ;;  %v9183_v0 = vld [vmem:[#allocation9 + $0x180] sm:$0xf] }
 0x29b   : > { %v9184_v28 = vor.u32 %v11595_v27, %v9183_v0  ;;  %v11635_v0 = vld [vmem:[#allocation9 + $0x2c4] sm:$0xf0]  ;;  %v9463_v27 = vld [vmem:[#allocation9 + $0x3b0] sm:$0xf] }
 0x29d   : > { %4515 = vmatpush.bf16.msra.mxu1 %v9064_v54  ;;  %4542 = vmatpush.bf16.msra.mxu3 %v9184_v28  ;;  %v9343_v54 = vld [vmem:[#allocation9 + $0x2c0] sm:$0xf]  ;;  %v11665_v28 = vld [vmem:[#allocation9 + $0x3b4] sm:$0xf0] }
 0x29e   : > { %4548 = vmatpush.bf16.msrb.mxu0 %v9304_v7  ;;  %v9495_v7 = vld [vmem:[#allocation9 + $0x3f0] sm:$0xf]  ;;  %v9344_v62 = vor.u32 %v11635_v0, %v9343_v54 }
 0x29f   : > { %v9496_v8 = vor.u32 %v11673_v2, %v9495_v7  ;;  %v9119_v7 = vld [vmem:[#allocation9 + $0x100] sm:$0xf]  ;;  %v11579_v2 = vld [vmem:[#allocation9 + $0x104] sm:$0xf0] }
 0x2a1   : > { %4587 = vmatpush.bf16.msrb.mxu3 %v9496_v8  ;;  %4516 = vmatpush.bf16.msra.mxu1 %v9056_v10  ;;  %v9120_v8 = vor.u32 %v11579_v2, %v9119_v7  ;;  %v11663_v10 = vld [vmem:[#allocation9 + $0x3a4] sm:$0xf0] }
 0x2a2   : > { %4549 = vmatpush.bf16.msrb.mxu0 %v9296_v13  ;;  %v9367_v13 = vld [vmem:[#allocation9 + $0x2f0] sm:$0xf] }
 0x2a3   : > { %v9368_v1 = vor.u32 %v11641_v20, %v9367_v13  ;;  %v9336_v13 = vor.u32 %v11633_v18, %v9335_v24  ;;  %v9423_v20 = vld [vmem:[#allocation9 + $0x360] sm:$0xf]  ;;  %v11647_v18 = vld [vmem:[#allocation9 + $0x324] sm:$0xf0] }
 0x2a5   : > { %4561 = vmatpush.bf16.msrb.mxu1 %v9368_v1  ;;  %4588 = vmatpush.bf16.msrb.mxu3 %v9488_v61  ;;  %v9456_v1 = vor.u32 %v11663_v10, %v9455_v32  ;;  %v9328_v61 = vor.u32 %v11631_v55, %v9327_v17 }
 0x2a6   : > { %4550 = vmatpush.bf16.msrb.mxu0 %v9288_v11  ;;  %v11611_v11 = vld [vmem:[#allocation9 + $0x204] sm:$0xf0] }
 0x2a7   : > { %v9248_v56 = vor.u32 %v11611_v11, %v9247_v63  ;;  %v9448_v63 = vor.u32 %v11661_v3, %v9447_v30  ;;  %v9415_v11 = vld [vmem:[#allocation9 + $0x350] sm:$0xf]  ;;  %v11645_v30 = vld [vmem:[#allocation9 + $0x314] sm:$0xf0] }
 0x2a9   : > { %4562 = vmatpush.bf16.msrb.mxu1 %v9360_v4  ;;  %4589 = vmatpush.bf16.msrb.mxu3 %v9480_v14  ;;  %v9319_v4 = vld [vmem:[#allocation9 + $0x290] sm:$0xf] }
 0x2aa   : > { %4551 = vmatpush.bf16.msrb.mxu0 %v9280_v22  ;;  %v11583_v22 = vld [vmem:[#allocation9 + $0x124] sm:$0xf0]  ;;  %v9320_v14 = vor.u32 %v11629_v38, %v9319_v4  ;;  %v9535_v4 = vld [vmem:[#allocation9 + $0x440] sm:$0xf] }
 0x2ab   : > { %v9136_v31 = vor.u32 %v11583_v22, %v9135_v6  ;;  %v11659_v6 = vld [vmem:[#allocation9 + $0x384] sm:$0xf0] }
 0x2ad   : > { %4527 = vmatpush.bf16.msra.mxu2 %v9136_v31  ;;  %4563 = vmatpush.bf16.msrb.mxu1 %v9352_v33  ;;  %v9440_v31 = vor.u32 %v11659_v6, %v9439_v48  ;;  %v9407_v33 = vld [vmem:[#allocation9 + $0x340] sm:$0xf]  ;;  %v11683_v6 = vld [vmem:[#allocation9 + $0x444] sm:$0xf0] }
 0x2ae   : > { %4552 = vmatpush.bf16.msrb.mxu0 %v9272_v35  ;;  %v9471_v35 = vld [vmem:[#allocation9 + $0x3c0] sm:$0xf] }
 0x2af   : > { %v9472_v46 = vor.u32 %v11667_v23, %v9471_v35  ;;  %v11651_v35 = vld [vmem:[#allocation9 + $0x344] sm:$0xf0]  ;;  %v9375_v48 = vld [vmem:[#allocation9 + $0x300] sm:$0xf] }
 0x2b1   : > { %4590 = vmatpush.bf16.msrb.mxu3 %v9472_v46  ;;  %4528 = vmatpush.bf16.msra.mxu2 %v9128_v52  ;;  %v9408_v46 = vor.u32 %v11651_v35, %v9407_v33  ;;  %v9312_v52 = vor.u32 %v11627_v50, %v9311_v19  ;;  %v9527_v33 = vld [vmem:[#allocation9 + $0x430] sm:$0xf]  ;;  %v11697_v19 = vld [vmem:[#allocation9 + $0x4b4] sm:$0xf0] }
 0x2b2   : > { %4553 = vmatpush.bf16.msrb.mxu0 %v9264_v34  ;;  %v9464_v34 = vor.u32 %v11665_v28, %v9463_v27  ;;  %4564 = vmatpush.bf16.msrb.mxu1 %v9344_v62  ;;  %v11689_v62 = vld [vmem:[#allocation9 + $0x474] sm:$0xf0]  ;;  %v9623_v28 = vld [vmem:[#allocation9 + $0x4f0] sm:$0xf] }
 0x2b3   : > { %v9560_v24 = vor.u32 %v11689_v62, %v9559_v26  ;;  %v9519_v26 = vld [vmem:[#allocation9 + $0x420] sm:$0xf] }
 0x2b4   : > { %v9583_v62 = vld [vmem:[#allocation9 + $0x4a0] sm:$0xf] }
 0x2b5   : > { %4591 = vmatpush.bf16.msrb.mxu3 %v9464_v34  ;;  %4529 = vmatpush.bf16.msra.mxu2 %v9120_v8 }
 0x2b6   : > { %4554 = vmatpush.bf16.msrb.mxu0 %v9256_v58  ;;  %v9424_v58 = vor.u32 %v11655_v60, %v9423_v20  ;;  %4565 = vmatpush.bf16.msrb.mxu1 %v9336_v13  ;;  %v2887_v44 = vpop.f32.mrf.mxu1  ;;  %v9615_v13 = vld [vmem:[#allocation9 + $0x4e0] sm:$0xf]  ;;  %v11703_v20 = vld [vmem:[#allocation9 + $0x4e4] sm:$0xf0] }
 0x2b9   : > { %4574 = vmatpush.bf16.msrb.mxu2 %v9432_v43  ;;  %4592 = vmatpush.bf16.msrb.mxu3 %v9456_v1  ;;  %v9391_v43 = vld [vmem:[#allocation9 + $0x320] sm:$0xf] }
 0x2ba   : > { %4555 = vmatpush.bf16.msrb.mxu0 %v9248_v56  ;;  %4566 = vmatpush.bf16.msrb.mxu1 %v9328_v61  ;;  %v9416_v56 = vor.u32 %v11653_v9, %v9415_v11  ;;  %v9392_v60 = vor.u32 %v11647_v18, %v9391_v43  ;;  %v9616_v61 = vor.u32 %v11703_v20, %v9615_v13  ;;  %v9607_v11 = vld [vmem:[#allocation9 + $0x4d0] sm:$0xf]  ;;  %v11701_v9 = vld [vmem:[#allocation9 + $0x4d4] sm:$0xf0] }
 0x2bb   : > { %v9608_v38 = vor.u32 %v11701_v9, %v9607_v11  ;;  %v9815_v9 = vld [vmem:[#allocation9 + $0x670] sm:$0xf] }
 0x2bc   : > { %v2839_v45 = vpop.f32.mrf.mxu3 }
 0x2bd   : > { %4575 = vmatpush.bf16.msrb.mxu2 %v9424_v58  ;;  %4593 = vmatpush.bf16.msrb.mxu3 %v9448_v63  ;;  %v2872_v22 = vmax.f32 %v1729_v25, %v2839_v45  ;;  %v11649_v25 = vld [vmem:[#allocation9 + $0x334] sm:$0xf0]  ;;  %v1732_v45 = vmax.f32 %v12937_v37, %v12955_v36  ;;  %v9551_v37 = vld [vmem:[#allocation9 + $0x460] sm:$0xf]  ;;  %v9624_v36 = vor.u32 %v11705_v15, %v9623_v28  ;;  %v9543_v58 = vld [vmem:[#allocation9 + $0x450] sm:$0xf] }
 0x2be   : > { %4567 = vmatpush.bf16.msrb.mxu1 %v9320_v14  ;;  %v9400_v47 = vor.u32 %v11649_v25, %v9399_v41  ;;  %v2889_v2 = vpop.f32.mrf.mxu1  ;;  %v11685_v63 = vld [vmem:[#allocation9 + $0x454] sm:$0xf0]  ;;  %v11643_v14 = vld [vmem:[#allocation9 + $0x304] sm:$0xf0] }
 0x2bf   : > { %v2920_v54 = vmax.f32 %v2872_v22, %v2887_v44  ;;  %v9599_v22 = vld [vmem:[#allocation9 + $0x4c0] sm:$0xf]  ;;  %v11695_v28 = vld [vmem:[#allocation9 + $0x4a4] sm:$0xf0] }
 0x2c1   : > { %4576 = vmatpush.bf16.msrb.mxu2 %v9416_v56  ;;  %4594 = vmatpush.bf16.msrb.mxu3 %v9440_v31  ;;  %v9544_v56 = vor.u32 %v11685_v63, %v9543_v58  ;;  %v11699_v31 = vld [vmem:[#allocation9 + $0x4c4] sm:$0xf0] }
 0x2c2   : > { %4568 = vmatpush.bf16.msrb.mxu1 %v9312_v52  ;;  %v9600_v35 = vor.u32 %v11699_v31, %v9599_v22  ;;  %v9807_v31 = vld [vmem:[#allocation9 + $0x660] sm:$0xf] }
 0x2c4   : > { %v2841_v51 = vpop.f32.mrf.mxu3 }
 0x2c5   : > { %4577 = vmatpush.bf16.msrb.mxu2 %v9408_v46  ;;  %v2875_v7 = vmax.f32 %v1732_v45, %v2841_v51  ;;  %v9383_v51 = vld [vmem:[#allocation9 + $0x310] sm:$0xf] }
 0x2c6   : > { %v9384_v44 = vor.u32 %v11645_v30, %v9383_v51  ;;  %v9591_v46 = vld [vmem:[#allocation9 + $0x4b0] sm:$0xf]  ;;  %v11675_v51 = vld [vmem:[#allocation9 + $0x404] sm:$0xf0]  ;;  %v9567_v30 = vld [vmem:[#allocation9 + $0x480] sm:$0xf] }
 0x2c7   : > { %v2923_v1 = vmax.f32 %v2875_v7, %v2889_v2  ;;  %v9592_v41 = vor.u32 %v11697_v19, %v9591_v46 }
 0x2c9   : > { %4578 = vmatpush.bf16.msrb.mxu2 %v9400_v47  ;;  %v9751_v47 = vld [vmem:[#allocation9 + $0x5f0] sm:$0xf] }
 0x2cd   : > { %4579 = vmatpush.bf16.msrb.mxu2 %v9392_v60  ;;  %v9743_v60 = vld [vmem:[#allocation9 + $0x5e0] sm:$0xf] }
 0x2d1   : > { %4580 = vmatpush.bf16.msrb.mxu2 %v9384_v44  ;;  %v11753_v44 = vld [vmem:[#allocation9 + $0x674] sm:$0xf0] }
 0x2de   : > { %v2853_v42 = vpop.f32.mrf.mxu3  ;;  %v2901_v16 = vpop.f32.mrf.mxu2 }
 0x2df   : > { %v2873_v23 = vmax.f32 %v1730_v12, %v2853_v42  ;;  %v1733_v12 = vmax.f32 %v12960_v21, %v12958_v53  ;;  %v11687_v21 = vld [vmem:[#allocation9 + $0x464] sm:$0xf0]  ;;  %v9376_v42 = vor.u32 %v11643_v14, %v9375_v48 }
 0x2e0   : > { %v9552_v55 = vor.u32 %v11687_v21, %v9551_v37  ;;  %v9584_v37 = vor.u32 %v11695_v28, %v9583_v62  ;;  %v9687_v28 = vld [vmem:[#allocation9 + $0x570] sm:$0xf] }
 0x2e1   : > { %v2921_v0 = vmax.f32 %v2873_v23, %v2901_v16  ;;  %v9536_v16 = vor.u32 %v11683_v6, %v9535_v4  ;;  %v11681_v23 = vld [vmem:[#allocation9 + $0x434] sm:$0xf0]  ;;  %4581 = vmatpush.bf16.msrb.mxu2 %v9376_v42  ;;  %v9735_v4 = vld [vmem:[#allocation9 + $0x5d0] sm:$0xf]  ;;  %v11751_v42 = vld [vmem:[#allocation9 + $0x664] sm:$0xf0] }
 0x2e2   : > { %v9808_v19 = vor.u32 %v11751_v42, %v9807_v31 }
 0x2e3   : > { %v2926_v27 = vpack.c.bf16 %v2921_v0, %v2920_v54  ;;  %v9528_v0 = vor.u32 %v11681_v23, %v9527_v33  ;;  %v9727_v33 = vld [vmem:[#allocation9 + $0x5c0] sm:$0xf] }
 0x2e5   : > { %2930 = vst [vmem:[#allocation2] sm:$0xff] %v2926_v27  ;;  %v13023_v34 = vunpack.c.l.b16 %v2926_v27  ;;  %v13025_v8 = vunpack.c.h.b16 %v2926_v27  ;;  %v11679_v27 = vld [vmem:[#allocation9 + $0x424] sm:$0xf0] }
 0x2e6   : > { %v2855_v29 = vpop.f32.mrf.mxu3  ;;  %v2903_v49 = vpop.f32.mrf.mxu2 }
 0x2e7   : > { %v2876_v32 = vmax.f32 %v1733_v12, %v2855_v29  ;;  %v13029_v10 = vpack.c.b16 %v13023_v34, %v13023_v34  ;;  %v13033_v53 = vpack.c.b16 %v13025_v8, %v13025_v8  ;;  %v11737_v12 = vld [vmem:[#allocation9 + $0x5f4] sm:$0xf0]  ;;  %v9520_v29 = vor.u32 %v11679_v27, %v9519_v26 }
 0x2e8   : > { %v9752_v21 = vor.u32 %v11737_v12, %v9751_v47  ;;  %v11729_v27 = vld [vmem:[#allocation9 + $0x5b4] sm:$0xf0]  ;;  %v9791_v12 = vld [vmem:[#allocation9 + $0x640] sm:$0xf] }
 0x2e9   : > { %v2924_v17 = vmax.f32 %v2876_v32, %v2903_v49  ;;  %4504 = vmatmul.bf16.vlgmr.msra.gmra.mxu0 %v13029_v10  ;;  %4517 = vmatmul.bf16.vlgmr.msra.gmra.mxu1 %v13033_v53  ;;  %v9511_v49 = vld [vmem:[#allocation9 + $0x410] sm:$0xf] }
 0x2ea   : > { %4600 = vmatpush.bf16.msra.mxu0 %v9560_v24  ;;  %4613 = vmatpush.bf16.msra.mxu1 %v9624_v36  ;;  %v11677_v24 = vld [vmem:[#allocation9 + $0x414] sm:$0xf0]  ;;  %v9575_v36 = vld [vmem:[#allocation9 + $0x490] sm:$0xf] }
 0x2eb   : > { %v2928_v3 = vpack.c.bf16 %v2924_v17, %v2923_v1  ;;  %v11735_v1 = vld [vmem:[#allocation9 + $0x5e4] sm:$0xf0]  ;;  %v9512_v17 = vor.u32 %v11677_v24, %v9511_v49 }
 0x2ec   : > { %v9744_v11 = vor.u32 %v11735_v1, %v9743_v60  ;;  %v13056_v22 = vld [vmem:[#allocation2] sm:$0xee]  ;;  %v11747_v49 = vld [vmem:[#allocation9 + $0x644] sm:$0xf0]  ;;  %v11745_v60 = vld [vmem:[#allocation9 + $0x634] sm:$0xf0] }
 0x2ed   : > { %2932 = vst [vmem:[#allocation2 + $0xc] sm:$0x33] %v2928_v3  ;;  %v11691_v3 = vld [vmem:[#allocation9 + $0x484] sm:$0xf0]  ;;  %v2990_v46 = vunpack.c.h.b16 %v13056_v22  ;;  %v9703_v1 = vld [vmem:[#allocation9 + $0x590] sm:$0xf] }
 0x2ee   : > { %4601 = vmatpush.bf16.msra.mxu0 %v9552_v55  ;;  %4614 = vmatpush.bf16.msra.mxu1 %v9616_v61  ;;  %v9503_v55 = vld [vmem:[#allocation9 + $0x400] sm:$0xf]  ;;  %v9568_v57 = vor.u32 %v11691_v3, %v9567_v30 }
 0x2ef   : > { %v9504_v48 = vor.u32 %v11675_v51, %v9503_v55  ;;  %v11717_v51 = vld [vmem:[#allocation9 + $0x554] sm:$0xf0] }
 0x2f2   : > { %4602 = vmatpush.bf16.msra.mxu0 %v9544_v56  ;;  %4615 = vmatpush.bf16.msra.mxu1 %v9608_v38  ;;  %v11733_v38 = vld [vmem:[#allocation9 + $0x5d4] sm:$0xf0] }
 0x2f3   : > { %v9736_v6 = vor.u32 %v11733_v38, %v9735_v4  ;;  %v9695_v4 = vld [vmem:[#allocation9 + $0x580] sm:$0xf]  ;;  %v11723_v38 = vld [vmem:[#allocation9 + $0x584] sm:$0xf0] }
 0x2f4   : > { %v13037_v50 = vld [vmem:[#allocation2 + $0xc] sm:$0x11] }
 0x2f5   : > { %v2957_v52 = vunpack.c.l.b16 %v13037_v50  ;;  %v2958_v54 = vunpack.c.h.b16 %v13037_v50  ;;  %v13075_v31 = vld [vmem:[#allocation2 + $0xc] sm:$0x33] }
 0x2f6   : > { %4603 = vmatpush.bf16.msra.mxu0 %v9536_v16  ;;  %4616 = vmatpush.bf16.msra.mxu1 %v9600_v35  ;;  %v1734_v16 = vmax.f32 %v12970_v39, %v12972_v5  ;;  %v11731_v35 = vld [vmem:[#allocation9 + $0x5c4] sm:$0xf0]  ;;  %v9719_v5 = vld [vmem:[#allocation9 + $0x5b0] sm:$0xf] }
 0x2f7   : > { %v2960_v25 = vpack.c.b16 %v2957_v52, %v13023_v34  ;;  %v2961_v45 = vpack.c.b16 %v2958_v54, %v13025_v8  ;;  %v11693_v8 = vld [vmem:[#allocation9 + $0x494] sm:$0xf0]  ;;  %v9728_v26 = vor.u32 %v11731_v35, %v9727_v33  ;;  %v2993_v39 = vpack.c.b16 %v2958_v54, %v2990_v46  ;;  %v11715_v33 = vld [vmem:[#allocation9 + $0x544] sm:$0xf0] }
 0x2f8   : > { %v9576_v58 = vor.u32 %v11693_v8, %v9575_v36  ;;  %v11727_v36 = vld [vmem:[#allocation9 + $0x5a4] sm:$0xf0] }
 0x2f9   : > { %v2966_v15 = vshll.u32 %v2960_v25, 16  ;;  %v2973_v7 = vshll.u32 %v2961_v45, 16  ;;  %v2964_v34 = vshrl.u32 %v2960_v25, 16  ;;  %v2971_v18 = vshrl.u32 %v2961_v45, 16  ;;  %v11749_v25 = vld [vmem:[#allocation9 + $0x654] sm:$0xf0] }
 0x2fa   : > { %v2867_v2 = vpop.f32.mrf.mxu0  ;;  %4604 = vmatpush.bf16.msra.mxu0 %v9528_v0  ;;  %4617 = vmatpush.bf16.msra.mxu1 %v9592_v41  ;;  %v9799_v41 = vld [vmem:[#allocation9 + $0x650] sm:$0xf]  ;;  %v13065_v24 = vrot.slane %v2993_v39, 1 }
 0x2fb   : > { %v2968_v43 = vrot.slane %v2966_v15, 1  ;;  %v2975_v32 = vrot.slane %v2973_v7, 1  ;;  %v2874_v61 = vmax.f32 %v1731_v59, %v2867_v2  ;;  %v9816_v59 = vor.u32 %v11753_v44, %v9815_v9  ;;  %v11721_v15 = vld [vmem:[#allocation9 + $0x574] sm:$0xf0]  ;;  %v9775_v9 = vld [vmem:[#allocation9 + $0x620] sm:$0xf] }
 0x2fc   : > { %v9800_v47 = vor.u32 %v11749_v25, %v9799_v41  ;;  %v9720_v7 = vor.u32 %v11729_v27, %v9719_v5  ;;  %v11558_v41 = vld [vmem:[#allocation9 + $0x64] sm:$0xf]  ;;  %v9041_v25 = vld [vmem:[#allocation9 + $0x68] sm:$0xf0] }
 0x2fd   : > { %v13047_v13 = vor.u32 %v2968_v43, %v2964_v34  ;;  %v13049_v20 = vor.u32 %v2975_v32, %v2971_v18  ;;  %v9688_v34 = vor.u32 %v11721_v15, %v9687_v28  ;;  %v9679_v43 = vld [vmem:[#allocation9 + $0x560] sm:$0xf]  ;;  %v11719_v18 = vld [vmem:[#allocation9 + $0x564] sm:$0xf0]  ;;  %v9792_v32 = vor.u32 %v11747_v49, %v9791_v12 }
 0x2fe   : > { %4605 = vmatpush.bf16.msra.mxu0 %v9520_v29  ;;  %4618 = vmatpush.bf16.msra.mxu1 %v9584_v37  ;;  %v9711_v29 = vld [vmem:[#allocation9 + $0x5a0] sm:$0xf]  ;;  %v9680_v55 = vor.u32 %v11719_v18, %v9679_v43 }
 0x2ff   : > { %4543 = vmatmul.bf16.vlgmr.msra.gmra.mxu3 %v13047_v13  ;;  %4556 = vmatmul.bf16.vlgmr.msrb.gmra.mxu0 %v13049_v20  ;;  %v9712_v8 = vor.u32 %v11727_v36, %v9711_v29  ;;  %v13081_v5 = vld [vmem:[#allocation2] sm:$0xcc]  ;;  %v11713_v29 = vld [vmem:[#allocation9 + $0x534] sm:$0xf0]  ;;  %v3003_v36 = vunpack.c.l.b16 %v13075_v31 }
 0x300   : > { %4639 = vmatpush.bf16.msra.mxu3 %v9752_v21  ;;  %v2915_v63 = vpop.f32.mrf.mxu3  ;;  %v9783_v21 = vld [vmem:[#allocation9 + $0x630] sm:$0xf] }
 0x301   : > { %v2922_v56 = vmax.f32 %v2874_v61, %v2915_v63  ;;  %v9671_v61 = vld [vmem:[#allocation9 + $0x550] sm:$0xf]  ;;  %v9784_v30 = vor.u32 %v11745_v60, %v9783_v21  ;;  %v9871_v21 = vld [vmem:[#allocation9 + $0x6e0] sm:$0xf]  ;;  %v11767_v60 = vld [vmem:[#allocation9 + $0x6e4] sm:$0xf0] }
 0x302   : > { %4606 = vmatpush.bf16.msra.mxu0 %v9512_v17  ;;  %4619 = vmatpush.bf16.msra.mxu1 %v9576_v58  ;;  %v2869_v14 = vpop.f32.mrf.mxu0  ;;  %v11725_v17 = vld [vmem:[#allocation9 + $0x594] sm:$0xf0] }
 0x303   : > { %v2927_v40 = vpack.c.bf16 %v2922_v56, %v2922_v56  ;;  %v2877_v23 = vmax.f32 %v1734_v16, %v2869_v14  ;;  %v9704_v3 = vor.u32 %v11725_v17, %v9703_v1  ;;  %v9049_v14 = vld [vmem:[#allocation9 + $0x78] sm:$0xf0]  ;;  %v9663_v16 = vld [vmem:[#allocation9 + $0x540] sm:$0xf]  ;;  %v3038_v1 = vunpack.c.l.b16 %v13081_v5 }
 0x304   : > { %4640 = vmatpush.bf16.msra.mxu3 %v9744_v11  ;;  %v9664_v12 = vor.u32 %v11715_v33, %v9663_v16  ;;  %v11554_v33 = vld [vmem:[#allocation9 + $0x44] sm:$0xf] }
 0x305   : > { %2931 = vst [vmem:[#allocation2 + $0x8] sm:$0xf] %v2927_v40  ;;  %v9672_v40 = vor.u32 %v11717_v51, %v9671_v61  ;;  %v9033_v61 = vld [vmem:[#allocation9 + $0x58] sm:$0xf0] }
 0x306   : > { %4607 = vmatpush.bf16.msra.mxu0 %v9504_v48  ;;  %4620 = vmatpush.bf16.msra.mxu1 %v9568_v57  ;;  %v11743_v57 = vld [vmem:[#allocation9 + $0x624] sm:$0xf0] }
 0x307   : > { %v9776_v39 = vor.u32 %v11743_v57, %v9775_v9  ;;  %v11711_v9 = vld [vmem:[#allocation9 + $0x524] sm:$0xf0]  ;;  %v9113_v57 = vld [vmem:[#allocation9 + $0xf8] sm:$0xf0] }
 0x308   : > { %4641 = vmatpush.bf16.msra.mxu3 %v9736_v6  ;;  %v2917_v0 = vpop.f32.mrf.mxu3  ;;  %v2989_v6 = vunpack.c.l.b16 %v13056_v22 }
 0x309   : > { %v2925_v45 = vmax.f32 %v2877_v23, %v2917_v0  ;;  %v9696_v0 = vor.u32 %v11723_v38, %v9695_v4  ;;  %v9872_v4 = vor.u32 %v11767_v60, %v9871_v21  ;;  %v11576_v38 = vld [vmem:[#allocation9 + $0xf4] sm:$0xf] }
 0x30a   : > { %4652 = vmatpush.bf16.msrb.mxu0 %v9816_v59  ;;  %v11560_v59 = vld [vmem:[#allocation9 + $0x74] sm:$0xf] }
 0x30b   : > { %v2929_v62 = vpack.c.bf16 %v2925_v45, %v2925_v45  ;;  %v2992_v45 = vpack.c.b16 %v2957_v52, %v2989_v6  ;;  %v11741_v52 = vld [vmem:[#allocation9 + $0x614] sm:$0xf0] }
 0x30c   : > { %4642 = vmatpush.bf16.msra.mxu3 %v9728_v26  ;;  %v2935_v2 = vld [vmem:[#allocation2 + $0x8] sm:$0xf]  ;;  %v11769_v26 = vld [vmem:[#allocation9 + $0x6f4] sm:$0xf0] }
 0x30d   : > { %2933 = vst [vmem:[#allocation2 + $0x14] sm:$0x3] %v2929_v62  ;;  %v2948_v37 = vunpack.c.l.b16 %v2935_v2  ;;  %v2939_v58 = vld [vmem:[#allocation2 + $0x8] sm:$0xe]  ;;  %v9052_v62 = vor.u32 %v11560_v59, %v9049_v14  ;;  %v9655_v2 = vld [vmem:[#allocation9 + $0x530] sm:$0xf] }
 0x30e   : > { %4653 = vmatpush.bf16.msrb.mxu0 %v9808_v19  ;;  %v2991_v56 = vunpack.c.l.b16 %v2939_v58  ;;  %v9879_v19 = vld [vmem:[#allocation9 + $0x6f0] sm:$0xf]  ;;  %v11556_v58 = vld [vmem:[#allocation9 + $0x54] sm:$0xf] }
 0x30f   : > { %4595 = vmatmul.bf16.vlgmr.msrb.gmra.mxu3 %v13065_v24  ;;  %v13068_v54 = vpack.c.b16 %v2948_v37, %v2948_v37  ;;  %v9880_v43 = vor.u32 %v11769_v26, %v9879_v19  ;;  %v9036_v59 = vor.u32 %v11556_v58, %v9033_v61  ;;  %v9863_v14 = vld [vmem:[#allocation9 + $0x6d0] sm:$0xf]  ;;  %v9116_v26 = vor.u32 %v11576_v38, %v9113_v57  ;;  %v9097_v58 = vld [vmem:[#allocation9 + $0xd8] sm:$0xf0]  ;;  %v11783_v38 = vld [vmem:[#allocation9 + $0x764] sm:$0xf0] }
 0x310   : > { %4643 = vmatpush.bf16.msra.mxu3 %v9720_v7  ;;  %v9639_v19 = vld [vmem:[#allocation9 + $0x510] sm:$0xf]  ;;  %v9839_v57 = vld [vmem:[#allocation9 + $0x6a0] sm:$0xf] }
 0x311   : > { %4530 = vmatmul.bf16.vlgmr.msra.gmra.mxu2 %v13068_v54 }
 0x312   : > { %4654 = vmatpush.bf16.msrb.mxu0 %v9800_v47  ;;  %4626 = vmatpush.bf16.msra.mxu2 %v9688_v34  ;;  %v9767_v47 = vld [vmem:[#allocation9 + $0x610] sm:$0xf] }
 0x313   : > { %v9768_v51 = vor.u32 %v11741_v52, %v9767_v47  ;;  %v11574_v47 = vld [vmem:[#allocation9 + $0xe4] sm:$0xf] }
 0x314   : > { %4644 = vmatpush.bf16.msra.mxu3 %v9712_v8  ;;  %v2937_v63 = vld [vmem:[#allocation2 + $0x14] sm:$0x1]  ;;  %v13089_v8 = vrot.slane %v2992_v45, 1 }
 0x315   : > { %v13071_v11 = vld [vmem:[#allocation2 + $0x14] sm:$0x3]  ;;  %v2959_v44 = vunpack.c.l.b16 %v2937_v63  ;;  %v9647_v63 = vld [vmem:[#allocation9 + $0x520] sm:$0xf] }
 0x316   : > { %4655 = vmatpush.bf16.msrb.mxu0 %v9792_v32  ;;  %v3005_v48 = vunpack.c.l.b16 %v13071_v11  ;;  %4627 = vmatpush.bf16.msra.mxu2 %v9680_v55  ;;  %v9044_v32 = vor.u32 %v11558_v41, %v9041_v25  ;;  %v9656_v55 = vor.u32 %v11713_v29, %v9655_v2  ;;  %v9648_v16 = vor.u32 %v11711_v9, %v9647_v63 }
 0x317   : > { %v2994_v42 = vpack.c.b16 %v2959_v44, %v2991_v56  ;;  %v2962_v35 = vpack.c.b16 %v2959_v44, %v2948_v37  ;;  %v11739_v44 = vld [vmem:[#allocation9 + $0x604] sm:$0xf0] }
 0x318   : > { %v3008_v23 = vpack.c.b16 %v3005_v48, %v2991_v56  ;;  %4645 = vmatpush.bf16.msra.mxu3 %v9704_v3  ;;  %v3004_v3 = vunpack.c.h.b16 %v13075_v31  ;;  %v3006_v56 = vpack.c.b16 %v3003_v36, %v2989_v6 }
 0x319   : > { %v13083_v27 = vrot.slane %v2994_v42, 1  ;;  %v2980_v28 = vshll.u32 %v2962_v35, 16  ;;  %v2978_v49 = vshrl.u32 %v2962_v35, 16  ;;  %v11765_v42 = vld [vmem:[#allocation9 + $0x6d4] sm:$0xf0] }
 0x31a   : > { %4656 = vmatpush.bf16.msrb.mxu0 %v9784_v30  ;;  %v3026_v15 = vshrl.u32 %v3008_v23, 16  ;;  %4628 = vmatpush.bf16.msra.mxu2 %v9672_v40  ;;  %v3029_v7 = vshll.u32 %v3008_v23, 16  ;;  %v9759_v30 = vld [vmem:[#allocation9 + $0x600] sm:$0xf]  ;;  %v3041_v40 = vpack.c.b16 %v3003_v36, %v3038_v1  ;;  %v9025_v35 = vld [vmem:[#allocation9 + $0x48] sm:$0xf0]  ;;  %v3007_v6 = vpack.c.b16 %v3004_v3, %v2990_v46 }
 0x31b   : > { %4608 = vmatmul.bf16.vlgmr.msra.gmra.mxu0 %v13083_v27  ;;  %v2982_v37 = vrot.slane %v2980_v28, 1  ;;  %v9760_v23 = vor.u32 %v11739_v44, %v9759_v30  ;;  %v3010_v41 = vshrl.u32 %v3006_v56, 16  ;;  %v3013_v25 = vshll.u32 %v3006_v56, 16  ;;  %v9017_v46 = vld [vmem:[#allocation9 + $0x38] sm:$0xf0] }
 0x31c   : > { %v3028_v50 = vrot.slane %v3026_v15, 1  ;;  %4646 = vmatpush.bf16.msra.mxu3 %v9696_v0  ;;  %v3031_v34 = vrot.slane %v3029_v7, 2  ;;  %v11709_v0 = vld [vmem:[#allocation9 + $0x514] sm:$0xf0]  ;;  %v9864_v45 = vor.u32 %v11765_v42, %v9863_v14  ;;  %v9028_v28 = vor.u32 %v11554_v33, %v9025_v35  ;;  %v11763_v15 = vld [vmem:[#allocation9 + $0x6c4] sm:$0xf0] }
 0x31d   : > { %v13087_v18 = vor.u32 %v2982_v37, %v2978_v49  ;;  %v9640_v22 = vor.u32 %v11709_v0, %v9639_v19  ;;  %v11552_v7 = vld [vmem:[#allocation9 + $0x34] sm:$0xf]  ;;  %v3018_v2 = vshrl.u32 %v3007_v6, 16  ;;  %v3021_v29 = vshll.u32 %v3007_v6, 16  ;;  %v9631_v49 = vld [vmem:[#allocation9 + $0x500] sm:$0xf] }
 0x31e   : > { %4657 = vmatpush.bf16.msrb.mxu0 %v9776_v39  ;;  %4629 = vmatpush.bf16.msra.mxu2 %v9664_v12  ;;  %v13092_v17 = vor.u32 %v3031_v34, %v3028_v50  ;;  %v9855_v39 = vld [vmem:[#allocation9 + $0x6c0] sm:$0xf]  ;;  %v9105_v12 = vld [vmem:[#allocation9 + $0xe8] sm:$0xf0]  ;;  %v11707_v37 = vld [vmem:[#allocation9 + $0x504] sm:$0xf0]  ;;  %v9020_v60 = vor.u32 %v11552_v7, %v9017_v46 }
 0x31f   : > { %4569 = vmatmul.bf16.vlgmr.msrb.gmra.mxu1 %v13087_v18  ;;  %v3012_v50 = vrot.slane %v3010_v41, 1  ;;  %v3015_v52 = vrot.slane %v3013_v25, 2  ;;  %v9856_v36 = vor.u32 %v11763_v15, %v9855_v39  ;;  %v9943_v34 = vld [vmem:[#allocation9 + $0x770] sm:$0xf]  ;;  %v9108_v21 = vor.u32 %v11574_v47, %v9105_v12  ;;  %v11761_v1 = vld [vmem:[#allocation9 + $0x6b4] sm:$0xf0] }
 0x320   : > { %4691 = vmatpush.bf16.msrb.mxu3 %v9052_v62  ;;  %4665 = vmatpush.bf16.msrb.mxu1 %v9880_v43  ;;  %v13102_v62 = vrot.slane %v3041_v40, 2  ;;  %v11785_v43 = vld [vmem:[#allocation9 + $0x774] sm:$0xf0]  ;;  %v9632_v61 = vor.u32 %v11707_v37, %v9631_v49  ;;  %v9009_v30 = vld [vmem:[#allocation9 + $0x28] sm:$0xf0]  ;;  %v3020_v9 = vrot.slane %v3018_v2, 1 }
 0x321   : > { %4647 = vmatmul.bf16.vlgmr.msra.gmra.mxu3 %v13092_v17  ;;  %4582 = vmatmul.bf16.vlgmr.msrb.gmra.mxu2 %v13089_v8  ;;  %v9944_v63 = vor.u32 %v11785_v43, %v9943_v34  ;;  %v3023_v44 = vrot.slane %v3021_v29, 2  ;;  %v11759_v42 = vld [vmem:[#allocation9 + $0x6a4] sm:$0xf0]  ;;  %v9089_v33 = vld [vmem:[#allocation9 + $0xc8] sm:$0xf0] }
 0x322   : > { %4630 = vmatpush.bf16.msra.mxu2 %v9656_v55  ;;  %4658 = vmatpush.bf16.msrb.mxu0 %v9768_v51  ;;  %v11572_v55 = vld [vmem:[#allocation9 + $0xd4] sm:$0xf]  ;;  %v11550_v51 = vld [vmem:[#allocation9 + $0x24] sm:$0xf]  ;;  %v9840_v0 = vor.u32 %v11759_v42, %v9839_v57  ;;  %v11781_v41 = vld [vmem:[#allocation9 + $0x754] sm:$0xf0] }
 0x323   : > { %v9100_v40 = vor.u32 %v11572_v55, %v9097_v58  ;;  %v9012_v14 = vor.u32 %v11550_v51, %v9009_v30  ;;  %v11548_v35 = vld [vmem:[#allocation9 + $0x14] sm:$0xf]  ;;  %v13108_v6 = vor.u32 %v3023_v44, %v3020_v9  ;;  %v9831_v25 = vld [vmem:[#allocation9 + $0x690] sm:$0xf]  ;;  %v9081_v47 = vld [vmem:[#allocation9 + $0xb8] sm:$0xf0]  ;;  %v3039_v51 = vunpack.c.h.b16 %v13081_v5 }
 0x324   : > { %4692 = vmatpush.bf16.msrb.mxu3 %v9044_v32  ;;  %4666 = vmatpush.bf16.msrb.mxu1 %v9872_v4  ;;  %v9847_v32 = vld [vmem:[#allocation9 + $0x6b0] sm:$0xf]  ;;  %v9935_v4 = vld [vmem:[#allocation9 + $0x760] sm:$0xf]  ;;  %v11568_v15 = vld [vmem:[#allocation9 + $0xb4] sm:$0xf] }
 0x325   : > { %v9848_v56 = vor.u32 %v11761_v1, %v9847_v32  ;;  %v9936_v19 = vor.u32 %v11783_v38, %v9935_v4  ;;  %v11546_v12 = vld [vmem:[#allocation9 + $0x4] sm:$0xf]  ;;  %v11624_v46 = vld [vmem:[#allocation9 + $0x274] sm:$0xf]  ;;  %v9305_v2 = vld [vmem:[#allocation9 + $0x278] sm:$0xf0] }
 0x326   : > { %4631 = vmatpush.bf16.msra.mxu2 %v9648_v16  ;;  %4659 = vmatpush.bf16.msrb.mxu0 %v9760_v23  ;;  %v11570_v16 = vld [vmem:[#allocation9 + $0xc4] sm:$0xf]  ;;  %v9001_v23 = vld [vmem:[#allocation9 + $0x18] sm:$0xf0]  ;;  %v9919_v49 = vld [vmem:[#allocation9 + $0x740] sm:$0xf]  ;;  %v9308_v32 = vor.u32 %v11624_v46, %v9305_v2 }
 0x327   : > { %v9004_v39 = vor.u32 %v11548_v35, %v9001_v23  ;;  %v11779_v37 = vld [vmem:[#allocation9 + $0x744] sm:$0xf0]  ;;  %v11592_v43 = vld [vmem:[#allocation9 + $0x174] sm:$0xf]  ;;  %v9073_v1 = vld [vmem:[#allocation9 + $0xa8] sm:$0xf0] }
 0x328   : > { %4693 = vmatpush.bf16.msrb.mxu3 %v9036_v59  ;;  %4667 = vmatpush.bf16.msrb.mxu1 %v9864_v45  ;;  %v13105_v59 = vor.u32 %v3015_v52, %v3012_v50  ;;  %v9092_v45 = vor.u32 %v11570_v16, %v9089_v33  ;;  %v9084_v50 = vor.u32 %v11568_v15, %v9081_v47  ;;  %v11755_v34 = vld [vmem:[#allocation9 + $0x684] sm:$0xf0]  ;;  %v11622_v58 = vld [vmem:[#allocation9 + $0x264] sm:$0xf]  ;;  %v11777_v9 = vld [vmem:[#allocation9 + $0x734] sm:$0xf0] }
 0x329   : > { %v9920_v55 = vor.u32 %v11779_v37, %v9919_v49  ;;  %v11590_v38 = vld [vmem:[#allocation9 + $0x164] sm:$0xf]  ;;  %v9065_v42 = vld [vmem:[#allocation9 + $0x98] sm:$0xf0]  ;;  %v11620_v5 = vld [vmem:[#allocation9 + $0x254] sm:$0xf] }
 0x32a   : > { %4704 = vmatpush.bf16.msra.mxu0 %v9116_v26  ;;  %4632 = vmatpush.bf16.msra.mxu2 %v9640_v22  ;;  %v9927_v26 = vld [vmem:[#allocation9 + $0x750] sm:$0xf]  ;;  %v8993_v22 = vld [vmem:[#allocation9 + $0x8] sm:$0xf0]  ;;  %v9289_v33 = vld [vmem:[#allocation9 + $0x258] sm:$0xf0] }
 0x32b   : > { %4660 = vmatmul.bf16.vlgmr.msrb.gmra.mxu0 %v13102_v62  ;;  %v9928_v7 = vor.u32 %v11781_v41, %v9927_v26  ;;  %v8996_v52 = vor.u32 %v11546_v12, %v8993_v22  ;;  %v9903_v35 = vld [vmem:[#allocation9 + $0x720] sm:$0xf]  ;;  %v11775_v23 = vld [vmem:[#allocation9 + $0x724] sm:$0xf0]  ;;  %v9161_v26 = vld [vmem:[#allocation9 + $0x158] sm:$0xf0]  ;;  %v9292_v41 = vor.u32 %v11620_v5, %v9289_v33 }
 0x32c   : > { %4694 = vmatpush.bf16.msrb.mxu3 %v9028_v28  ;;  %4668 = vmatpush.bf16.msrb.mxu1 %v9856_v36  ;;  %v11757_v28 = vld [vmem:[#allocation9 + $0x694] sm:$0xf0]  ;;  %v9823_v36 = vld [vmem:[#allocation9 + $0x680] sm:$0xf]  ;;  %v9281_v15 = vld [vmem:[#allocation9 + $0x248] sm:$0xf0] }
 0x32d   : > { %v9832_v29 = vor.u32 %v11757_v28, %v9831_v25  ;;  %v9824_v30 = vor.u32 %v11755_v34, %v9823_v36  ;;  %v11618_v25 = vld [vmem:[#allocation9 + $0x244] sm:$0xf]  ;;  %v9904_v28 = vor.u32 %v11775_v23, %v9903_v35  ;;  %v11640_v47 = vld [vmem:[#allocation9 + $0x2f4] sm:$0xf]  ;;  %v9369_v12 = vld [vmem:[#allocation9 + $0x2f8] sm:$0xf0] }
 0x32e   : > { %4705 = vmatpush.bf16.msra.mxu0 %v9108_v21  ;;  %4633 = vmatpush.bf16.msra.mxu2 %v9632_v61  ;;  %v9177_v21 = vld [vmem:[#allocation9 + $0x178] sm:$0xf0]  ;;  %v9297_v61 = vld [vmem:[#allocation9 + $0x268] sm:$0xf0]  ;;  %v9895_v22 = vld [vmem:[#allocation9 + $0x710] sm:$0xf]  ;;  %v9284_v49 = vor.u32 %v11618_v25, %v9281_v15 }
 0x32f   : > { %4621 = vmatmul.bf16.vlgmr.msra.gmra.mxu1 %v13105_v59  ;;  %v9180_v44 = vor.u32 %v11592_v43, %v9177_v21  ;;  %v9300_v57 = vor.u32 %v11622_v58, %v9297_v61  ;;  %v11586_v37 = vld [vmem:[#allocation9 + $0x144] sm:$0xf]  ;;  %v11616_v36 = vld [vmem:[#allocation9 + $0x234] sm:$0xf]  ;;  %v9273_v43 = vld [vmem:[#allocation9 + $0x238] sm:$0xf0] }
 0x330   : > { %4695 = vmatpush.bf16.msrb.mxu3 %v9020_v60  ;;  %4669 = vmatpush.bf16.msrb.mxu1 %v9848_v56  ;;  %v11566_v60 = vld [vmem:[#allocation9 + $0xa4] sm:$0xf]  ;;  %v3042_v56 = vpack.c.b16 %v3004_v3, %v3039_v51  ;;  %v9361_v21 = vld [vmem:[#allocation9 + $0x2e8] sm:$0xf0]  ;;  %v11608_v58 = vld [vmem:[#allocation9 + $0x1f4] sm:$0xf]  ;;  %v9276_v51 = vor.u32 %v11616_v36, %v9273_v43 }
 0x331   : > { %4634 = vmatmul.bf16.vlgmr.msra.gmra.mxu2 %v13108_v6  ;;  %v9076_v4 = vor.u32 %v11566_v60, %v9073_v1  ;;  %v9887_v60 = vld [vmem:[#allocation9 + $0x700] sm:$0xf]  ;;  %v11771_v1 = vld [vmem:[#allocation9 + $0x704] sm:$0xf0]  ;;  %v9241_v61 = vld [vmem:[#allocation9 + $0x1f8] sm:$0xf0] }
 0x332   : > { %4678 = vmatpush.bf16.msrb.mxu2 %v9944_v63  ;;  %4706 = vmatpush.bf16.msra.mxu0 %v9100_v40  ;;  %v9911_v63 = vld [vmem:[#allocation9 + $0x730] sm:$0xf]  ;;  %v9169_v40 = vld [vmem:[#allocation9 + $0x168] sm:$0xf0]  ;;  %v11606_v5 = vld [vmem:[#allocation9 + $0x1e4] sm:$0xf] }
 0x333   : > { %v9912_v16 = vor.u32 %v11777_v9, %v9911_v63  ;;  %v9172_v31 = vor.u32 %v11590_v38, %v9169_v40  ;;  %v9145_v63 = vld [vmem:[#allocation9 + $0x138] sm:$0xf0]  ;;  %v9265_v38 = vld [vmem:[#allocation9 + $0x228] sm:$0xf0]  ;;  %v11582_v23 = vld [vmem:[#allocation9 + $0x124] sm:$0xf] }
 0x334   : > { %4696 = vmatpush.bf16.msrb.mxu3 %v9012_v14  ;;  %4670 = vmatpush.bf16.msrb.mxu1 %v9840_v0  ;;  %v11564_v14 = vld [vmem:[#allocation9 + $0x94] sm:$0xf]  ;;  %v9233_v33 = vld [vmem:[#allocation9 + $0x1e8] sm:$0xf0]  ;;  %v11602_v36 = vld [vmem:[#allocation9 + $0x1c4] sm:$0xf] }
 0x335   : > { %v9068_v3 = vor.u32 %v11564_v14, %v9065_v42  ;;  %v11588_v0 = vld [vmem:[#allocation9 + $0x154] sm:$0xf]  ;;  %v9353_v42 = vld [vmem:[#allocation9 + $0x2d8] sm:$0xf0]  ;;  %v9236_v11 = vor.u32 %v11606_v5, %v9233_v33  ;;  %v9345_v25 = vld [vmem:[#allocation9 + $0x2c8] sm:$0xf0] }
 0x336   : > { %4679 = vmatpush.bf16.msrb.mxu2 %v9936_v19  ;;  %4707 = vmatpush.bf16.msra.mxu0 %v9092_v45  ;;  %v13115_v19 = vrot.slane %v3042_v56, 2  ;;  %v11562_v45 = vld [vmem:[#allocation9 + $0x84] sm:$0xf]  ;;  %v9164_v46 = vor.u32 %v11588_v0, %v9161_v26  ;;  %v9888_v56 = vor.u32 %v11771_v1, %v9887_v60  ;;  %v11636_v14 = vld [vmem:[#allocation9 + $0x2d4] sm:$0xf] }
 0x337   : > { %v11612_v0 = vld [vmem:[#allocation9 + $0x214] sm:$0xf]  ;;  %v9257_v26 = vld [vmem:[#allocation9 + $0x218] sm:$0xf0] }
 0x338   : > { %4697 = vmatpush.bf16.msrb.mxu3 %v9004_v39  ;;  %4671 = vmatpush.bf16.msrb.mxu1 %v9832_v29  ;;  %v9057_v39 = vld [vmem:[#allocation9 + $0x88] sm:$0xf0]  ;;  %v2943_v29 = vld [vmem:[#allocation2 + $0x8] sm:$0xc]  ;;  %v9260_v15 = vor.u32 %v11612_v0, %v9257_v26  ;;  %v9545_v33 = vld [vmem:[#allocation9 + $0x458] sm:$0xf0] }
 0x339   : > { %v9060_v2 = vor.u32 %v11562_v45, %v9057_v39  ;;  %v11604_v39 = vld [vmem:[#allocation9 + $0x1d4] sm:$0xf] }
 0x33a   : > { %4680 = vmatpush.bf16.msrb.mxu2 %v9928_v7  ;;  %4708 = vmatpush.bf16.msra.mxu0 %v9084_v50  ;;  %v11773_v7 = vld [vmem:[#allocation9 + $0x714] sm:$0xf0]  ;;  %v9153_v50 = vld [vmem:[#allocation9 + $0x148] sm:$0xf0]  ;;  %v11652_v26 = vld [vmem:[#allocation9 + $0x354] sm:$0xf] }
 0x33b   : > { %v9896_v34 = vor.u32 %v11773_v7, %v9895_v22  ;;  %v11610_v7 = vld [vmem:[#allocation9 + $0x204] sm:$0xf] }
 0x33c   : > { %4698 = vmatpush.bf16.msrb.mxu3 %v8996_v52  ;;  %4672 = vmatpush.bf16.msrb.mxu1 %v9824_v30  ;;  %v9372_v52 = vor.u32 %v11640_v47, %v9369_v12  ;;  %v11584_v30 = vld [vmem:[#allocation9 + $0x134] sm:$0xf]  ;;  %v9129_v12 = vld [vmem:[#allocation9 + $0x118] sm:$0xf0] }
 0x33d   : > { %v11580_v47 = vld [vmem:[#allocation9 + $0x114] sm:$0xf] }
 0x33e   : > { %4681 = vmatpush.bf16.msrb.mxu2 %v9920_v55  ;;  %4709 = vmatpush.bf16.msra.mxu0 %v9076_v4  ;;  %v9156_v55 = vor.u32 %v11586_v37, %v9153_v50  ;;  %v11614_v4 = vld [vmem:[#allocation9 + $0x224] sm:$0xf]  ;;  %v11632_v37 = vld [vmem:[#allocation9 + $0x2b4] sm:$0xf]  ;;  %v9337_v50 = vld [vmem:[#allocation9 + $0x2b8] sm:$0xf0] }
 0x33f   : > { %4699 = vmatmul.bf16.vlgmr.msrb.gmra.mxu3 %v13029_v10  ;;  %4673 = vmatmul.bf16.vlgmr.msrb.gmra.mxu1 %v13115_v19  ;;  %v9268_v35 = vor.u32 %v11614_v4, %v9265_v38  ;;  %v9340_v1 = vor.u32 %v11632_v37, %v9337_v50  ;;  %v9209_v4 = vld [vmem:[#allocation9 + $0x1b8] sm:$0xf0]  ;;  %v11650_v37 = vld [vmem:[#allocation9 + $0x344] sm:$0xf]  ;;  %v9409_v50 = vld [vmem:[#allocation9 + $0x348] sm:$0xf0] }
 0x340   : > { %4743 = vmatpush.bf16.msra.mxu3 %v9308_v32  ;;  %4717 = vmatpush.bf16.msra.mxu1 %v9180_v44  ;;  %v11638_v32 = vld [vmem:[#allocation9 + $0x2e4] sm:$0xf]  ;;  %v3040_v44 = vunpack.c.l.b16 %v2943_v29 }
 0x341   : > { %v9364_v9 = vor.u32 %v11638_v32, %v9361_v21  ;;  %v11578_v32 = vld [vmem:[#allocation9 + $0x104] sm:$0xf]  ;;  %v9121_v21 = vld [vmem:[#allocation9 + $0x108] sm:$0xf0] }
 0x342   : > { %4682 = vmatpush.bf16.msrb.mxu2 %v9912_v16  ;;  %4710 = vmatpush.bf16.msra.mxu0 %v9068_v3  ;;  %v3043_v40 = vpack.c.b16 %v3005_v48, %v3040_v44  ;;  %v9148_v16 = vor.u32 %v11584_v30, %v9145_v63  ;;  %v9356_v3 = vor.u32 %v11636_v14, %v9353_v42  ;;  %v11634_v48 = vld [vmem:[#allocation9 + $0x2c4] sm:$0xf]  ;;  %v9553_v30 = vld [vmem:[#allocation9 + $0x468] sm:$0xf0] }
 0x343   : > { %v9348_v22 = vor.u32 %v11634_v48, %v9345_v25  ;;  %v11630_v63 = vld [vmem:[#allocation9 + $0x2a4] sm:$0xf]  ;;  %v9124_v44 = vor.u32 %v11578_v32, %v9121_v21  ;;  %v9425_v42 = vld [vmem:[#allocation9 + $0x368] sm:$0xf0]  ;;  %v9417_v25 = vld [vmem:[#allocation9 + $0x358] sm:$0xf0] }
 0x344   : > { %4744 = vmatpush.bf16.msra.mxu3 %v9300_v57  ;;  %4718 = vmatpush.bf16.msra.mxu1 %v9172_v31  ;;  %v9244_v57 = vor.u32 %v11608_v58, %v9241_v61  ;;  %v9137_v31 = vld [vmem:[#allocation9 + $0x128] sm:$0xf0]  ;;  %v9433_v58 = vld [vmem:[#allocation9 + $0x378] sm:$0xf0]  ;;  %v11686_v61 = vld [vmem:[#allocation9 + $0x464] sm:$0xf] }
 0x345   : > { %v9140_v45 = vor.u32 %v11582_v23, %v9137_v31  ;;  %v11654_v14 = vld [vmem:[#allocation9 + $0x364] sm:$0xf]  ;;  %v9321_v23 = vld [vmem:[#allocation9 + $0x298] sm:$0xf0] }
 0x346   : > { %4683 = vmatpush.bf16.msrb.mxu2 %v9904_v28  ;;  %4711 = vmatpush.bf16.msra.mxu0 %v9060_v2  ;;  %v9225_v28 = vld [vmem:[#allocation9 + $0x1d8] sm:$0xf0]  ;;  %v11688_v2 = vld [vmem:[#allocation9 + $0x474] sm:$0xf]  ;;  %v11598_v31 = vld [vmem:[#allocation9 + $0x1a4] sm:$0xf]  ;;  %v9428_v0 = vor.u32 %v11654_v14, %v9425_v42 }
 0x347   : > { %v9228_v29 = vor.u32 %v11604_v39, %v9225_v28  ;;  %v9537_v39 = vld [vmem:[#allocation9 + $0x448] sm:$0xf0]  ;;  %v11594_v32 = vld [vmem:[#allocation9 + $0x184] sm:$0xf]  ;;  %v11700_v14 = vld [vmem:[#allocation9 + $0x4d4] sm:$0xf] }
 0x348   : > { %4745 = vmatpush.bf16.msra.mxu3 %v9292_v41  ;;  %4719 = vmatpush.bf16.msra.mxu1 %v9164_v46  ;;  %v13121_v41 = vrot.slane %v3043_v40, 2  ;;  %v9249_v46 = vld [vmem:[#allocation9 + $0x208] sm:$0xf0]  ;;  %v13126_v21 = vld [vmem:[#allocation12] sm:$0x3] }
 0x349   : > { %4712 = vmatmul.bf16.vlgmr.msra.gmra.mxu0 %v13033_v53  ;;  %v9252_v43 = vor.u32 %v11610_v7, %v9249_v46  ;;  %v11704_v7 = vld [vmem:[#allocation9 + $0x4f4] sm:$0xf]  ;;  %v9625_v46 = vld [vmem:[#allocation9 + $0x4f8] sm:$0xf0] }
 0x34a   : > { %4756 = vmatpush.bf16.msrb.mxu0 %v9372_v52  ;;  %4684 = vmatpush.bf16.msrb.mxu2 %v9896_v34  ;;  %v9132_v52 = vor.u32 %v11580_v47, %v9129_v12  ;;  %v9217_v34 = vld [vmem:[#allocation9 + $0x1c8] sm:$0xf0]  ;;  %v11626_v47 = vld [vmem:[#allocation9 + $0x284] sm:$0xf]  ;;  %v9609_v42 = vld [vmem:[#allocation9 + $0x4d8] sm:$0xf0] }
 0x34b   : > { %v9313_v12 = vld [vmem:[#allocation9 + $0x288] sm:$0xf0] }
 0x34c   : > { %4746 = vmatpush.bf16.msra.mxu3 %v9284_v49  ;;  %4720 = vmatpush.bf16.msra.mxu1 %v9156_v55  ;;  %v9561_v49 = vld [vmem:[#allocation9 + $0x478] sm:$0xf0]  ;;  %v11656_v55 = vld [vmem:[#allocation9 + $0x374] sm:$0xf] }
 0x34d   : > { %v9564_v60 = vor.u32 %v11688_v2, %v9561_v49  ;;  %v9436_v38 = vor.u32 %v11656_v55, %v9433_v58  ;;  %v9420_v2 = vor.u32 %v11652_v26, %v9417_v25  ;;  %v9316_v49 = vor.u32 %v11626_v47, %v9313_v12  ;;  %v9617_v55 = vld [vmem:[#allocation9 + $0x4e8] sm:$0xf0]  ;;  %v9513_v25 = vld [vmem:[#allocation9 + $0x418] sm:$0xf0]  ;;  %v11668_v12 = vld [vmem:[#allocation9 + $0x3d4] sm:$0xf] }
 0x34e   : > { %4757 = vmatpush.bf16.msrb.mxu0 %v9364_v9  ;;  %4685 = vmatpush.bf16.msrb.mxu2 %v9888_v56  ;;  %v9329_v9 = vld [vmem:[#allocation9 + $0x2a8] sm:$0xf0]  ;;  %v11600_v56 = vld [vmem:[#allocation9 + $0x1b4] sm:$0xf]  ;;  %v9412_v58 = vor.u32 %v11650_v37, %v9409_v50 }
 0x34f   : > { %v9332_v40 = vor.u32 %v11630_v63, %v9329_v9  ;;  %v9212_v5 = vor.u32 %v11600_v56, %v9209_v4  ;;  %v11648_v63 = vld [vmem:[#allocation9 + $0x334] sm:$0xf]  ;;  %v9401_v9 = vld [vmem:[#allocation9 + $0x338] sm:$0xf0]  ;;  %v9505_v37 = vld [vmem:[#allocation9 + $0x408] sm:$0xf0] }
 0x350   : > { %4747 = vmatpush.bf16.msra.mxu3 %v9276_v51  ;;  %4721 = vmatpush.bf16.msra.mxu1 %v9148_v16  ;;  %v9220_v51 = vor.u32 %v11602_v36, %v9217_v34  ;;  %v11684_v16 = vld [vmem:[#allocation9 + $0x454] sm:$0xf]  ;;  %v9628_v34 = vor.u32 %v11704_v7, %v9625_v46 }
 0x351   : > { %4686 = vmatmul.bf16.vlgmr.msrb.gmra.mxu2 %v13121_v41  ;;  %v11644_v46 = vld [vmem:[#allocation9 + $0x314] sm:$0xf] }
 0x352   : > { %4730 = vmatpush.bf16.msra.mxu2 %v9244_v57  ;;  %4758 = vmatpush.bf16.msrb.mxu0 %v9356_v3  ;;  %v9556_v57 = vor.u32 %v11686_v61, %v9553_v30  ;;  %v9201_v3 = vld [vmem:[#allocation9 + $0x1a8] sm:$0xf0]  ;;  %v11672_v61 = vld [vmem:[#allocation9 + $0x3f4] sm:$0xf] }
 0x353   : > { %v9204_v28 = vor.u32 %v11598_v31, %v9201_v3  ;;  %v11646_v3 = vld [vmem:[#allocation9 + $0x324] sm:$0xf]  ;;  %v11752_v50 = vld [vmem:[#allocation9 + $0x674] sm:$0xf] }
 0x354   : > { %4748 = vmatpush.bf16.msra.mxu3 %v9268_v35  ;;  %4722 = vmatpush.bf16.msra.mxu1 %v9140_v45  ;;  %v11628_v35 = vld [vmem:[#allocation9 + $0x294] sm:$0xf]  ;;  %v11682_v45 = vld [vmem:[#allocation9 + $0x444] sm:$0xf] }
 0x355   : > { %v9324_v48 = vor.u32 %v11628_v35, %v9321_v23 }
 0x356   : > { %4731 = vmatpush.bf16.msra.mxu2 %v9236_v11  ;;  %4759 = vmatpush.bf16.msrb.mxu0 %v9348_v22  ;;  %v9548_v11 = vor.u32 %v11684_v16, %v9545_v33  ;;  %v9193_v22 = vld [vmem:[#allocation9 + $0x198] sm:$0xf0]  ;;  %v9404_v16 = vor.u32 %v11648_v63, %v9401_v9  ;;  %v9489_v33 = vld [vmem:[#allocation9 + $0x3e8] sm:$0xf0] }
 0x358   : > { %4749 = vmatpush.bf16.msra.mxu3 %v9260_v15  ;;  %4723 = vmatpush.bf16.msra.mxu1 %v9132_v52  ;;  %v11596_v15 = vld [vmem:[#allocation9 + $0x194] sm:$0xf] }
 0x359   : > { %v11680_v52 = vld [vmem:[#allocation9 + $0x434] sm:$0xf]  ;;  %v9196_v36 = vor.u32 %v11596_v15, %v9193_v22  ;;  %v9601_v15 = vld [vmem:[#allocation9 + $0x4c8] sm:$0xf0]  ;;  %v9481_v22 = vld [vmem:[#allocation9 + $0x3d8] sm:$0xf0] }
 0x35a   : > { %4732 = vmatpush.bf16.msra.mxu2 %v9228_v29  ;;  %4760 = vmatpush.bf16.msrb.mxu0 %v9340_v1  ;;  %v9540_v29 = vor.u32 %v11682_v45, %v9537_v39  ;;  %v11702_v1 = vld [vmem:[#allocation9 + $0x4e4] sm:$0xf] }
 0x35b   : > { %v9620_v4 = vor.u32 %v11702_v1, %v9617_v55  ;;  %v9473_v1 = vld [vmem:[#allocation9 + $0x3c8] sm:$0xf0] }
 0x35c   : > { %4750 = vmatpush.bf16.msra.mxu3 %v9252_v43  ;;  %4724 = vmatpush.bf16.msra.mxu1 %v9124_v44  ;;  %v9529_v43 = vld [vmem:[#allocation9 + $0x438] sm:$0xf0]  ;;  %v3292_v44 = vperm.slane %v13126_v21, 0 }
 0x35d   : > { %v9532_v30 = vor.u32 %v11680_v52, %v9529_v43  ;;  %v9484_v52 = vor.u32 %v11668_v12, %v9481_v22  ;;  %v9593_v43 = vld [vmem:[#allocation9 + $0x4b8] sm:$0xf0]  ;;  %v11716_v12 = vld [vmem:[#allocation9 + $0x554] sm:$0xf] }
 0x35e   : > { %4733 = vmatpush.bf16.msra.mxu2 %v9220_v51  ;;  %4761 = vmatpush.bf16.msrb.mxu0 %v9332_v40  ;;  %v9497_v51 = vld [vmem:[#allocation9 + $0x3f8] sm:$0xf0] }
 0x35f   : > { %4751 = vmatmul.bf16.vlgmr.msra.gmra.mxu3 %v13049_v20  ;;  %4725 = vmatmul.bf16.vlgmr.msra.gmra.mxu1 %v13068_v54  ;;  %v9500_v40 = vor.u32 %v11672_v61, %v9497_v51  ;;  %v11642_v51 = vld [vmem:[#allocation9 + $0x304] sm:$0xf] }
 0x360   : > { %4795 = vmatpush.bf16.msrb.mxu3 %v9564_v60  ;;  %4769 = vmatpush.bf16.msrb.mxu1 %v9436_v38  ;;  %v9185_v60 = vld [vmem:[#allocation9 + $0x188] sm:$0xf0]  ;;  %v11678_v38 = vld [vmem:[#allocation9 + $0x424] sm:$0xf] }
 0x361   : > { %v9188_v56 = vor.u32 %v11594_v32, %v9185_v60  ;;  %v11666_v60 = vld [vmem:[#allocation9 + $0x3c4] sm:$0xf] }
 0x362   : > { %4734 = vmatpush.bf16.msra.mxu2 %v9212_v5  ;;  %4762 = vmatpush.bf16.msrb.mxu0 %v9324_v48  ;;  %v11670_v5 = vld [vmem:[#allocation9 + $0x3e4] sm:$0xf]  ;;  %v11676_v48 = vld [vmem:[#allocation9 + $0x414] sm:$0xf] }
 0x363   : > { %v9492_v45 = vor.u32 %v11670_v5, %v9489_v33  ;;  %v9516_v7 = vor.u32 %v11676_v48, %v9513_v25  ;;  %v11664_v5 = vld [vmem:[#allocation9 + $0x3b4] sm:$0xf]  ;;  %v9465_v33 = vld [vmem:[#allocation9 + $0x3b8] sm:$0xf0] }
 0x364   : > { %4796 = vmatpush.bf16.msrb.mxu3 %v9556_v57  ;;  %4770 = vmatpush.bf16.msrb.mxu1 %v9428_v0  ;;  %v9521_v57 = vld [vmem:[#allocation9 + $0x428] sm:$0xf0]  ;;  %v9801_v48 = vld [vmem:[#allocation9 + $0x658] sm:$0xf0]  ;;  %v11692_v25 = vld [vmem:[#allocation9 + $0x494] sm:$0xf] }
 0x365   : > { %v9524_v31 = vor.u32 %v11678_v38, %v9521_v57  ;;  %v9393_v0 = vld [vmem:[#allocation9 + $0x328] sm:$0xf0]  ;;  %v11750_v38 = vld [vmem:[#allocation9 + $0x664] sm:$0xf]  ;;  %v9476_v57 = vor.u32 %v11666_v60, %v9473_v1 }
 0x366   : > { %4735 = vmatpush.bf16.msra.mxu2 %v9204_v28  ;;  %4763 = vmatpush.bf16.msrb.mxu0 %v9316_v49  ;;  %v4505_v35 = vpop.f32.mrf.mxu0  ;;  %v4518_v23 = vpop.f32.mrf.mxu1  ;;  %v11698_v28 = vld [vmem:[#allocation9 + $0x4c4] sm:$0xf]  ;;  %v9396_v47 = vor.u32 %v11646_v3, %v9393_v0  ;;  %v9681_v0 = vld [vmem:[#allocation9 + $0x568] sm:$0xf0] }
 0x367   : > { %v4506_v26 = vadd.f32 %v4505_v35, %v3292_v44  ;;  %v11674_v49 = vld [vmem:[#allocation9 + $0x404] sm:$0xf] }
 0x368   : > { %4797 = vmatpush.bf16.msrb.mxu3 %v9548_v11  ;;  %4771 = vmatpush.bf16.msrb.mxu1 %v9420_v2  ;;  %v9612_v11 = vor.u32 %v11700_v14, %v9609_v42  ;;  %v9385_v2 = vld [vmem:[#allocation9 + $0x318] sm:$0xf0]  ;;  %v9508_v61 = vor.u32 %v11674_v49, %v9505_v37  ;;  %v11694_v14 = vld [vmem:[#allocation9 + $0x4a4] sm:$0xf]  ;;  %v9585_v42 = vld [vmem:[#allocation9 + $0x4a8] sm:$0xf0] }
 0x369   : > { %4764 = vmatmul.bf16.vlgmr.msrb.gmra.mxu0 %v13087_v18  ;;  %v13132_v39 = vadd.f32 %v4518_v23, %v4506_v26  ;;  %v9388_v32 = vor.u32 %v11644_v46, %v9385_v2  ;;  %v11718_v3 = vld [vmem:[#allocation9 + $0x564] sm:$0xf]  ;;  %v11748_v26 = vld [vmem:[#allocation9 + $0x654] sm:$0xf]  ;;  %v9673_v46 = vld [vmem:[#allocation9 + $0x558] sm:$0xf0] }
 0x36a   : > { %4736 = vmatpush.bf16.msra.mxu2 %v9196_v36  ;;  %4808 = vmatpush.bf16.msra.mxu0 %v9628_v34  ;;  %v9817_v36 = vld [vmem:[#allocation9 + $0x678] sm:$0xf0]  ;;  %v11696_v34 = vld [vmem:[#allocation9 + $0x4b4] sm:$0xf]  ;;  %v9804_v22 = vor.u32 %v11748_v26, %v9801_v48  ;;  %v11746_v2 = vld [vmem:[#allocation9 + $0x644] sm:$0xf] }
 0x36b   : > { %v9820_v63 = vor.u32 %v11752_v50, %v9817_v36  ;;  %v9596_v9 = vor.u32 %v11696_v34, %v9593_v43  ;;  %v11660_v37 = vld [vmem:[#allocation9 + $0x394] sm:$0xf]  ;;  %v11690_v50 = vld [vmem:[#allocation9 + $0x484] sm:$0xf]  ;;  %v9449_v36 = vld [vmem:[#allocation9 + $0x398] sm:$0xf0] }
 0x36c   : > { %4798 = vmatpush.bf16.msrb.mxu3 %v9540_v29  ;;  %4772 = vmatpush.bf16.msrb.mxu1 %v9412_v58  ;;  %v9604_v29 = vor.u32 %v11698_v28, %v9601_v15  ;;  %v11662_v28 = vld [vmem:[#allocation9 + $0x3a4] sm:$0xf]  ;;  %v9457_v15 = vld [vmem:[#allocation9 + $0x3a8] sm:$0xf0]  ;;  %v11768_v34 = vld [vmem:[#allocation9 + $0x6f4] sm:$0xf] }
 0x36d   : > { %v9460_v49 = vor.u32 %v11662_v28, %v9457_v15  ;;  %v9881_v43 = vld [vmem:[#allocation9 + $0x6f8] sm:$0xf0]  ;;  %v9745_v28 = vld [vmem:[#allocation9 + $0x5e8] sm:$0xf0] }
 0x36e   : > { %4737 = vmatpush.bf16.msra.mxu2 %v9188_v56  ;;  %4809 = vmatpush.bf16.msra.mxu0 %v9620_v4  ;;  %v4507_v55 = vpop.f32.mrf.mxu0  ;;  %v4520_v58 = vpop.f32.mrf.mxu1  ;;  %v11720_v56 = vld [vmem:[#allocation9 + $0x574] sm:$0xf]  ;;  %v9689_v4 = vld [vmem:[#allocation9 + $0x578] sm:$0xf0] }
 0x36f   : > { %v9692_v35 = vor.u32 %v11720_v56, %v9689_v4  ;;  %v11714_v58 = vld [vmem:[#allocation9 + $0x544] sm:$0xf]  ;;  %v9441_v4 = vld [vmem:[#allocation9 + $0x388] sm:$0xf0]  ;;  %v9865_v48 = vld [vmem:[#allocation9 + $0x6d8] sm:$0xf0] }
 0x370   : > { %4799 = vmatpush.bf16.msrb.mxu3 %v9532_v30  ;;  %4773 = vmatpush.bf16.msrb.mxu1 %v9404_v16  ;;  %v9377_v30 = vld [vmem:[#allocation9 + $0x308] sm:$0xf0]  ;;  %v11658_v56 = vld [vmem:[#allocation9 + $0x384] sm:$0xf] }
 0x371   : > { %4738 = vmatmul.bf16.vlgmr.msra.gmra.mxu2 %v13047_v13  ;;  %v9380_v16 = vor.u32 %v11642_v51, %v9377_v30  ;;  %v9452_v51 = vor.u32 %v11660_v37, %v9449_v36  ;;  %v9884_v30 = vor.u32 %v11768_v34, %v9881_v43  ;;  %v9857_v37 = vld [vmem:[#allocation9 + $0x6c8] sm:$0xf0]  ;;  %v9737_v36 = vld [vmem:[#allocation9 + $0x5d8] sm:$0xf0]  ;;  %v11708_v43 = vld [vmem:[#allocation9 + $0x514] sm:$0xf] }
 0x372   : > { %4782 = vmatpush.bf16.msrb.mxu2 %v9500_v40  ;;  %4810 = vmatpush.bf16.msra.mxu0 %v9612_v11  ;;  %v9809_v40 = vld [vmem:[#allocation9 + $0x668] sm:$0xf0]  ;;  %v9468_v11 = vor.u32 %v11664_v5, %v9465_v33  ;;  %v11712_v5 = vld [vmem:[#allocation9 + $0x534] sm:$0xf]  ;;  %v9657_v33 = vld [vmem:[#allocation9 + $0x538] sm:$0xf0] }
 0x373   : > { %v9812_v23 = vor.u32 %v11750_v38, %v9809_v40  ;;  %v11766_v38 = vld [vmem:[#allocation9 + $0x6e4] sm:$0xf] }
 0x374   : > { %4800 = vmatpush.bf16.msrb.mxu3 %v9524_v31  ;;  %4774 = vmatpush.bf16.msrb.mxu1 %v9396_v47  ;;  %v9588_v31 = vor.u32 %v11694_v14, %v9585_v42  ;;  %v9684_v47 = vor.u32 %v11718_v3, %v9681_v0  ;;  %v11736_v14 = vld [vmem:[#allocation9 + $0x5f4] sm:$0xf]  ;;  %v9753_v42 = vld [vmem:[#allocation9 + $0x5f8] sm:$0xf0]  ;;  %v9777_v3 = vld [vmem:[#allocation9 + $0x628] sm:$0xf0] }
 0x375   : > { %v9756_v26 = vor.u32 %v11736_v14, %v9753_v42  ;;  %v11784_v42 = vld [vmem:[#allocation9 + $0x774] sm:$0xf] }
 0x376   : > { %4783 = vmatpush.bf16.msrb.mxu2 %v9492_v45  ;;  %4811 = vmatpush.bf16.msra.mxu0 %v9604_v29  ;;  %v9577_v45 = vld [vmem:[#allocation9 + $0x498] sm:$0xf0]  ;;  %v9793_v29 = vld [vmem:[#allocation9 + $0x648] sm:$0xf0] }
 0x377   : > { %v9796_v1 = vor.u32 %v11746_v2, %v9793_v29  ;;  %v9769_v2 = vld [vmem:[#allocation9 + $0x618] sm:$0xf0] }
 0x378   : > { %4801 = vmatpush.bf16.msrb.mxu3 %v9516_v7  ;;  %4775 = vmatpush.bf16.msrb.mxu1 %v9388_v32  ;;  %v9580_v7 = vor.u32 %v11692_v25, %v9577_v45  ;;  %v9676_v32 = vor.u32 %v11716_v12, %v9673_v46  ;;  %v9660_v25 = vor.u32 %v11712_v5, %v9657_v33  ;;  %v11734_v45 = vld [vmem:[#allocation9 + $0x5e4] sm:$0xf]  ;;  %v11740_v46 = vld [vmem:[#allocation9 + $0x614] sm:$0xf] }
 0x379   : > { %v11710_v12 = vld [vmem:[#allocation9 + $0x524] sm:$0xf]  ;;  %v9748_v29 = vor.u32 %v11734_v45, %v9745_v28  ;;  %v9772_v34 = vor.u32 %v11740_v46, %v9769_v2 }
 0x37a   : > { %4784 = vmatpush.bf16.msrb.mxu2 %v9484_v52  ;;  %4812 = vmatpush.bf16.msra.mxu0 %v9596_v9  ;;  %v9569_v52 = vld [vmem:[#allocation9 + $0x488] sm:$0xf0]  ;;  %v9785_v9 = vld [vmem:[#allocation9 + $0x638] sm:$0xf0]  ;;  %v11758_v33 = vld [vmem:[#allocation9 + $0x6a4] sm:$0xf] }
 0x37b   : > { %v9572_v55 = vor.u32 %v11690_v50, %v9569_v52  ;;  %v11732_v52 = vld [vmem:[#allocation9 + $0x5d4] sm:$0xf] }
 0x37c   : > { %4802 = vmatpush.bf16.msrb.mxu3 %v9508_v61  ;;  %4776 = vmatpush.bf16.msrb.mxu1 %v9380_v16  ;;  %v13137_v60 = vpop.f32.mrf.mxu0  ;;  %v9665_v61 = vld [vmem:[#allocation9 + $0x548] sm:$0xf0] }
 0x37d   : > { %v9668_v40 = vor.u32 %v11714_v58, %v9665_v61  ;;  %v9761_v58 = vld [vmem:[#allocation9 + $0x608] sm:$0xf0] }
 0x37e   : > { %4785 = vmatpush.bf16.msrb.mxu2 %v9476_v57  ;;  %4813 = vmatpush.bf16.msra.mxu0 %v9588_v31  ;;  %v9873_v57 = vld [vmem:[#allocation9 + $0x6e8] sm:$0xf0]  ;;  %v11742_v31 = vld [vmem:[#allocation9 + $0x624] sm:$0xf] }
 0x37f   : > { %4803 = vmatmul.bf16.vlgmr.msrb.gmra.mxu3 %v13083_v27  ;;  %4777 = vmatmul.bf16.vlgmr.msrb.gmra.mxu1 %v13089_v8 }
 0x380   : > { %4847 = vmatpush.bf16.msra.mxu3 %v9820_v63  ;;  %4821 = vmatpush.bf16.msra.mxu1 %v9692_v35  ;;  %v11744_v63 = vld [vmem:[#allocation9 + $0x634] sm:$0xf]  ;;  %v9444_v35 = vor.u32 %v11658_v56, %v9441_v4  ;;  %v11730_v56 = vld [vmem:[#allocation9 + $0x5c4] sm:$0xf]  ;;  %v9729_v4 = vld [vmem:[#allocation9 + $0x5c8] sm:$0xf0] }
 0x381   : > { %v9788_v16 = vor.u32 %v11744_v63, %v9785_v9  ;;  %v9849_v63 = vld [vmem:[#allocation9 + $0x6b8] sm:$0xf0]  ;;  %v9732_v5 = vor.u32 %v11730_v56, %v9729_v4 }
 0x382   : > { %4786 = vmatpush.bf16.msrb.mxu2 %v9468_v11  ;;  %4814 = vmatpush.bf16.msra.mxu0 %v9580_v7  ;;  %v13139_v0 = vpop.f32.mrf.mxu3  ;;  %v11764_v11 = vld [vmem:[#allocation9 + $0x6d4] sm:$0xf] }
 0x383   : > { %v9868_v7 = vor.u32 %v11764_v11, %v9865_v48  ;;  %v11782_v48 = vld [vmem:[#allocation9 + $0x764] sm:$0xf] }
 0x384   : > { %4848 = vmatpush.bf16.msra.mxu3 %v9812_v23  ;;  %4822 = vmatpush.bf16.msra.mxu1 %v9684_v47  ;;  %v9876_v23 = vor.u32 %v11766_v38, %v9873_v57  ;;  %v4559_v15 = vpop.f32.mrf.mxu0  ;;  %v9780_v47 = vor.u32 %v11742_v31, %v9777_v3  ;;  %v11706_v57 = vld [vmem:[#allocation9 + $0x504] sm:$0xf]  ;;  %v11728_v31 = vld [vmem:[#allocation9 + $0x5b4] sm:$0xf]  ;;  %v9721_v3 = vld [vmem:[#allocation9 + $0x5b8] sm:$0xf0] }
 0x385   : > { %v9724_v28 = vor.u32 %v11728_v31, %v9721_v3  ;;  %v11756_v15 = vld [vmem:[#allocation9 + $0x694] sm:$0xf]  ;;  %v11797_v31 = vld [vmem:[#allocation9 + $0x7d4] sm:$0xf0] }
 0x386   : > { %4787 = vmatpush.bf16.msrb.mxu2 %v9460_v49  ;;  %4815 = vmatpush.bf16.msra.mxu0 %v9572_v55  ;;  %v11762_v49 = vld [vmem:[#allocation9 + $0x6c4] sm:$0xf] }
 0x387   : > { %v11738_v55 = vld [vmem:[#allocation9 + $0x604] sm:$0xf] }
 0x388   : > { %4849 = vmatpush.bf16.msra.mxu3 %v9804_v22  ;;  %4823 = vmatpush.bf16.msra.mxu1 %v9676_v32  ;;  %v9649_v22 = vld [vmem:[#allocation9 + $0x528] sm:$0xf0]  ;;  %v9641_v32 = vld [vmem:[#allocation9 + $0x518] sm:$0xf0]  ;;  %v9764_v38 = vor.u32 %v11738_v55, %v9761_v58  ;;  %v11801_v55 = vld [vmem:[#allocation9 + $0x7f4] sm:$0xf0] }
 0x389   : > { %4816 = vmatmul.bf16.vlgmr.msra.gmra.mxu0 %v13105_v59  ;;  %v9652_v50 = vor.u32 %v11710_v12, %v9649_v22  ;;  %v9644_v9 = vor.u32 %v11708_v43, %v9641_v32  ;;  %v11726_v12 = vld [vmem:[#allocation9 + $0x5a4] sm:$0xf]  ;;  %v9713_v22 = vld [vmem:[#allocation9 + $0x5a8] sm:$0xf0]  ;;  %v9705_v32 = vld [vmem:[#allocation9 + $0x598] sm:$0xf0] }
 0x38a   : > { %4788 = vmatpush.bf16.msrb.mxu2 %v9452_v51  ;;  %4860 = vmatpush.bf16.msrb.mxu0 %v9884_v30  ;;  %v4546_v61 = vpop.f32.mrf.mxu3  ;;  %v9740_v51 = vor.u32 %v11732_v52, %v9737_v36  ;;  %v11760_v30 = vld [vmem:[#allocation9 + $0x6b4] sm:$0xf]  ;;  %v11754_v36 = vld [vmem:[#allocation9 + $0x684] sm:$0xf] }
 0x38b   : > { %v9852_v14 = vor.u32 %v11760_v30, %v9849_v63  ;;  %v11724_v52 = vld [vmem:[#allocation9 + $0x594] sm:$0xf]  ;;  %v11778_v30 = vld [vmem:[#allocation9 + $0x744] sm:$0xf]  ;;  %v9921_v63 = vld [vmem:[#allocation9 + $0x748] sm:$0xf0] }
 0x38c   : > { %4850 = vmatpush.bf16.msra.mxu3 %v9796_v1  ;;  %4824 = vmatpush.bf16.msra.mxu1 %v9668_v40  ;;  %v9860_v1 = vor.u32 %v11762_v49, %v9857_v37  ;;  %v9633_v40 = vld [vmem:[#allocation9 + $0x508] sm:$0xf0]  ;;  %v11780_v49 = vld [vmem:[#allocation9 + $0x754] sm:$0xf]  ;;  %v9929_v37 = vld [vmem:[#allocation9 + $0x758] sm:$0xf0]  ;;  %v9708_v56 = vor.u32 %v11724_v52, %v9705_v32 }
 0x38d   : > { %v10075_v32 = vld [vmem:[#allocation9 + $0x870] sm:$0xf] }
 0x38e   : > { %4789 = vmatpush.bf16.msrb.mxu2 %v9444_v35  ;;  %4861 = vmatpush.bf16.msrb.mxu0 %v9876_v23  ;;  %v9841_v35 = vld [vmem:[#allocation9 + $0x6a8] sm:$0xf0]  ;;  %v9636_v23 = vor.u32 %v11706_v57, %v9633_v40  ;;  %v10003_v57 = vld [vmem:[#allocation9 + $0x7e0] sm:$0xf]  ;;  %v11799_v40 = vld [vmem:[#allocation9 + $0x7e4] sm:$0xf0] }
 0x38f   : > { %v9844_v11 = vor.u32 %v11758_v33, %v9841_v35  ;;  %v10004_v35 = vor.u32 %v11799_v40, %v10003_v57  ;;  %v9963_v57 = vld [vmem:[#allocation9 + $0x790] sm:$0xf]  ;;  %v11789_v40 = vld [vmem:[#allocation9 + $0x794] sm:$0xf0] }
 0x390   : > { %4851 = vmatpush.bf16.msra.mxu3 %v9788_v16  ;;  %4825 = vmatpush.bf16.msra.mxu1 %v9660_v25  ;;  %v9945_v16 = vld [vmem:[#allocation9 + $0x778] sm:$0xf0]  ;;  %v9937_v25 = vld [vmem:[#allocation9 + $0x768] sm:$0xf0] }
 0x391   : > { %4790 = vmatmul.bf16.vlgmr.msrb.gmra.mxu2 %v13065_v24  ;;  %v9940_v46 = vor.u32 %v11782_v48, %v9937_v25  ;;  %v9905_v48 = vld [vmem:[#allocation9 + $0x728] sm:$0xf0] }
 0x392   : > { %4834 = vmatpush.bf16.msra.mxu2 %v9756_v26  ;;  %4862 = vmatpush.bf16.msrb.mxu0 %v9868_v7  ;;  %v9948_v26 = vor.u32 %v11784_v42, %v9945_v16  ;;  %v13143_v45 = vpop.f32.mrf.mxu3  ;;  %v9924_v16 = vor.u32 %v11778_v30, %v9921_v63 }
 0x394   : > { %4852 = vmatpush.bf16.msra.mxu3 %v9780_v47  ;;  %4826 = vmatpush.bf16.msra.mxu1 %v9652_v50  ;;  %v9833_v47 = vld [vmem:[#allocation9 + $0x698] sm:$0xf0]  ;;  %v4531_v7 = vpop.f32.mrf.mxu2  ;;  %v9716_v50 = vor.u32 %v11726_v12, %v9713_v22 }
 0x395   : > { %v4532_v2 = vadd.f32 %v4531_v7, %v13132_v39  ;;  %v9932_v39 = vor.u32 %v11780_v49, %v9929_v37  ;;  %v9979_v49 = vld [vmem:[#allocation9 + $0x7b0] sm:$0xf]  ;;  %v11793_v37 = vld [vmem:[#allocation9 + $0x7b4] sm:$0xf0] }
 0x396   : > { %4835 = vmatpush.bf16.msra.mxu2 %v9748_v29  ;;  %4863 = vmatpush.bf16.msrb.mxu0 %v9860_v1  ;;  %v9836_v29 = vor.u32 %v11756_v15, %v9833_v47  ;;  %v10011_v1 = vld [vmem:[#allocation9 + $0x7f0] sm:$0xf]  ;;  %v9987_v15 = vld [vmem:[#allocation9 + $0x7c0] sm:$0xf]  ;;  %v11795_v47 = vld [vmem:[#allocation9 + $0x7c4] sm:$0xf0] }
 0x397   : > { %v4545_v43 = vadd.f32 %v13139_v0, %v4532_v2  ;;  %v10012_v4 = vor.u32 %v11801_v55, %v10011_v1  ;;  %v9697_v0 = vld [vmem:[#allocation9 + $0x588] sm:$0xf0]  ;;  %v9897_v2 = vld [vmem:[#allocation9 + $0x718] sm:$0xf0]  ;;  %v11817_v1 = vld [vmem:[#allocation9 + $0x874] sm:$0xf0] }
 0x398   : > { %4853 = vmatpush.bf16.msra.mxu3 %v9772_v34  ;;  %4827 = vmatpush.bf16.msra.mxu1 %v9644_v9  ;;  %v9825_v34 = vld [vmem:[#allocation9 + $0x688] sm:$0xf0]  ;;  %v13149_v58 = vpop.f32.mrf.mxu0 }
 0x399   : > { %v13152_v61 = vadd.f32 %v13137_v60, %v4545_v43  ;;  %v9913_v60 = vld [vmem:[#allocation9 + $0x738] sm:$0xf0]  ;;  %v9980_v43 = vor.u32 %v11793_v37, %v9979_v49  ;;  %v10043_v37 = vld [vmem:[#allocation9 + $0x830] sm:$0xf] }
 0x39a   : > { %4836 = vmatpush.bf16.msra.mxu2 %v9740_v51  ;;  %4864 = vmatpush.bf16.msrb.mxu0 %v9852_v14  ;;  %v9828_v51 = vor.u32 %v11754_v36, %v9825_v34  ;;  %v4598_v9 = vpop.f32.mrf.mxu3  ;;  %v11770_v36 = vld [vmem:[#allocation9 + $0x704] sm:$0xf]  ;;  %v9889_v34 = vld [vmem:[#allocation9 + $0x708] sm:$0xf0] }
 0x39b   : > { %v9892_v9 = vor.u32 %v11770_v36, %v9889_v34 }
 0x39c   : > { %4854 = vmatpush.bf16.msra.mxu3 %v9764_v38  ;;  %4828 = vmatpush.bf16.msra.mxu1 %v9636_v23  ;;  %v11722_v38 = vld [vmem:[#allocation9 + $0x584] sm:$0xf]  ;;  %v4533_v14 = vpop.f32.mrf.mxu2  ;;  %v13154_v42 = vpop.f32.mrf.mxu1  ;;  %v9995_v23 = vld [vmem:[#allocation9 + $0x7d0] sm:$0xf] }
 0x39d   : > { %v9700_v33 = vor.u32 %v11722_v38, %v9697_v0  ;;  %v9996_v25 = vor.u32 %v11797_v31, %v9995_v23  ;;  %v10067_v38 = vld [vmem:[#allocation9 + $0x860] sm:$0xf]  ;;  %v11815_v0 = vld [vmem:[#allocation9 + $0x864] sm:$0xf0] }
 0x39e   : > { %4837 = vmatpush.bf16.msra.mxu2 %v9732_v5  ;;  %4865 = vmatpush.bf16.msrb.mxu0 %v9844_v11  ;;  %v11776_v5 = vld [vmem:[#allocation9 + $0x734] sm:$0xf]  ;;  %v11774_v11 = vld [vmem:[#allocation9 + $0x724] sm:$0xf]  ;;  %v11787_v23 = vld [vmem:[#allocation9 + $0x784] sm:$0xf0] }
 0x39f   : > { %4855 = vmatmul.bf16.vlgmr.msra.gmra.mxu3 %v13102_v62  ;;  %4829 = vmatmul.bf16.vlgmr.msra.gmra.mxu1 %v13108_v6  ;;  %v9908_v7 = vor.u32 %v11774_v11, %v9905_v48  ;;  %v11865_v11 = vld [vmem:[#allocation9 + $0x9f4] sm:$0xf0] }
 0x3a0   : > { %4873 = vmatpush.bf16.msrb.mxu1 %v9948_v26  ;;  %v4611_v3 = vpop.f32.mrf.mxu0  ;;  %v9916_v26 = vor.u32 %v11776_v5, %v9913_v60  ;;  %v9964_v5 = vor.u32 %v11789_v40, %v9963_v57  ;;  %v10059_v60 = vld [vmem:[#allocation9 + $0x850] sm:$0xf]  ;;  %v11805_v40 = vld [vmem:[#allocation9 + $0x814] sm:$0xf0] }
 0x3a1   : > { %v10027_v57 = vld [vmem:[#allocation9 + $0x810] sm:$0xf] }
 0x3a2   : > { %4838 = vmatpush.bf16.msra.mxu2 %v9724_v28  ;;  %4866 = vmatpush.bf16.msrb.mxu0 %v9836_v29  ;;  %v9988_v29 = vor.u32 %v11795_v47, %v9987_v15  ;;  %v10051_v15 = vld [vmem:[#allocation9 + $0x840] sm:$0xf]  ;;  %v11811_v47 = vld [vmem:[#allocation9 + $0x844] sm:$0xf0] }
 0x3a4   : > { %4874 = vmatpush.bf16.msrb.mxu1 %v9940_v46  ;;  %v13157_v28 = vpop.f32.mrf.mxu3  ;;  %v4572_v12 = vpop.f32.mrf.mxu1  ;;  %v11772_v46 = vld [vmem:[#allocation9 + $0x714] sm:$0xf] }
 0x3a5   : > { %v4583_v22 = vpop.f32.mrf.mxu2  ;;  %v9900_v52 = vor.u32 %v11772_v46, %v9897_v2  ;;  %v10259_v46 = vld [vmem:[#allocation9 + $0x9e0] sm:$0xf]  ;;  %v11863_v2 = vld [vmem:[#allocation9 + $0x9e4] sm:$0xf0] }
 0x3a6   : > { %4839 = vmatpush.bf16.msra.mxu2 %v9716_v50  ;;  %4867 = vmatpush.bf16.msrb.mxu0 %v9828_v51  ;;  %v11791_v51 = vld [vmem:[#allocation9 + $0x7a4] sm:$0xf0]  ;;  %v10260_v36 = vor.u32 %v11863_v2, %v10259_v46 }
 0x3a8   : > { %4875 = vmatpush.bf16.msrb.mxu1 %v9932_v39  ;;  %v13160_v50 = vpop.f32.mrf.mxu0  ;;  %v9971_v39 = vld [vmem:[#allocation9 + $0x7a0] sm:$0xf] }
 0x3a9   : > { %4868 = vmatmul.bf16.vlgmr.msrb.gmra.mxu0 %v13115_v19 }
 0x3aa   : > { %4840 = vmatpush.bf16.msra.mxu2 %v9708_v56  ;;  %6401 = vmatpush.bf16.msra.mxu0 %v10012_v4  ;;  %v10076_v56 = vor.u32 %v11817_v1, %v10075_v32  ;;  %v9972_v4 = vor.u32 %v11791_v51, %v9971_v39  ;;  %v10251_v32 = vld [vmem:[#allocation9 + $0x9d0] sm:$0xf]  ;;  %v11861_v1 = vld [vmem:[#allocation9 + $0x9d4] sm:$0xf0]  ;;  %v10035_v39 = vld [vmem:[#allocation9 + $0x820] sm:$0xf] }
 0x3ab   : > { %v11807_v51 = vld [vmem:[#allocation9 + $0x824] sm:$0xf0] }
 0x3ac   : > { %4876 = vmatpush.bf16.msrb.mxu1 %v9924_v16  ;;  %v4650_v55 = vpop.f32.mrf.mxu3  ;;  %v13162_v63 = vpop.f32.mrf.mxu1  ;;  %v10068_v16 = vor.u32 %v11815_v0, %v10067_v38 }
 0x3ad   : > { %v4585_v30 = vpop.f32.mrf.mxu2 }
 0x3ae   : > { %4841 = vmatpush.bf16.msra.mxu2 %v9700_v33  ;;  %6402 = vmatpush.bf16.msra.mxu0 %v10004_v35  ;;  %v11813_v33 = vld [vmem:[#allocation9 + $0x854] sm:$0xf0]  ;;  %v9955_v35 = vld [vmem:[#allocation9 + $0x780] sm:$0xf]  ;;  %v10252_v30 = vor.u32 %v11861_v1, %v10251_v32  ;;  %v10315_v1 = vld [vmem:[#allocation9 + $0xa50] sm:$0xf] }
 0x3af   : > { %v10060_v48 = vor.u32 %v11813_v33, %v10059_v60  ;;  %v11857_v60 = vld [vmem:[#allocation9 + $0x9b4] sm:$0xf0] }
 0x3b0   : > { %4877 = vmatpush.bf16.msrb.mxu1 %v9916_v26  ;;  %v4663_v14 = vpop.f32.mrf.mxu0  ;;  %v10267_v26 = vld [vmem:[#allocation9 + $0x9f0] sm:$0xf] }
 0x3b1   : > { %4842 = vmatmul.bf16.vlgmr.msra.gmra.mxu2 %v13092_v17  ;;  %v10268_v12 = vor.u32 %v11865_v11, %v10267_v26  ;;  %v10019_v26 = vld [vmem:[#allocation9 + $0x800] sm:$0xf] }
 0x3b2   : > { %6403 = vmatpush.bf16.msra.mxu0 %v9996_v25  ;;  %v9956_v25 = vor.u32 %v11787_v23, %v9955_v35  ;;  %v10028_v35 = vor.u32 %v11805_v40, %v10027_v57  ;;  %v10515_v40 = vld [vmem:[#allocation9 + $0xbe0] sm:$0xf] }
 0x3b4   : > { %4878 = vmatpush.bf16.msrb.mxu1 %v9908_v7  ;;  %v4624_v31 = vpop.f32.mrf.mxu1  ;;  %v4571_v7 = vadd.f32 %v13154_v42, %v13152_v61  ;;  %v3293_v42 = vperm.slane %v13126_v21, 1 }
 0x3b5   : > { %v4635_v3 = vpop.f32.mrf.mxu2 }
 0x3b6   : > { %6404 = vmatpush.bf16.msra.mxu0 %v9988_v29  ;;  %v10052_v29 = vor.u32 %v11811_v47, %v10051_v15  ;;  %v4584_v49 = vadd.f32 %v4583_v22, %v4571_v7  ;;  %v11881_v15 = vld [vmem:[#allocation9 + $0xa74] sm:$0xf0]  ;;  %v10227_v47 = vld [vmem:[#allocation9 + $0x9a0] sm:$0xf] }
 0x3b8   : > { %4879 = vmatpush.bf16.msrb.mxu1 %v9900_v52  ;;  %v11809_v52 = vld [vmem:[#allocation9 + $0x834] sm:$0xf0]  ;;  %v4597_v61 = vadd.f32 %v13143_v45, %v4584_v49  ;;  %v10219_v49 = vld [vmem:[#allocation9 + $0x990] sm:$0xf] }
 0x3b9   : > { %v10044_v55 = vor.u32 %v11809_v52, %v10043_v37  ;;  %v11853_v37 = vld [vmem:[#allocation9 + $0x994] sm:$0xf0] }
 0x3ba   : > { %6405 = vmatpush.bf16.msra.mxu0 %v9980_v43  ;;  %v4610_v38 = vadd.f32 %v13149_v58, %v4597_v61  ;;  %v11803_v58 = vld [vmem:[#allocation9 + $0x804] sm:$0xf0]  ;;  %v10220_v32 = vor.u32 %v11853_v37, %v10219_v49  ;;  %v10499_v49 = vld [vmem:[#allocation9 + $0xbc0] sm:$0xf] }
 0x3bb   : > { %v11923_v37 = vld [vmem:[#allocation9 + $0xbc4] sm:$0xf0] }
 0x3bc   : > { %4880 = vmatpush.bf16.msrb.mxu1 %v9892_v9  ;;  %v4674_v43 = vpop.f32.mrf.mxu1  ;;  %v10243_v9 = vld [vmem:[#allocation9 + $0x9c0] sm:$0xf]  ;;  %v4623_v14 = vadd.f32 %v13162_v63, %v4610_v38  ;;  %v10020_v63 = vor.u32 %v11803_v58, %v10019_v26  ;;  %v11875_v38 = vld [vmem:[#allocation9 + $0xa44] sm:$0xf0] }
 0x3bd   : > { %v4637_v34 = vpop.f32.mrf.mxu2 }
 0x3be   : > { %6406 = vmatpush.bf16.msra.mxu0 %v9972_v4  ;;  %v10036_v4 = vor.u32 %v11807_v51, %v10035_v39  ;;  %v4636_v23 = vadd.f32 %v4635_v3, %v4623_v14  ;;  %v11879_v3 = vld [vmem:[#allocation9 + $0xa64] sm:$0xf0] }
 0x3bf   : > { %4881 = vmatmul.bf16.vlgmr.msrb.gmra.mxu1 %v13121_v41  ;;  %v11851_v39 = vld [vmem:[#allocation9 + $0x984] sm:$0xf0] }
 0x3c0   : > { %6414 = vmatpush.bf16.msra.mxu1 %v10076_v56  ;;  %v11859_v56 = vld [vmem:[#allocation9 + $0x9c4] sm:$0xf0]  ;;  %v4649_v7 = vadd.f32 %v13157_v28, %v4636_v23  ;;  %v10211_v28 = vld [vmem:[#allocation9 + $0x980] sm:$0xf] }
 0x3c1   : > { %v10244_v45 = vor.u32 %v11859_v56, %v10243_v9  ;;  %v13180_v23 = vld [vmem:[#allocation10] sm:$0x3] }
 0x3c2   : > { %6407 = vmatpush.bf16.msra.mxu0 %v9964_v5  ;;  %v4700_v22 = vpop.f32.mrf.mxu3  ;;  %v10235_v5 = vld [vmem:[#allocation9 + $0x9b0] sm:$0xf] }
 0x3c3   : > { %v4701_v0 = vadd.f32 %v4700_v22, %v3293_v42  ;;  %v10523_v22 = vld [vmem:[#allocation9 + $0xbf0] sm:$0xf] }
 0x3c4   : > { %6415 = vmatpush.bf16.msra.mxu1 %v10068_v16  ;;  %v4676_v16 = vpop.f32.mrf.mxu1 }
 0x3c5   : > { %v10139_v16 = vld [vmem:[#allocation9 + $0x8f0] sm:$0xf] }
 0x3c6   : > { %6408 = vmatpush.bf16.msra.mxu0 %v9956_v25  ;;  %v4713_v33 = vpop.f32.mrf.mxu0  ;;  %v10331_v25 = vld [vmem:[#allocation9 + $0xa70] sm:$0xf] }
 0x3c7   : > { %v13174_v31 = vadd.f32 %v4713_v33, %v4701_v0  ;;  %v10332_v46 = vor.u32 %v11881_v15, %v10331_v25  ;;  %v11873_v33 = vld [vmem:[#allocation9 + $0xa34] sm:$0xf0]  ;;  %v10507_v25 = vld [vmem:[#allocation9 + $0xbd0] sm:$0xf] }
 0x3c8   : > { %6416 = vmatpush.bf16.msra.mxu1 %v10060_v48  ;;  %v10236_v48 = vor.u32 %v11857_v60, %v10235_v5  ;;  %v11833_v5 = vld [vmem:[#allocation9 + $0x8f4] sm:$0xf0]  ;;  %v10299_v60 = vld [vmem:[#allocation9 + $0xa30] sm:$0xf] }
 0x3c9   : > { %6409 = vmatmul.bf16.vlgmr.msra.gmra.mxu0 %v13029_v10  ;;  %v11925_v15 = vld [vmem:[#allocation9 + $0xbd4] sm:$0xf0] }
 0x3ca   : > { %6453 = vmatpush.bf16.msrb.mxu0 %v10268_v12  ;;  %v4702_v11 = vpop.f32.mrf.mxu3  ;;  %v11855_v12 = vld [vmem:[#allocation9 + $0x9a4] sm:$0xf0] }
 0x3cb   : > { %v10228_v2 = vor.u32 %v11855_v12, %v10227_v47  ;;  %v10300_v47 = vor.u32 %v11873_v33, %v10299_v60  ;;  %v10131_v12 = vld [vmem:[#allocation9 + $0x8e0] sm:$0xf]  ;;  %v11825_v60 = vld [vmem:[#allocation9 + $0x8b4] sm:$0xf0] }
 0x3cc   : > { %6417 = vmatpush.bf16.msra.mxu1 %v10052_v29  ;;  %v10323_v29 = vld [vmem:[#allocation9 + $0xa60] sm:$0xf] }
 0x3cd   : > { %v10324_v34 = vor.u32 %v11879_v3, %v10323_v29  ;;  %v10508_v29 = vor.u32 %v11925_v15, %v10507_v25  ;;  %v10475_v15 = vld [vmem:[#allocation9 + $0xb90] sm:$0xf] }
 0x3ce   : > { %6454 = vmatpush.bf16.msrb.mxu0 %v10260_v36  ;;  %v4715_v52 = vpop.f32.mrf.mxu0  ;;  %v4662_v36 = vadd.f32 %v13160_v50, %v4649_v7  ;;  %v10307_v50 = vld [vmem:[#allocation9 + $0xa40] sm:$0xf] }
 0x3cf   : > { %v10291_v7 = vld [vmem:[#allocation9 + $0xa20] sm:$0xf] }
 0x3d0   : > { %6418 = vmatpush.bf16.msra.mxu1 %v10044_v55  ;;  %v11877_v55 = vld [vmem:[#allocation9 + $0xa54] sm:$0xf0]  ;;  %v4675_v61 = vadd.f32 %v4674_v43, %v4662_v36  ;;  %v10308_v43 = vor.u32 %v11875_v38, %v10307_v50  ;;  %v10123_v36 = vld [vmem:[#allocation9 + $0x8d0] sm:$0xf]  ;;  %v11867_v50 = vld [vmem:[#allocation9 + $0xa04] sm:$0xf0] }
 0x3d1   : > { %v10316_v56 = vor.u32 %v11877_v55, %v10315_v1  ;;  %v11869_v1 = vld [vmem:[#allocation9 + $0xa14] sm:$0xf0]  ;;  %v10500_v55 = vor.u32 %v11923_v37, %v10499_v49 }
 0x3d2   : > { %6455 = vmatpush.bf16.msrb.mxu0 %v10252_v30  ;;  %v11929_v30 = vld [vmem:[#allocation9 + $0xbf4] sm:$0xf0] }
 0x3d3   : > { %v10524_v57 = vor.u32 %v11929_v30, %v10523_v22  ;;  %v10115_v30 = vld [vmem:[#allocation9 + $0x8c0] sm:$0xf]  ;;  %v11941_v49 = vld [vmem:[#allocation9 + $0xc54] sm:$0xf0] }
 0x3d4   : > { %6419 = vmatpush.bf16.msra.mxu1 %v10036_v4  ;;  %v4687_v51 = vpop.f32.mrf.mxu2  ;;  %v10212_v4 = vor.u32 %v11851_v39, %v10211_v28  ;;  %v10491_v39 = vld [vmem:[#allocation9 + $0xbb0] sm:$0xf] }
 0x3d5   : > { %v4688_v9 = vadd.f32 %v4687_v51, %v4675_v61  ;;  %v11921_v51 = vld [vmem:[#allocation9 + $0xbb4] sm:$0xf0] }
 0x3d6   : > { %6456 = vmatpush.bf16.msrb.mxu0 %v10244_v45  ;;  %v11927_v45 = vld [vmem:[#allocation9 + $0xbe4] sm:$0xf0] }
 0x3d7   : > { %v4886_v0 = vmax.f32 %v4688_v9, 0.0  ;;  %v10516_v26 = vor.u32 %v11927_v45, %v10515_v40  ;;  %v11827_v9 = vld [vmem:[#allocation9 + $0x8c4] sm:$0xf0]  ;;  %v11945_v40 = vld [vmem:[#allocation9 + $0xc74] sm:$0xf0] }
 0x3d8   : > { %6420 = vmatpush.bf16.msra.mxu1 %v10028_v35  ;;  %v10116_v45 = vor.u32 %v11827_v9, %v10115_v30  ;;  %v10563_v30 = vld [vmem:[#allocation9 + $0xc40] sm:$0xf]  ;;  %v11939_v9 = vld [vmem:[#allocation9 + $0xc44] sm:$0xf0] }
 0x3d9   : > { %v4888_v14 = vpack.c.bf16 %v4886_v0, %v4886_v0  ;;  %v10492_v0 = vor.u32 %v11921_v51, %v10491_v39 }
 0x3da   : > { %6457 = vmatpush.bf16.msrb.mxu0 %v10236_v48  ;;  %v10140_v48 = vor.u32 %v11833_v5, %v10139_v16  ;;  %v10107_v5 = vld [vmem:[#allocation9 + $0x8b0] sm:$0xf] }
 0x3db   : > { %v4896_v35 = vsel %vm1624_vm4, %v4888_v14, 0  ;;  %v10483_v14 = vld [vmem:[#allocation9 + $0xba0] sm:$0xf]  ;;  %v10108_v25 = vor.u32 %v11825_v60, %v10107_v5 }
 0x3dc   : > { %6421 = vmatpush.bf16.msra.mxu1 %v10020_v63  ;;  %v4689_v58 = vpop.f32.mrf.mxu2  ;;  %v13182_v11 = vpop.f32.mrf.mxu1  ;;  %4908 = vmatpush.bf16.msrb.mxu2 %v4896_v35  ;;  %v11831_v63 = vld [vmem:[#allocation9 + $0x8e4] sm:$0xf0] }
 0x3dd   : > { %v10132_v3 = vor.u32 %v11831_v63, %v10131_v12  ;;  %v11943_v58 = vld [vmem:[#allocation9 + $0xc64] sm:$0xf0]  ;;  %v10099_v12 = vld [vmem:[#allocation9 + $0x8a0] sm:$0xf]  ;;  %v4727_v37 = vadd.f32 %v13182_v11, %v13174_v31 }
 0x3de   : > { %6458 = vmatpush.bf16.msrb.mxu0 %v10228_v2  ;;  %v11823_v63 = vld [vmem:[#allocation9 + $0x8a4] sm:$0xf0] }
 0x3df   : > { %6422 = vmatmul.bf16.vlgmr.msra.gmra.mxu1 %v13033_v53  ;;  %9949 = vmatmul.msk.bf16.vlgmr.msrb.gmra.mxu2 %vm4891_vm6, %v13180_v23 }
 0x3e0   : > { %6466 = vmatpush.bf16.msrb.mxu1 %v10332_v46  ;;  %4939 = vmatpush.bf16.msra.mxu2 %v4896_v35  ;;  %v11871_v46 = vld [vmem:[#allocation9 + $0xa24] sm:$0xf0] }
 0x3e1   : > { %v10292_v52 = vor.u32 %v11871_v46, %v10291_v7 }
 0x3e2   : > { %6459 = vmatpush.bf16.msrb.mxu0 %v10220_v32  ;;  %v13185_v2 = vpop.f32.mrf.mxu3  ;;  %v10283_v32 = vld [vmem:[#allocation9 + $0xa10] sm:$0xf] }
 0x3e3   : > { %v10284_v22 = vor.u32 %v11869_v1, %v10283_v32  ;;  %v11915_v32 = vld [vmem:[#allocation9 + $0xb84] sm:$0xf0] }
 0x3e4   : > { %6467 = vmatpush.bf16.msrb.mxu1 %v10324_v34  ;;  %6427 = vmatpush.bf16.msrb.mxu2 %v10140_v48  ;;  %v11829_v34 = vld [vmem:[#allocation9 + $0x8d4] sm:$0xf0]  ;;  %v4728_v61 = vpop.f32.mrf.mxu1  ;;  %v13191_v48 = vld [vmem:[#allocation10 + $0x2] sm:$0x3] }
 0x3e5   : > { %v10124_v28 = vor.u32 %v11829_v34, %v10123_v36  ;;  %v10091_v36 = vld [vmem:[#allocation9 + $0x890] sm:$0xf]  ;;  %v10467_v34 = vld [vmem:[#allocation9 + $0xb80] sm:$0xf] }
 0x3e6   : > { %6460 = vmatpush.bf16.msrb.mxu0 %v10212_v4  ;;  %v10275_v4 = vld [vmem:[#allocation9 + $0xa00] sm:$0xf]  ;;  %v10779_v61 = vld [vmem:[#allocation9 + $0xdf0] sm:$0xf] }
 0x3e7   : > { %v10276_v16 = vor.u32 %v11867_v50, %v10275_v4  ;;  %v10083_v50 = vld [vmem:[#allocation9 + $0x880] sm:$0xf] }
 0x3e8   : > { %6468 = vmatpush.bf16.msrb.mxu1 %v10316_v56  ;;  %6428 = vmatpush.bf16.msrb.mxu2 %v10132_v3  ;;  %v13189_v56 = vpop.f32.mrf.mxu0  ;;  %v10571_v3 = vld [vmem:[#allocation9 + $0xc50] sm:$0xf] }
 0x3e9   : > { %6461 = vmatmul.bf16.vlgmr.msrb.gmra.mxu0 %v13049_v20  ;;  %v10572_v51 = vor.u32 %v11941_v49, %v10571_v3  ;;  %v10755_v3 = vld [vmem:[#allocation9 + $0xdc0] sm:$0xf]  ;;  %v11987_v49 = vld [vmem:[#allocation9 + $0xdc4] sm:$0xf0] }
 0x3ea   : > { %6505 = vmatpush.bf16.msra.mxu0 %v10524_v57  ;;  %v4754_v38 = vpop.f32.mrf.mxu3  ;;  %v10587_v57 = vld [vmem:[#allocation9 + $0xc70] sm:$0xf] }
 0x3eb   : > { %v10588_v33 = vor.u32 %v11945_v40, %v10587_v57  ;;  %v11819_v38 = vld [vmem:[#allocation9 + $0x884] sm:$0xf0]  ;;  %v10564_v40 = vor.u32 %v11939_v9, %v10563_v30 }
 0x3ec   : > { %6469 = vmatpush.bf16.msrb.mxu1 %v10308_v43  ;;  %6429 = vmatpush.bf16.msrb.mxu2 %v10124_v28  ;;  %v11919_v43 = vld [vmem:[#allocation9 + $0xba4] sm:$0xf0]  ;;  %v11993_v28 = vld [vmem:[#allocation9 + $0xdf4] sm:$0xf0]  ;;  %v10084_v5 = vor.u32 %v11819_v38, %v10083_v50 }
 0x3ed   : > { %v10484_v35 = vor.u32 %v11919_v43, %v10483_v14  ;;  %v10780_v4 = vor.u32 %v11993_v28, %v10779_v61  ;;  %v11991_v57 = vld [vmem:[#allocation9 + $0xde4] sm:$0xf0]  ;;  %v11897_v14 = vld [vmem:[#allocation9 + $0xaf4] sm:$0xf0]  ;;  %v10555_v43 = vld [vmem:[#allocation9 + $0xc30] sm:$0xf] }
 0x3ee   : > { %6506 = vmatpush.bf16.msra.mxu0 %v10516_v26  ;;  %v10579_v26 = vld [vmem:[#allocation9 + $0xc60] sm:$0xf]  ;;  %v10747_v28 = vld [vmem:[#allocation9 + $0xdb0] sm:$0xf]  ;;  %v11891_v30 = vld [vmem:[#allocation9 + $0xac4] sm:$0xf0] }
 0x3ef   : > { %v10580_v46 = vor.u32 %v11943_v58, %v10579_v26  ;;  %9951 = vmatmul.msk.bf16.vlgmr.msra.gmra.mxu2 %vm4891_vm6, %v13191_v48  ;;  %v10763_v26 = vld [vmem:[#allocation9 + $0xdd0] sm:$0xf]  ;;  %v11989_v58 = vld [vmem:[#allocation9 + $0xdd4] sm:$0xf0] }
 0x3f0   : > { %6470 = vmatpush.bf16.msrb.mxu1 %v10300_v47  ;;  %6430 = vmatpush.bf16.msrb.mxu2 %v10116_v45  ;;  %v11917_v47 = vld [vmem:[#allocation9 + $0xb94] sm:$0xf0]  ;;  %v4767_v7 = vpop.f32.mrf.mxu0  ;;  %v10395_v45 = vld [vmem:[#allocation9 + $0xaf0] sm:$0xf] }
 0x3f2   : > { %6507 = vmatpush.bf16.msra.mxu0 %v10508_v29  ;;  %v10476_v29 = vor.u32 %v11917_v47, %v10475_v15  ;;  %v10387_v15 = vld [vmem:[#allocation9 + $0xae0] sm:$0xf]  ;;  %v11895_v47 = vld [vmem:[#allocation9 + $0xae4] sm:$0xf0] }
 0x3f4   : > { %6471 = vmatpush.bf16.msrb.mxu1 %v10292_v52  ;;  %6431 = vmatpush.bf16.msrb.mxu2 %v10108_v25  ;;  %v10100_v52 = vor.u32 %v11823_v63, %v10099_v12  ;;  %v4739_v1 = vpop.f32.mrf.mxu2  ;;  %v10547_v12 = vld [vmem:[#allocation9 + $0xc20] sm:$0xf]  ;;  %v11935_v63 = vld [vmem:[#allocation9 + $0xc24] sm:$0xf0] }
 0x3f5   : > { %v4740_v39 = vadd.f32 %v4739_v1, %v4727_v37  ;;  %v10548_v37 = vor.u32 %v11935_v63, %v10547_v12  ;;  %v10756_v1 = vor.u32 %v11987_v49, %v10755_v3  ;;  %v11887_v12 = vld [vmem:[#allocation9 + $0xaa4] sm:$0xf0]  ;;  %v10827_v3 = vld [vmem:[#allocation9 + $0xe50] sm:$0xf]  ;;  %v12005_v49 = vld [vmem:[#allocation9 + $0xe54] sm:$0xf0] }
 0x3f6   : > { %6508 = vmatpush.bf16.msra.mxu0 %v10500_v55  ;;  %v11821_v55 = vld [vmem:[#allocation9 + $0x894] sm:$0xf0] }
 0x3f7   : > { %v13199_v31 = vadd.f32 %v13185_v2, %v4740_v39  ;;  %v10092_v11 = vor.u32 %v11821_v55, %v10091_v36  ;;  %v11893_v36 = vld [vmem:[#allocation9 + $0xad4] sm:$0xf0] }
 0x3f8   : > { %6472 = vmatpush.bf16.msrb.mxu1 %v10284_v22  ;;  %v10468_v22 = vor.u32 %v11915_v32, %v10467_v34  ;;  %6432 = vmatpush.bf16.msrb.mxu2 %v10100_v52  ;;  %v10379_v52 = vld [vmem:[#allocation9 + $0xad0] sm:$0xf]  ;;  %v11933_v32 = vld [vmem:[#allocation9 + $0xc14] sm:$0xf0] }
 0x3f9   : > { %v10539_v34 = vld [vmem:[#allocation9 + $0xc10] sm:$0xf]  ;;  %v10380_v61 = vor.u32 %v11893_v36, %v10379_v52  ;;  %v11985_v39 = vld [vmem:[#allocation9 + $0xdb4] sm:$0xf0]  ;;  %v10723_v36 = vld [vmem:[#allocation9 + $0xd80] sm:$0xf] }
 0x3fa   : > { %6509 = vmatpush.bf16.msra.mxu0 %v10492_v0  ;;  %v10771_v0 = vld [vmem:[#allocation9 + $0xde0] sm:$0xf]  ;;  %v10748_v38 = vor.u32 %v11985_v39, %v10747_v28  ;;  %v10347_v52 = vld [vmem:[#allocation9 + $0xa90] sm:$0xf]  ;;  %v10828_v28 = vor.u32 %v12005_v49, %v10827_v3  ;;  %v11810_v49 = vld [vmem:[#allocation9 + $0x844] sm:$0xf] }
 0x3fb   : > { %v10772_v60 = vor.u32 %v11991_v57, %v10771_v0  ;;  %v10843_v0 = vld [vmem:[#allocation9 + $0xe70] sm:$0xf]  ;;  %v12009_v57 = vld [vmem:[#allocation9 + $0xe74] sm:$0xf0] }
 0x3fc   : > { %6473 = vmatpush.bf16.msrb.mxu1 %v10276_v16  ;;  %v11937_v16 = vld [vmem:[#allocation9 + $0xc34] sm:$0xf0]  ;;  %6433 = vmatpush.bf16.msrb.mxu2 %v10092_v11  ;;  %v4741_v2 = vpop.f32.mrf.mxu2  ;;  %v10531_v11 = vld [vmem:[#allocation9 + $0xc00] sm:$0xf] }
 0x3fd   : > { %v10556_v25 = vor.u32 %v11937_v16, %v10555_v43  ;;  %v10363_v16 = vld [vmem:[#allocation9 + $0xab0] sm:$0xf] }
 0x3fe   : > { %6510 = vmatpush.bf16.msra.mxu0 %v10484_v35  ;;  %v10396_v35 = vor.u32 %v11897_v14, %v10395_v45  ;;  %v10739_v45 = vld [vmem:[#allocation9 + $0xda0] sm:$0xf]  ;;  %v11983_v14 = vld [vmem:[#allocation9 + $0xda4] sm:$0xf0] }
 0x3ff   : > { %6474 = vmatmul.bf16.vlgmr.msrb.gmra.mxu1 %v13087_v18  ;;  %v10740_v2 = vor.u32 %v11983_v14, %v10739_v45  ;;  %v11961_v45 = vld [vmem:[#allocation9 + $0xcf4] sm:$0xf0]  ;;  %v10811_v14 = vld [vmem:[#allocation9 + $0xe30] sm:$0xf] }
 0x400   : > { %6518 = vmatpush.bf16.msra.mxu1 %v10588_v33  ;;  %v13201_v33 = vpop.f32.mrf.mxu1  ;;  %6434 = vmatpush.bf16.msrb.mxu2 %v10084_v5  ;;  %v11889_v5 = vld [vmem:[#allocation9 + $0xab4] sm:$0xf0] }
 0x402   : > { %6511 = vmatpush.bf16.msra.mxu0 %v10476_v29  ;;  %v13204_v7 = vpop.f32.mrf.mxu3  ;;  %v10388_v29 = vor.u32 %v11895_v47, %v10387_v15  ;;  %v11981_v15 = vld [vmem:[#allocation9 + $0xd94] sm:$0xf0]  ;;  %v10355_v47 = vld [vmem:[#allocation9 + $0xaa0] sm:$0xf] }
 0x403   : > { %6435 = vmatmul.bf16.vlgmr.msrb.gmra.mxu2 %v13068_v54 }
 0x404   : > { %6519 = vmatpush.bf16.msra.mxu1 %v10580_v46  ;;  %v10764_v46 = vor.u32 %v11989_v58, %v10763_v26  ;;  %6479 = vmatpush.bf16.msra.mxu2 %v10396_v35  ;;  %v10835_v35 = vld [vmem:[#allocation9 + $0xe60] sm:$0xf]  ;;  %v12007_v26 = vld [vmem:[#allocation9 + $0xe64] sm:$0xf0]  ;;  %v10364_v58 = vor.u32 %v11889_v5, %v10363_v16 }
 0x406   : > { %6512 = vmatpush.bf16.msra.mxu0 %v10468_v22  ;;  %v10371_v22 = vld [vmem:[#allocation9 + $0xac0] sm:$0xf]  ;;  %v13207_v9 = vpop.f32.mrf.mxu0 }
 0x408   : > { %6520 = vmatpush.bf16.msra.mxu1 %v10572_v51  ;;  %v4780_v55 = vpop.f32.mrf.mxu1  ;;  %6480 = vmatpush.bf16.msra.mxu2 %v10388_v29  ;;  %v10540_v51 = vor.u32 %v11933_v32, %v10539_v34  ;;  %v11979_v34 = vld [vmem:[#allocation9 + $0xd84] sm:$0xf0] }
 0x409   : > { %6513 = vmatmul.bf16.vlgmr.msra.gmra.mxu0 %v13083_v27  ;;  %v11816_v55 = vld [vmem:[#allocation9 + $0x874] sm:$0xf]  ;;  %v10724_v39 = vor.u32 %v11979_v34, %v10723_v36  ;;  %v10635_v36 = vld [vmem:[#allocation9 + $0xcd0] sm:$0xf]  ;;  %v11957_v34 = vld [vmem:[#allocation9 + $0xcd4] sm:$0xf0] }
 0x40a   : > { %6557 = vmatpush.bf16.msrb.mxu0 %v10780_v4  ;;  %v11931_v4 = vld [vmem:[#allocation9 + $0xc04] sm:$0xf0]  ;;  %v4806_v50 = vpop.f32.mrf.mxu3 }
 0x40b   : > { %v10532_v43 = vor.u32 %v11931_v4, %v10531_v11  ;;  %v10339_v4 = vld [vmem:[#allocation9 + $0xa80] sm:$0xf]  ;;  %v11883_v50 = vld [vmem:[#allocation9 + $0xa84] sm:$0xf0] }
 0x40c   : > { %6521 = vmatpush.bf16.msra.mxu1 %v10564_v40  ;;  %6481 = vmatpush.bf16.msra.mxu2 %v10380_v61  ;;  %v10372_v40 = vor.u32 %v11891_v30, %v10371_v22  ;;  %v10077_v61 = vld [vmem:[#allocation9 + $0x878] sm:$0xf0]  ;;  %v12003_v22 = vld [vmem:[#allocation9 + $0xe44] sm:$0xf0]  ;;  %v10340_v16 = vor.u32 %v11883_v50, %v10339_v4  ;;  %v10627_v50 = vld [vmem:[#allocation9 + $0xcc0] sm:$0xf] }
 0x40d   : > { %v10080_v11 = vor.u32 %v11816_v55, %v10077_v61  ;;  %v10795_v55 = vld [vmem:[#allocation9 + $0xe10] sm:$0xf]  ;;  %v11997_v61 = vld [vmem:[#allocation9 + $0xe14] sm:$0xf0] }
 0x40e   : > { %6558 = vmatpush.bf16.msrb.mxu0 %v10772_v60  ;;  %v10844_v60 = vor.u32 %v12009_v57, %v10843_v0  ;;  %v4819_v63 = vpop.f32.mrf.mxu0  ;;  %v10069_v0 = vld [vmem:[#allocation9 + $0x868] sm:$0xf0]  ;;  %v10796_v4 = vor.u32 %v11997_v61, %v10795_v55 }
 0x40f   : > { %v11999_v63 = vld [vmem:[#allocation9 + $0xe24] sm:$0xf0] }
 0x410   : > { %6522 = vmatpush.bf16.msra.mxu1 %v10556_v25  ;;  %6482 = vmatpush.bf16.msra.mxu2 %v10372_v40  ;;  %v10731_v25 = vld [vmem:[#allocation9 + $0xd90] sm:$0xf] }
 0x411   : > { %v10732_v29 = vor.u32 %v11981_v15, %v10731_v25  ;;  %v10651_v40 = vld [vmem:[#allocation9 + $0xcf0] sm:$0xf]  ;;  %v10643_v15 = vld [vmem:[#allocation9 + $0xce0] sm:$0xf] }
 0x412   : > { %6559 = vmatpush.bf16.msrb.mxu0 %v10764_v46  ;;  %v10836_v46 = vor.u32 %v12007_v26, %v10835_v35  ;;  %v10652_v35 = vor.u32 %v11961_v45, %v10651_v40  ;;  %v11812_v26 = vld [vmem:[#allocation9 + $0x854] sm:$0xf] }
 0x414   : > { %6523 = vmatpush.bf16.msra.mxu1 %v10548_v37  ;;  %6483 = vmatpush.bf16.msra.mxu2 %v10364_v58  ;;  %v10356_v37 = vor.u32 %v11887_v12, %v10355_v47  ;;  %v13210_v32 = vpop.f32.mrf.mxu2  ;;  %v10061_v58 = vld [vmem:[#allocation9 + $0x858] sm:$0xf0]  ;;  %v11959_v47 = vld [vmem:[#allocation9 + $0xce4] sm:$0xf0]  ;;  %v10803_v12 = vld [vmem:[#allocation9 + $0xe20] sm:$0xf] }
 0x415   : > { %v10644_v3 = vor.u32 %v11959_v47, %v10643_v15  ;;  %v11830_v15 = vld [vmem:[#allocation9 + $0x8e4] sm:$0xf]  ;;  %v10133_v47 = vld [vmem:[#allocation9 + $0x8e8] sm:$0xf0] }
 0x416   : > { %6560 = vmatpush.bf16.msrb.mxu0 %v10756_v1  ;;  %v11885_v1 = vld [vmem:[#allocation9 + $0xa94] sm:$0xf0] }
 0x417   : > { %v10348_v30 = vor.u32 %v11885_v1, %v10347_v52  ;;  %v10804_v52 = vor.u32 %v11999_v63, %v10803_v12  ;;  %v4766_v1 = vadd.f32 %v13189_v56, %v13199_v31  ;;  %v10787_v31 = vld [vmem:[#allocation9 + $0xe00] sm:$0xf]  ;;  %v11804_v63 = vld [vmem:[#allocation9 + $0x814] sm:$0xf] }
 0x418   : > { %6524 = vmatpush.bf16.msra.mxu1 %v10540_v51  ;;  %v10819_v51 = vld [vmem:[#allocation9 + $0xe40] sm:$0xf]  ;;  %6484 = vmatpush.bf16.msra.mxu2 %v10356_v37  ;;  %v10053_v37 = vld [vmem:[#allocation9 + $0x848] sm:$0xf0] }
 0x419   : > { %v10820_v57 = vor.u32 %v12003_v22, %v10819_v51  ;;  %v10636_v22 = vor.u32 %v11957_v34, %v10635_v36  ;;  %v10136_v36 = vor.u32 %v11830_v15, %v10133_v47 }
 0x41a   : > { %6561 = vmatpush.bf16.msrb.mxu0 %v10748_v38  ;;  %v11814_v38 = vld [vmem:[#allocation9 + $0x864] sm:$0xf] }
 0x41b   : > { %v10072_v5 = vor.u32 %v11814_v38, %v10069_v0  ;;  %v11955_v38 = vld [vmem:[#allocation9 + $0xcc4] sm:$0xf0] }
 0x41c   : > { %6525 = vmatpush.bf16.msra.mxu1 %v10532_v43  ;;  %v12001_v43 = vld [vmem:[#allocation9 + $0xe34] sm:$0xf0]  ;;  %6485 = vmatpush.bf16.msra.mxu2 %v10348_v30  ;;  %v11808_v30 = vld [vmem:[#allocation9 + $0x834] sm:$0xf] }
 0x41d   : > { %v10812_v25 = vor.u32 %v12001_v43, %v10811_v14  ;;  %v11832_v14 = vld [vmem:[#allocation9 + $0x8f4] sm:$0xf]  ;;  %v10628_v43 = vor.u32 %v11955_v38, %v10627_v50 }
 0x41e   : > { %6562 = vmatpush.bf16.msrb.mxu0 %v10740_v2  ;;  %v13212_v2 = vpop.f32.mrf.mxu1 }
 0x41f   : > { %6526 = vmatmul.bf16.vlgmr.msra.gmra.mxu1 %v13105_v59 }
 0x420   : > { %6570 = vmatpush.bf16.msrb.mxu1 %v10844_v60  ;;  %v4793_v60 = vpop.f32.mrf.mxu2  ;;  %6486 = vmatpush.bf16.msra.mxu2 %v10340_v16  ;;  %v11806_v16 = vld [vmem:[#allocation9 + $0x824] sm:$0xf] }
 0x422   : > { %6563 = vmatpush.bf16.msrb.mxu0 %v10732_v29  ;;  %v10064_v29 = vor.u32 %v11812_v26, %v10061_v58  ;;  %v11953_v26 = vld [vmem:[#allocation9 + $0xcb4] sm:$0xf0] }
 0x423   : > { %6487 = vmatmul.bf16.vlgmr.msra.gmra.mxu2 %v13089_v8 }
 0x424   : > { %6571 = vmatpush.bf16.msrb.mxu1 %v10836_v46  ;;  %v13215_v46 = vpop.f32.mrf.mxu3  ;;  %6531 = vmatpush.bf16.msrb.mxu2 %v10652_v35  ;;  %v10619_v35 = vld [vmem:[#allocation9 + $0xcb0] sm:$0xf] }
 0x425   : > { %v10620_v12 = vor.u32 %v11953_v26, %v10619_v35  ;;  %v11824_v35 = vld [vmem:[#allocation9 + $0x8b4] sm:$0xf]  ;;  %v10109_v26 = vld [vmem:[#allocation9 + $0x8b8] sm:$0xf0] }
 0x426   : > { %6564 = vmatpush.bf16.msrb.mxu0 %v10724_v39  ;;  %v4779_v39 = vadd.f32 %v13201_v33, %v4766_v1  ;;  %v4832_v51 = vpop.f32.mrf.mxu1  ;;  %v13222_v56 = vpop.f32.mrf.mxu0  ;;  %v10141_v33 = vld [vmem:[#allocation9 + $0x8f8] sm:$0xf0] }
 0x427   : > { %v10125_v1 = vld [vmem:[#allocation9 + $0x8d8] sm:$0xf0]  ;;  %v10021_v51 = vld [vmem:[#allocation9 + $0x808] sm:$0xf0] }
 0x428   : > { %6572 = vmatpush.bf16.msrb.mxu1 %v10828_v28  ;;  %v10056_v28 = vor.u32 %v11810_v49, %v10053_v37  ;;  %6532 = vmatpush.bf16.msrb.mxu2 %v10644_v3  ;;  %v4792_v0 = vadd.f32 %v13210_v32, %v4779_v39  ;;  %v10144_v32 = vor.u32 %v11832_v14, %v10141_v33  ;;  %v10611_v3 = vld [vmem:[#allocation9 + $0xca0] sm:$0xf]  ;;  %v11951_v49 = vld [vmem:[#allocation9 + $0xca4] sm:$0xf0]  ;;  %v11802_v39 = vld [vmem:[#allocation9 + $0x804] sm:$0xf] }
 0x429   : > { %6565 = vmatmul.bf16.vlgmr.msrb.gmra.mxu0 %v13102_v62  ;;  %v10612_v61 = vor.u32 %v11951_v49, %v10611_v3  ;;  %v10024_v38 = vor.u32 %v11802_v39, %v10021_v51  ;;  %v11947_v14 = vld [vmem:[#allocation9 + $0xc84] sm:$0xf0]  ;;  %v11878_v33 = vld [vmem:[#allocation9 + $0xa64] sm:$0xf]  ;;  %v10112_v3 = vor.u32 %v11824_v35, %v10109_v26  ;;  %v10899_v49 = vld [vmem:[#allocation9 + $0xee0] sm:$0xf] }
 0x42a   : > { %6609 = vmatpush.bf16.msra.mxu0 %v10080_v11  ;;  %v10045_v11 = vld [vmem:[#allocation9 + $0x838] sm:$0xf0]  ;;  %v4805_v58 = vadd.f32 %v13204_v7, %v4792_v0  ;;  %v11828_v7 = vld [vmem:[#allocation9 + $0x8d4] sm:$0xf]  ;;  %v11826_v0 = vld [vmem:[#allocation9 + $0x8c4] sm:$0xf] }
 0x42b   : > { %v10048_v45 = vor.u32 %v11808_v30, %v10045_v11  ;;  %v11949_v30 = vld [vmem:[#allocation9 + $0xc94] sm:$0xf0]  ;;  %v11880_v11 = vld [vmem:[#allocation9 + $0xa74] sm:$0xf]  ;;  %v10128_v50 = vor.u32 %v11828_v7, %v10125_v1  ;;  %v10203_v1 = vld [vmem:[#allocation9 + $0x970] sm:$0xf] }
 0x42c   : > { %6573 = vmatpush.bf16.msrb.mxu1 %v10820_v57  ;;  %v11995_v57 = vld [vmem:[#allocation9 + $0xe04] sm:$0xf0]  ;;  %v4858_v40 = vpop.f32.mrf.mxu3  ;;  %6533 = vmatpush.bf16.msrb.mxu2 %v10636_v22  ;;  %v4818_v37 = vadd.f32 %v13207_v9, %v4805_v58  ;;  %v10333_v9 = vld [vmem:[#allocation9 + $0xa78] sm:$0xf0]  ;;  %v11849_v51 = vld [vmem:[#allocation9 + $0x974] sm:$0xf0] }
 0x42d   : > { %v10788_v60 = vor.u32 %v11995_v57, %v10787_v31  ;;  %v10117_v31 = vld [vmem:[#allocation9 + $0x8c8] sm:$0xf0]  ;;  %v10336_v40 = vor.u32 %v11880_v11, %v10333_v9  ;;  %v10093_v11 = vld [vmem:[#allocation9 + $0x898] sm:$0xf0]  ;;  %v11896_v35 = vld [vmem:[#allocation9 + $0xaf4] sm:$0xf] }
 0x42e   : > { %6610 = vmatpush.bf16.msra.mxu0 %v10072_v5  ;;  %v10037_v5 = vld [vmem:[#allocation9 + $0x828] sm:$0xf0]  ;;  %v4831_v55 = vadd.f32 %v13212_v2, %v4818_v37  ;;  %v12023_v37 = vld [vmem:[#allocation9 + $0xee4] sm:$0xf0]  ;;  %v10397_v26 = vld [vmem:[#allocation9 + $0xaf8] sm:$0xf0] }
 0x42f   : > { %v10900_v7 = vor.u32 %v12023_v37, %v10899_v49  ;;  %v10389_v37 = vld [vmem:[#allocation9 + $0xae8] sm:$0xf0] }
 0x430   : > { %6574 = vmatpush.bf16.msrb.mxu1 %v10812_v25  ;;  %v10040_v25 = vor.u32 %v11806_v16, %v10037_v5  ;;  %6534 = vmatpush.bf16.msrb.mxu2 %v10628_v43  ;;  %v10325_v43 = vld [vmem:[#allocation9 + $0xa68] sm:$0xf0]  ;;  %v10120_v16 = vor.u32 %v11826_v0, %v10117_v31  ;;  %v10907_v5 = vld [vmem:[#allocation9 + $0xef0] sm:$0xf]  ;;  %v10195_v31 = vld [vmem:[#allocation9 + $0x960] sm:$0xf] }
 0x432   : > { %6611 = vmatpush.bf16.msra.mxu0 %v10064_v29  ;;  %v10029_v29 = vld [vmem:[#allocation9 + $0x818] sm:$0xf0] }
 0x433   : > { %v10032_v34 = vor.u32 %v11804_v63, %v10029_v29  ;;  %v10317_v63 = vld [vmem:[#allocation9 + $0xa58] sm:$0xf0] }
 0x434   : > { %6575 = vmatpush.bf16.msrb.mxu1 %v10804_v52  ;;  %v4871_v52 = vpop.f32.mrf.mxu0  ;;  %6535 = vmatpush.bf16.msrb.mxu2 %v10620_v12  ;;  %v4843_v22 = vpop.f32.mrf.mxu2  ;;  %v11876_v12 = vld [vmem:[#allocation9 + $0xa54] sm:$0xf] }
 0x435   : > { %v11822_v52 = vld [vmem:[#allocation9 + $0x8a4] sm:$0xf] }
 0x436   : > { %6612 = vmatpush.bf16.msra.mxu0 %v10056_v28  ;;  %v10603_v28 = vld [vmem:[#allocation9 + $0xc90] sm:$0xf] }
 0x437   : > { %v10604_v57 = vor.u32 %v11949_v30, %v10603_v28  ;;  %v11820_v30 = vld [vmem:[#allocation9 + $0x894] sm:$0xf] }
 0x438   : > { %6576 = vmatpush.bf16.msrb.mxu1 %v10796_v4  ;;  %v4844_v4 = vadd.f32 %v4843_v22, %v4831_v55  ;;  %6536 = vmatpush.bf16.msrb.mxu2 %v10612_v61  ;;  %v11874_v55 = vld [vmem:[#allocation9 + $0xa44] sm:$0xf]  ;;  %v10309_v61 = vld [vmem:[#allocation9 + $0xa48] sm:$0xf0]  ;;  %v10891_v22 = vld [vmem:[#allocation9 + $0xed0] sm:$0xf] }
 0x43a   : > { %6613 = vmatpush.bf16.msra.mxu0 %v10048_v45  ;;  %v4857_v2 = vadd.f32 %v13215_v46, %v4844_v4  ;;  %v10595_v45 = vld [vmem:[#allocation9 + $0xc80] sm:$0xf]  ;;  %v10328_v46 = vor.u32 %v11878_v33, %v10325_v43  ;;  %v10312_v4 = vor.u32 %v11874_v55, %v10309_v61  ;;  %v12019_v33 = vld [vmem:[#allocation9 + $0xec4] sm:$0xf0] }
 0x43b   : > { %v10867_v55 = vld [vmem:[#allocation9 + $0xea0] sm:$0xf]  ;;  %v12015_v61 = vld [vmem:[#allocation9 + $0xea4] sm:$0xf0] }
 0x43c   : > { %6577 = vmatpush.bf16.msrb.mxu1 %v10788_v60  ;;  %v12025_v60 = vld [vmem:[#allocation9 + $0xef4] sm:$0xf0]  ;;  %6537 = vmatpush.bf16.msrb.mxu2 %v10604_v57  ;;  %v4870_v58 = vadd.f32 %v13222_v56, %v4857_v2  ;;  %v4882_v15 = vpop.f32.mrf.mxu1  ;;  %v10320_v56 = vor.u32 %v11876_v12, %v10317_v63  ;;  %v11872_v2 = vld [vmem:[#allocation9 + $0xa34] sm:$0xf]  ;;  %v10301_v57 = vld [vmem:[#allocation9 + $0xa38] sm:$0xf0] }
 0x43d   : > { %v10908_v47 = vor.u32 %v12025_v60, %v10907_v5  ;;  %v10085_v5 = vld [vmem:[#allocation9 + $0x888] sm:$0xf0]  ;;  %v10304_v60 = vor.u32 %v11872_v2, %v10301_v57  ;;  %v11845_v12 = vld [vmem:[#allocation9 + $0x954] sm:$0xf0]  ;;  %v10875_v63 = vld [vmem:[#allocation9 + $0xeb0] sm:$0xf] }
 0x43e   : > { %6614 = vmatpush.bf16.msra.mxu0 %v10040_v25  ;;  %v4845_v25 = vpop.f32.mrf.mxu2  ;;  %v4883_v29 = vadd.f32 %v4882_v15, %v4870_v58  ;;  %v10293_v15 = vld [vmem:[#allocation9 + $0xa28] sm:$0xf0]  ;;  %v11944_v57 = vld [vmem:[#allocation9 + $0xc74] sm:$0xf] }
 0x43f   : > { %6578 = vmatmul.bf16.vlgmr.msrb.gmra.mxu1 %v13115_v19  ;;  %v11870_v25 = vld [vmem:[#allocation9 + $0xa24] sm:$0xf] }
 0x440   : > { %6622 = vmatpush.bf16.msra.mxu1 %v10144_v32  ;;  %v10596_v32 = vor.u32 %v11947_v14, %v10595_v45  ;;  %v11847_v45 = vld [vmem:[#allocation9 + $0x964] sm:$0xf0]  ;;  %v10883_v14 = vld [vmem:[#allocation9 + $0xec0] sm:$0xf]  ;;  %v10296_v49 = vor.u32 %v11870_v25, %v10293_v15  ;;  %v10205_v25 = vld [vmem:[#allocation9 + $0x978] sm:$0xf0] }
 0x441   : > { %v10196_v58 = vor.u32 %v11847_v45, %v10195_v31  ;;  %v12013_v31 = vld [vmem:[#allocation9 + $0xe94] sm:$0xf0]  ;;  %v11942_v15 = vld [vmem:[#allocation9 + $0xc64] sm:$0xf] }
 0x442   : > { %6615 = vmatpush.bf16.msra.mxu0 %v10032_v34  ;;  %v4887_v34 = vmax.f32 %v4883_v29, 0.0  ;;  %6538 = vmatpush.bf16.msrb.mxu2 %v10596_v32  ;;  %v10884_v32 = vor.u32 %v12019_v33, %v10883_v14  ;;  %v12017_v29 = vld [vmem:[#allocation9 + $0xeb4] sm:$0xf0]  ;;  %v11890_v14 = vld [vmem:[#allocation9 + $0xac4] sm:$0xf] }
 0x443   : > { %v10373_v33 = vld [vmem:[#allocation9 + $0xac8] sm:$0xf0] }
 0x444   : > { %6623 = vmatpush.bf16.msra.mxu1 %v10136_v36  ;;  %v10101_v36 = vld [vmem:[#allocation9 + $0x8a8] sm:$0xf0]  ;;  %v4889_v28 = vpack.c.bf16 %v4887_v34, %v4887_v34  ;;  %v10179_v34 = vld [vmem:[#allocation9 + $0x940] sm:$0xf] }
 0x445   : > { %v10104_v39 = vor.u32 %v11822_v52, %v10101_v36  ;;  %6539 = vmatmul.bf16.vlgmr.msrb.gmra.mxu2 %v13108_v6  ;;  %v10876_v36 = vor.u32 %v12017_v29, %v10875_v63  ;;  %v10365_v63 = vld [vmem:[#allocation9 + $0xab8] sm:$0xf0] }
 0x446   : > { %6616 = vmatpush.bf16.msra.mxu0 %v10024_v38  ;;  %6583 = vmatpush.bf16.msra.mxu2 %v10908_v47  ;;  %v4899_v9 = vsel %vm1624_vm4, %v4889_v28, 0  ;;  %v10204_v38 = vor.u32 %v11849_v51, %v10203_v1  ;;  %v13233_v43 = vpop.f32.mrf.mxu0  ;;  %v11843_v1 = vld [vmem:[#allocation9 + $0x944] sm:$0xf0] }
 0x447   : > { %4921 = vmatpush.bf16.msrb.mxu3 %v4899_v9  ;;  %v6411_v29 = vadd.f32 %v13233_v43, %v3292_v44  ;;  %v10573_v44 = vld [vmem:[#allocation9 + $0xc58] sm:$0xf0]  ;;  %v11886_v43 = vld [vmem:[#allocation9 + $0xaa4] sm:$0xf] }
 0x448   : > { %6624 = vmatpush.bf16.msra.mxu1 %v10128_v50  ;;  %v4884_v50 = vpop.f32.mrf.mxu1 }
 0x449   : > { %6617 = vmatmul.bf16.vlgmr.msra.gmra.mxu0 %v13033_v53  ;;  %v12021_v53 = vld [vmem:[#allocation9 + $0xed4] sm:$0xf0]  ;;  %v10277_v50 = vld [vmem:[#allocation9 + $0xa08] sm:$0xf0] }
 0x44a   : > { %6661 = vmatpush.bf16.msrb.mxu0 %v10336_v40  ;;  %6584 = vmatpush.bf16.msra.mxu2 %v10900_v7  ;;  %v10892_v0 = vor.u32 %v12021_v53, %v10891_v22  ;;  %v10096_v40 = vor.u32 %v11820_v30, %v10093_v11  ;;  %v10285_v7 = vld [vmem:[#allocation9 + $0xa18] sm:$0xf0]  ;;  %v11892_v22 = vld [vmem:[#allocation9 + $0xad4] sm:$0xf]  ;;  %v10180_v30 = vor.u32 %v11843_v1, %v10179_v34  ;;  %v11837_v34 = vld [vmem:[#allocation9 + $0x914] sm:$0xf0] }
 0x44b   : > { %4952 = vmatpush.bf16.msra.mxu3 %v4899_v9  ;;  %v10381_v53 = vld [vmem:[#allocation9 + $0xad8] sm:$0xf0]  ;;  %v10868_v11 = vor.u32 %v12015_v61, %v10867_v55  ;;  %v10171_v9 = vld [vmem:[#allocation9 + $0x930] sm:$0xf]  ;;  %v10197_v1 = vld [vmem:[#allocation9 + $0x968] sm:$0xf0] }
 0x44c   : > { %6625 = vmatpush.bf16.msra.mxu1 %v10120_v16  ;;  %v11818_v16 = vld [vmem:[#allocation9 + $0x884] sm:$0xf]  ;;  %9950 = vmatmul.msk.bf16.vlgmr.msrb.gmra.mxu3 %vm4891_vm6, %v13180_v23  ;;  %v10384_v2 = vor.u32 %v11892_v22, %v10381_v53  ;;  %v11940_v55 = vld [vmem:[#allocation9 + $0xc54] sm:$0xf]  ;;  %v10357_v61 = vld [vmem:[#allocation9 + $0xaa8] sm:$0xf0] }
 0x44d   : > { %v10088_v47 = vor.u32 %v11818_v16, %v10085_v5  ;;  %v11894_v23 = vld [vmem:[#allocation9 + $0xae4] sm:$0xf]  ;;  %v10576_v22 = vor.u32 %v11940_v55, %v10573_v44  ;;  %v11835_v53 = vld [vmem:[#allocation9 + $0x904] sm:$0xf0]  ;;  %v10435_v44 = vld [vmem:[#allocation9 + $0xb40] sm:$0xf] }
 0x44e   : > { %6662 = vmatpush.bf16.msrb.mxu0 %v10328_v46  ;;  %6585 = vmatpush.bf16.msra.mxu2 %v10892_v0  ;;  %v10187_v46 = vld [vmem:[#allocation9 + $0x950] sm:$0xf]  ;;  %v6412_v28 = vpop.f32.mrf.mxu0 }
 0x44f   : > { %6440 = vmatpush.bf16.msrb.mxu3 %v10204_v38  ;;  %v10188_v52 = vor.u32 %v11845_v12, %v10187_v46  ;;  %v11841_v38 = vld [vmem:[#allocation9 + $0x934] sm:$0xf0]  ;;  %v10859_v0 = vld [vmem:[#allocation9 + $0xe90] sm:$0xf]  ;;  %v10376_v46 = vor.u32 %v11890_v14, %v10373_v33  ;;  %v11888_v12 = vld [vmem:[#allocation9 + $0xab4] sm:$0xf] }
 0x450   : > { %6626 = vmatpush.bf16.msra.mxu1 %v10112_v3  ;;  %v10400_v3 = vor.u32 %v11896_v35, %v10397_v26  ;;  %v10172_v16 = vor.u32 %v11841_v38, %v10171_v9  ;;  %v10860_v5 = vor.u32 %v12013_v31, %v10859_v0  ;;  %v11839_v35 = vld [vmem:[#allocation9 + $0x924] sm:$0xf0]  ;;  %v10360_v9 = vor.u32 %v11886_v43, %v10357_v61  ;;  %v10349_v38 = vld [vmem:[#allocation9 + $0xa98] sm:$0xf0]  ;;  %v11938_v0 = vld [vmem:[#allocation9 + $0xc44] sm:$0xf] }
 0x451   : > { %v10565_v31 = vld [vmem:[#allocation9 + $0xc48] sm:$0xf0]  ;;  %v10451_v14 = vld [vmem:[#allocation9 + $0xb60] sm:$0xf]  ;;  %v11911_v33 = vld [vmem:[#allocation9 + $0xb64] sm:$0xf0] }
 0x452   : > { %6663 = vmatpush.bf16.msrb.mxu0 %v10320_v56  ;;  %6586 = vmatpush.bf16.msra.mxu2 %v10884_v32  ;;  %v11868_v56 = vld [vmem:[#allocation9 + $0xa14] sm:$0xf]  ;;  %v11907_v61 = vld [vmem:[#allocation9 + $0xb44] sm:$0xf0] }
 0x453   : > { %6441 = vmatpush.bf16.msrb.mxu3 %v10196_v58  ;;  %v10288_v51 = vor.u32 %v11868_v56, %v10285_v7  ;;  %v10851_v58 = vld [vmem:[#allocation9 + $0xe80] sm:$0xf]  ;;  %v11848_v32 = vld [vmem:[#allocation9 + $0x974] sm:$0xf]  ;;  %v11846_v56 = vld [vmem:[#allocation9 + $0x964] sm:$0xf] }
 0x454   : > { %6627 = vmatpush.bf16.msra.mxu1 %v10104_v39  ;;  %v10392_v39 = vor.u32 %v11894_v23, %v10389_v37  ;;  %v10208_v37 = vor.u32 %v11848_v32, %v10205_v25  ;;  %v10557_v32 = vld [vmem:[#allocation9 + $0xc38] sm:$0xf0]  ;;  %v11960_v25 = vld [vmem:[#allocation9 + $0xcf4] sm:$0xf] }
 0x456   : > { %6664 = vmatpush.bf16.msrb.mxu0 %v10312_v4  ;;  %6587 = vmatpush.bf16.msra.mxu2 %v10876_v36  ;;  %v11866_v4 = vld [vmem:[#allocation9 + $0xa04] sm:$0xf]  ;;  %v10155_v36 = vld [vmem:[#allocation9 + $0x910] sm:$0xf] }
 0x457   : > { %6442 = vmatpush.bf16.msrb.mxu3 %v10188_v52  ;;  %v10280_v45 = vor.u32 %v11866_v4, %v10277_v50  ;;  %v10156_v28 = vor.u32 %v11837_v34, %v10155_v36  ;;  %v10189_v4 = vld [vmem:[#allocation9 + $0x958] sm:$0xf0]  ;;  %v11884_v50 = vld [vmem:[#allocation9 + $0xa94] sm:$0xf]  ;;  %v11934_v36 = vld [vmem:[#allocation9 + $0xc24] sm:$0xf] }
 0x458   : > { %6628 = vmatpush.bf16.msra.mxu1 %v10096_v40  ;;  %v10589_v40 = vld [vmem:[#allocation9 + $0xc78] sm:$0xf0]  ;;  %v10549_v34 = vld [vmem:[#allocation9 + $0xc28] sm:$0xf0] }
 0x459   : > { %v10592_v26 = vor.u32 %v11944_v57, %v10589_v40  ;;  %v10552_v43 = vor.u32 %v11934_v36, %v10549_v34 }
 0x45a   : > { %6665 = vmatpush.bf16.msrb.mxu0 %v10304_v60  ;;  %6588 = vmatpush.bf16.msra.mxu2 %v10868_v11  ;;  %v10163_v60 = vld [vmem:[#allocation9 + $0x920] sm:$0xf]  ;;  %v11913_v11 = vld [vmem:[#allocation9 + $0xb74] sm:$0xf0] }
 0x45b   : > { %6443 = vmatpush.bf16.msrb.mxu3 %v10180_v30  ;;  %v10459_v30 = vld [vmem:[#allocation9 + $0xb70] sm:$0xf] }
 0x45c   : > { %6629 = vmatpush.bf16.msra.mxu1 %v10088_v47  ;;  %v10581_v47 = vld [vmem:[#allocation9 + $0xc68] sm:$0xf0]  ;;  %9952 = vmatmul.msk.bf16.vlgmr.msra.gmra.mxu3 %vm4891_vm6, %v13191_v48  ;;  %v6423_v23 = vpop.f32.mrf.mxu1  ;;  %v10368_v48 = vor.u32 %v11888_v12, %v10365_v63  ;;  %v10460_v40 = vor.u32 %v11913_v11, %v10459_v30  ;;  %v10443_v63 = vld [vmem:[#allocation9 + $0xb50] sm:$0xf]  ;;  %v10541_v30 = vld [vmem:[#allocation9 + $0xc18] sm:$0xf0] }
 0x45d   : > { %v10584_v52 = vor.u32 %v11942_v15, %v10581_v47  ;;  %v13243_v7 = vadd.f32 %v6423_v23, %v6411_v29  ;;  %v10653_v15 = vld [vmem:[#allocation9 + $0xcf8] sm:$0xf0]  ;;  %v10452_v47 = vor.u32 %v11911_v33, %v10451_v14  ;;  %v11840_v23 = vld [vmem:[#allocation9 + $0x934] sm:$0xf]  ;;  %v10533_v14 = vld [vmem:[#allocation9 + $0xc08] sm:$0xf0] }
 0x45e   : > { %6666 = vmatpush.bf16.msrb.mxu0 %v10296_v49  ;;  %6589 = vmatpush.bf16.msra.mxu2 %v10860_v5  ;;  %v10568_v5 = vor.u32 %v11938_v0, %v10565_v31  ;;  %v11905_v31 = vld [vmem:[#allocation9 + $0xb34] sm:$0xf0]  ;;  %v11954_v33 = vld [vmem:[#allocation9 + $0xcc4] sm:$0xf] }
 0x45f   : > { %6630 = vmatmul.bf16.vlgmr.msra.gmra.mxu1 %v13068_v54  ;;  %v12011_v54 = vld [vmem:[#allocation9 + $0xe84] sm:$0xf0]  ;;  %6444 = vmatpush.bf16.msrb.mxu3 %v10172_v16  ;;  %v10352_v16 = vor.u32 %v11884_v50, %v10349_v38  ;;  %v10427_v38 = vld [vmem:[#allocation9 + $0xb30] sm:$0xf] }
 0x460   : > { %6674 = vmatpush.bf16.msrb.mxu1 %v10400_v3  ;;  %v10164_v3 = vor.u32 %v11839_v35, %v10163_v60  ;;  %v10852_v49 = vor.u32 %v12011_v54, %v10851_v58  ;;  %v11842_v60 = vld [vmem:[#allocation9 + $0x944] sm:$0xf]  ;;  %v10181_v35 = vld [vmem:[#allocation9 + $0x948] sm:$0xf0]  ;;  %v11936_v54 = vld [vmem:[#allocation9 + $0xc34] sm:$0xf] }
 0x461   : > { %v10341_v58 = vld [vmem:[#allocation9 + $0xa88] sm:$0xf0]  ;;  %v10184_v12 = vor.u32 %v11842_v60, %v10181_v35  ;;  %v10845_v60 = vld [vmem:[#allocation9 + $0xe78] sm:$0xf0]  ;;  %v10428_v35 = vor.u32 %v11905_v31, %v10427_v38 }
 0x462   : > { %6667 = vmatpush.bf16.msrb.mxu0 %v10288_v51  ;;  %6590 = vmatpush.bf16.msra.mxu2 %v10852_v49  ;;  %v10200_v51 = vor.u32 %v11846_v56, %v10197_v1  ;;  %v11909_v49 = vld [vmem:[#allocation9 + $0xb54] sm:$0xf0]  ;;  %v11958_v56 = vld [vmem:[#allocation9 + $0xce4] sm:$0xf] }
 0x463   : > { %6445 = vmatpush.bf16.msrb.mxu3 %v10164_v3  ;;  %v10560_v3 = vor.u32 %v11936_v54, %v10557_v32  ;;  %v10444_v1 = vor.u32 %v11909_v49, %v10443_v63  ;;  %v11903_v54 = vld [vmem:[#allocation9 + $0xb24] sm:$0xf0]  ;;  %v11834_v32 = vld [vmem:[#allocation9 + $0x904] sm:$0xf]  ;;  %v11912_v63 = vld [vmem:[#allocation9 + $0xb74] sm:$0xf] }
 0x464   : > { %6675 = vmatpush.bf16.msrb.mxu1 %v10392_v39  ;;  %v10147_v39 = vld [vmem:[#allocation9 + $0x900] sm:$0xf]  ;;  %v6425_v57 = vpop.f32.mrf.mxu1  ;;  %v11952_v49 = vld [vmem:[#allocation9 + $0xcb4] sm:$0xf] }
 0x465   : > { %6591 = vmatmul.bf16.vlgmr.msra.gmra.mxu2 %v13121_v41  ;;  %v10157_v57 = vld [vmem:[#allocation9 + $0x918] sm:$0xf0] }
 0x466   : > { %6668 = vmatpush.bf16.msrb.mxu0 %v10280_v45  ;;  %6635 = vmatpush.bf16.msrb.mxu2 %v10208_v37  ;;  %v10173_v37 = vld [vmem:[#allocation9 + $0x938] sm:$0xf0] }
 0x467   : > { %6446 = vmatpush.bf16.msrb.mxu3 %v10156_v28  ;;  %v10176_v55 = vor.u32 %v11840_v23, %v10173_v37  ;;  %v11838_v28 = vld [vmem:[#allocation9 + $0x924] sm:$0xf]  ;;  %v10621_v23 = vld [vmem:[#allocation9 + $0xcb8] sm:$0xf0]  ;;  %v10837_v37 = vld [vmem:[#allocation9 + $0xe68] sm:$0xf0] }
 0x468   : > { %6676 = vmatpush.bf16.msrb.mxu1 %v10384_v2  ;;  %v10148_v2 = vor.u32 %v11835_v53, %v10147_v39  ;;  %v10165_v39 = vld [vmem:[#allocation9 + $0x928] sm:$0xf0]  ;;  %v11932_v53 = vld [vmem:[#allocation9 + $0xc14] sm:$0xf] }
 0x469   : > { %6669 = vmatmul.bf16.vlgmr.msrb.gmra.mxu0 %v13087_v18  ;;  %v11844_v18 = vld [vmem:[#allocation9 + $0x954] sm:$0xf]  ;;  %v10168_v50 = vor.u32 %v11838_v28, %v10165_v39  ;;  %v10544_v0 = vor.u32 %v11932_v53, %v10541_v30  ;;  %v11950_v28 = vld [vmem:[#allocation9 + $0xca4] sm:$0xf]  ;;  %v10613_v39 = vld [vmem:[#allocation9 + $0xca8] sm:$0xf0] }
 0x46a   : > { %6713 = vmatpush.bf16.msra.mxu0 %v10592_v26  ;;  %6636 = vmatpush.bf16.msrb.mxu2 %v10200_v51  ;;  %v10192_v45 = vor.u32 %v11844_v18, %v10189_v4  ;;  %v11882_v26 = vld [vmem:[#allocation9 + $0xa84] sm:$0xf]  ;;  %v13250_v51 = vpop.f32.mrf.mxu2  ;;  %v10637_v18 = vld [vmem:[#allocation9 + $0xcd8] sm:$0xf0]  ;;  %v10436_v4 = vor.u32 %v11907_v61, %v10435_v44  ;;  %v10453_v61 = vld [vmem:[#allocation9 + $0xb68] sm:$0xf0] }
 0x46b   : > { %6447 = vmatpush.bf16.msrb.mxu3 %v10148_v2  ;;  %v10344_v29 = vor.u32 %v11882_v26, %v10341_v58  ;;  %v11836_v2 = vld [vmem:[#allocation9 + $0x914] sm:$0xf]  ;;  %v10419_v58 = vld [vmem:[#allocation9 + $0xb20] sm:$0xf]  ;;  %v10829_v53 = vld [vmem:[#allocation9 + $0xe58] sm:$0xf0] }
 0x46c   : > { %6677 = vmatpush.bf16.msrb.mxu1 %v10376_v46  ;;  %v13247_v46 = vpop.f32.mrf.mxu0  ;;  %v10160_v26 = vor.u32 %v11836_v2, %v10157_v57  ;;  %v11908_v2 = vld [vmem:[#allocation9 + $0xb54] sm:$0xf]  ;;  %v10445_v57 = vld [vmem:[#allocation9 + $0xb58] sm:$0xf0] }
 0x46e   : > { %6714 = vmatpush.bf16.msra.mxu0 %v10584_v52  ;;  %6637 = vmatpush.bf16.msrb.mxu2 %v10192_v45  ;;  %v10656_v52 = vor.u32 %v11960_v25, %v10653_v15  ;;  %v11930_v45 = vld [vmem:[#allocation9 + $0xc04] sm:$0xf]  ;;  %v10149_v25 = vld [vmem:[#allocation9 + $0x908] sm:$0xf0] }
 0x46f   : > { %6492 = vmatpush.bf16.msra.mxu3 %v10460_v40  ;;  %v10152_v36 = vor.u32 %v11834_v32, %v10149_v25  ;;  %v11906_v32 = vld [vmem:[#allocation9 + $0xb44] sm:$0xf]  ;;  %v10437_v25 = vld [vmem:[#allocation9 + $0xb48] sm:$0xf0] }
 0x470   : > { %6678 = vmatpush.bf16.msrb.mxu1 %v10368_v48  ;;  %6448 = vmatmul.bf16.vlgmr.msrb.gmra.mxu3 %v13047_v13  ;;  %v10645_v48 = vld [vmem:[#allocation9 + $0xce8] sm:$0xf0] }
 0x472   : > { %6715 = vmatpush.bf16.msra.mxu0 %v10576_v22  ;;  %6638 = vmatpush.bf16.msrb.mxu2 %v10184_v12  ;;  %v10648_v22 = vor.u32 %v11958_v56, %v10645_v48  ;;  %v4912_v15 = vpop.f32.mrf.mxu2  ;;  %v10411_v48 = vld [vmem:[#allocation9 + $0xb10] sm:$0xf] }
 0x473   : > { %6493 = vmatpush.bf16.msra.mxu3 %v10452_v47  ;;  %v11946_v15 = vld [vmem:[#allocation9 + $0xc84] sm:$0xf] }
 0x474   : > { %6679 = vmatpush.bf16.msrb.mxu1 %v10360_v9  ;;  %v6464_v11 = vpop.f32.mrf.mxu0  ;;  %v11956_v9 = vld [vmem:[#allocation9 + $0xcd4] sm:$0xf] }
 0x475   : > { %v10640_v40 = vor.u32 %v11956_v9, %v10637_v18  ;;  %v10403_v11 = vld [vmem:[#allocation9 + $0xb00] sm:$0xf]  ;;  %v11899_v18 = vld [vmem:[#allocation9 + $0xb04] sm:$0xf0] }
 0x476   : > { %6716 = vmatpush.bf16.msra.mxu0 %v10568_v5  ;;  %6639 = vmatpush.bf16.msrb.mxu2 %v10176_v55  ;;  %v12008_v5 = vld [vmem:[#allocation9 + $0xe74] sm:$0xf]  ;;  %v10624_v55 = vor.u32 %v11952_v49, %v10621_v23  ;;  %v10440_v23 = vor.u32 %v11906_v32, %v10437_v25  ;;  %v10789_v32 = vld [vmem:[#allocation9 + $0xe08] sm:$0xf0]  ;;  %v12018_v25 = vld [vmem:[#allocation9 + $0xec4] sm:$0xf] }
 0x477   : > { %6494 = vmatpush.bf16.msra.mxu3 %v10444_v1  ;;  %v10848_v12 = vor.u32 %v12008_v5, %v10845_v60  ;;  %v11901_v1 = vld [vmem:[#allocation9 + $0xb14] sm:$0xf0] }
 0x478   : > { %6680 = vmatpush.bf16.msrb.mxu1 %v10352_v16  ;;  %v10629_v16 = vld [vmem:[#allocation9 + $0xcc8] sm:$0xf0]  ;;  %v10412_v30 = vor.u32 %v11901_v1, %v10411_v48  ;;  %v11973_v48 = vld [vmem:[#allocation9 + $0xd54] sm:$0xf0]  ;;  %v11904_v1 = vld [vmem:[#allocation9 + $0xb34] sm:$0xf] }
 0x479   : > { %v10632_v47 = vor.u32 %v11954_v33, %v10629_v16  ;;  %v10821_v33 = vld [vmem:[#allocation9 + $0xe48] sm:$0xf0]  ;;  %v10404_v16 = vor.u32 %v11899_v18, %v10403_v11  ;;  %v11902_v18 = vld [vmem:[#allocation9 + $0xb24] sm:$0xf] }
 0x47a   : > { %6717 = vmatpush.bf16.msra.mxu0 %v10560_v3  ;;  %6640 = vmatpush.bf16.msrb.mxu2 %v10168_v50  ;;  %v12006_v3 = vld [vmem:[#allocation9 + $0xe64] sm:$0xf]  ;;  %v11977_v50 = vld [vmem:[#allocation9 + $0xd74] sm:$0xf0]  ;;  %v13256_v38 = vpop.f32.mrf.mxu2 }
 0x47b   : > { %6495 = vmatpush.bf16.msra.mxu3 %v10436_v4  ;;  %v10840_v44 = vor.u32 %v12006_v3, %v10837_v37  ;;  %v10715_v4 = vld [vmem:[#allocation9 + $0xd70] sm:$0xf]  ;;  %v10909_v3 = vld [vmem:[#allocation9 + $0xef8] sm:$0xf0] }
 0x47c   : > { %6681 = vmatpush.bf16.msrb.mxu1 %v10344_v29  ;;  %v10461_v29 = vld [vmem:[#allocation9 + $0xb78] sm:$0xf0]  ;;  %v13253_v34 = vpop.f32.mrf.mxu1  ;;  %v10716_v60 = vor.u32 %v11977_v50, %v10715_v4  ;;  %v10699_v37 = vld [vmem:[#allocation9 + $0xd50] sm:$0xf]  ;;  %v10421_v4 = vld [vmem:[#allocation9 + $0xb28] sm:$0xf0] }
 0x47d   : > { %v10464_v56 = vor.u32 %v11912_v63, %v10461_v29  ;;  %v10813_v63 = vld [vmem:[#allocation9 + $0xe38] sm:$0xf0]  ;;  %v12024_v29 = vld [vmem:[#allocation9 + $0xef4] sm:$0xf] }
 0x47e   : > { %6718 = vmatpush.bf16.msra.mxu0 %v10552_v43  ;;  %6641 = vmatpush.bf16.msrb.mxu2 %v10160_v26  ;;  %v11910_v43 = vld [vmem:[#allocation9 + $0xb64] sm:$0xf]  ;;  %v10707_v26 = vld [vmem:[#allocation9 + $0xd60] sm:$0xf] }
 0x47f   : > { %6682 = vmatmul.bf16.vlgmr.msrb.gmra.mxu1 %v13089_v8  ;;  %v10536_v8 = vor.u32 %v11930_v45, %v10533_v14  ;;  %6496 = vmatpush.bf16.msra.mxu3 %v10428_v35  ;;  %v10456_v9 = vor.u32 %v11910_v43, %v10453_v61  ;;  %v4958_v45 = vmax.f32 %v13250_v51, %v13256_v38  ;;  %v12002_v14 = vld [vmem:[#allocation9 + $0xe44] sm:$0xf]  ;;  %v10805_v61 = vld [vmem:[#allocation9 + $0xe28] sm:$0xf0] }
 0x480   : > { %6726 = vmatpush.bf16.msra.mxu1 %v10656_v52  ;;  %v10420_v52 = vor.u32 %v11903_v54, %v10419_v58  ;;  %v10448_v35 = vor.u32 %v11908_v2, %v10445_v57  ;;  %v11975_v58 = vld [vmem:[#allocation9 + $0xd64] sm:$0xf0]  ;;  %v10824_v54 = vor.u32 %v12002_v14, %v10821_v33  ;;  %v11998_v43 = vld [vmem:[#allocation9 + $0xe24] sm:$0xf]  ;;  %v10797_v2 = vld [vmem:[#allocation9 + $0xe18] sm:$0xf0]  ;;  %v10424_v14 = vor.u32 %v11902_v18, %v10421_v4 }
 0x481   : > { %v10708_v49 = vor.u32 %v11975_v58, %v10707_v26  ;;  %v10808_v11 = vor.u32 %v11998_v43, %v10805_v61  ;;  %v12020_v57 = vld [vmem:[#allocation9 + $0xed4] sm:$0xf]  ;;  %v10683_v33 = vld [vmem:[#allocation9 + $0xd30] sm:$0xf]  ;;  %v10413_v26 = vld [vmem:[#allocation9 + $0xb18] sm:$0xf0] }
 0x482   : > { %6719 = vmatpush.bf16.msra.mxu0 %v10544_v0  ;;  %6642 = vmatpush.bf16.msrb.mxu2 %v10152_v36  ;;  %v10616_v0 = vor.u32 %v11950_v28, %v10613_v39  ;;  %v12022_v28 = vld [vmem:[#allocation9 + $0xee4] sm:$0xf]  ;;  %v10901_v39 = vld [vmem:[#allocation9 + $0xee8] sm:$0xf0]  ;;  %v10667_v43 = vld [vmem:[#allocation9 + $0xd10] sm:$0xf] }
 0x483   : > { %6497 = vmatpush.bf16.msra.mxu3 %v10420_v52  ;;  %v4943_v52 = vpop.f32.mrf.mxu2  ;;  %v11965_v61 = vld [vmem:[#allocation9 + $0xd14] sm:$0xf0]  ;;  %v10659_v18 = vld [vmem:[#allocation9 + $0xd00] sm:$0xf]  ;;  %v11963_v4 = vld [vmem:[#allocation9 + $0xd04] sm:$0xf0] }
 0x484   : > { %6727 = vmatpush.bf16.msra.mxu1 %v10648_v22  ;;  %v12004_v22 = vld [vmem:[#allocation9 + $0xe54] sm:$0xf]  ;;  %v6477_v5 = vpop.f32.mrf.mxu1 }
 0x485   : > { %v10832_v31 = vor.u32 %v12004_v22, %v10829_v53  ;;  %6643 = vmatmul.bf16.vlgmr.msrb.gmra.mxu2 %v13047_v13  ;;  %v10597_v13 = vld [vmem:[#allocation9 + $0xc88] sm:$0xf0]  ;;  %v10700_v22 = vor.u32 %v11973_v48, %v10699_v37  ;;  %v10717_v37 = vld [vmem:[#allocation9 + $0xd78] sm:$0xf0]  ;;  %v12016_v52 = vld [vmem:[#allocation9 + $0xeb4] sm:$0xf] }
 0x486   : > { %6720 = vmatpush.bf16.msra.mxu0 %v10536_v8  ;;  %6687 = vmatpush.bf16.msra.mxu2 %v10464_v56  ;;  %v10600_v36 = vor.u32 %v11946_v15, %v10597_v13  ;;  %v10885_v15 = vld [vmem:[#allocation9 + $0xec8] sm:$0xf0] }
 0x487   : > { %6498 = vmatpush.bf16.msra.mxu3 %v10412_v30  ;;  %v10691_v30 = vld [vmem:[#allocation9 + $0xd40] sm:$0xf]  ;;  %v12047_v51 = vld [vmem:[#allocation13 + $0xa8] sm:$0xff] }
 0x488   : > { %6728 = vmatpush.bf16.msra.mxu1 %v10640_v40  ;;  %v11948_v40 = vld [vmem:[#allocation9 + $0xc94] sm:$0xf] }
 0x489   : > { %6721 = vmatmul.bf16.vlgmr.msra.gmra.mxu0 %v13105_v59  ;;  %v10605_v59 = vld [vmem:[#allocation9 + $0xc98] sm:$0xf0]  ;;  %v12055_v38 = vld [vmem:[#allocation13 + $0xe8] sm:$0xff] }
 0x48a   : > { %6765 = vmatpush.bf16.msrb.mxu0 %v10848_v12  ;;  %6688 = vmatpush.bf16.msra.mxu2 %v10456_v9  ;;  %v10608_v8 = vor.u32 %v11948_v40, %v10605_v59  ;;  %v12000_v12 = vld [vmem:[#allocation9 + $0xe34] sm:$0xf]  ;;  %v11971_v9 = vld [vmem:[#allocation9 + $0xd44] sm:$0xf0]  ;;  %v10893_v40 = vld [vmem:[#allocation9 + $0xed8] sm:$0xf0] }
 0x48b   : > { %6499 = vmatpush.bf16.msra.mxu3 %v10404_v16  ;;  %v10816_v56 = vor.u32 %v12000_v12, %v10813_v63  ;;  %v10692_v59 = vor.u32 %v11971_v9, %v10691_v30  ;;  %v6436_v16 = vpop.f32.mrf.mxu2  ;;  %v10869_v30 = vld [vmem:[#allocation9 + $0xea8] sm:$0xf0] }
 0x48c   : > { %6729 = vmatpush.bf16.msra.mxu1 %v10632_v47  ;;  %v13261_v47 = vpop.f32.mrf.mxu0  ;;  %v13266_v58 = vadd.f32 %v6436_v16, %v13243_v7  ;;  %v11976_v7 = vld [vmem:[#allocation9 + $0xd74] sm:$0xf] }
 0x48e   : > { %6766 = vmatpush.bf16.msrb.mxu0 %v10840_v44  ;;  %6689 = vmatpush.bf16.msra.mxu2 %v10448_v35  ;;  %v10912_v44 = vor.u32 %v12024_v29, %v10909_v3  ;;  %v11900_v35 = vld [vmem:[#allocation9 + $0xb14] sm:$0xf]  ;;  %v11967_v29 = vld [vmem:[#allocation9 + $0xd24] sm:$0xf0]  ;;  %v11898_v3 = vld [vmem:[#allocation9 + $0xb04] sm:$0xf] }
 0x48f   : > { %6544 = vmatpush.bf16.msrb.mxu3 %v10716_v60  ;;  %v11969_v60 = vld [vmem:[#allocation9 + $0xd34] sm:$0xf0]  ;;  %v10416_v12 = vor.u32 %v11900_v35, %v10413_v26  ;;  %v10005_v35 = vld [vmem:[#allocation9 + $0x7e8] sm:$0xf0]  ;;  %v11970_v26 = vld [vmem:[#allocation9 + $0xd44] sm:$0xf] }
 0x490   : > { %6730 = vmatpush.bf16.msra.mxu1 %v10624_v55  ;;  %v10429_v55 = vld [vmem:[#allocation9 + $0xb38] sm:$0xf0]  ;;  %6500 = vmatmul.bf16.vlgmr.msra.gmra.mxu3 %v13065_v24  ;;  %v10684_v13 = vor.u32 %v11969_v60, %v10683_v33 }
 0x491   : > { %v10432_v53 = vor.u32 %v11904_v1, %v10429_v55 }
 0x492   : > { %6767 = vmatpush.bf16.msrb.mxu0 %v10832_v31  ;;  %6690 = vmatpush.bf16.msra.mxu2 %v10440_v23  ;;  %v11996_v31 = vld [vmem:[#allocation9 + $0xe14] sm:$0xf]  ;;  %v10888_v23 = vor.u32 %v12018_v25, %v10885_v15  ;;  %v10853_v25 = vld [vmem:[#allocation9 + $0xe88] sm:$0xf0] }
 0x493   : > { %6545 = vmatpush.bf16.msrb.mxu3 %v10708_v49  ;;  %v10800_v5 = vor.u32 %v11996_v31, %v10797_v2  ;;  %v10405_v49 = vld [vmem:[#allocation9 + $0xb08] sm:$0xf0]  ;;  %v6438_v1 = vpop.f32.mrf.mxu2  ;;  %v10013_v31 = vld [vmem:[#allocation9 + $0x7f8] sm:$0xf0]  ;;  %v11972_v2 = vld [vmem:[#allocation9 + $0xd54] sm:$0xf] }
 0x494   : > { %6731 = vmatpush.bf16.msra.mxu1 %v10616_v0  ;;  %v6516_v50 = vpop.f32.mrf.mxu0  ;;  %v10904_v0 = vor.u32 %v12022_v28, %v10901_v39  ;;  %v10408_v48 = vor.u32 %v11898_v3, %v10405_v49  ;;  %v11974_v39 = vld [vmem:[#allocation9 + $0xd64] sm:$0xf]  ;;  %v11792_v1 = vld [vmem:[#allocation9 + $0x7b4] sm:$0xf] }
 0x495   : > { %v11800_v50 = vld [vmem:[#allocation9 + $0x7f4] sm:$0xf] }
 0x496   : > { %6768 = vmatpush.bf16.msrb.mxu0 %v10824_v54  ;;  %6691 = vmatpush.bf16.msra.mxu2 %v10432_v53  ;;  %v11994_v54 = vld [vmem:[#allocation9 + $0xe04] sm:$0xf]  ;;  %v10016_v16 = vor.u32 %v11800_v50, %v10013_v31  ;;  %v9965_v31 = vld [vmem:[#allocation9 + $0x798] sm:$0xf0] }
 0x497   : > { %6546 = vmatpush.bf16.msrb.mxu3 %v10700_v22  ;;  %v10792_v63 = vor.u32 %v11994_v54, %v10789_v32  ;;  %v10709_v22 = vld [vmem:[#allocation9 + $0xd68] sm:$0xf0]  ;;  %v12014_v53 = vld [vmem:[#allocation9 + $0xea4] sm:$0xf] }
 0x498   : > { %6732 = vmatpush.bf16.msra.mxu1 %v10608_v8  ;;  %v10896_v8 = vor.u32 %v12020_v57, %v10893_v40  ;;  %v10712_v9 = vor.u32 %v11974_v39, %v10709_v22  ;;  %v10701_v57 = vld [vmem:[#allocation9 + $0xd58] sm:$0xf0]  ;;  %v12012_v40 = vld [vmem:[#allocation9 + $0xe94] sm:$0xf]  ;;  %v12010_v32 = vld [vmem:[#allocation9 + $0xe84] sm:$0xf] }
 0x49a   : > { %6769 = vmatpush.bf16.msrb.mxu0 %v10816_v56  ;;  %6692 = vmatpush.bf16.msra.mxu2 %v10424_v14  ;;  %v10660_v14 = vor.u32 %v11963_v4, %v10659_v18 }
 0x49b   : > { %6547 = vmatpush.bf16.msrb.mxu3 %v10692_v59  ;;  %v10861_v59 = vld [vmem:[#allocation9 + $0xe98] sm:$0xf0] }
 0x49c   : > { %6733 = vmatpush.bf16.msra.mxu1 %v10600_v36  ;;  %v10877_v36 = vld [vmem:[#allocation9 + $0xeb8] sm:$0xf0]  ;;  %v13268_v55 = vpop.f32.mrf.mxu1  ;;  %v10864_v60 = vor.u32 %v12012_v40, %v10861_v59  ;;  %v9957_v40 = vld [vmem:[#allocation9 + $0x788] sm:$0xf0]  ;;  %v11864_v59 = vld [vmem:[#allocation9 + $0x9f4] sm:$0xf] }
 0x49d   : > { %v10880_v28 = vor.u32 %v12016_v52, %v10877_v36  ;;  %v10677_v52 = vld [vmem:[#allocation9 + $0xd28] sm:$0xf0] }
 0x49e   : > { %6770 = vmatpush.bf16.msrb.mxu0 %v10808_v11  ;;  %6693 = vmatpush.bf16.msra.mxu2 %v10416_v12  ;;  %v10668_v11 = vor.u32 %v11965_v61, %v10667_v43  ;;  %v10856_v12 = vor.u32 %v12010_v32, %v10853_v25  ;;  %v9981_v43 = vld [vmem:[#allocation9 + $0x7b8] sm:$0xf0]  ;;  %v11964_v61 = vld [vmem:[#allocation9 + $0xd14] sm:$0xf] }
 0x49f   : > { %6734 = vmatmul.bf16.vlgmr.msra.gmra.mxu1 %v13108_v6  ;;  %v10675_v6 = vld [vmem:[#allocation9 + $0xd20] sm:$0xf]  ;;  %6548 = vmatpush.bf16.msrb.mxu3 %v10684_v13  ;;  %v11796_v13 = vld [vmem:[#allocation9 + $0x7d4] sm:$0xf]  ;;  %v9984_v39 = vor.u32 %v11792_v1, %v9981_v43  ;;  %v10253_v32 = vld [vmem:[#allocation9 + $0x9d8] sm:$0xf0] }
 0x4a0   : > { %6778 = vmatpush.bf16.msrb.mxu1 %v10912_v44  ;;  %v10676_v56 = vor.u32 %v11967_v29, %v10675_v6  ;;  %v10720_v44 = vor.u32 %v11976_v7, %v10717_v37  ;;  %v9997_v6 = vld [vmem:[#allocation9 + $0x7d8] sm:$0xf0]  ;;  %v9989_v7 = vld [vmem:[#allocation9 + $0x7c8] sm:$0xf0]  ;;  %v11966_v37 = vld [vmem:[#allocation9 + $0xd24] sm:$0xf] }
 0x4a1   : > { %v10685_v29 = vld [vmem:[#allocation9 + $0xd38] sm:$0xf0]  ;;  %v10000_v3 = vor.u32 %v11796_v13, %v9997_v6  ;;  %v11856_v6 = vld [vmem:[#allocation9 + $0x9b4] sm:$0xf]  ;;  %v10213_v1 = vld [vmem:[#allocation9 + $0x988] sm:$0xf0] }
 0x4a2   : > { %6771 = vmatpush.bf16.msrb.mxu0 %v10800_v5  ;;  %6694 = vmatpush.bf16.msra.mxu2 %v10408_v48  ;;  %v11798_v5 = vld [vmem:[#allocation9 + $0x7e4] sm:$0xf]  ;;  %v10680_v48 = vor.u32 %v11966_v37, %v10677_v52  ;;  %v11852_v37 = vld [vmem:[#allocation9 + $0x994] sm:$0xf]  ;;  %v10221_v52 = vld [vmem:[#allocation9 + $0x998] sm:$0xf0] }
 0x4a3   : > { %6549 = vmatpush.bf16.msrb.mxu3 %v10676_v56 }
 0x4a4   : > { %6779 = vmatpush.bf16.msrb.mxu1 %v10904_v0  ;;  %v10872_v0 = vor.u32 %v12014_v53, %v10869_v30  ;;  %v6529_v33 = vpop.f32.mrf.mxu1  ;;  %v11790_v53 = vld [vmem:[#allocation9 + $0x7a4] sm:$0xf]  ;;  %v9973_v30 = vld [vmem:[#allocation9 + $0x7a8] sm:$0xf0] }
 0x4a5   : > { %6695 = vmatmul.bf16.vlgmr.msra.gmra.mxu2 %v13065_v24  ;;  %v10008_v24 = vor.u32 %v11798_v5, %v10005_v35  ;;  %v9976_v18 = vor.u32 %v11790_v53, %v9973_v30  ;;  %v11862_v5 = vld [vmem:[#allocation9 + $0x9e4] sm:$0xf] }
 0x4a6   : > { %6772 = vmatpush.bf16.msrb.mxu0 %v10792_v63  ;;  %6739 = vmatpush.bf16.msrb.mxu2 %v10720_v44  ;;  %v13272_v54 = vpop.f32.mrf.mxu0  ;;  %v11968_v63 = vld [vmem:[#allocation9 + $0xd34] sm:$0xf]  ;;  %v13276_v44 = vpop.f32.mrf.mxu2  ;;  %v11926_v30 = vld [vmem:[#allocation9 + $0xbe4] sm:$0xf] }
 0x4a7   : > { %6550 = vmatpush.bf16.msrb.mxu3 %v10668_v11  ;;  %v10688_v49 = vor.u32 %v11968_v63, %v10685_v29  ;;  %v11962_v11 = vld [vmem:[#allocation9 + $0xd04] sm:$0xf]  ;;  %v10237_v63 = vld [vmem:[#allocation9 + $0x9b8] sm:$0xf0] }
 0x4a8   : > { %6780 = vmatpush.bf16.msrb.mxu1 %v10896_v8  ;;  %v10693_v8 = vld [vmem:[#allocation9 + $0xd48] sm:$0xf0]  ;;  %v10240_v29 = vor.u32 %v11856_v6, %v10237_v63  ;;  %v11914_v6 = vld [vmem:[#allocation9 + $0xb84] sm:$0xf] }
 0x4a9   : > { %6773 = vmatmul.bf16.vlgmr.msrb.gmra.mxu0 %v13115_v19  ;;  %v10704_v19 = vor.u32 %v11972_v2, %v10701_v57  ;;  %v10696_v15 = vor.u32 %v11970_v26, %v10693_v8  ;;  %v11786_v57 = vld [vmem:[#allocation9 + $0x784] sm:$0xf]  ;;  %v11860_v8 = vld [vmem:[#allocation9 + $0x9d4] sm:$0xf]  ;;  %v10469_v63 = vld [vmem:[#allocation9 + $0xb88] sm:$0xf0] }
 0x4aa   : > { %6740 = vmatpush.bf16.msrb.mxu2 %v10712_v9  ;;  %v10661_v9 = vld [vmem:[#allocation9 + $0xd08] sm:$0xf0]  ;;  %v9960_v33 = vor.u32 %v11786_v57, %v9957_v40  ;;  %v10256_v25 = vor.u32 %v11860_v8, %v10253_v32  ;;  %v11922_v57 = vld [vmem:[#allocation9 + $0xbc4] sm:$0xf] }
 0x4ab   : > { %6551 = vmatpush.bf16.msrb.mxu3 %v10660_v14  ;;  %v10664_v4 = vor.u32 %v11962_v11, %v10661_v9  ;;  %v10269_v14 = vld [vmem:[#allocation9 + $0x9f8] sm:$0xf0]  ;;  %v10517_v11 = vld [vmem:[#allocation9 + $0xbe8] sm:$0xf0] }
 0x4ac   : > { %6781 = vmatpush.bf16.msrb.mxu1 %v10888_v23  ;;  %v11794_v23 = vld [vmem:[#allocation9 + $0x7c4] sm:$0xf]  ;;  %v10501_v40 = vld [vmem:[#allocation9 + $0xbc8] sm:$0xf0] }
 0x4ad   : > { %v9992_v56 = vor.u32 %v11794_v23, %v9989_v7  ;;  %v10485_v8 = vld [vmem:[#allocation9 + $0xba8] sm:$0xf0] }
 0x4ae   : > { %6741 = vmatpush.bf16.msrb.mxu2 %v10704_v19  ;;  %6552 = vmatmul.bf16.vlgmr.msrb.gmra.mxu3 %v13092_v17  ;;  %v6568_v36 = vpop.f32.mrf.mxu0  ;;  %v6490_v50 = vpop.f32.mrf.mxu2  ;;  %v10272_v19 = vor.u32 %v11864_v59, %v10269_v14  ;;  %v10504_v14 = vor.u32 %v11922_v57, %v10501_v40  ;;  %v10741_v57 = vld [vmem:[#allocation9 + $0xda8] sm:$0xf0] }
 0x4af   : > { %6596 = vmatpush.bf16.msra.mxu3 %v10016_v16  ;;  %v11924_v50 = vld [vmem:[#allocation9 + $0xbd4] sm:$0xf] }
 0x4b0   : > { %6782 = vmatpush.bf16.msrb.mxu1 %v10880_v28  ;;  %v10669_v28 = vld [vmem:[#allocation9 + $0xd18] sm:$0xf0] }
 0x4b1   : > { %v10672_v22 = vor.u32 %v11964_v61, %v10669_v28  ;;  %v11928_v61 = vld [vmem:[#allocation9 + $0xbf4] sm:$0xf]  ;;  %v10525_v28 = vld [vmem:[#allocation9 + $0xbf8] sm:$0xf0] }
 0x4b2   : > { %6742 = vmatpush.bf16.msrb.mxu2 %v10696_v15  ;;  %v10245_v15 = vld [vmem:[#allocation9 + $0x9c8] sm:$0xf0] }
 0x4b3   : > { %6597 = vmatpush.bf16.msra.mxu3 %v10008_v24  ;;  %v11858_v24 = vld [vmem:[#allocation9 + $0x9c4] sm:$0xf] }
 0x4b4   : > { %6783 = vmatpush.bf16.msrb.mxu1 %v10872_v0  ;;  %v10248_v13 = vor.u32 %v11858_v24, %v10245_v15  ;;  %v11916_v24 = vld [vmem:[#allocation9 + $0xb94] sm:$0xf]  ;;  %v10477_v15 = vld [vmem:[#allocation9 + $0xb98] sm:$0xf0] }
 0x4b6   : > { %6743 = vmatpush.bf16.msrb.mxu2 %v10688_v49  ;;  %v10229_v49 = vld [vmem:[#allocation9 + $0x9a8] sm:$0xf0] }
 0x4b7   : > { %6598 = vmatpush.bf16.msra.mxu3 %v10000_v3  ;;  %v11854_v3 = vld [vmem:[#allocation9 + $0x9a4] sm:$0xf] }
 0x4b8   : > { %6784 = vmatpush.bf16.msrb.mxu1 %v10864_v60  ;;  %v10261_v60 = vld [vmem:[#allocation9 + $0x9e8] sm:$0xf0]  ;;  %v10232_v7 = vor.u32 %v11854_v3, %v10229_v49  ;;  %v10781_v3 = vld [vmem:[#allocation9 + $0xdf8] sm:$0xf0]  ;;  %v10472_v49 = vor.u32 %v11914_v6, %v10469_v63 }
 0x4b9   : > { %v10264_v26 = vor.u32 %v11862_v5, %v10261_v60  ;;  %v10493_v5 = vld [vmem:[#allocation9 + $0xbb8] sm:$0xf0] }
 0x4ba   : > { %6744 = vmatpush.bf16.msrb.mxu2 %v10680_v48  ;;  %v11850_v48 = vld [vmem:[#allocation9 + $0x984] sm:$0xf] }
 0x4bb   : > { %6599 = vmatpush.bf16.msra.mxu3 %v9992_v56  ;;  %v10224_v56 = vor.u32 %v11852_v37, %v10221_v52  ;;  %v11990_v52 = vld [vmem:[#allocation9 + $0xde4] sm:$0xf] }
 0x4bc   : > { %6785 = vmatpush.bf16.msrb.mxu1 %v10856_v12  ;;  %v13278_v0 = vpop.f32.mrf.mxu1 }
 0x4be   : > { %6745 = vmatpush.bf16.msrb.mxu2 %v10672_v22  ;;  %v10528_v22 = vor.u32 %v11928_v61, %v10525_v28  ;;  %v10765_v61 = vld [vmem:[#allocation9 + $0xdd8] sm:$0xf0] }
 0x4bf   : > { %6786 = vmatmul.bf16.vlgmr.msrb.gmra.mxu1 %v13121_v41  ;;  %6600 = vmatpush.bf16.msra.mxu3 %v9984_v39  ;;  %v11788_v41 = vld [vmem:[#allocation9 + $0x794] sm:$0xf]  ;;  %v10216_v39 = vor.u32 %v11850_v48, %v10213_v1 }
 0x4c0   : > { %v9968_v2 = vor.u32 %v11788_v41, %v9965_v31  ;;  %v10509_v41 = vld [vmem:[#allocation9 + $0xbd8] sm:$0xf0] }
 0x4c2   : > { %6746 = vmatpush.bf16.msrb.mxu2 %v10664_v4 }
 0x4c3   : > { %6601 = vmatpush.bf16.msra.mxu3 %v9976_v18  ;;  %v10520_v18 = vor.u32 %v11926_v30, %v10517_v11 }
 0x4c4   : > { %v6581_v16 = vpop.f32.mrf.mxu1 }
 0x4c5   : > { %6747 = vmatmul.bf16.vlgmr.msrb.gmra.mxu2 %v13092_v17 }
 0x4c6   : > { %v13281_v35 = vpop.f32.mrf.mxu0 }
 0x4c7   : > { %6602 = vmatpush.bf16.msra.mxu3 %v9968_v2  ;;  %v10512_v2 = vor.u32 %v11924_v50, %v10509_v41  ;;  %v10749_v50 = vld [vmem:[#allocation9 + $0xdb8] sm:$0xf0] }
 0x4c8   : > { %v13284_v12 = vpop.f32.mrf.mxu2 }
 0x4cb   : > { %6603 = vmatpush.bf16.msra.mxu3 %v9960_v33 }
 0x4ce   : > { %6604 = vmatmul.bf16.vlgmr.msra.gmra.mxu3 %v13029_v10  ;;  %v6620_v17 = vpop.f32.mrf.mxu0 }
 0x4cf   : > { %6648 = vmatpush.bf16.msrb.mxu3 %v10272_v19  ;;  %v13286_v23 = vpop.f32.mrf.mxu3  ;;  %v11920_v19 = vld [vmem:[#allocation9 + $0xbb4] sm:$0xf] }
 0x4d0   : > { %v6542_v10 = vpop.f32.mrf.mxu2  ;;  %v10496_v60 = vor.u32 %v11920_v19, %v10493_v5 }
 0x4d3   : > { %6649 = vmatpush.bf16.msrb.mxu3 %v10264_v26  ;;  %v11918_v26 = vld [vmem:[#allocation9 + $0xba4] sm:$0xf] }
 0x4d4   : > { %v10488_v32 = vor.u32 %v11918_v26, %v10485_v8  ;;  %v11978_v26 = vld [vmem:[#allocation9 + $0xd84] sm:$0xf]  ;;  %v10725_v8 = vld [vmem:[#allocation9 + $0xd88] sm:$0xf0] }
 0x4d7   : > { %6650 = vmatpush.bf16.msrb.mxu3 %v10256_v25  ;;  %v4925_v43 = vpop.f32.mrf.mxu3 }
 0x4d8   : > { %v11988_v43 = vld [vmem:[#allocation9 + $0xdd4] sm:$0xf] }
 0x4d9   : > { %v10768_v28 = vor.u32 %v11988_v43, %v10765_v61 }
 0x4db   : > { %6651 = vmatpush.bf16.msrb.mxu3 %v10248_v13  ;;  %v10480_v13 = vor.u32 %v11916_v24, %v10477_v15 }
 0x4dc   : > { %v13288_v36 = vpop.f32.mrf.mxu1 }
 0x4df   : > { %6652 = vmatpush.bf16.msrb.mxu3 %v10240_v29  ;;  %v13292_v4 = vpop.f32.mrf.mxu3  ;;  %v11992_v29 = vld [vmem:[#allocation9 + $0xdf4] sm:$0xf] }
 0x4e0   : > { %v4959_v31 = vmax.f32 %v13286_v23, %v13292_v4  ;;  %v10784_v10 = vor.u32 %v11992_v29, %v10781_v3  ;;  %v12076_v23 = vld [vmem:[#allocation13 + $0x190] sm:$0xff] }
 0x4e1   : > { %v12084_v4 = vld [vmem:[#allocation13 + $0x1d0] sm:$0xff] }
 0x4e3   : > { %6653 = vmatpush.bf16.msrb.mxu3 %v10232_v7 }
 0x4e4   : > { %v6633_v53 = vpop.f32.mrf.mxu1 }
 0x4e6   : > { %v13290_v9 = vpop.f32.mrf.mxu0 }
 0x4e7   : > { %6654 = vmatpush.bf16.msrb.mxu3 %v10224_v56  ;;  %v4956_v33 = vpop.f32.mrf.mxu3  ;;  %v10773_v56 = vld [vmem:[#allocation9 + $0xde8] sm:$0xf0] }
 0x4e8   : > { %v13297_v16 = vpop.f32.mrf.mxu2  ;;  %v10776_v48 = vor.u32 %v11990_v52, %v10773_v56  ;;  %v11980_v33 = vld [vmem:[#allocation9 + $0xd94] sm:$0xf] }
 0x4eb   : > { %6655 = vmatpush.bf16.msrb.mxu3 %v10216_v39  ;;  %v11986_v39 = vld [vmem:[#allocation9 + $0xdc4] sm:$0xf] }
 0x4ee   : > { %6656 = vmatmul.bf16.vlgmr.msrb.gmra.mxu3 %v13049_v20  ;;  %v6672_v59 = vpop.f32.mrf.mxu0 }
 0x4ef   : > { %6700 = vmatpush.bf16.msra.mxu3 %v10528_v22  ;;  %v10757_v22 = vld [vmem:[#allocation9 + $0xdc8] sm:$0xf0] }
 0x4f0   : > { %v6594_v20 = vpop.f32.mrf.mxu2  ;;  %v10760_v53 = vor.u32 %v11986_v39, %v10757_v22  ;;  %v12247_v22 = vld [vmem:[#allocation10 + $0x2] sm:$0x3] }
 0x4f1   : > { %v10728_v20 = vor.u32 %v11978_v26, %v10725_v8 }
 0x4f3   : > { %6701 = vmatpush.bf16.msra.mxu3 %v10520_v18  ;;  %v6449_v25 = vpop.f32.mrf.mxu3  ;;  %v11984_v18 = vld [vmem:[#allocation9 + $0xdb4] sm:$0xf] }
 0x4f4   : > { %v10752_v41 = vor.u32 %v11984_v18, %v10749_v50  ;;  %v6450_v5 = vadd.f32 %v6449_v25, %v13266_v58 }
 0x4f7   : > { %6702 = vmatpush.bf16.msra.mxu3 %v10512_v2  ;;  %v11982_v2 = vld [vmem:[#allocation9 + $0xda4] sm:$0xf] }
 0x4f8   : > { %v10744_v40 = vor.u32 %v11982_v2, %v10741_v57 }
 0x4fb   : > { %6703 = vmatpush.bf16.msra.mxu3 %v10504_v14  ;;  %v6451_v7 = vpop.f32.mrf.mxu3 }
 0x4fc   : > { %v13299_v17 = vpop.f32.mrf.mxu1 }
 0x4ff   : > { %6704 = vmatpush.bf16.msra.mxu3 %v10496_v60 }
 0x503   : > { %6705 = vmatpush.bf16.msra.mxu3 %v10488_v32  ;;  %v6463_v32 = vadd.f32 %v13247_v46, %v6450_v5 }
 0x504   : > { %v6685_v37 = vpop.f32.mrf.mxu1 }
 0x506   : > { %v13301_v1 = vpop.f32.mrf.mxu0 }
 0x507   : > { %6706 = vmatpush.bf16.msra.mxu3 %v10480_v13  ;;  %v6476_v13 = vadd.f32 %v13253_v34, %v6463_v32 }
 0x508   : > { %v6644_v11 = vpop.f32.mrf.mxu2 }
 0x509   : > { %v6489_v63 = vadd.f32 %v13276_v44, %v6476_v13  ;;  %v12039_v13 = vld [vmem:[#allocation13 + $0x68] sm:$0xff] }
 0x50b   : > { %6707 = vmatpush.bf16.msra.mxu3 %v10472_v49 }
 0x50e   : > { %6708 = vmatmul.bf16.vlgmr.msra.gmra.mxu3 %v13083_v27  ;;  %v6724_v30 = vpop.f32.mrf.mxu0  ;;  %v10733_v27 = vld [vmem:[#allocation9 + $0xd98] sm:$0xf0] }
 0x50f   : > { %6752 = vmatpush.bf16.msrb.mxu3 %v10784_v10  ;;  %v10736_v60 = vor.u32 %v11980_v33, %v10733_v27 }
 0x510   : > { %v6646_v14 = vpop.f32.mrf.mxu2 }
 0x513   : > { %6753 = vmatpush.bf16.msrb.mxu3 %v10776_v48  ;;  %v6501_v59 = vpop.f32.mrf.mxu3 }
 0x514   : > { %v6502_v29 = vadd.f32 %v6501_v59, %v6489_v63  ;;  %v12038_v63 = vld [vmem:[#allocation13 + $0x60] sm:$0xff] }
 0x516   : > { %v6515_v58 = vadd.f32 %v13261_v47, %v6502_v29 }
 0x517   : > { %6754 = vmatpush.bf16.msrb.mxu3 %v10768_v28 }
 0x518   : > { %v6528_v49 = vadd.f32 %v13268_v55, %v6515_v58  ;;  %v12246_v55 = vld [vmem:[#allocation10] sm:$0x3] }
 0x51a   : > { %v6541_v46 = vadd.f32 %v13284_v12, %v6528_v49 }
 0x51b   : > { %6755 = vmatpush.bf16.msrb.mxu3 %v10760_v53  ;;  %v6503_v24 = vpop.f32.mrf.mxu3 }
 0x51c   : > { %v6735_v19 = vpop.f32.mrf.mxu1  ;;  %v12057_v24 = vld [vmem:[#allocation13 + $0xf8] sm:$0xff] }
 0x51f   : > { %6756 = vmatpush.bf16.msrb.mxu3 %v10752_v41 }
 0x523   : > { %6757 = vmatpush.bf16.msrb.mxu3 %v10744_v40 }
 0x524   : > { %v6737_v15 = vpop.f32.mrf.mxu1 }
 0x525   : > { %v12031_v15 = vld [vmem:[#allocation13 + $0x28] sm:$0xff] }
 0x526   : > { %v6774_v6 = vpop.f32.mrf.mxu0 }
 0x527   : > { %6758 = vmatpush.bf16.msrb.mxu3 %v10736_v60 }
 0x528   : > { %v6696_v3 = vpop.f32.mrf.mxu2 }
 0x52b   : > { %6759 = vmatpush.bf16.msrb.mxu3 %v10728_v20  ;;  %v12049_v20 = vld [vmem:[#allocation13 + $0xb8] sm:$0xff] }
 0x52e   : > { %6760 = vmatmul.bf16.vlgmr.msrb.gmra.mxu3 %v13102_v62  ;;  %v6776_v25 = vpop.f32.mrf.mxu0 }
 0x530   : > { %v6698_v10 = vpop.f32.mrf.mxu2 }
 0x531   : > { %v6553_v7 = vpop.f32.mrf.mxu3  ;;  %v12037_v10 = vld [vmem:[#allocation13 + $0x58] sm:$0xff] }
 0x532   : > { %v6554_v37 = vadd.f32 %v6553_v7, %v6541_v46  ;;  %v12029_v7 = vld [vmem:[#allocation13 + $0x18] sm:$0xff] }
 0x534   : > { %v6567_v34 = vadd.f32 %v13272_v54, %v6554_v37  ;;  %v12048_v37 = vld [vmem:[#allocation13 + $0xb0] sm:$0xff] }
 0x536   : > { %v6580_v56 = vadd.f32 %v13278_v0, %v6567_v34  ;;  %v12028_v34 = vld [vmem:[#allocation13 + $0x10] sm:$0xff] }
 0x538   : > { %v6593_v44 = vadd.f32 %v13297_v16, %v6580_v56  ;;  %v12036_v56 = vld [vmem:[#allocation13 + $0x50] sm:$0xff] }
 0x539   : > { %v6555_v62 = vpop.f32.mrf.mxu3 }
 0x53a   : > { %v6791_v43 = vmax.f32 %v6593_v44, 0.0  ;;  %v12035_v44 = vld [vmem:[#allocation13 + $0x48] sm:$0xff]  ;;  %v12046_v62 = vld [vmem:[#allocation13 + $0xa0] sm:$0xff] }
 0x53c   : > { %v6787_v52 = vpop.f32.mrf.mxu1  ;;  %v6793_v47 = vpack.c.bf16 %v6791_v43, %v6791_v43  ;;  %v12026_v43 = vld [vmem:[#allocation13] sm:$0xff] }
 0x53e   : > { %v6796_v61 = vsel %vm1624_vm4, %v6793_v47, 0  ;;  %v12034_v47 = vld [vmem:[#allocation13 + $0x40] sm:$0xff] }
 0x53f   : > { %6808 = vmatpush.bf16.msra.mxu2 %v6796_v61 }
 0x542   : > { %10913 = vmatmul.msk.bf16.vlgmr.msra.gmra.mxu2 %vm4891_vm6, %v12246_v55 }
 0x543   : > { %6836 = vmatpush.bf16.msrb.mxu2 %v6796_v61  ;;  %v12045_v61 = vld [vmem:[#allocation13 + $0x98] sm:$0xff] }
 0x544   : > { %v6789_v48 = vpop.f32.mrf.mxu1 }
 0x545   : > { %v12054_v48 = vld [vmem:[#allocation13 + $0xe0] sm:$0xff] }
 0x547   : > { %7317 = vmatpush.bf16.msra.mxu2 %v12049_v20  ;;  %v12058_v20 = vld [vmem:[#allocation13 + $0x100] sm:$0xff] }
 0x548   : > { %v6748_v12 = vpop.f32.mrf.mxu2 }
 0x54b   : > { %7318 = vmatpush.bf16.msra.mxu2 %v12048_v37 }
 0x54f   : > { %7319 = vmatpush.bf16.msra.mxu2 %v12047_v51  ;;  %v12104_v51 = vld [vmem:[#allocation13 + $0x270] sm:$0xff] }
 0x550   : > { %v6750_v39 = vpop.f32.mrf.mxu2 }
 0x551   : > { %v6605_v28 = vpop.f32.mrf.mxu3  ;;  %v12044_v39 = vld [vmem:[#allocation13 + $0x90] sm:$0xff] }
 0x552   : > { %10915 = vmatmul.msk.bf16.vlgmr.msrb.gmra.mxu2 %vm4891_vm6, %v12247_v22  ;;  %v6606_v53 = vadd.f32 %v6605_v28, %v3293_v42  ;;  %v12073_v28 = vld [vmem:[#allocation13 + $0x178] sm:$0xff] }
 0x553   : > { %7320 = vmatpush.bf16.msra.mxu2 %v12046_v62 }
 0x554   : > { %v6619_v30 = vadd.f32 %v13281_v35, %v6606_v53  ;;  %v12051_v53 = vld [vmem:[#allocation13 + $0xc8] sm:$0xff] }
 0x556   : > { %v6632_v18 = vadd.f32 %v13288_v36, %v6619_v30  ;;  %v12063_v30 = vld [vmem:[#allocation13 + $0x128] sm:$0xff] }
 0x557   : > { %7321 = vmatpush.bf16.msra.mxu2 %v12045_v61  ;;  %v12094_v61 = vld [vmem:[#allocation13 + $0x220] sm:$0xff] }
 0x558   : > { %v6645_v50 = vadd.f32 %v6644_v11, %v6632_v18  ;;  %v12071_v18 = vld [vmem:[#allocation13 + $0x168] sm:$0xff] }
 0x559   : > { %v6607_v54 = vpop.f32.mrf.mxu3 }
 0x55a   : > { %v12064_v54 = vld [vmem:[#allocation13 + $0x130] sm:$0xff] }
 0x55b   : > { %7322 = vmatpush.bf16.msra.mxu2 %v12044_v39 }
 0x571   : > { %v6657_v0 = vpop.f32.mrf.mxu3 }
 0x572   : > { %v6658_v2 = vadd.f32 %v6657_v0, %v6645_v50  ;;  %v12072_v0 = vld [vmem:[#allocation13 + $0x170] sm:$0xff] }
 0x574   : > { %v6671_v57 = vadd.f32 %v13290_v9, %v6658_v2  ;;  %v12033_v9 = vld [vmem:[#allocation13 + $0x38] sm:$0xff]  ;;  %v12050_v2 = vld [vmem:[#allocation13 + $0xc0] sm:$0xff] }
 0x575   : > { %7291 = vmatpush.bf16.msra.mxu0 %v12033_v9  ;;  %v12086_v9 = vld [vmem:[#allocation13 + $0x1e0] sm:$0xff] }
 0x576   : > { %v6684_v59 = vadd.f32 %v13299_v17, %v6671_v57  ;;  %v12041_v17 = vld [vmem:[#allocation13 + $0x78] sm:$0xff]  ;;  %v12062_v57 = vld [vmem:[#allocation13 + $0x120] sm:$0xff] }
 0x577   : > { %7304 = vmatpush.bf16.msra.mxu1 %v12041_v17 }
 0x578   : > { %v6697_v14 = vadd.f32 %v6696_v3, %v6684_v59  ;;  %v12081_v59 = vld [vmem:[#allocation13 + $0x1b8] sm:$0xff] }
 0x579   : > { %v6659_v16 = vpop.f32.mrf.mxu3 }
 0x57a   : > { %v12043_v16 = vld [vmem:[#allocation13 + $0x88] sm:$0xff] }
 0x57b   : > { %7323 = vmatpush.bf16.msra.mxu2 %v12043_v16 }
 0x591   : > { %v6709_v41 = vpop.f32.mrf.mxu3 }
 0x592   : > { %v6710_v33 = vadd.f32 %v6709_v41, %v6697_v14  ;;  %v12042_v41 = vld [vmem:[#allocation13 + $0x80] sm:$0xff]  ;;  %v12089_v14 = vld [vmem:[#allocation13 + $0x1f8] sm:$0xff] }
 0x593   : > { %7324 = vmatpush.bf16.msra.mxu2 %v12042_v41  ;;  %v12120_v41 = vld [vmem:[#allocation13 + $0x2f0] sm:$0xff] }
 0x594   : > { %v6723_v27 = vadd.f32 %v13301_v1, %v6710_v33  ;;  %v12032_v1 = vld [vmem:[#allocation13 + $0x30] sm:$0xff]  ;;  %v12061_v33 = vld [vmem:[#allocation13 + $0x118] sm:$0xff] }
 0x595   : > { %7292 = vmatpush.bf16.msra.mxu0 %v12032_v1 }
 0x596   : > { %v6736_v5 = vadd.f32 %v6735_v19, %v6723_v27  ;;  %v12040_v19 = vld [vmem:[#allocation13 + $0x70] sm:$0xff]  ;;  %v12069_v27 = vld [vmem:[#allocation13 + $0x158] sm:$0xff] }
 0x597   : > { %7305 = vmatpush.bf16.msra.mxu1 %v12040_v19  ;;  %7762 = vmatpush.bf16.msrb.mxu2 %v12081_v59 }
 0x598   : > { %v6749_v60 = vadd.f32 %v6748_v12, %v6736_v5  ;;  %v12065_v12 = vld [vmem:[#allocation13 + $0x138] sm:$0xff]  ;;  %v12080_v5 = vld [vmem:[#allocation13 + $0x1b0] sm:$0xff] }
 0x599   : > { %v6711_v40 = vpop.f32.mrf.mxu3  ;;  %7293 = vmatpush.bf16.msra.mxu0 %v12031_v15  ;;  %v12077_v15 = vld [vmem:[#allocation13 + $0x198] sm:$0xff] }
 0x59a   : > { %v12070_v40 = vld [vmem:[#allocation13 + $0x160] sm:$0xff] }
 0x59b   : > { %7306 = vmatpush.bf16.msra.mxu1 %v12039_v13  ;;  %7763 = vmatpush.bf16.msrb.mxu2 %v12080_v5  ;;  %v12085_v13 = vld [vmem:[#allocation13 + $0x1d8] sm:$0xff]  ;;  %v12119_v5 = vld [vmem:[#allocation13 + $0x2e8] sm:$0xff] }
 0x59f   : > { %7307 = vmatpush.bf16.msra.mxu1 %v12038_v63 }
 0x5a3   : > { %7308 = vmatpush.bf16.msra.mxu1 %v12037_v10  ;;  %v12105_v10 = vld [vmem:[#allocation13 + $0x278] sm:$0xff] }
 0x5a7   : > { %7309 = vmatpush.bf16.msra.mxu1 %v12036_v56  ;;  %v12096_v56 = vld [vmem:[#allocation13 + $0x230] sm:$0xff] }
 0x5ab   : > { %7310 = vmatpush.bf16.msra.mxu1 %v12035_v44 }
 0x5af   : > { %7311 = vmatpush.bf16.msra.mxu1 %v12034_v47 }
 0x5b1   : > { %v6761_v21 = vpop.f32.mrf.mxu3 }
 0x5b2   : > { %v6762_v42 = vadd.f32 %v6761_v21, %v6749_v60  ;;  %v12088_v60 = vld [vmem:[#allocation13 + $0x1f0] sm:$0xff] }
 0x5b3   : > { %7356 = vmatpush.bf16.msrb.mxu1 %v12073_v28 }
 0x5b4   : > { %v6775_v26 = vadd.f32 %v6774_v6, %v6762_v42  ;;  %v12030_v6 = vld [vmem:[#allocation13 + $0x20] sm:$0xff]  ;;  %v12060_v42 = vld [vmem:[#allocation13 + $0x110] sm:$0xff] }
 0x5b5   : > { %7294 = vmatpush.bf16.msra.mxu0 %v12030_v6 }
 0x5b6   : > { %v6788_v35 = vadd.f32 %v6787_v52, %v6775_v26  ;;  %v12056_v52 = vld [vmem:[#allocation13 + $0xf0] sm:$0xff] }
 0x5b7   : > { %7357 = vmatpush.bf16.msrb.mxu1 %v12072_v0  ;;  %v12068_v26 = vld [vmem:[#allocation13 + $0x150] sm:$0xff]  ;;  %v12121_v0 = vld [vmem:[#allocation13 + $0x2f8] sm:$0xff] }
 0x5b8   : > { %v6792_v8 = vmax.f32 %v6788_v35, 0.0  ;;  %v12079_v35 = vld [vmem:[#allocation13 + $0x1a8] sm:$0xff] }
 0x5b9   : > { %v6763_v36 = vpop.f32.mrf.mxu3  ;;  %7295 = vmatpush.bf16.msra.mxu0 %v12029_v7  ;;  %7764 = vmatpush.bf16.msrb.mxu2 %v12079_v35  ;;  %v12097_v7 = vld [vmem:[#allocation13 + $0x238] sm:$0xff]  ;;  %v12090_v35 = vld [vmem:[#allocation13 + $0x200] sm:$0xff] }
 0x5ba   : > { %v6794_v11 = vpack.c.bf16 %v6792_v8, %v6792_v8  ;;  %v12087_v8 = vld [vmem:[#allocation13 + $0x1e8] sm:$0xff] }
 0x5bb   : > { %7358 = vmatpush.bf16.msrb.mxu1 %v12071_v18  ;;  %v12059_v36 = vld [vmem:[#allocation13 + $0x108] sm:$0xff]  ;;  %v12101_v18 = vld [vmem:[#allocation13 + $0x258] sm:$0xff] }
 0x5bc   : > { %v6799_v32 = vsel %vm1624_vm4, %v6794_v11, 0  ;;  %v12067_v11 = vld [vmem:[#allocation13 + $0x148] sm:$0xff] }
 0x5bd   : > { %6821 = vmatpush.bf16.msra.mxu3 %v6799_v32  ;;  %7296 = vmatpush.bf16.msra.mxu0 %v12028_v34 }
 0x5bf   : > { %7359 = vmatpush.bf16.msrb.mxu1 %v12070_v40 }
 0x5c0   : > { %10914 = vmatmul.msk.bf16.vlgmr.msra.gmra.mxu3 %vm4891_vm6, %v12246_v55  ;;  %v12053_v55 = vld [vmem:[#allocation13 + $0xd8] sm:$0xff] }
 0x5c1   : > { %6849 = vmatpush.bf16.msrb.mxu3 %v6799_v32  ;;  %v12078_v32 = vld [vmem:[#allocation13 + $0x1a0] sm:$0xff] }
 0x5c2   : > { %7765 = vmatpush.bf16.msrb.mxu2 %v12078_v32  ;;  %v12108_v32 = vld [vmem:[#allocation13 + $0x290] sm:$0xff] }
 0x5c3   : > { %7360 = vmatpush.bf16.msrb.mxu1 %v12069_v27  ;;  %v12111_v27 = vld [vmem:[#allocation13 + $0x2a8] sm:$0xff] }
 0x5c5   : > { %7330 = vmatpush.bf16.msra.mxu3 %v12057_v24  ;;  %v6810_v29 = vpop.f32.mrf.mxu2  ;;  %v12066_v24 = vld [vmem:[#allocation13 + $0x140] sm:$0xff] }
 0x5c6   : > { %v13331_v58 = vmax.f32 %v4958_v45, %v6810_v29  ;;  %v12027_v45 = vld [vmem:[#allocation13 + $0x8] sm:$0xff]  ;;  %7766 = vmatpush.bf16.msrb.mxu2 %v12077_v15 }
 0x5c7   : > { %7297 = vmatpush.bf16.msra.mxu0 %v12027_v45  ;;  %7361 = vmatpush.bf16.msrb.mxu1 %v12068_v26  ;;  %v12103_v45 = vld [vmem:[#allocation13 + $0x268] sm:$0xff]  ;;  %v12118_v26 = vld [vmem:[#allocation13 + $0x2e0] sm:$0xff] }
 0x5c9   : > { %7331 = vmatpush.bf16.msra.mxu3 %v12056_v52 }
 0x5ca   : > { %7767 = vmatpush.bf16.msrb.mxu2 %v12076_v23 }
 0x5cb   : > { %7298 = vmatpush.bf16.msra.mxu0 %v12026_v43  ;;  %7362 = vmatpush.bf16.msrb.mxu1 %v12067_v11  ;;  %v12117_v11 = vld [vmem:[#allocation13 + $0x2d8] sm:$0xff] }
 0x5cd   : > { %v6812_v25 = vpop.f32.mrf.mxu2  ;;  %7332 = vmatpush.bf16.msra.mxu3 %v12055_v38  ;;  %v12095_v38 = vld [vmem:[#allocation13 + $0x228] sm:$0xff] }
 0x5ce   : > { %v12075_v25 = vld [vmem:[#allocation13 + $0x188] sm:$0xff] }
 0x5cf   : > { %7343 = vmatpush.bf16.msrb.mxu0 %v12065_v12  ;;  %7363 = vmatpush.bf16.msrb.mxu1 %v12066_v24 }
 0x5d0   : > { %10916 = vmatmul.msk.bf16.vlgmr.msrb.gmra.mxu3 %vm4891_vm6, %v12247_v22  ;;  %v12052_v22 = vld [vmem:[#allocation13 + $0xd0] sm:$0xff]  ;;  %7768 = vmatpush.bf16.msrb.mxu2 %v12075_v25 }
 0x5d1   : > { %7333 = vmatpush.bf16.msra.mxu3 %v12054_v48 }
 0x5d3   : > { %7344 = vmatpush.bf16.msrb.mxu0 %v12064_v54  ;;  %v12113_v54 = vld [vmem:[#allocation13 + $0x2b8] sm:$0xff] }
 0x5d5   : > { %v13333_v3 = vpop.f32.mrf.mxu2  ;;  %7334 = vmatpush.bf16.msra.mxu3 %v12053_v55  ;;  %v12102_v55 = vld [vmem:[#allocation13 + $0x260] sm:$0xff] }
 0x5d6   : > { %v6855_v49 = vmax.f32 %v13331_v58, %v13333_v3  ;;  %v12074_v58 = vld [vmem:[#allocation13 + $0x180] sm:$0xff] }
 0x5d7   : > { %7345 = vmatpush.bf16.msrb.mxu0 %v12063_v30  ;;  %v12082_v3 = vld [vmem:[#allocation13 + $0x1c0] sm:$0xff]  ;;  %7769 = vmatpush.bf16.msrb.mxu2 %v12074_v58  ;;  %v12093_v30 = vld [vmem:[#allocation13 + $0x218] sm:$0xff] }
 0x5d9   : > { %7335 = vmatpush.bf16.msra.mxu3 %v12052_v22 }
 0x5db   : > { %7346 = vmatpush.bf16.msrb.mxu0 %v12062_v57 }
 0x5dd   : > { %v6840_v46 = vpop.f32.mrf.mxu2  ;;  %7336 = vmatpush.bf16.msra.mxu3 %v12051_v53 }
 0x5de   : > { %v12083_v46 = vld [vmem:[#allocation13 + $0x1c8] sm:$0xff] }
 0x5df   : > { %7347 = vmatpush.bf16.msrb.mxu0 %v12061_v33  ;;  %v12100_v33 = vld [vmem:[#allocation13 + $0x250] sm:$0xff] }
 0x5e1   : > { %7337 = vmatpush.bf16.msra.mxu3 %v12050_v2 }
 0x5e3   : > { %7348 = vmatpush.bf16.msrb.mxu0 %v12060_v42  ;;  %v12110_v42 = vld [vmem:[#allocation13 + $0x2a0] sm:$0xff] }
 0x5e5   : > { %7775 = vmatpush.bf16.msrb.mxu3 %v12089_v14  ;;  %v12092_v14 = vld [vmem:[#allocation13 + $0x210] sm:$0xff] }
 0x5e7   : > { %7349 = vmatpush.bf16.msrb.mxu0 %v12059_v36  ;;  %v12109_v36 = vld [vmem:[#allocation13 + $0x298] sm:$0xff] }
 0x5e9   : > { %7776 = vmatpush.bf16.msrb.mxu3 %v12088_v60  ;;  %v12091_v60 = vld [vmem:[#allocation13 + $0x208] sm:$0xff] }
 0x5eb   : > { %7350 = vmatpush.bf16.msrb.mxu0 %v12058_v20  ;;  %v12114_v20 = vld [vmem:[#allocation13 + $0x2c0] sm:$0xff] }
 0x5ed   : > { %7777 = vmatpush.bf16.msrb.mxu3 %v12087_v8  ;;  %v12098_v8 = vld [vmem:[#allocation13 + $0x240] sm:$0xff] }
 0x5f1   : > { %7778 = vmatpush.bf16.msrb.mxu3 %v12086_v9  ;;  %v12116_v9 = vld [vmem:[#allocation13 + $0x2d0] sm:$0xff] }
 0x5f5   : > { %7779 = vmatpush.bf16.msrb.mxu3 %v12085_v13 }
 0x5f9   : > { %7780 = vmatpush.bf16.msrb.mxu3 %v12084_v4 }
 0x5fd   : > { %7781 = vmatpush.bf16.msrb.mxu3 %v12083_v46 }
 0x601   : > { %7782 = vmatpush.bf16.msrb.mxu3 %v12082_v3 }
 0x643   : > { %v6823_v50 = vpop.f32.mrf.mxu3 }
 0x644   : > { %v6828_v17 = vmax.f32 %v4959_v31, %v6823_v50  ;;  %v12112_v50 = vld [vmem:[#allocation13 + $0x2b0] sm:$0xff] }
 0x64b   : > { %v6825_v21 = vpop.f32.mrf.mxu3 }
 0x64c   : > { %v12099_v21 = vld [vmem:[#allocation13 + $0x248] sm:$0xff] }
 0x653   : > { %v6851_v1 = vpop.f32.mrf.mxu3 }
 0x654   : > { %v6856_v19 = vmax.f32 %v6828_v17, %v6851_v1  ;;  %v12107_v17 = vld [vmem:[#allocation13 + $0x288] sm:$0xff] }
 0x655   : > { %v12115_v1 = vld [vmem:[#allocation13 + $0x2c8] sm:$0xff] }
 0x656   : > { %v6857_v6 = vpack.c.bf16 %v6856_v19, %v6855_v49  ;;  %v12106_v19 = vld [vmem:[#allocation13 + $0x280] sm:$0xff] }
 0x658   : > { %v6859_v63 = vrot.slane %v6857_v6, 2 }
 0x65a   : > { %v6863_v31 = vsel %vm6860_vm7, %v6857_v6, %v6859_v63  ;;  %v12244_v63 = vld [vmem:[#allocation15] ss:$0 sm:$0xff] }
 0x65b   : > { %6865 = vst [vmem:[#allocation3] sm:$0xf] %v6863_v31  ;;  %v6853_v29 = vpop.f32.mrf.mxu3 }
 0x662   : > { %v6866_v49 = vld [vmem:[#allocation3] sm:$0x5]  ;;  %v6868_v44 = vld [vmem:[#allocation3] sm:$0xa] }
 0x663   : > { %6870 = vst [vmem:[#allocation1] ss:$4 sm:$0xff] %v6866_v49  ;;  %v6867_v37 = vld [vmem:[#allocation3] sm:$0xf] }
 0x66a   : > { %v13344_v52 = vld.sshfl [vmem:[#allocation1] sm:$0xff pattern:$0x73625140]  ;;  %v13346_v34 = vld.sshfl [vmem:[#allocation1 + $0x8] sm:$0xff pattern:$0x73625140] }
 0x66b   : > { %7299 = vmatmul.bf16.vlgmr.msra.gmra.mxu0 %v13344_v52  ;;  %6876 = vst [vmem:[#allocation1] ss:$4 sm:$0xff] %v6867_v37  ;;  %7312 = vmatmul.bf16.vlgmr.msra.gmra.mxu1 %v13346_v34 }
 0x66c   : > { %7788 = vmatpush.bf16.msra.mxu0 %v12097_v7  ;;  %7801 = vmatpush.bf16.msra.mxu1 %v12105_v10 }
 0x670   : > { %7789 = vmatpush.bf16.msra.mxu0 %v12096_v56  ;;  %7802 = vmatpush.bf16.msra.mxu1 %v12104_v51 }
 0x672   : > { %v6877_v62 = vld.sshfl [vmem:[#allocation1] sm:$0xff pattern:$0x73625140]  ;;  %v6878_v48 = vld.sshfl [vmem:[#allocation1 + $0x8] sm:$0xff pattern:$0x73625140] }
 0x673   : > { %v6881_v43 = vshll.u32 %v6877_v62, 16  ;;  %v6887_v47 = vshll.u32 %v6878_v48, 16  ;;  %6894 = vst [vmem:[#allocation1] ss:$4 sm:$0xff] %v6868_v44  ;;  %v6879_v12 = vshrl.u32 %v6877_v62, 16  ;;  %v6885_v39 = vshrl.u32 %v6878_v48, 16 }
 0x674   : > { %7790 = vmatpush.bf16.msra.mxu0 %v12095_v38  ;;  %7803 = vmatpush.bf16.msra.mxu1 %v12103_v45 }
 0x675   : > { %v6883_v28 = vrot.slane %v6881_v43, 1  ;;  %v6889_v22 = vrot.slane %v6887_v47, 1 }
 0x677   : > { %v6884_v16 = vor.u32 %v6883_v28, %v6879_v12  ;;  %v6890_v53 = vor.u32 %v6889_v22, %v6885_v39 }
 0x678   : > { %7791 = vmatpush.bf16.msra.mxu0 %v12094_v61  ;;  %7804 = vmatpush.bf16.msra.mxu1 %v12102_v55 }
 0x679   : > { %7325 = vmatmul.bf16.vlgmr.msra.gmra.mxu2 %v6884_v16  ;;  %7338 = vmatmul.bf16.vlgmr.msra.gmra.mxu3 %v6890_v53 }
 0x67a   : > { %7814 = vmatpush.bf16.msra.mxu2 %v12113_v54  ;;  %7827 = vmatpush.bf16.msra.mxu3 %v12121_v0  ;;  %v6895_v2 = vld.sshfl [vmem:[#allocation1] sm:$0xff pattern:$0x73625140]  ;;  %v6897_v57 = vld.sshfl [vmem:[#allocation1 + $0x8] sm:$0xff pattern:$0x73625140] }
 0x67b   : > { %v6899_v40 = vrot.slane %v6895_v2, 1  ;;  %v6900_v59 = vrot.slane %v6897_v57, 1 }
 0x67c   : > { %7792 = vmatpush.bf16.msra.mxu0 %v12093_v30  ;;  %7805 = vmatpush.bf16.msra.mxu1 %v12101_v18 }
 0x67d   : > { %7351 = vmatmul.bf16.vlgmr.msrb.gmra.mxu0 %v6899_v40  ;;  %7364 = vmatmul.bf16.vlgmr.msrb.gmra.mxu1 %v6900_v59 }
 0x67e   : > { %7815 = vmatpush.bf16.msra.mxu2 %v12112_v50  ;;  %7828 = vmatpush.bf16.msra.mxu3 %v12120_v41 }
 0x680   : > { %7793 = vmatpush.bf16.msra.mxu0 %v12092_v14  ;;  %7806 = vmatpush.bf16.msra.mxu1 %v12100_v33 }
 0x682   : > { %7816 = vmatpush.bf16.msra.mxu2 %v12111_v27  ;;  %7829 = vmatpush.bf16.msra.mxu3 %v12119_v5 }
 0x684   : > { %7794 = vmatpush.bf16.msra.mxu0 %v12091_v60  ;;  %7807 = vmatpush.bf16.msra.mxu1 %v12099_v21 }
 0x686   : > { %7817 = vmatpush.bf16.msra.mxu2 %v12110_v42  ;;  %7830 = vmatpush.bf16.msra.mxu3 %v12118_v26 }
 0x688   : > { %7795 = vmatpush.bf16.msra.mxu0 %v12090_v35  ;;  %7808 = vmatpush.bf16.msra.mxu1 %v12098_v8 }
 0x689   : > { %7770 = vmatmul.bf16.vlgmr.msrb.gmra.mxu2 %v13344_v52  ;;  %7783 = vmatmul.bf16.vlgmr.msrb.gmra.mxu3 %v13346_v34 }
 0x68a   : > { %7818 = vmatpush.bf16.msra.mxu2 %v12109_v36  ;;  %7831 = vmatpush.bf16.msra.mxu3 %v12117_v11 }
 0x68d   : > { %7796 = vmatmul.bf16.vlgmr.msra.gmra.mxu0 %v6884_v16  ;;  %7809 = vmatmul.bf16.vlgmr.msra.gmra.mxu1 %v6890_v53 }
 0x68e   : > { %7819 = vmatpush.bf16.msra.mxu2 %v12108_v32  ;;  %7832 = vmatpush.bf16.msra.mxu3 %v12116_v9 }
 0x692   : > { %7820 = vmatpush.bf16.msra.mxu2 %v12107_v17  ;;  %7833 = vmatpush.bf16.msra.mxu3 %v12115_v1 }
 0x696   : > { %7821 = vmatpush.bf16.msra.mxu2 %v12106_v19  ;;  %7834 = vmatpush.bf16.msra.mxu3 %v12114_v20 }
 0x699   : > { %7822 = vmatmul.bf16.vlgmr.msra.gmra.mxu2 %v6899_v40  ;;  %7835 = vmatmul.bf16.vlgmr.msra.gmra.mxu3 %v6900_v59 }
 0x6e8   : > { %v7300_v24 = vpop.f32.mrf.mxu0  ;;  %v7313_v15 = vpop.f32.mrf.mxu1 }
 0x6e9   : > { %v7301_v25 = vadd.f32 %v12244_v63, %v7300_v24 }
 0x6eb   : > { %v7314_v46 = vadd.f32 %v7313_v15, %v7301_v25 }
 0x6f0   : > { %v7302_v13 = vpop.f32.mrf.mxu0  ;;  %v7315_v6 = vpop.f32.mrf.mxu1 }
 0x6fa   : > { %v7352_v23 = vpop.f32.mrf.mxu0  ;;  %v7365_v4 = vpop.f32.mrf.mxu1 }
 0x6fc   : > { %v7326_v31 = vpop.f32.mrf.mxu2  ;;  %v7339_v29 = vpop.f32.mrf.mxu3 }
 0x6fd   : > { %v7327_v49 = vadd.f32 %v7326_v31, %v7314_v46 }
 0x6ff   : > { %v7340_v37 = vadd.f32 %v7339_v29, %v7327_v49 }
 0x701   : > { %v7353_v56 = vadd.f32 %v7352_v23, %v7340_v37 }
 0x702   : > { %v7354_v58 = vpop.f32.mrf.mxu0  ;;  %v7367_v3 = vpop.f32.mrf.mxu1 }
 0x703   : > { %v7366_v45 = vadd.f32 %v7365_v4, %v7353_v56 }
 0x704   : > { %v7328_v7 = vpop.f32.mrf.mxu2  ;;  %v7341_v10 = vpop.f32.mrf.mxu3 }
 0x705   : > { %v7369_v43 = vmax.f32 %v7366_v45, 0.0 }
 0x707   : > { %v7370_v12 = vsel %vm6860_vm7, %v7369_v43, -inf }
 0x708   : > { %v7371_v39 = vrot.slane %v7370_v12, 4 }
 0x70a   : > { %v7797_v52 = vpop.f32.mrf.mxu0  ;;  %v7810_v34 = vpop.f32.mrf.mxu1  ;;  %v7372_v53 = vmax.f32 %v7370_v12, %v7371_v39 }
 0x70c   : > { %v7771_v51 = vpop.f32.mrf.mxu2  ;;  %v7784_v38 = vpop.f32.mrf.mxu3  ;;  %v7373_v50 = vrot.slane %v7372_v53, 2 }
 0x70d   : > { %v7772_v44 = vadd.f32 %v12244_v63, %v7771_v51 }
 0x70e   : > { %v7374_v59 = vmax.f32 %v7372_v53, %v7373_v50 }
 0x70f   : > { %v7785_v47 = vadd.f32 %v7784_v38, %v7772_v44 }
 0x710   : > { %v7375_v27 = vrot.slane %v7374_v59, 1 }
 0x711   : > { %v7798_v28 = vadd.f32 %v7797_v52, %v7785_v47 }
 0x712   : > { %v7799_v62 = vpop.f32.mrf.mxu0  ;;  %v7812_v48 = vpop.f32.mrf.mxu1  ;;  %v7376_v21 = vmax.f32 %v7374_v59, %v7375_v27 }
 0x713   : > { %v7811_v22 = vadd.f32 %v7810_v34, %v7798_v28 }
 0x714   : > { %v7773_v61 = vpop.f32.mrf.mxu2  ;;  %v7786_v55 = vpop.f32.mrf.mxu3 }
 0x71c   : > { %v7823_v54 = vpop.f32.mrf.mxu2  ;;  %v7836_v0 = vpop.f32.mrf.mxu3 }
 0x71d   : > { %v7824_v16 = vadd.f32 %v7823_v54, %v7811_v22 }
 0x71f   : > { %v7837_v30 = vadd.f32 %v7836_v0, %v7824_v16 }
 0x721   : > { %v7840_v18 = vmax.f32 %v7837_v30, 0.0 }
 0x723   : > { %v7841_v41 = vsel %vm6860_vm7, %v7840_v18, -inf }
 0x724   : > { %v7842_v2 = vrot.slane %v7841_v41, 4  ;;  %v7825_v57 = vpop.f32.mrf.mxu2  ;;  %v7838_v40 = vpop.f32.mrf.mxu3 }
 0x726   : > { %v7843_v14 = vmax.f32 %v7841_v41, %v7842_v2 }
 0x728   : > { %v7844_v33 = vrot.slane %v7843_v14, 2 }
 0x72a   : > { %v7845_v5 = vmax.f32 %v7843_v14, %v7844_v33 }
 0x72c   : > { %v7846_v60 = vrot.slane %v7845_v5, 1 }
 0x72e   : > { %v7847_v42 = vmax.f32 %v7845_v5, %v7846_v60 }
 0x730   : > { %v7848_v26 = vmax.f32 %v7376_v21, %v7847_v42 }
 0x732   : > { %7849 = vst [vmem:[%s434_s21] sm:$0x1] %v7848_v26 }
 0x733   : > { %12485 = shalt.err (!%p12482_p8)
}
 0x734   : > { %12154 = dma.vmem_to_hbm [thread:$0]  (%p12641_p5), %s7862_s14, 16, %s7864_s25, %s7851_s11  }
 0x735 PF: > { %p12196_p9 = scmp.ge.s32.totalorder %s12536_s12, 2  ;;  %s7875_s26 = sand.u32 1, %s12524_s30  }
 0x736   : > { %s7876_s16 = scalar_lea.sflag [#allocation6], %s7875_s26 }
 0x737   : > { %p12179_p10 = pnand %p12196_p9, %p12645_p6 }
 0x739   : > { %p12180_p11 = pneg %p12179_p10 }
 0x73b   : > { %12519 = dma.done.wait (%p12180_p11), %s7876_s16, 16  }
 0x73c   : > { %12521 = vsyncadd (%p12180_p11), %s7876_s16, 4294967280  ;;  %s13410_s12 = sld [smem:[#allocation23_spill]]  ;;  %s13413_s30 = smov %s12528_s10 }
 0x73d   : > { %s13411_s29 = sld [smem:[#allocation22_spill]] }
 0x73e   : > { %s13412_s11 = sld [smem:[#allocation24_spill]] }
 0x742   : > { %p23_p12 = scmp.ge.s32.totalorder %s13410_s12, 4  }
 0x743   : > { %s13414_s10 = smov %s13411_s29 }
 0x744   :  { %25 = sbr.rel (!%p23_p12) target bundleno = 10 (0xa), region = 125 }
 0x749   :  { %7881 = vsyncpa [#allocation5], 1 }
 0x74a   :  { %7883 = vsyncpa [#allocation5 + $0x1], 1 }
 0x74b   :  { %7884 = vsyncpa [#allocation8], 1 }
 0x74c   :  { %7885 = vsyncpa [#allocation11], 1 }
 0x74d   :  { %7886 = vsyncpa [#allocation14], 1 }
 0x74e   :  { %7887 = vsyncpa [#allocation6], 1 }
 0x74f   :  { %7889 = vsyncpa [#allocation6 + $0x1], 1 }

</bundles_post_ra>
